<compile_context>
chip_gen: v7x
topology: tpu7x:2x2x1
jax: 0.10.0
libtpu: 0.0.40
codegen_flags: <defaults>
</compile_context>

<pallas_src>
import functools

import jax
import jax.numpy as jnp
from jax import lax
from jax.experimental import pallas as pl
from jax.experimental.pallas import tpu as pltpu

MATMUL_DTYPE = jnp.bfloat16      # MXU operand / HBM weight dtype (accum is f32)
# Fused-kernel VMEM budget: ~7 MiB of per-step operands x2 (double buffering)
# + <1 MiB of intermediates; 40 MiB leaves headroom under v7x's 64 MiB
# physical VMEM and is far below v5e/v6e's 128 MiB.
VMEM_LIMIT = 40 * 1024 * 1024


def _round_up(x, m):
    return ((x + m - 1) // m) * m


def _layer_norm(y, gamma, beta, eps):
    mean = jnp.mean(y, axis=-1, keepdims=True)
    var = jnp.mean((y - mean) ** 2, axis=-1, keepdims=True)
    return (y - mean) * lax.rsqrt(var + eps) * gamma + beta


# --------------------------- fused ViT kernel body ---------------------------

def _vit_kernel(a_ref, waug_ref, pos_ref,
                wqkv_ref, bqkv_ref, wo_ref, bo_ref, ln1g_ref, ln1b_ref,
                w1_ref, b1_ref, w2_ref, b2_ref, ln2g_ref, ln2b_ref,
                fcw_ref, fcb_ref,
                out_ref, x_scr,
                *, num_heads, head_dim, seq_valid, eps):
    """One grid step = one (batch, layer) pair.

    At layer 0 the token matrix is built from the augmented patch operand
    (patch embedding + cls token + positional embedding), then one full
    transformer block is applied; at the last layer the classifier head is
    applied to the cls row and written out.  The activation lives in x_scr
    (f32 VMEM) across the layer axis.
    """
    layer = pl.program_id(1)

    # ---- layer 0: patch embedding folded in as a matmul -------------------
    @pl.when(layer == 0)
    def _():
        emb = jnp.dot(a_ref[0], waug_ref[...],
                      preferred_element_type=jnp.float32)        # (SP, E)
        x_scr[...] = emb + pos_ref[...]

    x = x_scr[...]                                               # (SP, E) f32
    SP, E = x.shape
    H, D = num_heads, head_dim

    # ---- fused QKV projection (one MXU matmul, cast to bf16 once) ---------
    xb = x.astype(MATMUL_DTYPE)
    qkv = (jnp.dot(xb, wqkv_ref[0], preferred_element_type=jnp.float32)
           + bqkv_ref[0]).astype(MATMUL_DTYPE)                   # (SP, 3E)

    # ---- multi-head attention (scores/softmax in f32, masked padded keys) -
    key_ids = lax.broadcasted_iota(jnp.int32, (SP, SP), 1)
    key_mask = key_ids < seq_valid
    scale = 1.0 / (D ** 0.5)
    dn_qkT = (((1,), (1,)), ((), ()))      # contract head_dim of q and k
    head_outs = []
    for h in range(H):                     # D=128 -> vreg-aligned lane slices
        qh = qkv[:, h * D:(h + 1) * D]
        kh = qkv[:, E + h * D: E + (h + 1) * D]
        vh = qkv[:, 2 * E + h * D: 2 * E + (h + 1) * D]
        s = lax.dot_general(qh, kh, dn_qkT,
                            preferred_element_type=jnp.float32) * scale
        s = jnp.where(key_mask, s, -1e30)          # scores stay f32
        m = jnp.max(s, axis=-1, keepdims=True)
        p = jnp.exp(s - m)
        denom = jnp.sum(p, axis=-1, keepdims=True)
        probs = p * pl.reciprocal(denom, approx=True)
        head_outs.append(jnp.dot(probs.astype(MATMUL_DTYPE), vh,
                                 preferred_element_type=jnp.float32))
    att = jnp.concatenate(head_outs, axis=-1)                    # (SP, E) f32

    # ---- out-projection + residual + LayerNorm1 ----------------------------
    y = (jnp.dot(att.astype(MATMUL_DTYPE), wo_ref[0],
                 preferred_element_type=jnp.float32)
         + bo_ref[0] + x)
    x1 = _layer_norm(y, ln1g_ref[0], ln1b_ref[0], eps)

    # ---- MLP + residual + LayerNorm2 ---------------------------------------
    h1 = jnp.maximum(
        jnp.dot(x1.astype(MATMUL_DTYPE), w1_ref[0],
                preferred_element_type=jnp.float32) + b1_ref[0], 0.0)
    y2 = (jnp.dot(h1.astype(MATMUL_DTYPE), w2_ref[0],
                  preferred_element_type=jnp.float32)
          + b2_ref[0] + x1)
    x2 = _layer_norm(y2, ln2g_ref[0], ln2b_ref[0], eps)
    x_scr[...] = x2                                              # carry to l+1

    # ---- last layer: classifier head on the cls row ------------------------
    @pl.when(layer == pl.num_programs(1) - 1)
    def _():
        logits_all = (jnp.dot(x2.astype(MATMUL_DTYPE), fcw_ref[...],
                              preferred_element_type=jnp.float32)
                      + fcb_ref[...])                            # (SP, NC)
        out_ref[0] = logits_all[0:1, :]                          # cls row only


# ------------------------------ forward wrapper ------------------------------

def vit_forward(x, params, cfg):
    B, C, Himg, Wimg = x.shape
    P = cfg["patch_size"]
    E = cfg["emb_dim"]
    H = cfg["num_heads"]
    F = cfg["forward_expansion"] * E
    L = cfg["num_layers"]
    NC = cfg["num_classes"]
    assert E % H == 0
    D = E // H

    hp, wp = Himg // P, Wimg // P
    n_patches = hp * wp
    S = n_patches + 1                       # +cls token
    SP = _round_up(S, 8)                    # sublane-pad (same #vregs as S)
    K_raw = C * P * P
    KA = _round_up(K_raw + 2, 128)          # +bias col +cls col, MXU-aligned K

    # --- augmented patch operand: A @ [W_patch; b_patch; cls] = tokens ------
    # TODO(synk): at real image sizes express this im2col relayout via the
    # BlockSpec index_map (or accept NHWC) so it rides the kernel DMA pipeline
    # instead of a host-graph transpose (negligible at this 6 KB image size).
    xp = x.reshape(B, C, hp, P, wp, P)
    xp = jnp.transpose(xp, (0, 2, 4, 1, 3, 5)).reshape(B, n_patches, K_raw)
    A = jnp.zeros((B, SP, KA), jnp.float32)
    A = A.at[:, 1:1 + n_patches, :K_raw].set(xp)
    A = A.at[:, 1:1 + n_patches, K_raw].set(1.0)      # patch-bias selector
    A = A.at[:, 0, K_raw + 1].set(1.0)                # cls-token selector
    A = A.astype(MATMUL_DTYPE)

    W_aug = jnp.zeros((KA, E), jnp.float32)
    W_aug = W_aug.at[:K_raw].set(params["patch_w"])
    W_aug = W_aug.at[K_raw].set(params["patch_b"])
    W_aug = W_aug.at[K_raw + 1].set(params["cls_token"])
    W_aug = W_aug.astype(MATMUL_DTYPE)

    pos_pad = jnp.zeros((SP, E), jnp.float32).at[:S].set(params["pos_emb"])

    lp = params["layers"]
    fc_w = params["fc_w"]
    fc_b = params["fc_b"].reshape(1, NC)

    kernel = functools.partial(_vit_kernel, num_heads=H, head_dim=D,
                               seq_valid=S, eps=1e-5)
    lmap = lambda b, l: (l, 0, 0)           # per-layer stacked weights
    out = pl.pallas_call(
        kernel,
        out_shape=jax.ShapeDtypeStruct((B, 1, NC), jnp.float32),
        grid=(B, L),
        in_specs=[
            pl.BlockSpec((1, SP, KA), lambda b, l: (b, 0, 0)),   # A
            pl.BlockSpec((KA, E), lambda b, l: (0, 0)),          # W_aug
            pl.BlockSpec((SP, E), lambda b, l: (0, 0)),          # pos
            pl.BlockSpec((1, E, 3 * E), lmap),                   # w_qkv
            pl.BlockSpec((1, 1, 3 * E), lmap),                   # b_qkv
            pl.BlockSpec((1, E, E), lmap),                       # w_out
            pl.BlockSpec((1, 1, E), lmap),                       # b_out
            pl.BlockSpec((1, 1, E), lmap),                       # ln1 gamma
            pl.BlockSpec((1, 1, E), lmap),                       # ln1 beta
            pl.BlockSpec((1, E, F), lmap),                       # w1
            pl.BlockSpec((1, 1, F), lmap),                       # b1
            pl.BlockSpec((1, F, E), lmap),                       # w2
            pl.BlockSpec((1, 1, E), lmap),                       # b2
            pl.BlockSpec((1, 1, E), lmap),                       # ln2 gamma
            pl.BlockSpec((1, 1, E), lmap),                       # ln2 beta
            pl.BlockSpec((E, NC), lambda b, l: (0, 0)),          # fc_w
            pl.BlockSpec((1, NC), lambda b, l: (0, 0)),          # fc_b
        ],
        out_specs=pl.BlockSpec((1, 1, NC), lambda b, l: (b, 0, 0)),
        scratch_shapes=[pltpu.VMEM((SP, E), jnp.float32)],       # resident act
        compiler_params=pltpu.CompilerParams(
            dimension_semantics=("parallel", "arbitrary"),
            vmem_limit_bytes=VMEM_LIMIT),
    )(A, W_aug, pos_pad,
      lp["wqkv"], lp["bqkv"], lp["wo"], lp["bo"], lp["ln1g"], lp["ln1b"],
      lp["w1"], lp["b1"], lp["w2"], lp["b2"], lp["ln2g"], lp["ln2b"],
      fc_w, fc_b)
    return out.reshape(B, NC)


# ------------------------------ parameter init ------------------------------

def init_params(key, cfg):
    E = cfg["emb_dim"]
    C = cfg["in_channels"]
    P = cfg["patch_size"]
    F = cfg["forward_expansion"] * E
    L = cfg["num_layers"]
    NC = cfg["num_classes"]
    n_patches = (cfg["img_size"] // P) ** 2
    scale = 0.02

    def nrm(k, shape, dtype=jnp.float32):
        return (scale * jax.random.normal(k, shape, jnp.float32)).astype(dtype)

    k = jax.random.split(key, 7)
    params = {
        "patch_w": nrm(k[0], (C * P * P, E)),
        "patch_b": nrm(k[1], (E,)),
        "cls_token": nrm(k[2], (E,)),
        "pos_emb": nrm(k[3], (1 + n_patches, E)),
        "fc_w": nrm(k[4], (E, NC), MATMUL_DTYPE),
        "fc_b": nrm(k[5], (NC,)),
    }
    wqkv, bqkv, wo, bo, w1, b1, w2, b2 = ([] for _ in range(8))
    for lk in jax.random.split(k[6], L):
        s = jax.random.split(lk, 12)
        wq, wk, wv = nrm(s[0], (E, E)), nrm(s[1], (E, E)), nrm(s[2], (E, E))
        wqkv.append(jnp.concatenate([wq, wk, wv], axis=1).astype(MATMUL_DTYPE))
        bqkv.append(jnp.concatenate(
            [nrm(s[3], (E,)), nrm(s[4], (E,)), nrm(s[5], (E,))])[None, :])
        wo.append(nrm(s[6], (E, E), MATMUL_DTYPE))
        bo.append(nrm(s[7], (E,))[None, :])
        w1.append(nrm(s[8], (E, F), MATMUL_DTYPE))
        b1.append(nrm(s[9], (F,))[None, :])
        w2.append(nrm(s[10], (F, E), MATMUL_DTYPE))
        b2.append(nrm(s[11], (E,))[None, :])
    ones = jnp.ones((L, 1, E), jnp.float32)
    zeros = jnp.zeros((L, 1, E), jnp.float32)
    params["layers"] = {
        "wqkv": jnp.stack(wqkv), "bqkv": jnp.stack(bqkv),
        "wo": jnp.stack(wo), "bo": jnp.stack(bo),
        "ln1g": ones, "ln1b": zeros,
        "w1": jnp.stack(w1), "b1": jnp.stack(b1),
        "w2": jnp.stack(w2), "b2": jnp.stack(b2),
        "ln2g": ones, "ln2b": zeros,
    }
    return params


# ----------------------------------- main -----------------------------------

if __name__ == "__main__":
    # Small-shape config consistent with the module (original: emb=1024, H=4,
    # head_dim=256, img=64, 24 layers).  Here: head_dim=128 keeps every lane
    # slice / contraction MXU-aligned while staying small.
    cfg = dict(
        img_size=16,
        patch_size=4,
        in_channels=3,
        emb_dim=512,
        num_heads=4,
        forward_expansion=4,
        num_layers=2,
    )
    cfg["num_classes"] = cfg["img_size"] * cfg["img_size"] * cfg["in_channels"]
    batch = 2

    key = jax.random.PRNGKey(0)
    pkey, xkey = jax.random.split(key)
    params = init_params(pkey, cfg)
    x = jax.random.normal(
        xkey, (batch, cfg["in_channels"], cfg["img_size"], cfg["img_size"]),
        jnp.float32)

    fwd = jax.jit(functools.partial(vit_forward, cfg=cfg))
    out = jax.block_until_ready(fwd(x, params))
    assert out.shape == (batch, cfg["num_classes"])
    assert bool(jnp.all(jnp.isfinite(out)))
    print("KERNEL_OK")
</pallas_src>

<mosaic_0001>
module attributes {stable_mosaic.version = 11 : i64} {
  func.func @_vit_kernel(%arg0: i32, %arg1: i32, %arg2: memref<1x24x128xbf16, #tpu.memory_space<vmem>>, %arg3: memref<128x512xbf16, #tpu.memory_space<vmem>>, %arg4: memref<24x512xf32, #tpu.memory_space<vmem>>, %arg5: memref<1x512x1536xbf16, #tpu.memory_space<vmem>>, %arg6: memref<1x1x1536xf32, #tpu.memory_space<vmem>>, %arg7: memref<1x512x512xbf16, #tpu.memory_space<vmem>>, %arg8: memref<1x1x512xf32, #tpu.memory_space<vmem>>, %arg9: memref<1x1x512xf32, #tpu.memory_space<vmem>>, %arg10: memref<1x1x512xf32, #tpu.memory_space<vmem>>, %arg11: memref<1x512x2048xbf16, #tpu.memory_space<vmem>>, %arg12: memref<1x1x2048xf32, #tpu.memory_space<vmem>>, %arg13: memref<1x2048x512xbf16, #tpu.memory_space<vmem>>, %arg14: memref<1x1x512xf32, #tpu.memory_space<vmem>>, %arg15: memref<1x1x512xf32, #tpu.memory_space<vmem>>, %arg16: memref<1x1x512xf32, #tpu.memory_space<vmem>>, %arg17: memref<512x768xbf16, #tpu.memory_space<vmem>>, %arg18: memref<1x768xf32, #tpu.memory_space<vmem>>, %arg19: memref<1x1x768xf32, #tpu.memory_space<vmem>>, %arg20: memref<24x512xf32, #tpu.memory_space<vmem>>) attributes {dimension_semantics = [#tpu.dimension_semantics<parallel>, #tpu.dimension_semantics<arbitrary>], iteration_bounds = array<i64: 2, 2>, scalar_prefetch = 0 : i64, scratch_operands = 1 : i64, tpu.core_type = #tpu.core_type<tc>, window_params = [{transform_indices = @transform_0, window_bounds = array<i64: 1, 24, 128>}, {pipeline_mode = #tpu.pipeline_mode<synchronous>, transform_indices = @transform_1, window_bounds = array<i64: 128, 512>}, {pipeline_mode = #tpu.pipeline_mode<synchronous>, transform_indices = @transform_2, window_bounds = array<i64: 24, 512>}, {transform_indices = @transform_3, window_bounds = array<i64: 1, 512, 1536>}, {transform_indices = @transform_4, window_bounds = array<i64: 1, 1, 1536>}, {transform_indices = @transform_5, window_bounds = array<i64: 1, 512, 512>}, {transform_indices = @transform_6, window_bounds = array<i64: 1, 1, 512>}, {transform_indices = @transform_7, window_bounds = array<i64: 1, 1, 512>}, {transform_indices = @transform_8, window_bounds = array<i64: 1, 1, 512>}, {transform_indices = @transform_9, window_bounds = array<i64: 1, 512, 2048>}, {transform_indices = @transform_10, window_bounds = array<i64: 1, 1, 2048>}, {transform_indices = @transform_11, window_bounds = array<i64: 1, 2048, 512>}, {transform_indices = @transform_12, window_bounds = array<i64: 1, 1, 512>}, {transform_indices = @transform_13, window_bounds = array<i64: 1, 1, 512>}, {transform_indices = @transform_14, window_bounds = array<i64: 1, 1, 512>}, {pipeline_mode = #tpu.pipeline_mode<synchronous>, transform_indices = @transform_15, window_bounds = array<i64: 512, 768>}, {pipeline_mode = #tpu.pipeline_mode<synchronous>, transform_indices = @transform_16, window_bounds = array<i64: 1, 768>}, {transform_indices = @transform_17, window_bounds = array<i64: 1, 1, 768>}]} {
    %c0_i32 = arith.constant 0 : i32
    %0 = arith.cmpi eq, %arg1, %c0_i32 : i32
    %1 = arith.extui %0 : i1 to i32
    %c0_i32_0 = arith.constant 0 : i32
    %2 = arith.cmpi ne, %1, %c0_i32_0 : i32
    scf.if %2 {
      %c0_79 = arith.constant 0 : index
      %c0_80 = arith.constant 0 : index
      %c0_81 = arith.constant 0 : index
      %181 = vector.load %arg2[%c0_79, %c0_80, %c0_81] : memref<1x24x128xbf16, #tpu.memory_space<vmem>>, vector<1x24x128xbf16>
      %182 = vector.shape_cast %181 : vector<1x24x128xbf16> to vector<24x128xbf16>
      %c0_82 = arith.constant 0 : index
      %c0_83 = arith.constant 0 : index
      %183 = vector.load %arg3[%c0_82, %c0_83] : memref<128x512xbf16, #tpu.memory_space<vmem>>, vector<128x512xbf16>
      %cst_84 = arith.constant dense<0.000000e+00> : vector<24x512xf32>
      %184 = tpu.matmul %182, %183, %cst_84 {dimension_numbers = #tpu.dot_dimension_numbers<[1], [0], [0], [1], [0, 0, 1, 1], [], []>} : vector<24x128xbf16>, vector<128x512xbf16>, vector<24x512xf32> -> vector<24x512xf32>
      %c0_85 = arith.constant 0 : index
      %c0_86 = arith.constant 0 : index
      %185 = vector.load %arg4[%c0_85, %c0_86] : memref<24x512xf32, #tpu.memory_space<vmem>>, vector<24x512xf32>
      %186 = arith.addf %184, %185 : vector<24x512xf32>
      %c0_87 = arith.constant 0 : index
      %c0_88 = arith.constant 0 : index
      %187 = vector.load %arg20[%c0_87, %c0_88] : memref<24x512xf32, #tpu.memory_space<vmem>>, vector<24x512xf32>
      tpu.vector_store %arg20[%c0_87, %c0_88], %186 {strides = array<i32>} : memref<24x512xf32, #tpu.memory_space<vmem>>, vector<24x512xf32>,
    } else {
    }
    %c0 = arith.constant 0 : index
    %c0_1 = arith.constant 0 : index
    %3 = vector.load %arg20[%c0, %c0_1] : memref<24x512xf32, #tpu.memory_space<vmem>>, vector<24x512xf32>
    %4 = arith.truncf %3 : vector<24x512xf32> to vector<24x512xbf16>
    %c0_2 = arith.constant 0 : index
    %c0_3 = arith.constant 0 : index
    %c0_4 = arith.constant 0 : index
    %5 = vector.load %arg5[%c0_2, %c0_3, %c0_4] : memref<1x512x1536xbf16, #tpu.memory_space<vmem>>, vector<1x512x1536xbf16>
    %6 = vector.shape_cast %5 : vector<1x512x1536xbf16> to vector<512x1536xbf16>
    %cst = arith.constant dense<0.000000e+00> : vector<24x1536xf32>
    %7 = tpu.matmul %4, %6, %cst {dimension_numbers = #tpu.dot_dimension_numbers<[1], [0], [0], [1], [0, 0, 1, 1], [], []>} : vector<24x512xbf16>, vector<512x1536xbf16>, vector<24x1536xf32> -> vector<24x1536xf32>
    %c0_5 = arith.constant 0 : index
    %c0_6 = arith.constant 0 : index
    %c0_7 = arith.constant 0 : index
    %8 = vector.load %arg6[%c0_5, %c0_6, %c0_7] : memref<1x1x1536xf32, #tpu.memory_space<vmem>>, vector<1x1x1536xf32>
    %9 = vector.shape_cast %8 : vector<1x1x1536xf32> to vector<1x1536xf32>
    %10 = vector.broadcast %9 : vector<1x1536xf32> to vector<24x1536xf32>
    %11 = arith.addf %7, %10 : vector<24x1536xf32>
    %12 = arith.truncf %11 : vector<24x1536xf32> to vector<24x1536xbf16>
    %13 = tpu.iota {dimensions = array<i32: 1>} : vector<24x24xi32>
    %c17_i32 = arith.constant 17 : i32
    %14 = vector.broadcast %c17_i32 : i32 to vector<24x24xi32>
    %15 = arith.cmpi slt, %13, %14 : vector<24x24xi32>
    %16 = vector.extract_strided_slice %12 {offsets = [0, 0], sizes = [24, 128], strides = [1, 1]} : vector<24x1536xbf16> to vector<24x128xbf16>
    %17 = vector.extract_strided_slice %12 {offsets = [0, 512], sizes = [24, 128], strides = [1, 1]} : vector<24x1536xbf16> to vector<24x128xbf16>
    %18 = vector.extract_strided_slice %12 {offsets = [0, 1024], sizes = [24, 128], strides = [1, 1]} : vector<24x1536xbf16> to vector<24x128xbf16>
    %cst_8 = arith.constant dense<0.000000e+00> : vector<24x24xf32>
    %19 = tpu.matmul %16, %17, %cst_8 {dimension_numbers = #tpu.dot_dimension_numbers<[1], [1], [0], [0], [0, 0, 1, 0], [], []>} : vector<24x128xbf16>, vector<24x128xbf16>, vector<24x24xf32> -> vector<24x24xf32>
    %cst_9 = arith.constant 0.0883883461 : f32
    %20 = vector.broadcast %cst_9 : f32 to vector<24x24xf32>
    %21 = arith.mulf %19, %20 : vector<24x24xf32>
    %cst_10 = arith.constant -1.000000e+30 : f32
    %22 = vector.broadcast %cst_10 : f32 to vector<24x24xf32>
    %23 = arith.select %15, %21, %22 : vector<24x24xi1>, vector<24x24xf32>
    %cst_11 = arith.constant dense<0xFF800000> : vector<24xf32>
    %24 = vector.multi_reduction <maximumf>, %23, %cst_11 [1] : vector<24x24xf32> to vector<24xf32>
    %25 = vector.shape_cast %24 : vector<24xf32> to vector<24x1xf32>
    %26 = vector.broadcast %25 : vector<24x1xf32> to vector<24x24xf32>
    %27 = arith.subf %23, %26 : vector<24x24xf32>
    %28 = math.exp %27 : vector<24x24xf32>
    %cst_12 = arith.constant dense<0.000000e+00> : vector<24xf32>
    %29 = vector.multi_reduction <add>, %28, %cst_12 [1] : vector<24x24xf32> to vector<24xf32>
    %30 = vector.shape_cast %29 : vector<24xf32> to vector<24x1xf32>
    %31 = tpu.reciprocal %30 {approx = true} : vector<24x1xf32> -> vector<24x1xf32>
    %32 = vector.broadcast %31 : vector<24x1xf32> to vector<24x24xf32>
    %33 = arith.mulf %28, %32 : vector<24x24xf32>
    %34 = arith.truncf %33 : vector<24x24xf32> to vector<24x24xbf16>
    %cst_13 = arith.constant dense<0.000000e+00> : vector<24x128xf32>
    %35 = tpu.matmul %34, %18, %cst_13 {dimension_numbers = #tpu.dot_dimension_numbers<[1], [0], [0], [1], [0, 0, 1, 1], [], []>} : vector<24x24xbf16>, vector<24x128xbf16>, vector<24x128xf32> -> vector<24x128xf32>
    %36 = vector.extract_strided_slice %12 {offsets = [0, 128], sizes = [24, 128], strides = [1, 1]} : vector<24x1536xbf16> to vector<24x128xbf16>
    %37 = vector.extract_strided_slice %12 {offsets = [0, 640], sizes = [24, 128], strides = [1, 1]} : vector<24x1536xbf16> to vector<24x128xbf16>
    %38 = vector.extract_strided_slice %12 {offsets = [0, 1152], sizes = [24, 128], strides = [1, 1]} : vector<24x1536xbf16> to vector<24x128xbf16>
    %cst_14 = arith.constant dense<0.000000e+00> : vector<24x24xf32>
    %39 = tpu.matmul %36, %37, %cst_14 {dimension_numbers = #tpu.dot_dimension_numbers<[1], [1], [0], [0], [0, 0, 1, 0], [], []>} : vector<24x128xbf16>, vector<24x128xbf16>, vector<24x24xf32> -> vector<24x24xf32>
    %cst_15 = arith.constant 0.0883883461 : f32
    %40 = vector.broadcast %cst_15 : f32 to vector<24x24xf32>
    %41 = arith.mulf %39, %40 : vector<24x24xf32>
    %cst_16 = arith.constant -1.000000e+30 : f32
    %42 = vector.broadcast %cst_16 : f32 to vector<24x24xf32>
    %43 = arith.select %15, %41, %42 : vector<24x24xi1>, vector<24x24xf32>
    %cst_17 = arith.constant dense<0xFF800000> : vector<24xf32>
    %44 = vector.multi_reduction <maximumf>, %43, %cst_17 [1] : vector<24x24xf32> to vector<24xf32>
    %45 = vector.shape_cast %44 : vector<24xf32> to vector<24x1xf32>
    %46 = vector.broadcast %45 : vector<24x1xf32> to vector<24x24xf32>
    %47 = arith.subf %43, %46 : vector<24x24xf32>
    %48 = math.exp %47 : vector<24x24xf32>
    %cst_18 = arith.constant dense<0.000000e+00> : vector<24xf32>
    %49 = vector.multi_reduction <add>, %48, %cst_18 [1] : vector<24x24xf32> to vector<24xf32>
    %50 = vector.shape_cast %49 : vector<24xf32> to vector<24x1xf32>
    %51 = tpu.reciprocal %50 {approx = true} : vector<24x1xf32> -> vector<24x1xf32>
    %52 = vector.broadcast %51 : vector<24x1xf32> to vector<24x24xf32>
    %53 = arith.mulf %48, %52 : vector<24x24xf32>
    %54 = arith.truncf %53 : vector<24x24xf32> to vector<24x24xbf16>
    %cst_19 = arith.constant dense<0.000000e+00> : vector<24x128xf32>
    %55 = tpu.matmul %54, %38, %cst_19 {dimension_numbers = #tpu.dot_dimension_numbers<[1], [0], [0], [1], [0, 0, 1, 1], [], []>} : vector<24x24xbf16>, vector<24x128xbf16>, vector<24x128xf32> -> vector<24x128xf32>
    %56 = vector.extract_strided_slice %12 {offsets = [0, 256], sizes = [24, 128], strides = [1, 1]} : vector<24x1536xbf16> to vector<24x128xbf16>
    %57 = vector.extract_strided_slice %12 {offsets = [0, 768], sizes = [24, 128], strides = [1, 1]} : vector<24x1536xbf16> to vector<24x128xbf16>
    %58 = vector.extract_strided_slice %12 {offsets = [0, 1280], sizes = [24, 128], strides = [1, 1]} : vector<24x1536xbf16> to vector<24x128xbf16>
    %cst_20 = arith.constant dense<0.000000e+00> : vector<24x24xf32>
    %59 = tpu.matmul %56, %57, %cst_20 {dimension_numbers = #tpu.dot_dimension_numbers<[1], [1], [0], [0], [0, 0, 1, 0], [], []>} : vector<24x128xbf16>, vector<24x128xbf16>, vector<24x24xf32> -> vector<24x24xf32>
    %cst_21 = arith.constant 0.0883883461 : f32
    %60 = vector.broadcast %cst_21 : f32 to vector<24x24xf32>
    %61 = arith.mulf %59, %60 : vector<24x24xf32>
    %cst_22 = arith.constant -1.000000e+30 : f32
    %62 = vector.broadcast %cst_22 : f32 to vector<24x24xf32>
    %63 = arith.select %15, %61, %62 : vector<24x24xi1>, vector<24x24xf32>
    %cst_23 = arith.constant dense<0xFF800000> : vector<24xf32>
    %64 = vector.multi_reduction <maximumf>, %63, %cst_23 [1] : vector<24x24xf32> to vector<24xf32>
    %65 = vector.shape_cast %64 : vector<24xf32> to vector<24x1xf32>
    %66 = vector.broadcast %65 : vector<24x1xf32> to vector<24x24xf32>
    %67 = arith.subf %63, %66 : vector<24x24xf32>
    %68 = math.exp %67 : vector<24x24xf32>
    %cst_24 = arith.constant dense<0.000000e+00> : vector<24xf32>
    %69 = vector.multi_reduction <add>, %68, %cst_24 [1] : vector<24x24xf32> to vector<24xf32>
    %70 = vector.shape_cast %69 : vector<24xf32> to vector<24x1xf32>
    %71 = tpu.reciprocal %70 {approx = true} : vector<24x1xf32> -> vector<24x1xf32>
    %72 = vector.broadcast %71 : vector<24x1xf32> to vector<24x24xf32>
    %73 = arith.mulf %68, %72 : vector<24x24xf32>
    %74 = arith.truncf %73 : vector<24x24xf32> to vector<24x24xbf16>
    %cst_25 = arith.constant dense<0.000000e+00> : vector<24x128xf32>
    %75 = tpu.matmul %74, %58, %cst_25 {dimension_numbers = #tpu.dot_dimension_numbers<[1], [0], [0], [1], [0, 0, 1, 1], [], []>} : vector<24x24xbf16>, vector<24x128xbf16>, vector<24x128xf32> -> vector<24x128xf32>
    %76 = vector.extract_strided_slice %12 {offsets = [0, 384], sizes = [24, 128], strides = [1, 1]} : vector<24x1536xbf16> to vector<24x128xbf16>
    %77 = vector.extract_strided_slice %12 {offsets = [0, 896], sizes = [24, 128], strides = [1, 1]} : vector<24x1536xbf16> to vector<24x128xbf16>
    %78 = vector.extract_strided_slice %12 {offsets = [0, 1408], sizes = [24, 128], strides = [1, 1]} : vector<24x1536xbf16> to vector<24x128xbf16>
    %cst_26 = arith.constant dense<0.000000e+00> : vector<24x24xf32>
    %79 = tpu.matmul %76, %77, %cst_26 {dimension_numbers = #tpu.dot_dimension_numbers<[1], [1], [0], [0], [0, 0, 1, 0], [], []>} : vector<24x128xbf16>, vector<24x128xbf16>, vector<24x24xf32> -> vector<24x24xf32>
    %cst_27 = arith.constant 0.0883883461 : f32
    %80 = vector.broadcast %cst_27 : f32 to vector<24x24xf32>
    %81 = arith.mulf %79, %80 : vector<24x24xf32>
    %cst_28 = arith.constant -1.000000e+30 : f32
    %82 = vector.broadcast %cst_28 : f32 to vector<24x24xf32>
    %83 = arith.select %15, %81, %82 : vector<24x24xi1>, vector<24x24xf32>
    %cst_29 = arith.constant dense<0xFF800000> : vector<24xf32>
    %84 = vector.multi_reduction <maximumf>, %83, %cst_29 [1] : vector<24x24xf32> to vector<24xf32>
    %85 = vector.shape_cast %84 : vector<24xf32> to vector<24x1xf32>
    %86 = vector.broadcast %85 : vector<24x1xf32> to vector<24x24xf32>
    %87 = arith.subf %83, %86 : vector<24x24xf32>
    %88 = math.exp %87 : vector<24x24xf32>
    %cst_30 = arith.constant dense<0.000000e+00> : vector<24xf32>
    %89 = vector.multi_reduction <add>, %88, %cst_30 [1] : vector<24x24xf32> to vector<24xf32>
    %90 = vector.shape_cast %89 : vector<24xf32> to vector<24x1xf32>
    %91 = tpu.reciprocal %90 {approx = true} : vector<24x1xf32> -> vector<24x1xf32>
    %92 = vector.broadcast %91 : vector<24x1xf32> to vector<24x24xf32>
    %93 = arith.mulf %88, %92 : vector<24x24xf32>
    %94 = arith.truncf %93 : vector<24x24xf32> to vector<24x24xbf16>
    %cst_31 = arith.constant dense<0.000000e+00> : vector<24x128xf32>
    %95 = tpu.matmul %94, %78, %cst_31 {dimension_numbers = #tpu.dot_dimension_numbers<[1], [0], [0], [1], [0, 0, 1, 1], [], []>} : vector<24x24xbf16>, vector<24x128xbf16>, vector<24x128xf32> -> vector<24x128xf32>
    %96 = tpu.concatenate %35, %55, %75, %95 in 1 : vector<24x128xf32>, vector<24x128xf32>, vector<24x128xf32>, vector<24x128xf32> -> vector<24x512xf32>
    %97 = arith.truncf %96 : vector<24x512xf32> to vector<24x512xbf16>
    %c0_32 = arith.constant 0 : index
    %c0_33 = arith.constant 0 : index
    %c0_34 = arith.constant 0 : index
    %98 = vector.load %arg7[%c0_32, %c0_33, %c0_34] : memref<1x512x512xbf16, #tpu.memory_space<vmem>>, vector<1x512x512xbf16>
    %99 = vector.shape_cast %98 : vector<1x512x512xbf16> to vector<512x512xbf16>
    %cst_35 = arith.constant dense<0.000000e+00> : vector<24x512xf32>
    %100 = tpu.matmul %97, %99, %cst_35 {dimension_numbers = #tpu.dot_dimension_numbers<[1], [0], [0], [1], [0, 0, 1, 1], [], []>} : vector<24x512xbf16>, vector<512x512xbf16>, vector<24x512xf32> -> vector<24x512xf32>
    %c0_36 = arith.constant 0 : index
    %c0_37 = arith.constant 0 : index
    %c0_38 = arith.constant 0 : index
    %101 = vector.load %arg8[%c0_36, %c0_37, %c0_38] : memref<1x1x512xf32, #tpu.memory_space<vmem>>, vector<1x1x512xf32>
    %102 = vector.shape_cast %101 : vector<1x1x512xf32> to vector<1x512xf32>
    %103 = vector.broadcast %102 : vector<1x512xf32> to vector<24x512xf32>
    %104 = arith.addf %100, %103 : vector<24x512xf32>
    %105 = arith.addf %104, %3 : vector<24x512xf32>
    %c0_39 = arith.constant 0 : index
    %c0_40 = arith.constant 0 : index
    %c0_41 = arith.constant 0 : index
    %106 = vector.load %arg9[%c0_39, %c0_40, %c0_41] : memref<1x1x512xf32, #tpu.memory_space<vmem>>, vector<1x1x512xf32>
    %107 = vector.shape_cast %106 : vector<1x1x512xf32> to vector<1x512xf32>
    %c0_42 = arith.constant 0 : index
    %c0_43 = arith.constant 0 : index
    %c0_44 = arith.constant 0 : index
    %108 = vector.load %arg10[%c0_42, %c0_43, %c0_44] : memref<1x1x512xf32, #tpu.memory_space<vmem>>, vector<1x1x512xf32>
    %109 = vector.shape_cast %108 : vector<1x1x512xf32> to vector<1x512xf32>
    %cst_45 = arith.constant dense<0.000000e+00> : vector<24xf32>
    %110 = vector.multi_reduction <add>, %105, %cst_45 [1] : vector<24x512xf32> to vector<24xf32>
    %111 = vector.shape_cast %110 : vector<24xf32> to vector<24x1xf32>
    %cst_46 = arith.constant 5.120000e+02 : f32
    %112 = vector.broadcast %cst_46 : f32 to vector<24x1xf32>
    %113 = arith.divf %111, %112 : vector<24x1xf32>
    %114 = vector.broadcast %113 : vector<24x1xf32> to vector<24x512xf32>
    %115 = arith.subf %105, %114 : vector<24x512xf32>
    %116 = arith.mulf %115, %115 : vector<24x512xf32>
    %cst_47 = arith.constant dense<0.000000e+00> : vector<24xf32>
    %117 = vector.multi_reduction <add>, %116, %cst_47 [1] : vector<24x512xf32> to vector<24xf32>
    %118 = vector.shape_cast %117 : vector<24xf32> to vector<24x1xf32>
    %cst_48 = arith.constant 5.120000e+02 : f32
    %119 = vector.broadcast %cst_48 : f32 to vector<24x1xf32>
    %120 = arith.divf %118, %119 : vector<24x1xf32>
    %121 = vector.broadcast %113 : vector<24x1xf32> to vector<24x512xf32>
    %122 = arith.subf %105, %121 : vector<24x512xf32>
    %cst_49 = arith.constant 9.99999974E-6 : f32
    %123 = vector.broadcast %cst_49 : f32 to vector<24x1xf32>
    %124 = arith.addf %120, %123 : vector<24x1xf32>
    %125 = math.rsqrt %124 : vector<24x1xf32>
    %126 = vector.broadcast %125 : vector<24x1xf32> to vector<24x512xf32>
    %127 = arith.mulf %122, %126 : vector<24x512xf32>
    %128 = vector.broadcast %107 : vector<1x512xf32> to vector<24x512xf32>
    %129 = arith.mulf %127, %128 : vector<24x512xf32>
    %130 = vector.broadcast %109 : vector<1x512xf32> to vector<24x512xf32>
    %131 = arith.addf %129, %130 : vector<24x512xf32>
    %132 = arith.truncf %131 : vector<24x512xf32> to vector<24x512xbf16>
    %c0_50 = arith.constant 0 : index
    %c0_51 = arith.constant 0 : index
    %c0_52 = arith.constant 0 : index
    %133 = vector.load %arg11[%c0_50, %c0_51, %c0_52] : memref<1x512x2048xbf16, #tpu.memory_space<vmem>>, vector<1x512x2048xbf16>
    %134 = vector.shape_cast %133 : vector<1x512x2048xbf16> to vector<512x2048xbf16>
    %cst_53 = arith.constant dense<0.000000e+00> : vector<24x2048xf32>
    %135 = tpu.matmul %132, %134, %cst_53 {dimension_numbers = #tpu.dot_dimension_numbers<[1], [0], [0], [1], [0, 0, 1, 1], [], []>} : vector<24x512xbf16>, vector<512x2048xbf16>, vector<24x2048xf32> -> vector<24x2048xf32>
    %c0_54 = arith.constant 0 : index
    %c0_55 = arith.constant 0 : index
    %c0_56 = arith.constant 0 : index
    %136 = vector.load %arg12[%c0_54, %c0_55, %c0_56] : memref<1x1x2048xf32, #tpu.memory_space<vmem>>, vector<1x1x2048xf32>
    %137 = vector.shape_cast %136 : vector<1x1x2048xf32> to vector<1x2048xf32>
    %138 = vector.broadcast %137 : vector<1x2048xf32> to vector<24x2048xf32>
    %139 = arith.addf %135, %138 : vector<24x2048xf32>
    %cst_57 = arith.constant 0.000000e+00 : f32
    %140 = vector.broadcast %cst_57 : f32 to vector<24x2048xf32>
    %141 = arith.maximumf %139, %140 : vector<24x2048xf32>
    %142 = arith.truncf %141 : vector<24x2048xf32> to vector<24x2048xbf16>
    %c0_58 = arith.constant 0 : index
    %c0_59 = arith.constant 0 : index
    %c0_60 = arith.constant 0 : index
    %143 = vector.load %arg13[%c0_58, %c0_59, %c0_60] : memref<1x2048x512xbf16, #tpu.memory_space<vmem>>, vector<1x2048x512xbf16>
    %144 = vector.shape_cast %143 : vector<1x2048x512xbf16> to vector<2048x512xbf16>
    %cst_61 = arith.constant dense<0.000000e+00> : vector<24x512xf32>
    %145 = tpu.matmul %142, %144, %cst_61 {dimension_numbers = #tpu.dot_dimension_numbers<[1], [0], [0], [1], [0, 0, 1, 1], [], []>} : vector<24x2048xbf16>, vector<2048x512xbf16>, vector<24x512xf32> -> vector<24x512xf32>
    %c0_62 = arith.constant 0 : index
    %c0_63 = arith.constant 0 : index
    %c0_64 = arith.constant 0 : index
    %146 = vector.load %arg14[%c0_62, %c0_63, %c0_64] : memref<1x1x512xf32, #tpu.memory_space<vmem>>, vector<1x1x512xf32>
    %147 = vector.shape_cast %146 : vector<1x1x512xf32> to vector<1x512xf32>
    %148 = vector.broadcast %147 : vector<1x512xf32> to vector<24x512xf32>
    %149 = arith.addf %145, %148 : vector<24x512xf32>
    %150 = arith.addf %149, %131 : vector<24x512xf32>
    %c0_65 = arith.constant 0 : index
    %c0_66 = arith.constant 0 : index
    %c0_67 = arith.constant 0 : index
    %151 = vector.load %arg15[%c0_65, %c0_66, %c0_67] : memref<1x1x512xf32, #tpu.memory_space<vmem>>, vector<1x1x512xf32>
    %152 = vector.shape_cast %151 : vector<1x1x512xf32> to vector<1x512xf32>
    %c0_68 = arith.constant 0 : index
    %c0_69 = arith.constant 0 : index
    %c0_70 = arith.constant 0 : index
    %153 = vector.load %arg16[%c0_68, %c0_69, %c0_70] : memref<1x1x512xf32, #tpu.memory_space<vmem>>, vector<1x1x512xf32>
    %154 = vector.shape_cast %153 : vector<1x1x512xf32> to vector<1x512xf32>
    %cst_71 = arith.constant dense<0.000000e+00> : vector<24xf32>
    %155 = vector.multi_reduction <add>, %150, %cst_71 [1] : vector<24x512xf32> to vector<24xf32>
    %156 = vector.shape_cast %155 : vector<24xf32> to vector<24x1xf32>
    %cst_72 = arith.constant 5.120000e+02 : f32
    %157 = vector.broadcast %cst_72 : f32 to vector<24x1xf32>
    %158 = arith.divf %156, %157 : vector<24x1xf32>
    %159 = vector.broadcast %158 : vector<24x1xf32> to vector<24x512xf32>
    %160 = arith.subf %150, %159 : vector<24x512xf32>
    %161 = arith.mulf %160, %160 : vector<24x512xf32>
    %cst_73 = arith.constant dense<0.000000e+00> : vector<24xf32>
    %162 = vector.multi_reduction <add>, %161, %cst_73 [1] : vector<24x512xf32> to vector<24xf32>
    %163 = vector.shape_cast %162 : vector<24xf32> to vector<24x1xf32>
    %cst_74 = arith.constant 5.120000e+02 : f32
    %164 = vector.broadcast %cst_74 : f32 to vector<24x1xf32>
    %165 = arith.divf %163, %164 : vector<24x1xf32>
    %166 = vector.broadcast %158 : vector<24x1xf32> to vector<24x512xf32>
    %167 = arith.subf %150, %166 : vector<24x512xf32>
    %cst_75 = arith.constant 9.99999974E-6 : f32
    %168 = vector.broadcast %cst_75 : f32 to vector<24x1xf32>
    %169 = arith.addf %165, %168 : vector<24x1xf32>
    %170 = math.rsqrt %169 : vector<24x1xf32>
    %171 = vector.broadcast %170 : vector<24x1xf32> to vector<24x512xf32>
    %172 = arith.mulf %167, %171 : vector<24x512xf32>
    %173 = vector.broadcast %152 : vector<1x512xf32> to vector<24x512xf32>
    %174 = arith.mulf %172, %173 : vector<24x512xf32>
    %175 = vector.broadcast %154 : vector<1x512xf32> to vector<24x512xf32>
    %176 = arith.addf %174, %175 : vector<24x512xf32>
    %c0_76 = arith.constant 0 : index
    %c0_77 = arith.constant 0 : index
    %177 = vector.load %arg20[%c0_76, %c0_77] : memref<24x512xf32, #tpu.memory_space<vmem>>, vector<24x512xf32>
    tpu.vector_store %arg20[%c0_76, %c0_77], %176 {strides = array<i32>} : memref<24x512xf32, #tpu.memory_space<vmem>>, vector<24x512xf32>,
    %c1_i32 = arith.constant 1 : i32
    %178 = arith.cmpi eq, %arg1, %c1_i32 : i32
    %179 = arith.extui %178 : i1 to i32
    %c0_i32_78 = arith.constant 0 : i32
    %180 = arith.cmpi ne, %179, %c0_i32_78 : i32
    scf.if %180 {
      %181 = arith.truncf %176 : vector<24x512xf32> to vector<24x512xbf16>
      %c0_79 = arith.constant 0 : index
      %c0_80 = arith.constant 0 : index
      %182 = vector.load %arg17[%c0_79, %c0_80] : memref<512x768xbf16, #tpu.memory_space<vmem>>, vector<512x768xbf16>
      %cst_81 = arith.constant dense<0.000000e+00> : vector<24x768xf32>
      %183 = tpu.matmul %181, %182, %cst_81 {dimension_numbers = #tpu.dot_dimension_numbers<[1], [0], [0], [1], [0, 0, 1, 1], [], []>} : vector<24x512xbf16>, vector<512x768xbf16>, vector<24x768xf32> -> vector<24x768xf32>
      %c0_82 = arith.constant 0 : index
      %c0_83 = arith.constant 0 : index
      %184 = vector.load %arg18[%c0_82, %c0_83] : memref<1x768xf32, #tpu.memory_space<vmem>>, vector<1x768xf32>
      %185 = vector.broadcast %184 : vector<1x768xf32> to vector<24x768xf32>
      %186 = arith.addf %183, %185 : vector<24x768xf32>
      %187 = vector.extract_strided_slice %186 {offsets = [0, 0], sizes = [1, 768], strides = [1, 1]} : vector<24x768xf32> to vector<1x768xf32>
      %c0_84 = arith.constant 0 : index
      %c0_85 = arith.constant 0 : index
      %c0_86 = arith.constant 0 : index
      %188 = vector.load %arg19[%c0_84, %c0_85, %c0_86] : memref<1x1x768xf32, #tpu.memory_space<vmem>>, vector<1x1x768xf32>
      %189 = vector.shape_cast %188 : vector<1x1x768xf32> to vector<1x768xf32>
      %190 = vector.shape_cast %187 : vector<1x768xf32> to vector<1x1x768xf32>
      tpu.vector_store %arg19[%c0_84, %c0_85, %c0_86], %190 {strides = array<i32>} : memref<1x1x768xf32, #tpu.memory_space<vmem>>, vector<1x1x768xf32>,
    } else {
    }
    return
  }
  func.func @transform_0(%arg0: i32, %arg1: i32) -> (i32, i32, i32) {
    %c0_i32 = arith.constant 0 : i32
    %c0_i32_0 = arith.constant 0 : i32
    %c0_i32_1 = arith.constant 0 : i32
    return %arg0, %c0_i32, %c0_i32_0 : i32, i32, i32
  }
  func.func @transform_1(%arg0: i32, %arg1: i32) -> (i32, i32) {
    %c0_i32 = arith.constant 0 : i32
    %c0_i32_0 = arith.constant 0 : i32
    %c0_i32_1 = arith.constant 0 : i32
    return %c0_i32, %c0_i32_0 : i32, i32
  }
  func.func @transform_2(%arg0: i32, %arg1: i32) -> (i32, i32) {
    %c0_i32 = arith.constant 0 : i32
    %c0_i32_0 = arith.constant 0 : i32
    %c0_i32_1 = arith.constant 0 : i32
    return %c0_i32, %c0_i32_0 : i32, i32
  }
  func.func @transform_3(%arg0: i32, %arg1: i32) -> (i32, i32, i32) {
    %c0_i32 = arith.constant 0 : i32
    %c0_i32_0 = arith.constant 0 : i32
    %c0_i32_1 = arith.constant 0 : i32
    return %arg1, %c0_i32, %c0_i32_0 : i32, i32, i32
  }
  func.func @transform_4(%arg0: i32, %arg1: i32) -> (i32, i32, i32) {
    %c0_i32 = arith.constant 0 : i32
    %c0_i32_0 = arith.constant 0 : i32
    %c0_i32_1 = arith.constant 0 : i32
    return %arg1, %c0_i32, %c0_i32_0 : i32, i32, i32
  }
  func.func @transform_5(%arg0: i32, %arg1: i32) -> (i32, i32, i32) {
    %c0_i32 = arith.constant 0 : i32
    %c0_i32_0 = arith.constant 0 : i32
    %c0_i32_1 = arith.constant 0 : i32
    return %arg1, %c0_i32, %c0_i32_0 : i32, i32, i32
  }
  func.func @transform_6(%arg0: i32, %arg1: i32) -> (i32, i32, i32) {
    %c0_i32 = arith.constant 0 : i32
    %c0_i32_0 = arith.constant 0 : i32
    %c0_i32_1 = arith.constant 0 : i32
    return %arg1, %c0_i32, %c0_i32_0 : i32, i32, i32
  }
  func.func @transform_7(%arg0: i32, %arg1: i32) -> (i32, i32, i32) {
    %c0_i32 = arith.constant 0 : i32
    %c0_i32_0 = arith.constant 0 : i32
    %c0_i32_1 = arith.constant 0 : i32
    return %arg1, %c0_i32, %c0_i32_0 : i32, i32, i32
  }
  func.func @transform_8(%arg0: i32, %arg1: i32) -> (i32, i32, i32) {
    %c0_i32 = arith.constant 0 : i32
    %c0_i32_0 = arith.constant 0 : i32
    %c0_i32_1 = arith.constant 0 : i32
    return %arg1, %c0_i32, %c0_i32_0 : i32, i32, i32
  }
  func.func @transform_9(%arg0: i32, %arg1: i32) -> (i32, i32, i32) {
    %c0_i32 = arith.constant 0 : i32
    %c0_i32_0 = arith.constant 0 : i32
    %c0_i32_1 = arith.constant 0 : i32
    return %arg1, %c0_i32, %c0_i32_0 : i32, i32, i32
  }
  func.func @transform_10(%arg0: i32, %arg1: i32) -> (i32, i32, i32) {
    %c0_i32 = arith.constant 0 : i32
    %c0_i32_0 = arith.constant 0 : i32
    %c0_i32_1 = arith.constant 0 : i32
    return %arg1, %c0_i32, %c0_i32_0 : i32, i32, i32
  }
  func.func @transform_11(%arg0: i32, %arg1: i32) -> (i32, i32, i32) {
    %c0_i32 = arith.constant 0 : i32
    %c0_i32_0 = arith.constant 0 : i32
    %c0_i32_1 = arith.constant 0 : i32
    return %arg1, %c0_i32, %c0_i32_0 : i32, i32, i32
  }
  func.func @transform_12(%arg0: i32, %arg1: i32) -> (i32, i32, i32) {
    %c0_i32 = arith.constant 0 : i32
    %c0_i32_0 = arith.constant 0 : i32
    %c0_i32_1 = arith.constant 0 : i32
    return %arg1, %c0_i32, %c0_i32_0 : i32, i32, i32
  }
  func.func @transform_13(%arg0: i32, %arg1: i32) -> (i32, i32, i32) {
    %c0_i32 = arith.constant 0 : i32
    %c0_i32_0 = arith.constant 0 : i32
    %c0_i32_1 = arith.constant 0 : i32
    return %arg1, %c0_i32, %c0_i32_0 : i32, i32, i32
  }
  func.func @transform_14(%arg0: i32, %arg1: i32) -> (i32, i32, i32) {
    %c0_i32 = arith.constant 0 : i32
    %c0_i32_0 = arith.constant 0 : i32
    %c0_i32_1 = arith.constant 0 : i32
    return %arg1, %c0_i32, %c0_i32_0 : i32, i32, i32
  }
  func.func @transform_15(%arg0: i32, %arg1: i32) -> (i32, i32) {
    %c0_i32 = arith.constant 0 : i32
    %c0_i32_0 = arith.constant 0 : i32
    %c0_i32_1 = arith.constant 0 : i32
    return %c0_i32, %c0_i32_0 : i32, i32
  }
  func.func @transform_16(%arg0: i32, %arg1: i32) -> (i32, i32) {
    %c0_i32 = arith.constant 0 : i32
    %c0_i32_0 = arith.constant 0 : i32
    %c0_i32_1 = arith.constant 0 : i32
    return %c0_i32, %c0_i32_0 : i32, i32
  }
  func.func @transform_17(%arg0: i32, %arg1: i32) -> (i32, i32, i32) {
    %c0_i32 = arith.constant 0 : i32
    %c0_i32_0 = arith.constant 0 : i32
    %c0_i32_1 = arith.constant 0 : i32
    return %arg0, %c0_i32, %c0_i32_0 : i32, i32, i32
  }
}

</mosaic_0001>

<bundles_post_ra>
// kernel: vit_forward.1
= control target key start
LH: loop header
LB: loop body
LE: loop exit
PB: predicated region body
PF: predicated region fallthrough
CT: control target
= control target key end

     0   :  { %s24439_s0 = inlined_call_operand.vmem [shape: bf16[2,24,128], index: 0, kind: input, shape index: {}]   ;;  %s24440_s1 = inlined_call_operand.vmem [shape: bf16[128,512], index: 1, kind: input, shape index: {}]   ;;  %s24441_s2 = inlined_call_operand.vmem [shape: f32[24,512], index: 2, kind: input, shape index: {}]   ;;  %s24442_s3 = inlined_call_operand.hbm [shape: bf16[2,512,1536], index: 3, kind: input, shape index: {}]   ;;  %s24443_s4 = inlined_call_operand.hbm [shape: f32[2,1,1536], index: 4, kind: input, shape index: {}]   ;;  %s24444_s5 = inlined_call_operand.hbm [shape: bf16[2,512,512], index: 5, kind: input, shape index: {}]   ;;  %s24445_s6 = inlined_call_operand.hbm [shape: f32[2,1,512], index: 6, kind: input, shape index: {}]   ;;  %s24446_s7 = inlined_call_operand.hbm [shape: f32[2,1,512], index: 7, kind: input, shape index: {}]   ;;  %s24447_s8 = inlined_call_operand.hbm [shape: f32[2,1,512], index: 8, kind: input, shape index: {}]   ;;  %s24448_s9 = inlined_call_operand.hbm [shape: bf16[2,512,2048], index: 9, kind: input, shape index: {}]   ;;  %s24449_s10 = inlined_call_operand.hbm [shape: f32[2,1,2048], index: 10, kind: input, shape index: {}]   ;;  %s24450_s11 = inlined_call_operand.hbm [shape: bf16[2,2048,512], index: 11, kind: input, shape index: {}]   ;;  %s24451_s12 = inlined_call_operand.hbm [shape: f32[2,1,512], index: 12, kind: input, shape index: {}]   ;;  %s24452_s13 = inlined_call_operand.hbm [shape: f32[2,1,512], index: 13, kind: input, shape index: {}]   ;;  %s24453_s14 = inlined_call_operand.hbm [shape: f32[2,1,512], index: 14, kind: input, shape index: {}]   ;;  %s24454_s15 = inlined_call_operand.hbm [shape: bf16[512,768], index: 15, kind: input, shape index: {}]   ;;  %s24455_s16 = inlined_call_operand.vmem [shape: f32[1,768], index: 16, kind: input, shape index: {}]   ;;  %s24456_s17 = inlined_call_operand.vmem [shape: f32[2,1,768], index: 17, kind: output, shape index: {}]  }
   0x1   :  { %24489 = sst [smem:[#allocation48_spill]] %s24439_s0 }
   0x2   :  { %24490 = sst [smem:[#allocation49_spill]] %s24440_s1 }
   0x3   :  { %24491 = sst [smem:[#allocation50_spill]] %s24441_s2 }
   0x4   :  { %24492 = sst [smem:[#allocation51_spill]] %s24442_s3 }
   0x5   :  { %24493 = sst [smem:[#allocation52_spill]] %s24443_s4 }
   0x6   :  { %24494 = sst [smem:[#allocation53_spill]] %s24444_s5 }
   0x7   :  { %24495 = sst [smem:[#allocation54_spill]] %s24445_s6 }
   0x8   :  { %24496 = sst [smem:[#allocation55_spill]] %s24446_s7 }
   0x9   :  { %24497 = sst [smem:[#allocation56_spill]] %s24447_s8 }
   0xa   :  { %24498 = sst [smem:[#allocation57_spill]] %s24448_s9 }
   0xb   :  { %24499 = sst [smem:[#allocation58_spill]] %s24449_s10 }
   0xc   :  { %24500 = sst [smem:[#allocation59_spill]] %s24454_s15 }
   0xd   :  { %24501 = sst [smem:[#allocation60_spill]] %s24455_s16 }
   0xe   :  { %24502 = sst [smem:[#allocation61_spill]] %s24456_s17 }
   0xf   :  { %22 = vsyncpa [#allocation4], 0 }
  0x10   :  { %24 = vsyncpa [#allocation4 + $0x1], 0 }
  0x11   :  { %25 = vsyncpa [#allocation6], 0 }
  0x12   :  { %27 = vsyncpa [#allocation6 + $0x1], 0 }
  0x13   :  { %28 = vsyncpa [#allocation9], 0 }
  0x14   :  { %30 = vsyncpa [#allocation9 + $0x1], 0 }
  0x15   :  { %31 = vsyncpa [#allocation12], 0 }
  0x16   :  { %33 = vsyncpa [#allocation12 + $0x1], 0 }
  0x17   :  { %34 = vsyncpa [#allocation15], 0 }
  0x18   :  { %36 = vsyncpa [#allocation15 + $0x1], 0 }
  0x19   :  { %37 = vsyncpa [#allocation18], 0 }
  0x1a   :  { %39 = vsyncpa [#allocation18 + $0x1], 0 }
  0x1b   :  { %40 = vsyncpa [#allocation21], 0 }
  0x1c   :  { %42 = vsyncpa [#allocation21 + $0x1], 0  ;;  %s21062_s24 = smov 0   ;;  %s21064_s25 = smov 0  }
  0x1d   :  { %s21066_s26 = smov 0   ;;  %s21068_s27 = smov 0  }
  0x1e   :  { %s21070_s28 = smov 0   ;;  %s21072_s29 = smov 0  }
  0x1f   :  { %s21074_s0 = smov 0   ;;  %s21076_s30 = smov 0  }
  0x20 LB: > { %24503 = sst [smem:[#allocation31_spill]] %s20927_s26  ;;  %s24458_s18 = sadd.s32 4294967295, %s20947_s30   ;;  %s20947_s30 = sphi %s21076_s30, %s48_s30   ;;  %s20943_s0 = sphi %s21074_s0, %s24589_s0   ;;  %s20939_s29 = sphi %s21072_s29, %s24593_s29   ;;  %s20935_s28 = sphi %s21070_s28, %s24587_s28   ;;  %s20931_s27 = sphi %s21068_s27, %s24592_s27   ;;  %s20927_s26 = sphi %s21066_s26, %s24586_s26   ;;  %s20923_s25 = sphi %s21064_s25, %s24591_s25   ;;  %s20919_s24 = sphi %s21062_s24, %s24590_s24  }
  0x21   : > { %24504 = sst [smem:[#allocation32_spill]] %s20931_s27  ;;  %p142_p0 = scmp.ne.s32.totalorder %s20927_s26, %s20923_s25 }
  0x22   : > { %24505 = sst [smem:[#allocation33_spill]] %s20935_s28  ;;  %p143_p1 = scmp.eq.s32.totalorder %s20947_s30, 0 }
  0x23   : > { %24506 = sst [smem:[#allocation34_spill]] %s20943_s0  ;;  %p148_p2 = scmp.ne.s32.totalorder %s20923_s25, %s20919_s24 }
  0x24   : > { %24507 = sst [smem:[#allocation35_spill]] %s20947_s30  ;;  %p21108_p3 = scmp.eq.s32.totalorder %s24458_s18, 0 }
  0x25   : > { %p144_p4 = por %p143_p1, %p142_p0  ;;  %p16139_p5 = scmp.ge.s32.totalorder %s20947_s30, 1 }
  0x26   : > { %s24508_s1 = scalar_select %p21108_p3, 1, 0 }
  0x27   : > { %p21115_p6 = por %p21108_p3, %p148_p2  ;;  %p513_p7 = scmp.lt.s32.totalorder %s20947_s30, 5 }
  0x28   : > { %24509 = sst [smem:[#allocation36_spill]] %s24508_s1  ;;  %s20949_s22 = smov [#allocation22]  }
  0x29   : > { %s24510_s20 = scalar_select %p21115_p6, 1, 0 }
  0x2a   : > { %p21120_p8 = pnand %p16139_p5, %p513_p7  ;;  %s531_s23 = sshll.u32 %s20949_s22, 4  ;;  %s532_s23 = int_to_ptr.vmem [resolvable:$true] %s531_s23 }
  0x2b   : > { %24511 = sst [smem:[#allocation37_spill]] %s24510_s20  ;;  %p18441_p10 = scmp.lt.s32.totalorder %s20947_s30, 4 }
  0x2c   : > { %s24512_s21 = scalar_select %p21120_p8, 1, 0 }
  0x2d   : > { %p18399_p9 = pneg %p21120_p8  ;;  %p21133_p12 = pnand %p18441_p10, %p144_p4 }
  0x2e   : > { %s24515_s15 = sld [smem:[#allocation59_spill]] }
  0x2f   : > { %p21129_p11 = pnand %p18399_p9, %p21108_p3 }
  0x30   : > { %s24514_s18 = scalar_select %p21133_p12, 1, 0 }
  0x31   : > { %p20467_p0 = pneg %p21129_p11 }
  0x34   : > { %s20465_s2 = scalar_lea.hbm %s24515_s15, 24576 }
  0x35   : > { %p20466_p13 = scmp.ne.s32.totalorder %s24515_s15, %s20465_s2  ;;  %p20472_p5 = scmp.lt.u32.totalorder %s20465_s2, %s24515_s15 }
  0x37   : > { %p20468_p1 = pnand %p20467_p0, %p20466_p13 }
  0x39   : > { %p20469_p2 = pneg %p20468_p1 }
  0x3b   : > { %p20474_p4 = pnand %p20472_p5, %p20469_p2 }
  0x3d   : > { %20477 = shalt.err (!%p20474_p4)
}
  0x3e   : > { %s20478_s1 = scalar_lea.vmem %s532_s23, 24576  ;;  %p20486_p3 = scmp.lt.s32.totalorder %s532_s23, %s532_s23 }
  0x3f   : > { %p20479_p7 = scmp.ne.s32.totalorder %s532_s23, %s20478_s1  ;;  %p20487_p6 = scmp.lt.s32.totalorder %s20478_s1, %s20478_s1 }
  0x41   : > { %p20481_p9 = pnand %p20479_p7, %p20467_p0  ;;  %p20488_p8 = por %p20487_p6, %p20486_p3 }
  0x43   : > { %p20482_p10 = pneg %p20481_p9 }
  0x45   : > { %p20489_p12 = pnand %p20488_p8, %p20482_p10 }
  0x47   : > { %20492 = shalt.err (!%p20489_p12)
}
  0x48   : > { %s20950_s16 = smov 384   ;;  %s20951_s2 = smov 24  }
  0x49   : > { %18402 = dma.hbm_to_vmem [thread:$0]  (!%p21129_p11), %s24515_s15, 24576, %s532_s23, [#allocation21], %s20950_s16, %s20950_s16, %s20951_s2  }
  0x4a   : > { %s57_s28 = sadd.s32 1, %s20939_s29  ;;  %s60_s19 = sadd.s32 1, %s20943_s0 }
  0x4b   : > { %p58_p3 = scmp.ge.s32.totalorder %s57_s28, 2  ;;  %s21156_s1 = sand.u32 1, %s20927_s26  }
  0x4c   : > { %s21159_s22 = sand.u32 1, %s20947_s30   ;;  %s18365_s20 = smul.u32 12, %s21156_s1 }
  0x4d   : > { %s24595_s28 = smov (%p58_p3, %s57_s28), 0  ;;  %s24597_s19 = smov (!%p58_p3, %s60_s19), %s20943_s0 }
  0x4e   : > { %24516 = sst [smem:[#allocation38_spill]] %s24595_s28  ;;  %s132_s24 = ssub.s32 %s20939_s29, %s24595_s28 }
  0x4f   : > { %p62_p6 = scmp.ge.s32.totalorder %s24597_s19, 2  ;;  %p133_p8 = scmp.eq.s32.totalorder %s132_s24, 0 }
  0x50   : > { %s18366_s17 = smul.u32 192, %s20939_s29  ;;  %s24518_s23 = sadd.s32 1, %s20927_s26 }
  0x51   : > { %s24599_s19 = smov (%p62_p6, %s24597_s19), 0  ;;  %s24520_s4 = sld [smem:[#allocation52_spill]] }
  0x52   : > { %24517 = sst [smem:[#allocation39_spill]] %s24599_s19  ;;  %s581_s30 = scalar_lea.vmem [#allocation5], %s18365_s20 }
  0x53   : > { %s21173_s16 = scalar_select %p133_p8, %s20927_s26, %s24518_s23  }
  0x54   : > { %s589_s0 = sshll.u32 %s581_s30, 4  ;;  %p24521_p12 = scmp.ne.s32.totalorder %s24514_s18, 0  ;;  %s21180_s0 = int_to_ptr.vmem [resolvable:$true] %s589_s0 }
  0x55   : > { %24519 = sst [smem:[#allocation40_spill]] %s21173_s16 }
  0x56   : > { %p21187_p13 = pneg %p24521_p12 }
  0x57   : > { %s21178_s15 = scalar_lea.hbm %s24520_s4, %s18366_s17  ;;  %s20498_s27 = scalar_lea.hbm %s24520_s4, 384 }
  0x58   : > { %s20493_s28 = scalar_lea.hbm %s21178_s15, 192  ;;  %p20499_p2 = scmp.lt.u32.totalorder %s21178_s15, %s24520_s4 }
  0x59   : > { %p20494_p11 = scmp.ne.s32.totalorder %s21178_s15, %s20493_s28  ;;  %p20500_p5 = scmp.lt.u32.totalorder %s20498_s27, %s20493_s28 }
  0x5a   : > { %p20502_p7 = scmp.lt.u32.totalorder %s20493_s28, %s21178_s15 }
  0x5b   : > { %p20496_p0 = pnand %p21187_p13, %p20494_p11  ;;  %p20501_p4 = por %p20500_p5, %p20499_p2 }
  0x5d   : > { %p20497_p1 = pneg %p20496_p0  ;;  %p20503_p9 = por %p20502_p7, %p20501_p4 }
  0x5f   : > { %p20504_p10 = pnand %p20503_p9, %p20497_p1 }
  0x61   : > { %20507 = shalt.err (!%p20504_p10)
}
  0x62   : > { %s20508_s24 = scalar_lea.vmem %s21180_s0, 192  ;;  %s20952_s17 = smov [#allocation5]  }
  0x63   : > { %p20509_p3 = scmp.ne.s32.totalorder %s21180_s0, %s20508_s24  ;;  %s20513_s2 = sshll.u32 %s20952_s17, 4  ;;  %s20514_s2 = int_to_ptr.vmem [resolvable:$false] %s20513_s2 }
  0x64   : > { %s20515_s20 = scalar_lea.vmem %s20514_s2, 384  ;;  %p20516_p11 = scmp.lt.s32.totalorder %s21180_s0, %s20514_s2 }
  0x65   : > { %p20511_p6 = pnand %p20509_p3, %p21187_p13  ;;  %p20517_p0 = scmp.lt.s32.totalorder %s20515_s20, %s20508_s24 }
  0x67   : > { %p20512_p8 = pneg %p20511_p6  ;;  %p20518_p2 = por %p20517_p0, %p20516_p11 }
  0x69   : > { %p20519_p5 = pnand %p20518_p2, %p20512_p8 }
  0x6b   : > { %20522 = shalt.err (!%p20519_p5)
}
  0x6c   : > { %s24523_s28 = scalar_lea.sflag [#allocation6], %s21159_s22  ;;  %s21213_s27 = sshll.u32 %s21156_s1, 2 }
  0x6d   : > { %18409 = dma.hbm_to_vmem [thread:$0]  (!%p24521_p12), %s21178_s15, 192, %s21180_s0, %s24523_s28  }
  0x6e   : > { %s21216_s30 = sshll.u32 %s20939_s29, 6  ;;  %s24524_s6 = sld [smem:[#allocation54_spill]] }
  0x6f   : > { %s621_s20 = scalar_lea.vmem [#allocation8], %s21213_s27 }
  0x70   : > { %s629_s4 = sshll.u32 %s621_s20, 4  ;;  %s630_s4 = int_to_ptr.vmem [resolvable:$true] %s629_s4 }
  0x74   : > { %s21222_s2 = scalar_lea.hbm %s24524_s6, %s21216_s30  ;;  %s20528_s16 = scalar_lea.hbm %s24524_s6, 128 }
  0x75   : > { %s20523_s15 = scalar_lea.hbm %s21222_s2, 64  ;;  %p20529_p9 = scmp.lt.u32.totalorder %s21222_s2, %s24524_s6 }
  0x76   : > { %p20524_p1 = scmp.ne.s32.totalorder %s21222_s2, %s20523_s15  ;;  %p20530_p10 = scmp.lt.u32.totalorder %s20528_s16, %s20523_s15 }
  0x77   : > { %p20532_p6 = scmp.lt.u32.totalorder %s20523_s15, %s21222_s2 }
  0x78   : > { %p20526_p4 = pnand %p20524_p1, %p21187_p13  ;;  %p20531_p3 = por %p20530_p10, %p20529_p9 }
  0x7a   : > { %p20527_p7 = pneg %p20526_p4  ;;  %p20533_p8 = por %p20532_p6, %p20531_p3 }
  0x7c   : > { %p20534_p11 = pnand %p20533_p8, %p20527_p7 }
  0x7e   : > { %20537 = shalt.err (!%p20534_p11)
}
  0x7f   : > { %s20538_s20 = scalar_lea.vmem %s630_s4, 64  ;;  %s20953_s19 = smov [#allocation8]  }
  0x80   : > { %p20539_p0 = scmp.ne.s32.totalorder %s630_s4, %s20538_s20  ;;  %s20543_s26 = sshll.u32 %s20953_s19, 4  ;;  %s20544_s26 = int_to_ptr.vmem [resolvable:$false] %s20543_s26 }
  0x81   : > { %s20545_s0 = scalar_lea.vmem %s20544_s26, 128  ;;  %p20546_p1 = scmp.lt.s32.totalorder %s630_s4, %s20544_s26 }
  0x82   : > { %p20541_p2 = pnand %p20539_p0, %p21187_p13  ;;  %p20547_p4 = scmp.lt.s32.totalorder %s20545_s0, %s20538_s20 }
  0x84   : > { %p20542_p5 = pneg %p20541_p2  ;;  %p20548_p12 = por %p20547_p4, %p20546_p1 }
  0x86   : > { %p20549_p9 = pnand %p20548_p12, %p20542_p5 }
  0x88   : > { %20552 = shalt.err (!%p20549_p9)
}
  0x89   : > { %p24525_p10 = scmp.ne.s32.totalorder %s24514_s18, 0  ;;  %s24526_s16 = scalar_lea.sflag [#allocation9], %s21159_s22 }
  0x8a   : > { %s24527_s8 = sld [smem:[#allocation56_spill]]  ;;  %s659_s26 = scalar_lea.vmem [#allocation11], %s21213_s27 }
  0x8b   : > { %18415 = dma.hbm_to_vmem [thread:$0]  (!%p24525_p10), %s21222_s2, 64, %s630_s4, %s24526_s16  }
  0x8c   : > { %s667_s24 = sshll.u32 %s659_s26, 4  ;;  %s668_s24 = int_to_ptr.vmem [resolvable:$true] %s667_s24 }
  0x90   : > { %s21249_s19 = scalar_lea.hbm %s24527_s8, %s21216_s30  ;;  %s20558_s2 = scalar_lea.hbm %s24527_s8, 128 }
  0x91   : > { %s20553_s20 = scalar_lea.hbm %s21249_s19, 64  ;;  %p20559_p6 = scmp.lt.u32.totalorder %s21249_s19, %s24527_s8 }
  0x92   : > { %p20554_p12 = scmp.ne.s32.totalorder %s21249_s19, %s20553_s20  ;;  %p20560_p8 = scmp.lt.u32.totalorder %s20558_s2, %s20553_s20 }
  0x93   : > { %p20562_p0 = scmp.lt.u32.totalorder %s20553_s20, %s21249_s19 }
  0x94   : > { %p20556_p7 = pnand %p20554_p12, %p21187_p13  ;;  %p20561_p11 = por %p20560_p8, %p20559_p6 }
  0x96   : > { %p20557_p3 = pneg %p20556_p7  ;;  %p20563_p2 = por %p20562_p0, %p20561_p11 }
  0x98   : > { %p20564_p5 = pnand %p20563_p2, %p20557_p3 }
  0x9a   : > { %20567 = shalt.err (!%p20564_p5)
}
  0x9b   : > { %s20568_s28 = scalar_lea.vmem %s668_s24, 64  ;;  %s20954_s26 = smov [#allocation11]  }
  0x9c   : > { %p20569_p1 = scmp.ne.s32.totalorder %s668_s24, %s20568_s28  ;;  %s20573_s17 = sshll.u32 %s20954_s26, 4  ;;  %s20574_s17 = int_to_ptr.vmem [resolvable:$false] %s20573_s17 }
  0x9d   : > { %s20575_s0 = scalar_lea.vmem %s20574_s17, 128  ;;  %p20576_p12 = scmp.lt.s32.totalorder %s668_s24, %s20574_s17 }
  0x9e   : > { %p20571_p4 = pnand %p20569_p1, %p21187_p13  ;;  %p20577_p7 = scmp.lt.s32.totalorder %s20575_s0, %s20568_s28 }
  0xa0   : > { %p20572_p9 = pneg %p20571_p4  ;;  %p20578_p10 = por %p20577_p7, %p20576_p12 }
  0xa2   : > { %p20579_p6 = pnand %p20578_p10, %p20572_p9 }
  0xa4   : > { %20582 = shalt.err (!%p20579_p6)
}
  0xa5   : > { %p24528_p8 = scmp.ne.s32.totalorder %s24514_s18, 0  ;;  %s24529_s20 = scalar_lea.sflag [#allocation12], %s21159_s22 }
  0xa6   : > { %s16159_s4 = sshll.u32 %s21156_s1, 4  ;;  %s17966_s2 = sshll.u32 %s20939_s29, 8 }
  0xa7   : > { %18421 = dma.hbm_to_vmem [thread:$0]  (!%p24528_p8), %s21249_s19, 64, %s668_s24, %s24529_s20  }
  0xa8   : > { %s24530_s10 = sld [smem:[#allocation58_spill]]  ;;  %s699_s28 = scalar_lea.vmem [#allocation14], %s16159_s4 }
  0xa9   : > { %s707_s26 = sshll.u32 %s699_s28, 4  ;;  %s24475_s0 = scalar_lea.sflag [#allocation15], %s21159_s22  ;;  %s708_s26 = int_to_ptr.vmem [resolvable:$true] %s707_s26 }
  0xae   : > { %s21277_s17 = scalar_lea.hbm %s24530_s10, %s17966_s2  ;;  %s20588_s20 = scalar_lea.hbm %s24530_s10, 512 }
  0xaf   : > { %s20583_s6 = scalar_lea.hbm %s21277_s17, 256  ;;  %p20589_p0 = scmp.lt.u32.totalorder %s21277_s17, %s24530_s10 }
  0xb0   : > { %p20584_p10 = scmp.ne.s32.totalorder %s21277_s17, %s20583_s6  ;;  %p20590_p2 = scmp.lt.u32.totalorder %s20588_s20, %s20583_s6 }
  0xb1   : > { %p20592_p1 = scmp.lt.u32.totalorder %s20583_s6, %s21277_s17 }
  0xb2   : > { %p20586_p3 = pnand %p20584_p10, %p21187_p13  ;;  %p20591_p5 = por %p20590_p2, %p20589_p0 }
  0xb4   : > { %p20587_p11 = pneg %p20586_p3  ;;  %p20593_p4 = por %p20592_p1, %p20591_p5 }
  0xb6   : > { %p20594_p9 = pnand %p20593_p4, %p20587_p11 }
  0xb8   : > { %20597 = shalt.err (!%p20594_p9)
}
  0xb9   : > { %s20598_s4 = scalar_lea.vmem %s708_s26, 256  ;;  %s20955_s15 = smov [#allocation14]  }
  0xba   : > { %p20599_p12 = scmp.ne.s32.totalorder %s708_s26, %s20598_s4  ;;  %s20603_s28 = sshll.u32 %s20955_s15, 4  ;;  %s20604_s28 = int_to_ptr.vmem [resolvable:$false] %s20603_s28 }
  0xbb   : > { %s20605_s19 = scalar_lea.vmem %s20604_s28, 512  ;;  %p20606_p10 = scmp.lt.s32.totalorder %s708_s26, %s20604_s28 }
  0xbc   : > { %p20601_p7 = pnand %p20599_p12, %p21187_p13  ;;  %p20607_p3 = scmp.lt.s32.totalorder %s20605_s19, %s20598_s4 }
  0xbe   : > { %p20602_p6 = pneg %p20601_p7  ;;  %p20608_p8 = por %p20607_p3, %p20606_p10 }
  0xc0   : > { %p20609_p0 = pnand %p20608_p8, %p20602_p6 }
  0xc2   : > { %20612 = shalt.err (!%p20609_p0)
}
  0xc3   : > { %p24531_p2 = scmp.ne.s32.totalorder %s24514_s18, 0  ;;  %s21303_s20 = scalar_lea.hbm %s24451_s12, %s21216_s30 }
  0xc4   : > { %s739_s16 = scalar_lea.vmem [#allocation17], %s21213_s27  ;;  %s24476_s4 = scalar_lea.sflag [#allocation18], %s21159_s22 }
  0xc5   : > { %18427 = dma.hbm_to_vmem [thread:$0]  (!%p24531_p2), %s21277_s17, 256, %s708_s26, %s24475_s0  }
  0xc6   : > { %s747_s2 = sshll.u32 %s739_s16, 4  ;;  %s20613_s15 = scalar_lea.hbm %s21303_s20, 64  ;;  %s748_s2 = int_to_ptr.vmem [resolvable:$true] %s747_s2 }
  0xc7   : > { %p20614_p8 = scmp.ne.s32.totalorder %s21303_s20, %s20613_s15  ;;  %s20618_s26 = scalar_lea.hbm %s24451_s12, 128 }
  0xc8   : > { %p20619_p1 = scmp.lt.u32.totalorder %s21303_s20, %s24451_s12  ;;  %p20620_p4 = scmp.lt.u32.totalorder %s20618_s26, %s20613_s15 }
  0xc9   : > { %p20616_p11 = pnand %p20614_p8, %p21187_p13  ;;  %p20622_p12 = scmp.lt.u32.totalorder %s20613_s15, %s21303_s20 }
  0xca   : > { %p20621_p9 = por %p20620_p4, %p20619_p1 }
  0xcb   : > { %p20617_p5 = pneg %p20616_p11 }
  0xcc   : > { %p20623_p7 = por %p20622_p12, %p20621_p9 }
  0xce   : > { %p20624_p6 = pnand %p20623_p7, %p20617_p5 }
  0xd0   : > { %20627 = shalt.err (!%p20624_p6)
}
  0xd1   : > { %s20628_s24 = scalar_lea.vmem %s748_s2, 64  ;;  %s20956_s16 = smov [#allocation17]  }
  0xd2   : > { %p20629_p10 = scmp.ne.s32.totalorder %s748_s2, %s20628_s24  ;;  %s20633_s0 = sshll.u32 %s20956_s16, 4  ;;  %s20634_s0 = int_to_ptr.vmem [resolvable:$false] %s20633_s0 }
  0xd3   : > { %s20635_s28 = scalar_lea.vmem %s20634_s0, 128  ;;  %p20636_p8 = scmp.lt.s32.totalorder %s748_s2, %s20634_s0 }
  0xd4   : > { %p20631_p3 = pnand %p20629_p10, %p21187_p13  ;;  %p20637_p11 = scmp.lt.s32.totalorder %s20635_s28, %s20628_s24 }
  0xd6   : > { %p20632_p0 = pneg %p20631_p3  ;;  %p20638_p2 = por %p20637_p11, %p20636_p8 }
  0xd8   : > { %p20639_p1 = pnand %p20638_p2, %p20632_p0 }
  0xda   : > { %20642 = shalt.err (!%p20639_p1)
}
  0xdb   : > { %p24532_p4 = scmp.ne.s32.totalorder %s24514_s18, 0  ;;  %s18363_s15 = smul.u32 3072, %s21156_s1 }
  0xdc   : > { %s18364_s17 = smul.u32 49152, %s20939_s29  ;;  %s16144_s26 = sshll.u32 %s21156_s1, 10 }
  0xdd   : > { %18433 = dma.hbm_to_vmem [thread:$0]  (!%p24532_p4), %s21303_s20, 64, %s748_s2, %s24476_s4  }
  0xde   : > { %s24533_s3 = sld [smem:[#allocation51_spill]]  ;;  %s560_s24 = scalar_lea.vmem [#allocation3], %s18363_s15 }
  0xdf   : > { %s567_s16 = sshll.u32 %s560_s24, 4  ;;  %s557_s28 = scalar_lea.sflag [#allocation4], %s21156_s1  ;;  %s21334_s16 = int_to_ptr.vmem [resolvable:$true] %s567_s16 }
  0xe4   : > { %s21332_s6 = scalar_lea.hbm %s24533_s3, %s18364_s17  ;;  %s20648_s19 = scalar_lea.hbm %s24533_s3, 98304 }
  0xe5   : > { %s20643_s8 = scalar_lea.hbm %s21332_s6, 49152  ;;  %p20649_p12 = scmp.lt.u32.totalorder %s21332_s6, %s24533_s3 }
  0xe6   : > { %p20644_p2 = scmp.ne.s32.totalorder %s21332_s6, %s20643_s8  ;;  %p20650_p7 = scmp.lt.u32.totalorder %s20648_s19, %s20643_s8 }
  0xe7   : > { %p20652_p10 = scmp.lt.u32.totalorder %s20643_s8, %s21332_s6 }
  0xe8   : > { %p20646_p5 = pnand %p20644_p2, %p21187_p13  ;;  %p20651_p6 = por %p20650_p7, %p20649_p12 }
  0xea   : > { %p20647_p9 = pneg %p20646_p5  ;;  %p20653_p3 = por %p20652_p10, %p20651_p6 }
  0xec   : > { %p20654_p0 = pnand %p20653_p3, %p20647_p9 }
  0xee   : > { %20657 = shalt.err (!%p20654_p0)
}
  0xef   : > { %s20658_s15 = scalar_lea.vmem %s21334_s16, 49152  ;;  %s20957_s24 = smov [#allocation3]  }
  0xf0   : > { %p20659_p8 = scmp.ne.s32.totalorder %s21334_s16, %s20658_s15  ;;  %s20663_s20 = sshll.u32 %s20957_s24, 4  ;;  %s20664_s20 = int_to_ptr.vmem [resolvable:$false] %s20663_s20 }
  0xf1   : > { %s20665_s2 = scalar_lea.vmem %s20664_s20, 98304  ;;  %p20666_p2 = scmp.lt.s32.totalorder %s21334_s16, %s20664_s20 }
  0xf2   : > { %p20661_p11 = pnand %p20659_p8, %p21187_p13  ;;  %p20667_p5 = scmp.lt.s32.totalorder %s20665_s2, %s20658_s15 }
  0xf4   : > { %p20662_p1 = pneg %p20661_p11  ;;  %p20668_p12 = por %p20667_p5, %p20666_p2 }
  0xf6   : > { %p20669_p7 = pnand %p20668_p12, %p20662_p1 }
  0xf8   : > { %20672 = shalt.err (!%p20669_p7)
}
  0xf9   : > { %s20958_s8 = smov 768   ;;  %s20959_s19 = smov 48  }
  0xfa   : > { %18406 = dma.hbm_to_vmem [thread:$0]  (!%p24532_p4), %s21332_s6, 49152, %s21334_s16, %s557_s28, %s20958_s8, %s20958_s8, %s20959_s19  }
  0xfb   : > { %s17961_s17 = sshll.u32 %s20939_s29, 14  ;;  %s600_s0 = scalar_lea.vmem [#allocation7], %s16144_s26 }
  0xfc   : > { %s607_s24 = sshll.u32 %s600_s0, 4  ;;  %s24534_s5 = sld [smem:[#allocation53_spill]]  ;;  %s21368_s24 = int_to_ptr.vmem [resolvable:$true] %s607_s24 }
 0x102   : > { %s21366_s2 = scalar_lea.hbm %s24534_s5, %s17961_s17  ;;  %s20678_s26 = scalar_lea.hbm %s24534_s5, 32768 }
 0x103   : > { %s20673_s4 = scalar_lea.hbm %s21366_s2, 16384  ;;  %p20679_p3 = scmp.lt.u32.totalorder %s21366_s2, %s24534_s5 }
 0x104   : > { %p20674_p9 = scmp.ne.s32.totalorder %s21366_s2, %s20673_s4  ;;  %p20680_p0 = scmp.lt.u32.totalorder %s20678_s26, %s20673_s4 }
 0x105   : > { %p20682_p11 = scmp.lt.u32.totalorder %s20673_s4, %s21366_s2 }
 0x106   : > { %p20676_p6 = pnand %p20674_p9, %p21187_p13  ;;  %p20681_p8 = por %p20680_p0, %p20679_p3 }
 0x108   : > { %p20677_p10 = pneg %p20676_p6  ;;  %p20683_p1 = por %p20682_p11, %p20681_p8 }
 0x10a   : > { %p20684_p2 = pnand %p20683_p1, %p20677_p10 }
 0x10c   : > { %20687 = shalt.err (!%p20684_p2)
}
 0x10d   : > { %s20688_s19 = scalar_lea.vmem %s21368_s24, 16384  ;;  %s20960_s17 = smov [#allocation7]  }
 0x10e   : > { %p20689_p5 = scmp.ne.s32.totalorder %s21368_s24, %s20688_s19  ;;  %s20693_s0 = sshll.u32 %s20960_s17, 4  ;;  %s20694_s0 = int_to_ptr.vmem [resolvable:$false] %s20693_s0 }
 0x10f   : > { %s20695_s15 = scalar_lea.vmem %s20694_s0, 32768  ;;  %p20696_p9 = scmp.lt.s32.totalorder %s21368_s24, %s20694_s0 }
 0x110   : > { %p20691_p12 = pnand %p20689_p5, %p21187_p13  ;;  %p20697_p6 = scmp.lt.s32.totalorder %s20695_s15, %s20688_s19 }
 0x112   : > { %p20692_p7 = pneg %p20691_p12  ;;  %p20698_p3 = por %p20697_p6, %p20696_p9 }
 0x114   : > { %p20699_p0 = pnand %p20698_p3, %p20692_p7 }
 0x116   : > { %20702 = shalt.err (!%p20699_p0)
}
 0x117   : > { %s24477_s4 = smov 256   ;;  %s24479_s20 = smov 16  }
 0x118   : > { %s24535_s6 = scalar_lea.sflag [#allocation6], %s21159_s22  ;;  %s24536_s7 = sld [smem:[#allocation55_spill]] }
 0x119   : > { %18412 = dma.hbm_to_vmem [thread:$0]  (!%p24532_p4), %s21366_s2, 16384, %s21368_s24, %s24535_s6, %s24477_s4, %s24477_s4, %s24479_s20  }
 0x11a   : > { %s640_s8 = scalar_lea.vmem [#allocation10], %s21213_s27  ;;  %s16156_s17 = sshll.u32 %s21156_s1, 12 }
 0x11b   : > { %s648_s19 = sshll.u32 %s640_s8, 4  ;;  %s649_s19 = int_to_ptr.vmem [resolvable:$true] %s648_s19 }
 0x11e   : > { %s21400_s28 = scalar_lea.hbm %s24536_s7, %s21216_s30  ;;  %s20708_s2 = scalar_lea.hbm %s24536_s7, 128 }
 0x11f   : > { %s20703_s0 = scalar_lea.hbm %s21400_s28, 64  ;;  %p20709_p1 = scmp.lt.u32.totalorder %s21400_s28, %s24536_s7 }
 0x120   : > { %p20704_p10 = scmp.ne.s32.totalorder %s21400_s28, %s20703_s0  ;;  %p20710_p2 = scmp.lt.u32.totalorder %s20708_s2, %s20703_s0 }
 0x121   : > { %p20712_p12 = scmp.lt.u32.totalorder %s20703_s0, %s21400_s28 }
 0x122   : > { %p20706_p8 = pnand %p20704_p10, %p21187_p13  ;;  %p20711_p5 = por %p20710_p2, %p20709_p1 }
 0x124   : > { %p20707_p11 = pneg %p20706_p8  ;;  %p20713_p7 = por %p20712_p12, %p20711_p5 }
 0x126   : > { %p20714_p9 = pnand %p20713_p7, %p20707_p11 }
 0x128   : > { %20717 = shalt.err (!%p20714_p9)
}
 0x129   : > { %s20718_s26 = scalar_lea.vmem %s649_s19, 64  ;;  %s20963_s8 = smov [#allocation10]  }
 0x12a   : > { %p20719_p6 = scmp.ne.s32.totalorder %s649_s19, %s20718_s26  ;;  %s20723_s4 = sshll.u32 %s20963_s8, 4  ;;  %s20724_s4 = int_to_ptr.vmem [resolvable:$false] %s20723_s4 }
 0x12b   : > { %s20725_s15 = scalar_lea.vmem %s20724_s4, 128  ;;  %p20726_p10 = scmp.lt.s32.totalorder %s649_s19, %s20724_s4 }
 0x12c   : > { %p20721_p3 = pnand %p20719_p6, %p21187_p13  ;;  %p20727_p8 = scmp.lt.s32.totalorder %s20725_s15, %s20718_s26 }
 0x12e   : > { %p20722_p0 = pneg %p20721_p3  ;;  %p20728_p4 = por %p20727_p8, %p20726_p10 }
 0x130   : > { %p20729_p1 = pnand %p20728_p4, %p20722_p0 }
 0x132   : > { %20732 = shalt.err (!%p20729_p1)
}
 0x133   : > { %p24537_p2 = scmp.ne.s32.totalorder %s24514_s18, 0  ;;  %s24538_s0 = scalar_lea.sflag [#allocation9], %s21159_s22 }
 0x134   : > { %s17965_s24 = sshll.u32 %s20939_s29, 16  ;;  %s678_s2 = scalar_lea.vmem [#allocation13], %s16156_s17 }
 0x135   : > { %18418 = dma.hbm_to_vmem [thread:$0]  (!%p24537_p2), %s21400_s28, 64, %s649_s19, %s24538_s0  }
 0x136   : > { %s685_s6 = sshll.u32 %s678_s2, 4  ;;  %s24539_s9 = sld [smem:[#allocation57_spill]]  ;;  %s21433_s6 = int_to_ptr.vmem [resolvable:$true] %s685_s6 }
 0x13c   : > { %s21431_s26 = scalar_lea.hbm %s24539_s9, %s17965_s24  ;;  %s20738_s15 = scalar_lea.hbm %s24539_s9, 131072 }
 0x13d   : > { %s20733_s8 = scalar_lea.hbm %s21431_s26, 65536  ;;  %p20739_p12 = scmp.lt.u32.totalorder %s21431_s26, %s24539_s9 }
 0x13e   : > { %p20734_p4 = scmp.ne.s32.totalorder %s21431_s26, %s20733_s8  ;;  %p20740_p7 = scmp.lt.u32.totalorder %s20738_s15, %s20733_s8 }
 0x13f   : > { %p20742_p6 = scmp.lt.u32.totalorder %s20733_s8, %s21431_s26 }
 0x140   : > { %p20736_p11 = pnand %p20734_p4, %p21187_p13  ;;  %p20741_p9 = por %p20740_p7, %p20739_p12 }
 0x142   : > { %p20737_p5 = pneg %p20736_p11  ;;  %p20743_p3 = por %p20742_p6, %p20741_p9 }
 0x144   : > { %p20744_p0 = pnand %p20743_p3, %p20737_p5 }
 0x146   : > { %20747 = shalt.err (!%p20744_p0)
}
 0x147   : > { %s20748_s4 = scalar_lea.vmem %s21433_s6, 65536  ;;  %s20964_s16 = smov [#allocation13]  }
 0x148   : > { %p20749_p10 = scmp.ne.s32.totalorder %s21433_s6, %s20748_s4  ;;  %s20753_s28 = sshll.u32 %s20964_s16, 4  ;;  %s20754_s28 = int_to_ptr.vmem [resolvable:$false] %s20753_s28 }
 0x149   : > { %s20755_s19 = scalar_lea.vmem %s20754_s28, 131072  ;;  %p20756_p4 = scmp.lt.s32.totalorder %s21433_s6, %s20754_s28 }
 0x14a   : > { %p20751_p8 = pnand %p20749_p10, %p21187_p13  ;;  %p20757_p11 = scmp.lt.s32.totalorder %s20755_s19, %s20748_s4 }
 0x14c   : > { %p20752_p1 = pneg %p20751_p8  ;;  %p20758_p12 = por %p20757_p11, %p20756_p4 }
 0x14e   : > { %p20759_p7 = pnand %p20758_p12, %p20752_p1 }
 0x150   : > { %20762 = shalt.err (!%p20759_p7)
}
 0x151   : > { %s20965_s8 = smov 1024   ;;  %s20966_s15 = smov 64  }
 0x152   : > { %s24540_s0 = scalar_lea.sflag [#allocation12], %s21159_s22  ;;  %s21463_s4 = scalar_lea.hbm %s24450_s11, %s17965_s24 }
 0x153   : > { %18424 = dma.hbm_to_vmem [thread:$0]  (!%p24537_p2), %s21431_s26, 65536, %s21433_s6, %s24540_s0, %s20965_s8, %s20965_s8, %s20966_s15  }
 0x154   : > { %s718_s28 = scalar_lea.vmem [#allocation16], %s16156_s17  ;;  %s21473_s5 = scalar_lea.hbm %s24452_s13, %s21216_s30 }
 0x155   : > { %s725_s19 = sshll.u32 %s718_s28, 4  ;;  %s20763_s6 = scalar_lea.hbm %s21463_s4, 65536  ;;  %s21467_s19 = int_to_ptr.vmem [resolvable:$true] %s725_s19 }
 0x156   : > { %p20764_p5 = scmp.ne.s32.totalorder %s21463_s4, %s20763_s6  ;;  %s20768_s26 = scalar_lea.hbm %s24450_s11, 131072 }
 0x157   : > { %p20769_p3 = scmp.lt.u32.totalorder %s21463_s4, %s24450_s11  ;;  %p20770_p0 = scmp.lt.u32.totalorder %s20768_s26, %s20763_s6 }
 0x158   : > { %p20766_p9 = pnand %p20764_p5, %p21187_p13  ;;  %p20772_p8 = scmp.lt.u32.totalorder %s20763_s6, %s21463_s4 }
 0x159   : > { %p20771_p10 = por %p20770_p0, %p20769_p3 }
 0x15a   : > { %p20767_p6 = pneg %p20766_p9 }
 0x15b   : > { %p20773_p1 = por %p20772_p8, %p20771_p10 }
 0x15d   : > { %p20774_p4 = pnand %p20773_p1, %p20767_p6 }
 0x15f   : > { %20777 = shalt.err (!%p20774_p4)
}
 0x160   : > { %s20778_s3 = scalar_lea.vmem %s21467_s19, 65536  ;;  %s20967_s20 = smov [#allocation16]  }
 0x161   : > { %p20779_p11 = scmp.ne.s32.totalorder %s21467_s19, %s20778_s3  ;;  %s20783_s17 = sshll.u32 %s20967_s20, 4  ;;  %s20784_s17 = int_to_ptr.vmem [resolvable:$false] %s20783_s17 }
 0x162   : > { %s20785_s0 = scalar_lea.vmem %s20784_s17, 131072  ;;  %p20786_p5 = scmp.lt.s32.totalorder %s21467_s19, %s20784_s17 }
 0x163   : > { %p20781_p12 = pnand %p20779_p11, %p21187_p13  ;;  %p20787_p9 = scmp.lt.s32.totalorder %s20785_s0, %s20778_s3 }
 0x165   : > { %p20782_p7 = pneg %p20781_p12  ;;  %p20788_p3 = por %p20787_p9, %p20786_p5 }
 0x167   : > { %p20789_p0 = pnand %p20788_p3, %p20782_p7 }
 0x169   : > { %20792 = shalt.err (!%p20789_p0)
}
 0x16a   : > { %s24541_s2 = smov 16   ;;  %s24542_s16 = smov 256  }
 0x16b   : > { %s24543_s28 = scalar_lea.sflag [#allocation15], %s21159_s22  ;;  %s758_s6 = scalar_lea.vmem [#allocation19], %s21213_s27 }
 0x16c   : > { %18430 = dma.hbm_to_vmem [thread:$0]  (!%p24537_p2), %s21463_s4, 65536, %s21467_s19, %s24543_s28, %s24542_s16, %s24542_s16, %s24541_s2  }
 0x16d   : > { %s766_s24 = sshll.u32 %s758_s6, 4  ;;  %s20793_s1 = scalar_lea.hbm %s21473_s5, 64  ;;  %s767_s24 = int_to_ptr.vmem [resolvable:$true] %s766_s24 }
 0x16e   : > { %p20794_p6 = scmp.ne.s32.totalorder %s21473_s5, %s20793_s1  ;;  %s20798_s15 = scalar_lea.hbm %s24452_s13, 128 }
 0x16f   : > { %p20799_p1 = scmp.lt.u32.totalorder %s21473_s5, %s24452_s13  ;;  %p20800_p4 = scmp.lt.u32.totalorder %s20798_s15, %s20793_s1 }
 0x170   : > { %p20796_p10 = pnand %p20794_p6, %p21187_p13  ;;  %p20802_p12 = scmp.lt.u32.totalorder %s20793_s1, %s21473_s5 }
 0x171   : > { %p20801_p11 = por %p20800_p4, %p20799_p1 }
 0x172   : > { %p20797_p8 = pneg %p20796_p10 }
 0x173   : > { %p20803_p7 = por %p20802_p12, %p20801_p11 }
 0x175   : > { %p20804_p5 = pnand %p20803_p7, %p20797_p8 }
 0x177   : > { %20807 = shalt.err (!%p20804_p5)
}
 0x178   : > { %s20808_s4 = scalar_lea.vmem %s767_s24, 64  ;;  %s20968_s19 = smov [#allocation19]  }
 0x179   : > { %p20809_p9 = scmp.ne.s32.totalorder %s767_s24, %s20808_s4  ;;  %s20813_s17 = sshll.u32 %s20968_s19, 4  ;;  %s20814_s17 = int_to_ptr.vmem [resolvable:$false] %s20813_s17 }
 0x17a   : > { %s20815_s0 = scalar_lea.vmem %s20814_s17, 128  ;;  %p20816_p6 = scmp.lt.s32.totalorder %s767_s24, %s20814_s17 }
 0x17b   : > { %p20811_p3 = pnand %p20809_p9, %p21187_p13  ;;  %p20817_p10 = scmp.lt.s32.totalorder %s20815_s0, %s20808_s4 }
 0x17d   : > { %p20812_p0 = pneg %p20811_p3  ;;  %p20818_p2 = por %p20817_p10, %p20816_p6 }
 0x17f   : > { %p20819_p1 = pnand %p20818_p2, %p20812_p0 }
 0x181   : > { %20822 = shalt.err (!%p20819_p1)
}
 0x182   : > { %p24544_p4 = scmp.ne.s32.totalorder %s24514_s18, 0  ;;  %s24545_s2 = scalar_lea.sflag [#allocation18], %s21159_s22 }
 0x183   : > { %s21525_s6 = scalar_lea.hbm %s24453_s14, %s21216_s30  ;;  %s777_s1 = scalar_lea.vmem [#allocation20], %s21213_s27 }
 0x184   : > { %18436 = dma.hbm_to_vmem [thread:$0]  (!%p24544_p4), %s21473_s5, 64, %s767_s24, %s24545_s2  }
 0x185   : > { %s785_s26 = sshll.u32 %s777_s1, 4  ;;  %s774_s8 = scalar_lea.sflag [#allocation21], %s21159_s22  ;;  %s786_s26 = int_to_ptr.vmem [resolvable:$true] %s785_s26 }
 0x186   : > { %s20823_s15 = scalar_lea.hbm %s21525_s6, 64  ;;  %s20828_s24 = scalar_lea.hbm %s24453_s14, 128 }
 0x187   : > { %p20824_p2 = scmp.ne.s32.totalorder %s21525_s6, %s20823_s15  ;;  %p20829_p12 = scmp.lt.u32.totalorder %s21525_s6, %s24453_s14 }
 0x188   : > { %p20830_p7 = scmp.lt.u32.totalorder %s20828_s24, %s20823_s15  ;;  %p20832_p9 = scmp.lt.u32.totalorder %s20823_s15, %s21525_s6 }
 0x189   : > { %p20826_p8 = pnand %p20824_p2, %p21187_p13 }
 0x18a   : > { %p20831_p5 = por %p20830_p7, %p20829_p12 }
 0x18b   : > { %p20827_p11 = pneg %p20826_p8 }
 0x18c   : > { %p20833_p3 = por %p20832_p9, %p20831_p5 }
 0x18e   : > { %p20834_p0 = pnand %p20833_p3, %p20827_p11 }
 0x190   : > { %20837 = shalt.err (!%p20834_p0)
}
 0x191   : > { %s20838_s22 = scalar_lea.vmem %s786_s26, 64  ;;  %s20969_s27 = smov [#allocation20]  }
 0x192   : > { %p20839_p6 = scmp.ne.s32.totalorder %s786_s26, %s20838_s22  ;;  %s20843_s4 = sshll.u32 %s20969_s27, 4  ;;  %s20844_s4 = int_to_ptr.vmem [resolvable:$false] %s20843_s4 }
 0x193   : > { %s20845_s19 = scalar_lea.vmem %s20844_s4, 128  ;;  %p20846_p2 = scmp.lt.s32.totalorder %s786_s26, %s20844_s4 }
 0x194   : > { %p20841_p10 = pnand %p20839_p6, %p21187_p13  ;;  %p20847_p8 = scmp.lt.s32.totalorder %s20845_s19, %s20838_s22 }
 0x196   : > { %p20842_p1 = pneg %p20841_p10  ;;  %p20848_p4 = por %p20847_p8, %p20846_p2 }
 0x198   : > { %p20849_p7 = pnand %p20848_p4, %p20842_p1 }
 0x19a   : > { %20852 = shalt.err (!%p20849_p7)
}
 0x19b   : > { %p24546_p12 = scmp.ne.s32.totalorder %s24514_s18, 0  ;;  %p24547_p11 = scmp.ne.s32.totalorder %s24512_s21, 0 }
 0x19d   : > { %18439 = dma.hbm_to_vmem [thread:$0]  (!%p24546_p12), %s21525_s6, 64, %s786_s26, %s774_s8  }
 0x19e   : > { %794 = sbr.rel (%p24547_p11) target bundleno = 5578 (0x15ca), region = 88 }
 0x1a5   : > { %s24548_s23 = sld [smem:[#allocation37_spill]]  ;;  %s21549_s17 = sand.u32 1, %s20923_s25  }
 0x1a6   : > { %s18367_s0 = smul.u32 3072, %s21549_s17  ;;  %s797_s2 = scalar_lea.sflag [#allocation4], %s21549_s17 }
 0x1a8   : > { %s21553_s16 = scalar_lea.vmem [#allocation3], %s18367_s0 }
 0x1ab   : > { %p24549_p13 = scmp.ne.s32.totalorder %s24548_s23, 0 }
 0x1ad   : > { %20886 = dma.done.wait (%p24549_p13), %s797_s2, 49152  }
 0x1ae   : > { %20888 = vsyncadd (%p24549_p13), %s797_s2, 4294918144  ;;  %s24550_s18 = sld [smem:[#allocation35_spill]]  ;;  %s18368_s6 = smul.u32 12, %s21549_s17 }
 0x1b0   : > { %s21565_s26 = scalar_lea.vmem [#allocation5], %s18368_s6 }
 0x1b4   : > { %s24551_s28 = sadd.s32 4294967295, %s24550_s18  }
 0x1b5   : > { %s21561_s21 = sand.u32 1, %s24551_s28  }
 0x1b6   : > { %s806_s1 = scalar_lea.sflag [#allocation6], %s21561_s21 }
 0x1b7   : > { %20890 = dma.done.wait (%p24549_p13), %s806_s1, 16576  }
 0x1b8   : > { %20892 = vsyncadd (%p24549_p13), %s806_s1, 4294950720  ;;  %s16175_s8 = sshll.u32 %s21549_s17, 10  ;;  %s21573_s15 = sshll.u32 %s21549_s17, 2 }
 0x1b9   : > { %s21575_s3 = scalar_lea.vmem [#allocation7], %s16175_s8  ;;  %s824_s5 = scalar_lea.sflag [#allocation9], %s21561_s21 }
 0x1ba   : > { %20894 = dma.done.wait (%p24549_p13), %s824_s5, 128  }
 0x1bb   : > { %20896 = vsyncadd (%p24549_p13), %s824_s5, 4294967168  ;;  %s842_s30 = scalar_lea.sflag [#allocation12], %s21561_s21 }
 0x1bc   : > { %20898 = dma.done.wait (%p24549_p13), %s842_s30, 65600  }
 0x1bd   : > { %20900 = vsyncadd (%p24549_p13), %s842_s30, 4294901696  ;;  %s16179_s27 = sshll.u32 %s21549_s17, 12  ;;  %s16180_s4 = sshll.u32 %s21549_s17, 4 }
 0x1be   : > { %s21592_s19 = scalar_lea.vmem [#allocation13], %s16179_s27  ;;  %s860_s0 = scalar_lea.sflag [#allocation15], %s21561_s21 }
 0x1bf   : > { %s21595_s2 = scalar_lea.vmem [#allocation14], %s16180_s4 }
 0x1c0   : > { %20902 = dma.done.wait (%p24549_p13), %s860_s0, 65792  }
 0x1c1   : > { %20904 = vsyncadd (%p24549_p13), %s860_s0, 4294901504  ;;  %s21601_s18 = scalar_lea.vmem [#allocation16], %s16179_s27  ;;  %s878_s28 = scalar_lea.sflag [#allocation18], %s21561_s21 }
 0x1c2   : > { %20906 = dma.done.wait (%p24549_p13), %s878_s28, 128  }
 0x1c3   : > { %20908 = vsyncadd (%p24549_p13), %s878_s28, 4294967168  ;;  %s896_s1 = scalar_lea.sflag [#allocation21], %s21561_s21 }
 0x1c4   : > { %20910 = dma.done.wait (%p24549_p13), %s896_s1, 64  }
 0x1c5   : > { %20912 = vsyncadd (%p24549_p13), %s896_s1, 4294967232  ;;  %s24552_s5 = sld [smem:[#allocation36_spill]] }
 0x1cb   : > { %p24553_p4 = scmp.ne.s32.totalorder %s24552_s5, 0 }
 0x1cd   : > { %20914 = dma.done.wait (%p24553_p4), [#allocation21], 24576  }
 0x1ce   : > { %20916 = vsyncadd (%p24553_p4), [#allocation21], 4294942720  ;;  %s24554_s30 = sld [smem:[#allocation33_spill]]  ;;  %s24555_s28 = sld [smem:[#allocation48_spill]] }
 0x1cf   : > { %s24556_s1 = sld [smem:[#allocation61_spill]]  ;;  %s24557_s22 = sld [smem:[#allocation32_spill]] }
 0x1d4   : > { %p1013_p5 = scmp.lt.s32.totalorder %s24554_s30, 1 }
 0x1d5   : > { %p16187_p9 = scmp.ne.s32.totalorder %s24557_s22, 0 }
 0x1d6   : > { %s24601_s30 = smov (!%p1013_p5, %s24554_s30), 1  ;;  %s24558_s24 = sld [smem:[#allocation49_spill]] (!%p16187_p9)  ;;  %v20970_v2 = vmov (!%p16187_p9), 0  }
 0x1d7   : > { %s18369_s27 = smul.u32 12, %s24601_s30  ;;  %1276 = vmatprep.mubr.bf16.mxu0 (!%p16187_p9), %v20970_v2  ;;  %1327 = vmatprep.mubr.bf16.mxu1 (!%p16187_p9), %v20970_v2  ;;  %s24560_s22 = sld [smem:[#allocation50_spill]] (!%p16187_p9) }
 0x1d8   : > { %s18370_s4 = smul.u32 6, %s24601_s30 }
 0x1d9   : > { %s21625_s8 = scalar_lea.vmem %s24555_s28, %s18369_s27  ;;  %1026 = sbr.rel (%p16187_p9) target bundleno = 734 (0x2de), region = 144 }
 0x1da   : > { %s21630_s6 = scalar_lea.vmem %s24556_s1, %s18370_s4  ;;  %v18566_v33 = vld [vmem:[%s21625_s8] sm:$0xff] (!%p16187_p9)   ;;  %v18567_v34 = vld [vmem:[%s21625_s8 + $0x8] ss:$0 sps:$4 sm:$0xff] (!%p16187_p9)  }
 0x1dc   : > { %s24559_s7 = smov (!%p16187_p9), %s24558_s24  ;;  %v18518_v0 = vld [vmem:[%s24558_s24 + $0x4] ss:$16 sps:$4 sm:$0xff] (!%p16187_p9)  }
 0x1dd   : > { %v18520_v1 = vld [vmem:[%s24559_s7 + $0xc] ss:$16 sps:$4 sm:$0xff] (!%p16187_p9)   ;;  %1244 = vmatprep.subr.bf16.mxu0 (!%p16187_p9), %v18518_v0  ;;  %v18522_v3 = vld [vmem:[%s24559_s7] ss:$16 sps:$4 sm:$0xff] (!%p16187_p9)   ;;  %v18523_v4 = vld [vmem:[%s24559_s7 + $0x8] ss:$16 sps:$4 sm:$0xff] (!%p16187_p9)  }
 0x1de   : > { %1295 = vmatprep.subr.bf16.mxu1 (!%p16187_p9), %v18520_v1  ;;  %v18524_v5 = vld [vmem:[%s24559_s7 + $0x24] ss:$16 sps:$4 sm:$0xff] (!%p16187_p9)   ;;  %1245 = vmatpush1.bf16.msra.mxu0 (!%p16187_p9), %v18522_v3  ;;  %v18526_v6 = vld [vmem:[%s24559_s7 + $0x2c] ss:$16 sps:$4 sm:$0xff] (!%p16187_p9)   ;;  %v18528_v7 = vld [vmem:[%s24559_s7 + $0x20] ss:$16 sps:$4 sm:$0xff] (!%p16187_p9)  }
 0x1df   : > { %1296 = vmatpush1.bf16.msra.mxu1 (!%p16187_p9), %v18523_v4  ;;  %1246 = vmatprep.subr.bf16.mxu0 (!%p16187_p9), %v18524_v5  ;;  %v18529_v8 = vld [vmem:[%s24559_s7 + $0x28] ss:$16 sps:$4 sm:$0xff] (!%p16187_p9)   ;;  %v18530_v9 = vld [vmem:[%s24559_s7 + $0x44] ss:$16 sps:$4 sm:$0xff] (!%p16187_p9)   ;;  %v18532_v10 = vld [vmem:[%s24559_s7 + $0x4c] ss:$16 sps:$4 sm:$0xff] (!%p16187_p9)  }
 0x1e0   : > { %1297 = vmatprep.subr.bf16.mxu1 %v18526_v6  ;;  %v18534_v11 = vld [vmem:[%s24559_s7 + $0x40] ss:$16 sps:$4 sm:$0xff]   ;;  %v18535_v12 = vld [vmem:[%s24559_s7 + $0x48] ss:$16 sps:$4 sm:$0xff]   ;;  %v18536_v13 = vld [vmem:[%s24559_s7 + $0x64] ss:$16 sps:$4 sm:$0xff]  }
 0x1e1   : > { %v18538_v14 = vld [vmem:[%s24559_s7 + $0x6c] ss:$16 sps:$4 sm:$0xff]   ;;  %v18540_v15 = vld [vmem:[%s24559_s7 + $0x60] ss:$16 sps:$4 sm:$0xff]   ;;  %v18541_v16 = vld [vmem:[%s24559_s7 + $0x68] ss:$16 sps:$4 sm:$0xff]  }
 0x1e2   : > { %1247 = vmatpush1.bf16.msra.mxu0 %v18528_v7  ;;  %v18542_v17 = vld [vmem:[%s24559_s7 + $0x84] ss:$16 sps:$4 sm:$0xff]   ;;  %v18544_v18 = vld [vmem:[%s24559_s7 + $0x8c] ss:$16 sps:$4 sm:$0xff]   ;;  %v18546_v19 = vld [vmem:[%s24559_s7 + $0x80] ss:$16 sps:$4 sm:$0xff]  }
 0x1e3   : > { %1298 = vmatpush1.bf16.msra.mxu1 %v18529_v8  ;;  %1248 = vmatprep.subr.bf16.mxu0 %v18530_v9  ;;  %v18547_v20 = vld [vmem:[%s24559_s7 + $0x88] ss:$16 sps:$4 sm:$0xff]   ;;  %v18548_v21 = vld [vmem:[%s24559_s7 + $0xa4] ss:$16 sps:$4 sm:$0xff]   ;;  %v18550_v22 = vld [vmem:[%s24559_s7 + $0xac] ss:$16 sps:$4 sm:$0xff]  }
 0x1e4   : > { %1299 = vmatprep.subr.bf16.mxu1 %v18532_v10  ;;  %v18552_v23 = vld [vmem:[%s24559_s7 + $0xa0] ss:$16 sps:$4 sm:$0xff]   ;;  %v18553_v24 = vld [vmem:[%s24559_s7 + $0xa8] ss:$16 sps:$4 sm:$0xff]   ;;  %v18554_v25 = vld [vmem:[%s24559_s7 + $0xc4] ss:$16 sps:$4 sm:$0xff]  }
 0x1e5   : > { %v18556_v26 = vld [vmem:[%s24559_s7 + $0xcc] ss:$16 sps:$4 sm:$0xff]   ;;  %v18558_v27 = vld [vmem:[%s24559_s7 + $0xc0] ss:$16 sps:$4 sm:$0xff]   ;;  %v18559_v28 = vld [vmem:[%s24559_s7 + $0xc8] ss:$16 sps:$4 sm:$0xff]  }
 0x1e6   : > { %1249 = vmatpush1.bf16.msra.mxu0 %v18534_v11  ;;  %v18560_v29 = vld [vmem:[%s24559_s7 + $0xe4] ss:$16 sps:$4 sm:$0xff]   ;;  %v18562_v30 = vld [vmem:[%s24559_s7 + $0xec] ss:$16 sps:$4 sm:$0xff]   ;;  %v18564_v31 = vld [vmem:[%s24559_s7 + $0xe0] ss:$16 sps:$4 sm:$0xff]  }
 0x1e7   : > { %1300 = vmatpush1.bf16.msra.mxu1 %v18535_v12  ;;  %1250 = vmatprep.subr.bf16.mxu0 %v18536_v13  ;;  %v18565_v32 = vld [vmem:[%s24559_s7 + $0xe8] ss:$16 sps:$4 sm:$0xff]   ;;  %v1062_v35 = vld [vmem:[%s24560_s22] sm:$0xff]  ;;  %v1064_v36 = vld [vmem:[%s24560_s22 + $0x10] sm:$0xff] }
 0x1e8   : > { %1301 = vmatprep.subr.bf16.mxu1 %v18538_v14  ;;  %v1063_v37 = vld [vmem:[%s24560_s22 + $0x8] sm:$0xff]  ;;  %v1065_v38 = vld [vmem:[%s24560_s22 + $0x18] sm:$0xff]  ;;  %v1066_v41 = vld [vmem:[%s24560_s22 + $0x20] sm:$0xff] }
 0x1e9   : > { %v1068_v42 = vld [vmem:[%s24560_s22 + $0x30] sm:$0xff]  ;;  %v1067_v47 = vld [vmem:[%s24560_s22 + $0x28] sm:$0xff]  ;;  %v1069_v48 = vld [vmem:[%s24560_s22 + $0x38] sm:$0xff] }
 0x1ea   : > { %1251 = vmatpush1.bf16.msra.mxu0 %v18540_v15  ;;  %v1070_v59 = vld [vmem:[%s24560_s22 + $0x40] sm:$0xff]  ;;  %v1072_v60 = vld [vmem:[%s24560_s22 + $0x50] sm:$0xff]  ;;  %v1071_v61 = vld [vmem:[%s24560_s22 + $0x48] sm:$0xff] }
 0x1eb   : > { %1302 = vmatpush1.bf16.msra.mxu1 %v18541_v16  ;;  %1252 = vmatprep.subr.bf16.mxu0 %v18542_v17  ;;  %v1073_v62 = vld [vmem:[%s24560_s22 + $0x58] sm:$0xff] }
 0x1ec   : > { %1303 = vmatprep.subr.bf16.mxu1 %v18544_v18 }
 0x1ee   : > { %1253 = vmatpush1.bf16.msra.mxu0 %v18546_v19 }
 0x1ef   : > { %1304 = vmatpush1.bf16.msra.mxu1 %v18547_v20  ;;  %1254 = vmatprep.subr.bf16.mxu0 %v18548_v21 }
 0x1f0   : > { %1305 = vmatprep.subr.bf16.mxu1 %v18550_v22 }
 0x1f2   : > { %1255 = vmatpush1.bf16.msra.mxu0 %v18552_v23 }
 0x1f3   : > { %1306 = vmatpush1.bf16.msra.mxu1 %v18553_v24  ;;  %1256 = vmatprep.subr.bf16.mxu0 %v18554_v25 }
 0x1f4   : > { %1307 = vmatprep.subr.bf16.mxu1 %v18556_v26 }
 0x1f6   : > { %1257 = vmatpush1.bf16.msra.mxu0 %v18558_v27 }
 0x1f7   : > { %1308 = vmatpush1.bf16.msra.mxu1 %v18559_v28  ;;  %1258 = vmatprep.subr.bf16.mxu0 %v18560_v29 }
 0x1f8   : > { %1309 = vmatprep.subr.bf16.mxu1 %v18562_v30 }
 0x1fa   : > { %1259 = vmatpush1.bf16.msra.mxu0 %v18564_v31 }
 0x1fb   : > { %1310 = vmatpush1.bf16.msra.mxu1 %v18565_v32 }
 0x1fd   : > { %1277 = vmatmul.mubr.bf16.vlgmr.msra.gmra.mrb[0].mxu0 %v18566_v33 }
 0x1fe   : > { %1328 = vmatmul.mubr.bf16.vlgmr.msra.gmra.mrb[0].mxu1 %v18566_v33  ;;  %1286 = vmatprep.mubr.bf16.mxu0 %v20970_v2 }
 0x1ff   : > { %1337 = vmatprep.mubr.bf16.mxu1 %v20970_v2 }
 0x205   : > { %1287 = vmatmul.mubr.bf16.gmra.mrb[4].mxu0 %v18567_v34 }
 0x206   : > { %1338 = vmatmul.mubr.bf16.gmra.mrb[4].mxu1 %v18567_v34 }
 0x2d0   : > { %v1278_v39 = vpop.f32.mrb[0].mxu0 }
 0x2d1   : > { %v1329_v40 = vpop.f32.mrb[0].mxu1  ;;  %v1279_v43 = vadd.f32 %v1278_v39, %v1062_v35  ;;  %v1280_v45 = vpop.f32.mrb[1].mxu0 }
 0x2d2   : > { %v1330_v44 = vadd.f32 %v1329_v40, %v1064_v36  ;;  %v1331_v46 = vpop.f32.mrb[1].mxu1  ;;  %v1281_v49 = vadd.f32 %v1280_v45, %v1063_v37  ;;  %v1282_v51 = vpop.f32.mrb[2].mxu0 }
 0x2d3   : > { %v1332_v50 = vadd.f32 %v1331_v46, %v1065_v38  ;;  %v1333_v52 = vpop.f32.mrb[2].mxu1  ;;  %1346 = vst [vmem:[#allocation2] sm:$0xff] %v1279_v43  ;;  %v1283_v53 = vadd.f32 %v1282_v51, %v1066_v41  ;;  %v1284_v55 = vpop.f32.mrb[3].mxu0 }
 0x2d4   : > { %1348 = vst [vmem:[#allocation2 + $0x10] sm:$0xff] %v1330_v44  ;;  %v1334_v54 = vadd.f32 %v1333_v52, %v1068_v42  ;;  %v1335_v56 = vpop.f32.mrb[3].mxu1  ;;  %1347 = vst [vmem:[#allocation2 + $0x8] sm:$0xff] %v1281_v49  ;;  %v1285_v57 = vadd.f32 %v1284_v55, %v1067_v47 }
 0x2d5   : > { %1349 = vst [vmem:[#allocation2 + $0x18] sm:$0xff] %v1332_v50  ;;  %v1336_v58 = vadd.f32 %v1335_v56, %v1069_v48  ;;  %1350 = vst [vmem:[#allocation2 + $0x20] sm:$0xff] %v1283_v53 }
 0x2d6   : > { %1352 = vst [vmem:[#allocation2 + $0x30] sm:$0xff] %v1334_v54  ;;  %1351 = vst [vmem:[#allocation2 + $0x28] sm:$0xff] %v1285_v57 }
 0x2d7   : > { %1353 = vst [vmem:[#allocation2 + $0x38] sm:$0xff] %v1336_v58 }
 0x2d8   : > { %v1288_v63 = vpop.f32.mrb[4].mxu0 }
 0x2d9   : > { %v1339_v0 = vpop.f32.mrb[4].mxu1  ;;  %v1289_v1 = vadd.f32 %v1288_v63, %v1070_v59  ;;  %v1290_v3 = vpop.f32.mrb[5].mxu0 }
 0x2da   : > { %v1340_v2 = vadd.f32 %v1339_v0, %v1072_v60  ;;  %v1341_v4 = vpop.f32.mrb[5].mxu1  ;;  %v1291_v5 = vadd.f32 %v1290_v3, %v1071_v61  ;;  %v1292_v7 = vpop.f32.mrb[6].mxu0 }
 0x2db   : > { %v1342_v6 = vadd.f32 %v1341_v4, %v1073_v62  ;;  %v1343_v8 = vpop.f32.mrb[6].mxu1  ;;  %1354 = vst [vmem:[#allocation2 + $0x40] sm:$0xff] %v1289_v1  ;;  %v1293_v9 = vpop.f32.mrb[7].mxu0 }
 0x2dc   : > { %1356 = vst [vmem:[#allocation2 + $0x50] sm:$0xff] %v1340_v2  ;;  %v1344_v10 = vpop.f32.mrb[7].mxu1  ;;  %1355 = vst [vmem:[#allocation2 + $0x48] sm:$0xff] %v1291_v5 }
 0x2dd   : > { %1357 = vst [vmem:[#allocation2 + $0x58] sm:$0xff] %v1342_v6 }
 0x2de PF: > { %v18568_v11 = vld [vmem:[%s21553_s16 + $0x4] ss:$48 sps:$4 sm:$0xff]   ;;  %v18570_v12 = vld [vmem:[%s21553_s16] ss:$48 sps:$4 sm:$0xff]   ;;  %v1359_v24 = vld [vmem:[#allocation2 + $0x8] sm:$0xff]  ;;  %vm4481_vm0 = vcmask 1043456  }
 0x2df   : > { %3746 = vmatprep.subr.bf16.mxu0 %v18568_v11  ;;  %v18571_v13 = vld [vmem:[%s21553_s16 + $0x64] ss:$48 sps:$4 sm:$0xff]   ;;  %v18573_v14 = vld [vmem:[%s21553_s16 + $0x60] ss:$48 sps:$4 sm:$0xff]   ;;  %v1363_v25 = vld [vmem:[#allocation2 + $0x28] sm:$0xff]  ;;  %vm4439_vm2 = vcmask 195584  }
 0x2e0   : > { %3747 = vmatpush1.bf16.msra.mxu0 %v18570_v12  ;;  %v18574_v15 = vld [vmem:[%s21553_s16 + $0xc4] ss:$48 sps:$4 sm:$0xff]   ;;  %v18576_v16 = vld [vmem:[%s21553_s16 + $0xc0] ss:$48 sps:$4 sm:$0xff]   ;;  %v21784_v26 = vpack.c.bf16 %v1363_v25, %v1359_v24  ;;  %v1361_v57 = vld [vmem:[#allocation2 + $0x18] sm:$0xff] }
 0x2e1   : > { %3748 = vmatprep.subr.bf16.mxu0 %v18571_v13  ;;  %v18577_v17 = vld [vmem:[%s21553_s16 + $0x124] ss:$48 sps:$4 sm:$0xff]   ;;  %v18579_v18 = vld [vmem:[%s21553_s16 + $0x120] ss:$48 sps:$4 sm:$0xff]   ;;  %v1365_v58 = vld [vmem:[#allocation2 + $0x38] sm:$0xff] }
 0x2e2   : > { %v18580_v19 = vld [vmem:[%s21553_s16 + $0x184] ss:$48 sps:$4 sm:$0xff]   ;;  %v18582_v20 = vld [vmem:[%s21553_s16 + $0x180] ss:$48 sps:$4 sm:$0xff]   ;;  %3778 = vmatprep.mubr.bf16.mxu0 %v21784_v26  ;;  %3880 = vmatprep.mubr.bf16.mxu1 %v21784_v26  ;;  %v21822_v62 = vpack.c.bf16 %v1365_v58, %v1361_v57  ;;  %v18759_v24 = vld [vmem:[%s21553_s16 + $0xc8] ss:$48 sps:$4 sm:$0xff]  }
 0x2e3   : > { %v18583_v21 = vld [vmem:[%s21553_s16 + $0x1e4] ss:$48 sps:$4 sm:$0xff]   ;;  %v18585_v22 = vld [vmem:[%s21553_s16 + $0x1e0] ss:$48 sps:$4 sm:$0xff]   ;;  %v1367_v49 = vld [vmem:[#allocation2 + $0x48] sm:$0xff] }
 0x2e4   : > { %3749 = vmatpush1.bf16.msra.mxu0 %v18573_v14  ;;  %v18586_v23 = vld [vmem:[%s21553_s16 + $0x244] ss:$48 sps:$4 sm:$0xff]   ;;  %v18588_v27 = vld [vmem:[%s21553_s16 + $0x240] ss:$48 sps:$4 sm:$0xff]   ;;  %v21811_v52 = vpack.c.bf16 %v1367_v49, %v1367_v49  ;;  %v18795_v58 = vld [vmem:[%s21553_s16 + $0x308] ss:$48 sps:$4 sm:$0xff]  }
 0x2e5   : > { %3750 = vmatprep.subr.bf16.mxu0 %v18574_v15  ;;  %v18589_v28 = vld [vmem:[%s21553_s16 + $0x2a4] ss:$48 sps:$4 sm:$0xff]   ;;  %v18591_v29 = vld [vmem:[%s21553_s16 + $0x2a0] ss:$48 sps:$4 sm:$0xff]   ;;  %v18742_v15 = vld [vmem:[%s21553_s16 + $0xc] ss:$48 sps:$4 sm:$0xff]  }
 0x2e6   : > { %v18592_v30 = vld [vmem:[%s21553_s16 + $0x304] ss:$48 sps:$4 sm:$0xff]   ;;  %v18594_v31 = vld [vmem:[%s21553_s16 + $0x300] ss:$48 sps:$4 sm:$0xff]   ;;  %3848 = vmatprep.subr.bf16.mxu1 %v18742_v15  ;;  %v18820_v15 = vld [vmem:[%s21553_s16 + $0x4ec] ss:$48 sps:$4 sm:$0xff]  }
 0x2e7   : > { %v18595_v32 = vld [vmem:[%s21553_s16 + $0x364] ss:$48 sps:$4 sm:$0xff]   ;;  %v18597_v33 = vld [vmem:[%s21553_s16 + $0x360] ss:$48 sps:$4 sm:$0xff]  }
 0x2e8   : > { %3751 = vmatpush1.bf16.msra.mxu0 %v18576_v16  ;;  %v18598_v34 = vld [vmem:[%s21553_s16 + $0x3c4] ss:$48 sps:$4 sm:$0xff]   ;;  %v18600_v35 = vld [vmem:[%s21553_s16 + $0x3c0] ss:$48 sps:$4 sm:$0xff]   ;;  %v18747_v16 = vld [vmem:[%s21553_s16 + $0x8] ss:$48 sps:$4 sm:$0xff]  }
 0x2e9   : > { %3752 = vmatprep.subr.bf16.mxu0 %v18577_v17  ;;  %v18601_v36 = vld [vmem:[%s21553_s16 + $0x424] ss:$48 sps:$4 sm:$0xff]   ;;  %v18603_v37 = vld [vmem:[%s21553_s16 + $0x420] ss:$48 sps:$4 sm:$0xff]   ;;  %3849 = vmatpush1.bf16.msra.mxu1 %v18747_v16  ;;  %v18825_v16 = vld [vmem:[%s21553_s16 + $0x4e8] ss:$48 sps:$4 sm:$0xff]  }
 0x2ea   : > { %v18604_v38 = vld [vmem:[%s21553_s16 + $0x484] ss:$48 sps:$4 sm:$0xff]   ;;  %v18606_v39 = vld [vmem:[%s21553_s16 + $0x480] ss:$48 sps:$4 sm:$0xff]  }
 0x2eb   : > { %v18607_v40 = vld [vmem:[%s21553_s16 + $0x4e4] ss:$48 sps:$4 sm:$0xff]   ;;  %v18609_v41 = vld [vmem:[%s21553_s16 + $0x4e0] ss:$48 sps:$4 sm:$0xff]  }
 0x2ec   : > { %3753 = vmatpush1.bf16.msra.mxu0 %v18579_v18  ;;  %v18610_v42 = vld [vmem:[%s21553_s16 + $0x544] ss:$48 sps:$4 sm:$0xff]   ;;  %v18612_v43 = vld [vmem:[%s21553_s16 + $0x540] ss:$48 sps:$4 sm:$0xff]  }
 0x2ed   : > { %3754 = vmatprep.subr.bf16.mxu0 %v18580_v19  ;;  %v18613_v44 = vld [vmem:[%s21553_s16 + $0x5a4] ss:$48 sps:$4 sm:$0xff]   ;;  %v18615_v45 = vld [vmem:[%s21553_s16 + $0x5a0] ss:$48 sps:$4 sm:$0xff]   ;;  %v18748_v19 = vld [vmem:[%s21553_s16 + $0x6c] ss:$48 sps:$4 sm:$0xff]  }
 0x2ee   : > { %v18618_v46 = vld [vmem:[%s21553_s16 + $0x604] ss:$48 sps:$4 sm:$0xff]   ;;  %v18616_v51 = vld [vmem:[%s21553_s16 + $0x600] ss:$48 sps:$4 sm:$0xff]   ;;  %3850 = vmatprep.subr.bf16.mxu1 %v18748_v19  ;;  %v18826_v19 = vld [vmem:[%s21553_s16 + $0x54c] ss:$48 sps:$4 sm:$0xff]  }
 0x2ef   : > { %v1358_v47 = vld [vmem:[#allocation2] sm:$0xff] }
 0x2f0   : > { %3755 = vmatpush1.bf16.msra.mxu0 %v18582_v20  ;;  %v1362_v48 = vld [vmem:[#allocation2 + $0x20] sm:$0xff]  ;;  %v18753_v20 = vld [vmem:[%s21553_s16 + $0x68] ss:$48 sps:$4 sm:$0xff]  }
 0x2f1   : > { %3756 = vmatprep.subr.bf16.mxu0 %v18583_v21  ;;  %v21808_v50 = vpack.c.bf16 %v1362_v48, %v1358_v47  ;;  %v18621_v53 = vld [vmem:[%s21553_s16 + $0x664] ss:$48 sps:$4 sm:$0xff]   ;;  %v18619_v54 = vld [vmem:[%s21553_s16 + $0x660] ss:$48 sps:$4 sm:$0xff]   ;;  %3851 = vmatpush1.bf16.msra.mxu1 %v18753_v20  ;;  %v18783_v47 = vld [vmem:[%s21553_s16 + $0x248] ss:$48 sps:$4 sm:$0xff]  }
 0x2f2   : > { %v18624_v55 = vld [vmem:[%s21553_s16 + $0x6c4] ss:$48 sps:$4 sm:$0xff]   ;;  %v18622_v60 = vld [vmem:[%s21553_s16 + $0x6c0] ss:$48 sps:$4 sm:$0xff]   ;;  %v18831_v20 = vld [vmem:[%s21553_s16 + $0x548] ss:$48 sps:$4 sm:$0xff]  }
 0x2f3   : > { %v1366_v56 = vld [vmem:[#allocation2 + $0x40] sm:$0xff]  ;;  %v1368_v48 = vld [vmem:[#allocation2 + $0x50] sm:$0xff] }
 0x2f4   : > { %3757 = vmatpush1.bf16.msra.mxu0 %v18585_v22  ;;  %v21818_v59 = vpack.c.bf16 %v1366_v56, %v1366_v56  ;;  %v18627_v61 = vld [vmem:[%s21553_s16 + $0x724] ss:$48 sps:$4 sm:$0xff]   ;;  %v18625_v63 = vld [vmem:[%s21553_s16 + $0x720] ss:$48 sps:$4 sm:$0xff]   ;;  %v18790_v56 = vld [vmem:[%s21553_s16 + $0x30c] ss:$48 sps:$4 sm:$0xff]  }
 0x2f5   : > { %3758 = vmatprep.subr.bf16.mxu0 %v18586_v23  ;;  %v18630_v0 = vld [vmem:[%s21553_s16 + $0x784] ss:$48 sps:$4 sm:$0xff]   ;;  %v18628_v1 = vld [vmem:[%s21553_s16 + $0x780] ss:$48 sps:$4 sm:$0xff]   ;;  %v18754_v23 = vld [vmem:[%s21553_s16 + $0xcc] ss:$48 sps:$4 sm:$0xff]  }
 0x2f6   : > { %v18633_v2 = vld [vmem:[%s21553_s16 + $0x7e4] ss:$48 sps:$4 sm:$0xff]   ;;  %v18631_v3 = vld [vmem:[%s21553_s16 + $0x7e0] ss:$48 sps:$4 sm:$0xff]   ;;  %3852 = vmatprep.subr.bf16.mxu1 %v18754_v23  ;;  %v18832_v23 = vld [vmem:[%s21553_s16 + $0x5ac] ss:$48 sps:$4 sm:$0xff]  }
 0x2f7   : > { %v18636_v4 = vld [vmem:[%s21553_s16 + $0x844] ss:$48 sps:$4 sm:$0xff]   ;;  %v18634_v5 = vld [vmem:[%s21553_s16 + $0x840] ss:$48 sps:$4 sm:$0xff]   ;;  %3853 = vmatpush1.bf16.msra.mxu1 %v18759_v24  ;;  %v18837_v24 = vld [vmem:[%s21553_s16 + $0x5a8] ss:$48 sps:$4 sm:$0xff]  }
 0x2f8   : > { %3759 = vmatpush1.bf16.msra.mxu0 %v18588_v27  ;;  %v18639_v6 = vld [vmem:[%s21553_s16 + $0x8a4] ss:$48 sps:$4 sm:$0xff]   ;;  %v18637_v7 = vld [vmem:[%s21553_s16 + $0x8a0] ss:$48 sps:$4 sm:$0xff]  }
 0x2f9   : > { %3760 = vmatprep.subr.bf16.mxu0 %v18589_v28  ;;  %v18642_v8 = vld [vmem:[%s21553_s16 + $0x904] ss:$48 sps:$4 sm:$0xff]   ;;  %v18640_v9 = vld [vmem:[%s21553_s16 + $0x900] ss:$48 sps:$4 sm:$0xff]   ;;  %v18760_v28 = vld [vmem:[%s21553_s16 + $0x12c] ss:$48 sps:$4 sm:$0xff]  }
 0x2fa   : > { %v18645_v10 = vld [vmem:[%s21553_s16 + $0x964] ss:$48 sps:$4 sm:$0xff]   ;;  %v18643_v11 = vld [vmem:[%s21553_s16 + $0x960] ss:$48 sps:$4 sm:$0xff]   ;;  %3854 = vmatprep.subr.bf16.mxu1 %v18760_v28  ;;  %v18840_v28 = vld [vmem:[%s21553_s16 + $0x60c] ss:$48 sps:$4 sm:$0xff]  }
 0x2fb   : > { %v18648_v12 = vld [vmem:[%s21553_s16 + $0x9c4] ss:$48 sps:$4 sm:$0xff]   ;;  %v18646_v13 = vld [vmem:[%s21553_s16 + $0x9c0] ss:$48 sps:$4 sm:$0xff]  }
 0x2fc   : > { %3761 = vmatpush1.bf16.msra.mxu0 %v18591_v29  ;;  %v18651_v14 = vld [vmem:[%s21553_s16 + $0xa24] ss:$48 sps:$4 sm:$0xff]   ;;  %v18649_v17 = vld [vmem:[%s21553_s16 + $0xa20] ss:$48 sps:$4 sm:$0xff]   ;;  %v18765_v29 = vld [vmem:[%s21553_s16 + $0x128] ss:$48 sps:$4 sm:$0xff]  }
 0x2fd   : > { %3762 = vmatprep.subr.bf16.mxu0 %v18592_v30  ;;  %v18654_v18 = vld [vmem:[%s21553_s16 + $0xa84] ss:$48 sps:$4 sm:$0xff]   ;;  %v18652_v21 = vld [vmem:[%s21553_s16 + $0xa80] ss:$48 sps:$4 sm:$0xff]   ;;  %3855 = vmatpush1.bf16.msra.mxu1 %v18765_v29  ;;  %v18838_v29 = vld [vmem:[%s21553_s16 + $0x608] ss:$48 sps:$4 sm:$0xff]  }
 0x2fe   : > { %v18657_v22 = vld [vmem:[%s21553_s16 + $0xae4] ss:$48 sps:$4 sm:$0xff]   ;;  %v18655_v25 = vld [vmem:[%s21553_s16 + $0xae0] ss:$48 sps:$4 sm:$0xff]  }
 0x2ff   : > { %v18660_v27 = vld [vmem:[%s21553_s16 + $0xb44] ss:$48 sps:$4 sm:$0xff]   ;;  %v18658_v30 = vld [vmem:[%s21553_s16 + $0xb40] ss:$48 sps:$4 sm:$0xff]  }
 0x300   : > { %3763 = vmatpush1.bf16.msra.mxu0 %v18594_v31  ;;  %v18663_v31 = vld [vmem:[%s21553_s16 + $0xba4] ss:$48 sps:$4 sm:$0xff]  }
 0x301   : > { %3764 = vmatprep.subr.bf16.mxu0 %v18595_v32  ;;  %v18766_v32 = vld [vmem:[%s21553_s16 + $0x18c] ss:$48 sps:$4 sm:$0xff]   ;;  %v18672_v49 = vld [vmem:[%s21553_s16 + $0xd4] ss:$48 sps:$4 sm:$0xff]  }
 0x302   : > { %3856 = vmatprep.subr.bf16.mxu1 %v18766_v32  ;;  %v18675_v57 = vld [vmem:[%s21553_s16 + $0x134] ss:$48 sps:$4 sm:$0xff]   ;;  %v18846_v32 = vld [vmem:[%s21553_s16 + $0x66c] ss:$48 sps:$4 sm:$0xff]  }
 0x304   : > { %3765 = vmatpush1.bf16.msra.mxu0 %v18597_v33  ;;  %v18771_v33 = vld [vmem:[%s21553_s16 + $0x188] ss:$48 sps:$4 sm:$0xff]  }
 0x305   : > { %3766 = vmatprep.subr.bf16.mxu0 %v18598_v34  ;;  %v18661_v34 = vld [vmem:[%s21553_s16 + $0xba0] ss:$48 sps:$4 sm:$0xff]   ;;  %3857 = vmatpush1.bf16.msra.mxu1 %v18771_v33  ;;  %v18844_v33 = vld [vmem:[%s21553_s16 + $0x668] ss:$48 sps:$4 sm:$0xff]  }
 0x308   : > { %3767 = vmatpush1.bf16.msra.mxu0 %v18600_v35  ;;  %v1360_v35 = vld [vmem:[#allocation2 + $0x10] sm:$0xff] }
 0x309   : > { %3768 = vmatprep.subr.bf16.mxu0 %v18601_v36  ;;  %v1364_v36 = vld [vmem:[#allocation2 + $0x30] sm:$0xff] }
 0x30c   : > { %3769 = vmatpush1.bf16.msra.mxu0 %v18603_v37  ;;  %v18666_v37 = vld [vmem:[%s21553_s16 + $0x14] ss:$48 sps:$4 sm:$0xff]  }
 0x30d   : > { %3770 = vmatprep.subr.bf16.mxu0 %v18604_v38  ;;  %v1369_v38 = vld [vmem:[#allocation2 + $0x58] sm:$0xff] }
 0x310   : > { %3771 = vmatpush1.bf16.msra.mxu0 %v18606_v39  ;;  %v18772_v39 = vld [vmem:[%s21553_s16 + $0x1ec] ss:$48 sps:$4 sm:$0xff]  }
 0x311   : > { %3772 = vmatprep.subr.bf16.mxu0 %v18607_v40  ;;  %v18777_v40 = vld [vmem:[%s21553_s16 + $0x1e8] ss:$48 sps:$4 sm:$0xff]   ;;  %3858 = vmatprep.subr.bf16.mxu1 %v18772_v39  ;;  %v18708_v39 = vld [vmem:[%s21553_s16 + $0x554] ss:$48 sps:$4 sm:$0xff]  }
 0x312   : > { %3859 = vmatpush1.bf16.msra.mxu1 %v18777_v40  ;;  %v18858_v40 = vld [vmem:[%s21553_s16 + $0x72c] ss:$48 sps:$4 sm:$0xff]  }
 0x314   : > { %3773 = vmatpush1.bf16.msra.mxu0 %v18609_v41  ;;  %v18664_v41 = vld [vmem:[%s21553_s16 + $0x10] ss:$48 sps:$4 sm:$0xff]  }
 0x315   : > { %3774 = vmatprep.subr.bf16.mxu0 %v18610_v42  ;;  %v21865_v42 = vpack.c.bf16 %v1364_v36, %v1360_v35  ;;  %v18705_v35 = vld [vmem:[%s21553_s16 + $0x4f4] ss:$48 sps:$4 sm:$0xff]   ;;  %v18852_v36 = vld [vmem:[%s21553_s16 + $0x6cc] ss:$48 sps:$4 sm:$0xff]  }
 0x318   : > { %3775 = vmatpush1.bf16.msra.mxu0 %v18612_v43  ;;  %v21867_v43 = vpack.c.bf16 %v1369_v38, %v1369_v38  ;;  %v18703_v38 = vld [vmem:[%s21553_s16 + $0x4f0] ss:$48 sps:$4 sm:$0xff]  }
 0x319   : > { %3776 = vmatprep.subr.bf16.mxu0 %v18613_v44  ;;  %v18778_v44 = vld [vmem:[%s21553_s16 + $0x24c] ss:$48 sps:$4 sm:$0xff]  }
 0x31a   : > { %3860 = vmatprep.subr.bf16.mxu1 %v18778_v44  ;;  %v18706_v44 = vld [vmem:[%s21553_s16 + $0x550] ss:$48 sps:$4 sm:$0xff]  }
 0x31b   : > { %3861 = vmatpush1.bf16.msra.mxu1 %v18783_v47  ;;  %v18862_v47 = vld [vmem:[%s21553_s16 + $0x788] ss:$48 sps:$4 sm:$0xff]  }
 0x31c   : > { %3777 = vmatpush1.bf16.msra.mxu0 %v18615_v45  ;;  %v18669_v45 = vld [vmem:[%s21553_s16 + $0x74] ss:$48 sps:$4 sm:$0xff]  }
 0x31d   : > { %3797 = vmatprep.subr.bf16.mxu0 %v18618_v46  ;;  %v18667_v46 = vld [vmem:[%s21553_s16 + $0x70] ss:$48 sps:$4 sm:$0xff]  }
 0x31f   : > { %3779 = vmatmul.mubr.bf16.vlgmr.msra.gmra.mrb[0].mxu0 %v21808_v50 }
 0x320   : > { %3798 = vmatpush1.bf16.msra.mxu0 %v18616_v51  ;;  %3788 = vmatprep.mubr.bf16.mxu0 %v21811_v52  ;;  %v18784_v51 = vld [vmem:[%s21553_s16 + $0x2ac] ss:$48 sps:$4 sm:$0xff]  }
 0x321   : > { %3799 = vmatprep.subr.bf16.mxu0 %v18621_v53  ;;  %v18789_v53 = vld [vmem:[%s21553_s16 + $0x2a8] ss:$48 sps:$4 sm:$0xff]   ;;  %3862 = vmatprep.subr.bf16.mxu1 %v18784_v51  ;;  %v18870_v51 = vld [vmem:[%s21553_s16 + $0x7ec] ss:$48 sps:$4 sm:$0xff]  }
 0x322   : > { %3863 = vmatpush1.bf16.msra.mxu1 %v18789_v53  ;;  %v18868_v53 = vld [vmem:[%s21553_s16 + $0x7e8] ss:$48 sps:$4 sm:$0xff]  }
 0x323   : > { %3864 = vmatprep.subr.bf16.mxu1 %v18790_v56  ;;  %v18717_v56 = vld [vmem:[%s21553_s16 + $0x674] ss:$48 sps:$4 sm:$0xff]  }
 0x324   : > { %3800 = vmatpush1.bf16.msra.mxu0 %v18619_v54  ;;  %v18670_v54 = vld [vmem:[%s21553_s16 + $0xd0] ss:$48 sps:$4 sm:$0xff]  }
 0x325   : > { %3801 = vmatprep.subr.bf16.mxu0 %v18624_v55  ;;  %v21879_v55 = vpack.c.bf16 %v1368_v48, %v1368_v48  ;;  %v18709_v48 = vld [vmem:[%s21553_s16 + $0x5b0] ss:$48 sps:$4 sm:$0xff]  }
 0x326   : > { %3865 = vmatpush1.bf16.msra.mxu1 %v18795_v58  ;;  %v18874_v58 = vld [vmem:[%s21553_s16 + $0x848] ss:$48 sps:$4 sm:$0xff]  }
 0x327   : > { %3789 = vmatmul.mubr.bf16.gmra.mrb[4].mxu0 %v21818_v59 }
 0x328   : > { %3802 = vmatpush1.bf16.msra.mxu0 %v18622_v60  ;;  %3829 = vmatprep.mubr.bf16.mxu0 %v21822_v62  ;;  %v18673_v60 = vld [vmem:[%s21553_s16 + $0x130] ss:$48 sps:$4 sm:$0xff]  }
 0x329   : > { %3803 = vmatprep.subr.bf16.mxu0 %v18627_v61  ;;  %v18678_v61 = vld [vmem:[%s21553_s16 + $0x194] ss:$48 sps:$4 sm:$0xff]  }
 0x32c   : > { %3804 = vmatpush1.bf16.msra.mxu0 %v18625_v63  ;;  %v18796_v63 = vld [vmem:[%s21553_s16 + $0x36c] ss:$48 sps:$4 sm:$0xff]  }
 0x32d   : > { %3805 = vmatprep.subr.bf16.mxu0 %v18630_v0  ;;  %v18801_v0 = vld [vmem:[%s21553_s16 + $0x368] ss:$48 sps:$4 sm:$0xff]   ;;  %3866 = vmatprep.subr.bf16.mxu1 %v18796_v63  ;;  %v18882_v63 = vld [vmem:[%s21553_s16 + $0x8ac] ss:$48 sps:$4 sm:$0xff]  }
 0x32e   : > { %3867 = vmatpush1.bf16.msra.mxu1 %v18801_v0  ;;  %v18880_v0 = vld [vmem:[%s21553_s16 + $0x8a8] ss:$48 sps:$4 sm:$0xff]  }
 0x330   : > { %3806 = vmatpush1.bf16.msra.mxu0 %v18628_v1  ;;  %v18676_v1 = vld [vmem:[%s21553_s16 + $0x190] ss:$48 sps:$4 sm:$0xff]  }
 0x331   : > { %3807 = vmatprep.subr.bf16.mxu0 %v18633_v2  ;;  %v18681_v2 = vld [vmem:[%s21553_s16 + $0x1f4] ss:$48 sps:$4 sm:$0xff]  }
 0x334   : > { %3808 = vmatpush1.bf16.msra.mxu0 %v18631_v3  ;;  %v18802_v3 = vld [vmem:[%s21553_s16 + $0x3cc] ss:$48 sps:$4 sm:$0xff]  }
 0x335   : > { %3809 = vmatprep.subr.bf16.mxu0 %v18636_v4  ;;  %v18807_v4 = vld [vmem:[%s21553_s16 + $0x3c8] ss:$48 sps:$4 sm:$0xff]   ;;  %3868 = vmatprep.subr.bf16.mxu1 %v18802_v3  ;;  %v18888_v3 = vld [vmem:[%s21553_s16 + $0x90c] ss:$48 sps:$4 sm:$0xff]  }
 0x336   : > { %3869 = vmatpush1.bf16.msra.mxu1 %v18807_v4  ;;  %v18886_v4 = vld [vmem:[%s21553_s16 + $0x908] ss:$48 sps:$4 sm:$0xff]  }
 0x338   : > { %3810 = vmatpush1.bf16.msra.mxu0 %v18634_v5  ;;  %v18679_v5 = vld [vmem:[%s21553_s16 + $0x1f0] ss:$48 sps:$4 sm:$0xff]  }
 0x339   : > { %3811 = vmatprep.subr.bf16.mxu0 %v18639_v6  ;;  %v18684_v6 = vld [vmem:[%s21553_s16 + $0x254] ss:$48 sps:$4 sm:$0xff]  }
 0x33c   : > { %3812 = vmatpush1.bf16.msra.mxu0 %v18637_v7  ;;  %v18808_v7 = vld [vmem:[%s21553_s16 + $0x42c] ss:$48 sps:$4 sm:$0xff]  }
 0x33d   : > { %3813 = vmatprep.subr.bf16.mxu0 %v18642_v8  ;;  %v18813_v8 = vld [vmem:[%s21553_s16 + $0x428] ss:$48 sps:$4 sm:$0xff]   ;;  %3870 = vmatprep.subr.bf16.mxu1 %v18808_v7  ;;  %v18894_v7 = vld [vmem:[%s21553_s16 + $0x96c] ss:$48 sps:$4 sm:$0xff]  }
 0x33e   : > { %3871 = vmatpush1.bf16.msra.mxu1 %v18813_v8  ;;  %v18892_v8 = vld [vmem:[%s21553_s16 + $0x968] ss:$48 sps:$4 sm:$0xff]  }
 0x340   : > { %3814 = vmatpush1.bf16.msra.mxu0 %v18640_v9  ;;  %v18682_v9 = vld [vmem:[%s21553_s16 + $0x250] ss:$48 sps:$4 sm:$0xff]  }
 0x341   : > { %3815 = vmatprep.subr.bf16.mxu0 %v18645_v10  ;;  %v18687_v10 = vld [vmem:[%s21553_s16 + $0x2b4] ss:$48 sps:$4 sm:$0xff]  }
 0x344   : > { %3816 = vmatpush1.bf16.msra.mxu0 %v18643_v11  ;;  %v18814_v11 = vld [vmem:[%s21553_s16 + $0x48c] ss:$48 sps:$4 sm:$0xff]  }
 0x345   : > { %3817 = vmatprep.subr.bf16.mxu0 %v18648_v12  ;;  %v18819_v12 = vld [vmem:[%s21553_s16 + $0x488] ss:$48 sps:$4 sm:$0xff]   ;;  %3872 = vmatprep.subr.bf16.mxu1 %v18814_v11  ;;  %v18900_v11 = vld [vmem:[%s21553_s16 + $0x9cc] ss:$48 sps:$4 sm:$0xff]  }
 0x346   : > { %3873 = vmatpush1.bf16.msra.mxu1 %v18819_v12  ;;  %v18898_v12 = vld [vmem:[%s21553_s16 + $0x9c8] ss:$48 sps:$4 sm:$0xff]  }
 0x347   : > { %3874 = vmatprep.subr.bf16.mxu1 %v18820_v15  ;;  %v18906_v15 = vld [vmem:[%s21553_s16 + $0xa2c] ss:$48 sps:$4 sm:$0xff]  }
 0x348   : > { %3818 = vmatpush1.bf16.msra.mxu0 %v18646_v13  ;;  %v18685_v13 = vld [vmem:[%s21553_s16 + $0x2b0] ss:$48 sps:$4 sm:$0xff]  }
 0x349   : > { %3819 = vmatprep.subr.bf16.mxu0 %v18651_v14  ;;  %v18690_v14 = vld [vmem:[%s21553_s16 + $0x314] ss:$48 sps:$4 sm:$0xff]  }
 0x34a   : > { %3875 = vmatpush1.bf16.msra.mxu1 %v18825_v16  ;;  %v18730_v16 = vld [vmem:[%s21553_s16 + $0x850] ss:$48 sps:$4 sm:$0xff]  }
 0x34b   : > { %3876 = vmatprep.subr.bf16.mxu1 %v18826_v19  ;;  %v18912_v19 = vld [vmem:[%s21553_s16 + $0xa8c] ss:$48 sps:$4 sm:$0xff]  }
 0x34c   : > { %3820 = vmatpush1.bf16.msra.mxu0 %v18649_v17  ;;  %v18688_v17 = vld [vmem:[%s21553_s16 + $0x310] ss:$48 sps:$4 sm:$0xff]  }
 0x34d   : > { %3821 = vmatprep.subr.bf16.mxu0 %v18654_v18  ;;  %v18693_v18 = vld [vmem:[%s21553_s16 + $0x374] ss:$48 sps:$4 sm:$0xff]  }
 0x34e   : > { %3877 = vmatpush1.bf16.msra.mxu1 %v18831_v20  ;;  %v18733_v20 = vld [vmem:[%s21553_s16 + $0x8b0] ss:$48 sps:$4 sm:$0xff]  }
 0x34f   : > { %3878 = vmatprep.subr.bf16.mxu1 %v18832_v23  ;;  %v18918_v23 = vld [vmem:[%s21553_s16 + $0xaec] ss:$48 sps:$4 sm:$0xff]  }
 0x350   : > { %3822 = vmatpush1.bf16.msra.mxu0 %v18652_v21  ;;  %v18691_v21 = vld [vmem:[%s21553_s16 + $0x370] ss:$48 sps:$4 sm:$0xff]  }
 0x351   : > { %3823 = vmatprep.subr.bf16.mxu0 %v18657_v22  ;;  %v18696_v22 = vld [vmem:[%s21553_s16 + $0x3d4] ss:$48 sps:$4 sm:$0xff]  }
 0x352   : > { %3879 = vmatpush1.bf16.msra.mxu1 %v18837_v24  ;;  %v18736_v24 = vld [vmem:[%s21553_s16 + $0x910] ss:$48 sps:$4 sm:$0xff]  }
 0x353   : > { %3899 = vmatprep.subr.bf16.mxu1 %v18840_v28  ;;  %v18924_v28 = vld [vmem:[%s21553_s16 + $0xb4c] ss:$48 sps:$4 sm:$0xff]  }
 0x354   : > { %3824 = vmatpush1.bf16.msra.mxu0 %v18655_v25  ;;  %v18694_v25 = vld [vmem:[%s21553_s16 + $0x3d0] ss:$48 sps:$4 sm:$0xff]  }
 0x355   : > { %3825 = vmatprep.subr.bf16.mxu0 %v18660_v27  ;;  %v18699_v27 = vld [vmem:[%s21553_s16 + $0x434] ss:$48 sps:$4 sm:$0xff]   ;;  %3881 = vmatmul.mubr.bf16.vlgmr.msra.gmra.mrb[0].mxu1 %v21808_v50 }
 0x356   : > { %3900 = vmatpush1.bf16.msra.mxu1 %v18838_v29  ;;  %3890 = vmatprep.mubr.bf16.mxu1 %v21811_v52  ;;  %v18922_v29 = vld [vmem:[%s21553_s16 + $0xb48] ss:$48 sps:$4 sm:$0xff]  }
 0x357   : > { %3901 = vmatprep.subr.bf16.mxu1 %v18846_v32  ;;  %v18930_v32 = vld [vmem:[%s21553_s16 + $0xbac] ss:$48 sps:$4 sm:$0xff]  }
 0x358   : > { %3826 = vmatpush1.bf16.msra.mxu0 %v18658_v30  ;;  %v18697_v30 = vld [vmem:[%s21553_s16 + $0x430] ss:$48 sps:$4 sm:$0xff]  }
 0x359   : > { %3827 = vmatprep.subr.bf16.mxu0 %v18663_v31  ;;  %v18702_v31 = vld [vmem:[%s21553_s16 + $0x494] ss:$48 sps:$4 sm:$0xff]  }
 0x35a   : > { %3902 = vmatpush1.bf16.msra.mxu1 %v18844_v33  ;;  %v18928_v33 = vld [vmem:[%s21553_s16 + $0xba8] ss:$48 sps:$4 sm:$0xff]  }
 0x35b   : > { %3903 = vmatprep.subr.bf16.mxu1 %v18852_v36  ;;  %v18936_v36 = vld [vmem:[%s21553_s16 + $0x1c] ss:$48 sps:$4 sm:$0xff]  }
 0x35c   : > { %3828 = vmatpush1.bf16.msra.mxu0 %v18661_v34  ;;  %v18700_v34 = vld [vmem:[%s21553_s16 + $0x490] ss:$48 sps:$4 sm:$0xff]  }
 0x35d   : > { %3950 = vmatprep.subr.bf16.mxu0 %v18666_v37  ;;  %v18850_v37 = vld [vmem:[%s21553_s16 + $0x6c8] ss:$48 sps:$4 sm:$0xff]   ;;  %3891 = vmatmul.mubr.bf16.gmra.mrb[4].mxu1 %v21818_v59 }
 0x35e   : > { %3904 = vmatpush1.bf16.msra.mxu1 %v18850_v37  ;;  %3931 = vmatprep.mubr.bf16.mxu1 %v21822_v62  ;;  %v18934_v37 = vld [vmem:[%s21553_s16 + $0x18] ss:$48 sps:$4 sm:$0xff]  }
 0x35f   : > { %3830 = vmatmul.mubr.bf16.vlgmr.msra.gmra.mrb[0].mxu0 %v21865_v42  ;;  %3905 = vmatprep.subr.bf16.mxu1 %v18858_v40  ;;  %v18942_v40 = vld [vmem:[%s21553_s16 + $0x7c] ss:$48 sps:$4 sm:$0xff]  }
 0x360   : > { %3951 = vmatpush1.bf16.msra.mxu0 %v18664_v41  ;;  %3839 = vmatprep.mubr.bf16.mxu0 %v21867_v43  ;;  %v18856_v41 = vld [vmem:[%s21553_s16 + $0x728] ss:$48 sps:$4 sm:$0xff]  }
 0x361   : > { %3952 = vmatprep.subr.bf16.mxu0 %v18669_v45  ;;  %v18711_v45 = vld [vmem:[%s21553_s16 + $0x5b4] ss:$48 sps:$4 sm:$0xff]  }
 0x362   : > { %3906 = vmatpush1.bf16.msra.mxu1 %v18856_v41  ;;  %v18940_v41 = vld [vmem:[%s21553_s16 + $0x78] ss:$48 sps:$4 sm:$0xff]  }
 0x364   : > { %3953 = vmatpush1.bf16.msra.mxu0 %v18667_v46  ;;  %v18864_v46 = vld [vmem:[%s21553_s16 + $0x78c] ss:$48 sps:$4 sm:$0xff]  }
 0x365   : > { %3954 = vmatprep.subr.bf16.mxu0 %v18672_v49  ;;  %3907 = vmatprep.subr.bf16.mxu1 %v18864_v46  ;;  %v18714_v49 = vld [vmem:[%s21553_s16 + $0x614] ss:$48 sps:$4 sm:$0xff]   ;;  %v18948_v46 = vld [vmem:[%s21553_s16 + $0xdc] ss:$48 sps:$4 sm:$0xff]  }
 0x366   : > { %3908 = vmatpush1.bf16.msra.mxu1 %v18862_v47  ;;  %v18946_v47 = vld [vmem:[%s21553_s16 + $0xd8] ss:$48 sps:$4 sm:$0xff]  }
 0x367   : > { %3840 = vmatmul.mubr.bf16.gmra.mrb[4].mxu0 %v21879_v55  ;;  %3909 = vmatprep.subr.bf16.mxu1 %v18870_v51  ;;  %v18954_v51 = vld [vmem:[%s21553_s16 + $0x13c] ss:$48 sps:$4 sm:$0xff]  }
 0x368   : > { %3955 = vmatpush1.bf16.msra.mxu0 %v18670_v54  ;;  %3982 = vmatprep.mubr.bf16.mxu0 %v21784_v26  ;;  %v18712_v54 = vld [vmem:[%s21553_s16 + $0x610] ss:$48 sps:$4 sm:$0xff]  }
 0x369   : > { %3956 = vmatprep.subr.bf16.mxu0 %v18675_v57  ;;  %v18876_v57 = vld [vmem:[%s21553_s16 + $0x84c] ss:$48 sps:$4 sm:$0xff]  }
 0x36a   : > { %3910 = vmatpush1.bf16.msra.mxu1 %v18868_v53  ;;  %v18952_v53 = vld [vmem:[%s21553_s16 + $0x138] ss:$48 sps:$4 sm:$0xff]  }
 0x36b   : > { %3911 = vmatprep.subr.bf16.mxu1 %v18876_v57  ;;  %v18960_v57 = vld [vmem:[%s21553_s16 + $0x19c] ss:$48 sps:$4 sm:$0xff]  }
 0x36c   : > { %3957 = vmatpush1.bf16.msra.mxu0 %v18673_v60  ;;  %v18715_v60 = vld [vmem:[%s21553_s16 + $0x670] ss:$48 sps:$4 sm:$0xff]  }
 0x36d   : > { %3958 = vmatprep.subr.bf16.mxu0 %v18678_v61  ;;  %v18720_v61 = vld [vmem:[%s21553_s16 + $0x6d4] ss:$48 sps:$4 sm:$0xff]  }
 0x36e   : > { %3912 = vmatpush1.bf16.msra.mxu1 %v18874_v58  ;;  %v18958_v58 = vld [vmem:[%s21553_s16 + $0x198] ss:$48 sps:$4 sm:$0xff]  }
 0x36f   : > { %3913 = vmatprep.subr.bf16.mxu1 %v18882_v63  ;;  %v18966_v63 = vld [vmem:[%s21553_s16 + $0x1fc] ss:$48 sps:$4 sm:$0xff]  }
 0x370   : > { %3959 = vmatpush1.bf16.msra.mxu0 %v18676_v1  ;;  %v18718_v1 = vld [vmem:[%s21553_s16 + $0x6d0] ss:$48 sps:$4 sm:$0xff]  }
 0x371   : > { %3960 = vmatprep.subr.bf16.mxu0 %v18681_v2  ;;  %v18723_v2 = vld [vmem:[%s21553_s16 + $0x734] ss:$48 sps:$4 sm:$0xff]  }
 0x372   : > { %3914 = vmatpush1.bf16.msra.mxu1 %v18880_v0  ;;  %v18964_v0 = vld [vmem:[%s21553_s16 + $0x1f8] ss:$48 sps:$4 sm:$0xff]  }
 0x373   : > { %3915 = vmatprep.subr.bf16.mxu1 %v18888_v3  ;;  %v18970_v3 = vld [vmem:[%s21553_s16 + $0x258] ss:$48 sps:$4 sm:$0xff]  }
 0x374   : > { %3961 = vmatpush1.bf16.msra.mxu0 %v18679_v5  ;;  %v18721_v5 = vld [vmem:[%s21553_s16 + $0x730] ss:$48 sps:$4 sm:$0xff]  }
 0x375   : > { %3962 = vmatprep.subr.bf16.mxu0 %v18684_v6  ;;  %v18726_v6 = vld [vmem:[%s21553_s16 + $0x794] ss:$48 sps:$4 sm:$0xff]  }
 0x376   : > { %3916 = vmatpush1.bf16.msra.mxu1 %v18886_v4  ;;  %v18972_v4 = vld [vmem:[%s21553_s16 + $0x25c] ss:$48 sps:$4 sm:$0xff]  }
 0x377   : > { %3917 = vmatprep.subr.bf16.mxu1 %v18894_v7  ;;  %v18975_v7 = vld [vmem:[%s21553_s16 + $0x2bc] ss:$48 sps:$4 sm:$0xff]  }
 0x378   : > { %3963 = vmatpush1.bf16.msra.mxu0 %v18682_v9  ;;  %v18724_v9 = vld [vmem:[%s21553_s16 + $0x790] ss:$48 sps:$4 sm:$0xff]  }
 0x379   : > { %3964 = vmatprep.subr.bf16.mxu0 %v18687_v10  ;;  %v18729_v10 = vld [vmem:[%s21553_s16 + $0x7f4] ss:$48 sps:$4 sm:$0xff]  }
 0x37a   : > { %3918 = vmatpush1.bf16.msra.mxu1 %v18892_v8  ;;  %v18973_v8 = vld [vmem:[%s21553_s16 + $0x2b8] ss:$48 sps:$4 sm:$0xff]  }
 0x37b   : > { %3919 = vmatprep.subr.bf16.mxu1 %v18900_v11  ;;  %v18800_v11 = vld [vmem:[%s21553_s16 + $0x144] ss:$48 sps:$4 sm:$0xff]  }
 0x37c   : > { %3965 = vmatpush1.bf16.msra.mxu0 %v18685_v13  ;;  %v18727_v13 = vld [vmem:[%s21553_s16 + $0x7f0] ss:$48 sps:$4 sm:$0xff]  }
 0x37d   : > { %3966 = vmatprep.subr.bf16.mxu0 %v18690_v14  ;;  %v18732_v14 = vld [vmem:[%s21553_s16 + $0x854] ss:$48 sps:$4 sm:$0xff]  }
 0x37e   : > { %3920 = vmatpush1.bf16.msra.mxu1 %v18898_v12  ;;  %v18976_v12 = vld [vmem:[%s21553_s16 + $0x318] ss:$48 sps:$4 sm:$0xff]  }
 0x37f   : > { %3921 = vmatprep.subr.bf16.mxu1 %v18906_v15  ;;  %v18806_v15 = vld [vmem:[%s21553_s16 + $0x1a4] ss:$48 sps:$4 sm:$0xff]  }
 0x380   : > { %3967 = vmatpush1.bf16.msra.mxu0 %v18688_v17  ;;  %v18904_v17 = vld [vmem:[%s21553_s16 + $0xa28] ss:$48 sps:$4 sm:$0xff]  }
 0x381   : > { %3968 = vmatprep.subr.bf16.mxu0 %v18693_v18  ;;  %v18735_v18 = vld [vmem:[%s21553_s16 + $0x8b4] ss:$48 sps:$4 sm:$0xff]  }
 0x382   : > { %3922 = vmatpush1.bf16.msra.mxu1 %v18904_v17  ;;  %v18984_v17 = vld [vmem:[%s21553_s16 + $0x3dc] ss:$48 sps:$4 sm:$0xff]  }
 0x383   : > { %3923 = vmatprep.subr.bf16.mxu1 %v18912_v19  ;;  %v18812_v19 = vld [vmem:[%s21553_s16 + $0x204] ss:$48 sps:$4 sm:$0xff]  }
 0x384   : > { %3969 = vmatpush1.bf16.msra.mxu0 %v18691_v21  ;;  %v18910_v21 = vld [vmem:[%s21553_s16 + $0xa88] ss:$48 sps:$4 sm:$0xff]  }
 0x385   : > { %3970 = vmatprep.subr.bf16.mxu0 %v18696_v22  ;;  %v18738_v22 = vld [vmem:[%s21553_s16 + $0x914] ss:$48 sps:$4 sm:$0xff]  }
 0x386   : > { %3924 = vmatpush1.bf16.msra.mxu1 %v18910_v21  ;;  %v18987_v21 = vld [vmem:[%s21553_s16 + $0x43c] ss:$48 sps:$4 sm:$0xff]  }
 0x387   : > { %3925 = vmatprep.subr.bf16.mxu1 %v18918_v23  ;;  %v18818_v23 = vld [vmem:[%s21553_s16 + $0x264] ss:$48 sps:$4 sm:$0xff]  }
 0x388   : > { %3971 = vmatpush1.bf16.msra.mxu0 %v18694_v25  ;;  %v18916_v25 = vld [vmem:[%s21553_s16 + $0xae8] ss:$48 sps:$4 sm:$0xff]  }
 0x389   : > { %3972 = vmatprep.subr.bf16.mxu0 %v18699_v27  ;;  %v18741_v27 = vld [vmem:[%s21553_s16 + $0x974] ss:$48 sps:$4 sm:$0xff]  }
 0x38a   : > { %3926 = vmatpush1.bf16.msra.mxu1 %v18916_v25  ;;  %v18990_v25 = vld [vmem:[%s21553_s16 + $0x49c] ss:$48 sps:$4 sm:$0xff]  }
 0x38b   : > { %3927 = vmatprep.subr.bf16.mxu1 %v18924_v28  ;;  %v18824_v28 = vld [vmem:[%s21553_s16 + $0x2c4] ss:$48 sps:$4 sm:$0xff]  }
 0x38c   : > { %3973 = vmatpush1.bf16.msra.mxu0 %v18697_v30  ;;  %v18739_v30 = vld [vmem:[%s21553_s16 + $0x970] ss:$48 sps:$4 sm:$0xff]  }
 0x38d   : > { %3974 = vmatprep.subr.bf16.mxu0 %v18702_v31  ;;  %v18746_v31 = vld [vmem:[%s21553_s16 + $0x9d4] ss:$48 sps:$4 sm:$0xff]  }
 0x38e   : > { %3928 = vmatpush1.bf16.msra.mxu1 %v18922_v29  ;;  %v18988_v29 = vld [vmem:[%s21553_s16 + $0x498] ss:$48 sps:$4 sm:$0xff]  }
 0x38f   : > { %3929 = vmatprep.subr.bf16.mxu1 %v18930_v32  ;;  %v18830_v32 = vld [vmem:[%s21553_s16 + $0x324] ss:$48 sps:$4 sm:$0xff]  }
 0x390   : > { %3975 = vmatpush1.bf16.msra.mxu0 %v18700_v34  ;;  %v18744_v34 = vld [vmem:[%s21553_s16 + $0x9d0] ss:$48 sps:$4 sm:$0xff]  }
 0x391   : > { %3976 = vmatprep.subr.bf16.mxu0 %v18705_v35  ;;  %v18752_v35 = vld [vmem:[%s21553_s16 + $0xa34] ss:$48 sps:$4 sm:$0xff]  }
 0x392   : > { %3930 = vmatpush1.bf16.msra.mxu1 %v18928_v33  ;;  %v18991_v33 = vld [vmem:[%s21553_s16 + $0x4f8] ss:$48 sps:$4 sm:$0xff]  }
 0x393   : > { %4052 = vmatprep.subr.bf16.mxu1 %v18936_v36  ;;  %v18836_v36 = vld [vmem:[%s21553_s16 + $0x384] ss:$48 sps:$4 sm:$0xff]  }
 0x394   : > { %3977 = vmatpush1.bf16.msra.mxu0 %v18703_v38  ;;  %v18750_v38 = vld [vmem:[%s21553_s16 + $0xa30] ss:$48 sps:$4 sm:$0xff]  }
 0x395   : > { %3978 = vmatprep.subr.bf16.mxu0 %v18708_v39  ;;  %v18758_v39 = vld [vmem:[%s21553_s16 + $0xa94] ss:$48 sps:$4 sm:$0xff]   ;;  %3932 = vmatmul.mubr.bf16.vlgmr.msra.gmra.mrb[0].mxu1 %v21865_v42 }
 0x396   : > { %4053 = vmatpush1.bf16.msra.mxu1 %v18934_v37  ;;  %3941 = vmatprep.mubr.bf16.mxu1 %v21867_v43  ;;  %v18994_v37 = vld [vmem:[%s21553_s16 + $0x558] ss:$48 sps:$4 sm:$0xff]  }
 0x397   : > { %4054 = vmatprep.subr.bf16.mxu1 %v18942_v40  ;;  %v18843_v40 = vld [vmem:[%s21553_s16 + $0x3e4] ss:$48 sps:$4 sm:$0xff]  }
 0x398   : > { %3979 = vmatpush1.bf16.msra.mxu0 %v18706_v44  ;;  %v18756_v44 = vld [vmem:[%s21553_s16 + $0xa90] ss:$48 sps:$4 sm:$0xff]  }
 0x399   : > { %3980 = vmatprep.subr.bf16.mxu0 %v18711_v45  ;;  %v18764_v45 = vld [vmem:[%s21553_s16 + $0xaf4] ss:$48 sps:$4 sm:$0xff]  }
 0x39a   : > { %4055 = vmatpush1.bf16.msra.mxu1 %v18940_v41  ;;  %v18997_v41 = vld [vmem:[%s21553_s16 + $0x5b8] ss:$48 sps:$4 sm:$0xff]  }
 0x39b   : > { %4056 = vmatprep.subr.bf16.mxu1 %v18948_v46  ;;  %v18849_v46 = vld [vmem:[%s21553_s16 + $0x444] ss:$48 sps:$4 sm:$0xff]  }
 0x39c   : > { %3981 = vmatpush1.bf16.msra.mxu0 %v18709_v48  ;;  %v18762_v48 = vld [vmem:[%s21553_s16 + $0xaf0] ss:$48 sps:$4 sm:$0xff]  }
 0x39d   : > { %4001 = vmatprep.subr.bf16.mxu0 %v18714_v49  ;;  %v18770_v49 = vld [vmem:[%s21553_s16 + $0xb54] ss:$48 sps:$4 sm:$0xff]   ;;  %3942 = vmatmul.mubr.bf16.gmra.mrb[4].mxu1 %v21879_v55 }
 0x39e   : > { %4057 = vmatpush1.bf16.msra.mxu1 %v18946_v47  ;;  %4084 = vmatprep.mubr.bf16.mxu1 %v21784_v26  ;;  %v19000_v47 = vld [vmem:[%s21553_s16 + $0x618] ss:$48 sps:$4 sm:$0xff]  }
 0x39f   : > { %3983 = vmatmul.mubr.bf16.vlgmr.msra.gmra.mrb[8].mxu0 %v21808_v50  ;;  %4058 = vmatprep.subr.bf16.mxu1 %v18954_v51  ;;  %v18855_v51 = vld [vmem:[%s21553_s16 + $0x4a4] ss:$48 sps:$4 sm:$0xff]  }
 0x3a0   : > { %4002 = vmatpush1.bf16.msra.mxu0 %v18712_v54  ;;  %3992 = vmatprep.mubr.bf16.mxu0 %v21811_v52  ;;  %v18768_v54 = vld [vmem:[%s21553_s16 + $0xb50] ss:$48 sps:$4 sm:$0xff]  }
 0x3a1   : > { %4003 = vmatprep.subr.bf16.mxu0 %v18717_v56  ;;  %v18776_v56 = vld [vmem:[%s21553_s16 + $0xbb4] ss:$48 sps:$4 sm:$0xff]  }
 0x3a2   : > { %4059 = vmatpush1.bf16.msra.mxu1 %v18952_v53  ;;  %v19003_v53 = vld [vmem:[%s21553_s16 + $0x678] ss:$48 sps:$4 sm:$0xff]  }
 0x3a3   : > { %4060 = vmatprep.subr.bf16.mxu1 %v18960_v57  ;;  %v18861_v57 = vld [vmem:[%s21553_s16 + $0x504] ss:$48 sps:$4 sm:$0xff]  }
 0x3a4   : > { %4004 = vmatpush1.bf16.msra.mxu0 %v18715_v60  ;;  %v18774_v60 = vld [vmem:[%s21553_s16 + $0xbb0] ss:$48 sps:$4 sm:$0xff]  }
 0x3a5   : > { %4005 = vmatprep.subr.bf16.mxu0 %v18720_v61  ;;  %v18782_v61 = vld [vmem:[%s21553_s16 + $0x24] ss:$48 sps:$4 sm:$0xff]  }
 0x3a6   : > { %4061 = vmatpush1.bf16.msra.mxu1 %v18958_v58  ;;  %v19006_v58 = vld [vmem:[%s21553_s16 + $0x6d8] ss:$48 sps:$4 sm:$0xff]  }
 0x3a7   : > { %3993 = vmatmul.mubr.bf16.gmra.mrb[12].mxu0 %v21818_v59  ;;  %4062 = vmatprep.subr.bf16.mxu1 %v18966_v63  ;;  %v18867_v63 = vld [vmem:[%s21553_s16 + $0x564] ss:$48 sps:$4 sm:$0xff]  }
 0x3a8   : > { %4006 = vmatpush1.bf16.msra.mxu0 %v18718_v1  ;;  %4033 = vmatprep.mubr.bf16.mxu0 %v21822_v62  ;;  %v18780_v1 = vld [vmem:[%s21553_s16 + $0x20] ss:$48 sps:$4 sm:$0xff]  }
 0x3a9   : > { %4007 = vmatprep.subr.bf16.mxu0 %v18723_v2  ;;  %v18788_v2 = vld [vmem:[%s21553_s16 + $0x84] ss:$48 sps:$4 sm:$0xff]  }
 0x3aa   : > { %4063 = vmatpush1.bf16.msra.mxu1 %v18964_v0  ;;  %v19009_v0 = vld [vmem:[%s21553_s16 + $0x738] ss:$48 sps:$4 sm:$0xff]  }
 0x3ab   : > { %4064 = vmatprep.subr.bf16.mxu1 %v18972_v4  ;;  %v19012_v4 = vld [vmem:[%s21553_s16 + $0x798] ss:$48 sps:$4 sm:$0xff]  }
 0x3ac   : > { %4008 = vmatpush1.bf16.msra.mxu0 %v18721_v5  ;;  %v18786_v5 = vld [vmem:[%s21553_s16 + $0x80] ss:$48 sps:$4 sm:$0xff]  }
 0x3ad   : > { %4009 = vmatprep.subr.bf16.mxu0 %v18726_v6  ;;  %v18794_v6 = vld [vmem:[%s21553_s16 + $0xe4] ss:$48 sps:$4 sm:$0xff]  }
 0x3ae   : > { %4065 = vmatpush1.bf16.msra.mxu1 %v18970_v3  ;;  %v18873_v3 = vld [vmem:[%s21553_s16 + $0x5c4] ss:$48 sps:$4 sm:$0xff]  }
 0x3af   : > { %4066 = vmatprep.subr.bf16.mxu1 %v18975_v7  ;;  %v18879_v7 = vld [vmem:[%s21553_s16 + $0x624] ss:$48 sps:$4 sm:$0xff]  }
 0x3b0   : > { %4010 = vmatpush1.bf16.msra.mxu0 %v18724_v9  ;;  %v18978_v9 = vld [vmem:[%s21553_s16 + $0x31c] ss:$48 sps:$4 sm:$0xff]  }
 0x3b1   : > { %4011 = vmatprep.subr.bf16.mxu0 %v18729_v10  ;;  %v18792_v10 = vld [vmem:[%s21553_s16 + $0xe0] ss:$48 sps:$4 sm:$0xff]  }
 0x3b2   : > { %4067 = vmatpush1.bf16.msra.mxu1 %v18973_v8  ;;  %v19015_v8 = vld [vmem:[%s21553_s16 + $0x7f8] ss:$48 sps:$4 sm:$0xff]  }
 0x3b3   : > { %4068 = vmatprep.subr.bf16.mxu1 %v18978_v9  ;;  %v19020_v9 = vld [vmem:[%s21553_s16 + $0x85c] ss:$48 sps:$4 sm:$0xff]  }
 0x3b4   : > { %4012 = vmatpush1.bf16.msra.mxu0 %v18727_v13  ;;  %v18798_v13 = vld [vmem:[%s21553_s16 + $0x140] ss:$48 sps:$4 sm:$0xff]  }
 0x3b5   : > { %4013 = vmatprep.subr.bf16.mxu0 %v18732_v14  ;;  %v18981_v14 = vld [vmem:[%s21553_s16 + $0x37c] ss:$48 sps:$4 sm:$0xff]  }
 0x3b6   : > { %4069 = vmatpush1.bf16.msra.mxu1 %v18976_v12  ;;  %v19018_v12 = vld [vmem:[%s21553_s16 + $0x858] ss:$48 sps:$4 sm:$0xff]  }
 0x3b7   : > { %4070 = vmatprep.subr.bf16.mxu1 %v18981_v14  ;;  %v18883_v14 = vld [vmem:[%s21553_s16 + $0x680] ss:$48 sps:$4 sm:$0xff]  }
 0x3b8   : > { %4014 = vmatpush1.bf16.msra.mxu0 %v18730_v16  ;;  %v18979_v16 = vld [vmem:[%s21553_s16 + $0x378] ss:$48 sps:$4 sm:$0xff]  }
 0x3b9   : > { %4015 = vmatprep.subr.bf16.mxu0 %v18735_v18  ;;  %v18804_v18 = vld [vmem:[%s21553_s16 + $0x1a0] ss:$48 sps:$4 sm:$0xff]  }
 0x3ba   : > { %4071 = vmatpush1.bf16.msra.mxu1 %v18979_v16  ;;  %v19021_v16 = vld [vmem:[%s21553_s16 + $0x8b8] ss:$48 sps:$4 sm:$0xff]  }
 0x3bb   : > { %4072 = vmatprep.subr.bf16.mxu1 %v18984_v17  ;;  %v19026_v17 = vld [vmem:[%s21553_s16 + $0x91c] ss:$48 sps:$4 sm:$0xff]  }
 0x3bc   : > { %4016 = vmatpush1.bf16.msra.mxu0 %v18733_v20  ;;  %v18982_v20 = vld [vmem:[%s21553_s16 + $0x3d8] ss:$48 sps:$4 sm:$0xff]  }
 0x3bd   : > { %4017 = vmatprep.subr.bf16.mxu0 %v18738_v22  ;;  %v18810_v22 = vld [vmem:[%s21553_s16 + $0x200] ss:$48 sps:$4 sm:$0xff]  }
 0x3be   : > { %4073 = vmatpush1.bf16.msra.mxu1 %v18982_v20  ;;  %v19024_v20 = vld [vmem:[%s21553_s16 + $0x918] ss:$48 sps:$4 sm:$0xff]  }
 0x3bf   : > { %4074 = vmatprep.subr.bf16.mxu1 %v18987_v21  ;;  %v19029_v21 = vld [vmem:[%s21553_s16 + $0x97c] ss:$48 sps:$4 sm:$0xff]  }
 0x3c0   : > { %4018 = vmatpush1.bf16.msra.mxu0 %v18736_v24  ;;  %v18985_v24 = vld [vmem:[%s21553_s16 + $0x438] ss:$48 sps:$4 sm:$0xff]  }
 0x3c1   : > { %4019 = vmatprep.subr.bf16.mxu0 %v18741_v27  ;;  %v18816_v27 = vld [vmem:[%s21553_s16 + $0x260] ss:$48 sps:$4 sm:$0xff]  }
 0x3c2   : > { %4075 = vmatpush1.bf16.msra.mxu1 %v18985_v24  ;;  %v18903_v24 = vld [vmem:[%s21553_s16 + $0x7a4] ss:$48 sps:$4 sm:$0xff]  }
 0x3c3   : > { %4076 = vmatprep.subr.bf16.mxu1 %v18990_v25  ;;  %v19027_v25 = vld [vmem:[%s21553_s16 + $0x978] ss:$48 sps:$4 sm:$0xff]  }
 0x3c4   : > { %4020 = vmatpush1.bf16.msra.mxu0 %v18739_v30  ;;  %v18993_v30 = vld [vmem:[%s21553_s16 + $0x4fc] ss:$48 sps:$4 sm:$0xff]  }
 0x3c5   : > { %4021 = vmatprep.subr.bf16.mxu0 %v18746_v31  ;;  %v18822_v31 = vld [vmem:[%s21553_s16 + $0x2c0] ss:$48 sps:$4 sm:$0xff]  }
 0x3c6   : > { %4077 = vmatpush1.bf16.msra.mxu1 %v18988_v29  ;;  %v18901_v29 = vld [vmem:[%s21553_s16 + $0x7a0] ss:$48 sps:$4 sm:$0xff]  }
 0x3c7   : > { %4078 = vmatprep.subr.bf16.mxu1 %v18993_v30  ;;  %v18909_v30 = vld [vmem:[%s21553_s16 + $0x804] ss:$48 sps:$4 sm:$0xff]  }
 0x3c8   : > { %4022 = vmatpush1.bf16.msra.mxu0 %v18744_v34  ;;  %v18996_v34 = vld [vmem:[%s21553_s16 + $0x55c] ss:$48 sps:$4 sm:$0xff]  }
 0x3c9   : > { %4023 = vmatprep.subr.bf16.mxu0 %v18752_v35  ;;  %v18828_v35 = vld [vmem:[%s21553_s16 + $0x320] ss:$48 sps:$4 sm:$0xff]  }
 0x3ca   : > { %4079 = vmatpush1.bf16.msra.mxu1 %v18991_v33 }
 0x3cb   : > { %4080 = vmatprep.subr.bf16.mxu1 %v18996_v34 }
 0x3cc   : > { %4024 = vmatpush1.bf16.msra.mxu0 %v18750_v38  ;;  %v18999_v38 = vld [vmem:[%s21553_s16 + $0x5bc] ss:$48 sps:$4 sm:$0xff]  }
 0x3cd   : > { %4025 = vmatprep.subr.bf16.mxu0 %v18758_v39  ;;  %v18834_v39 = vld [vmem:[%s21553_s16 + $0x380] ss:$48 sps:$4 sm:$0xff]  }
 0x3ce   : > { %4081 = vmatpush1.bf16.msra.mxu1 %v18994_v37 }
 0x3cf   : > { %4082 = vmatprep.subr.bf16.mxu1 %v18999_v38  ;;  %v19035_v38 = vld [vmem:[%s21553_s16 + $0xa3c] ss:$48 sps:$4 sm:$0xff]  }
 0x3d0   : > { %4026 = vmatpush1.bf16.msra.mxu0 %v18756_v44  ;;  %v19002_v44 = vld [vmem:[%s21553_s16 + $0x61c] ss:$48 sps:$4 sm:$0xff]  }
 0x3d1   : > { %4027 = vmatprep.subr.bf16.mxu0 %v18764_v45  ;;  %v18841_v45 = vld [vmem:[%s21553_s16 + $0x3e0] ss:$48 sps:$4 sm:$0xff]  }
 0x3d2   : > { %4083 = vmatpush1.bf16.msra.mxu1 %v18997_v41  ;;  %v18913_v41 = vld [vmem:[%s21553_s16 + $0x860] ss:$48 sps:$4 sm:$0xff]  }
 0x3d3   : > { %4103 = vmatprep.subr.bf16.mxu1 %v19002_v44  ;;  %v19033_v44 = vld [vmem:[%s21553_s16 + $0xa38] ss:$48 sps:$4 sm:$0xff]  }
 0x3d4   : > { %4028 = vmatpush1.bf16.msra.mxu0 %v18762_v48  ;;  %v19005_v48 = vld [vmem:[%s21553_s16 + $0x67c] ss:$48 sps:$4 sm:$0xff]  }
 0x3d5   : > { %4029 = vmatprep.subr.bf16.mxu0 %v18770_v49  ;;  %v18847_v49 = vld [vmem:[%s21553_s16 + $0x440] ss:$48 sps:$4 sm:$0xff]   ;;  %4085 = vmatmul.mubr.bf16.vlgmr.msra.gmra.mrb[8].mxu1 %v21808_v50 }
 0x3d6   : > { %4104 = vmatpush1.bf16.msra.mxu1 %v19000_v47  ;;  %4094 = vmatprep.mubr.bf16.mxu1 %v21811_v52 }
 0x3d7   : > { %4105 = vmatprep.subr.bf16.mxu1 %v19005_v48 }
 0x3d8   : > { %4030 = vmatpush1.bf16.msra.mxu0 %v18768_v54  ;;  %v19008_v54 = vld [vmem:[%s21553_s16 + $0x6dc] ss:$48 sps:$4 sm:$0xff]  }
 0x3d9   : > { %4031 = vmatprep.subr.bf16.mxu0 %v18776_v56  ;;  %v18853_v56 = vld [vmem:[%s21553_s16 + $0x4a0] ss:$48 sps:$4 sm:$0xff]  }
 0x3da   : > { %4106 = vmatpush1.bf16.msra.mxu1 %v19003_v53  ;;  %v19038_v53 = vld [vmem:[%s21553_s16 + $0xa9c] ss:$48 sps:$4 sm:$0xff]  }
 0x3db   : > { %4107 = vmatprep.subr.bf16.mxu1 %v19008_v54 }
 0x3dc   : > { %4032 = vmatpush1.bf16.msra.mxu0 %v18774_v60  ;;  %v19011_v60 = vld [vmem:[%s21553_s16 + $0x73c] ss:$48 sps:$4 sm:$0xff]  }
 0x3dd   : > { %4154 = vmatprep.subr.bf16.mxu0 %v18782_v61  ;;  %v18859_v61 = vld [vmem:[%s21553_s16 + $0x500] ss:$48 sps:$4 sm:$0xff]   ;;  %4095 = vmatmul.mubr.bf16.gmra.mrb[12].mxu1 %v21818_v59 }
 0x3de   : > { %4108 = vmatpush1.bf16.msra.mxu1 %v19006_v58  ;;  %4135 = vmatprep.mubr.bf16.mxu1 %v21822_v62  ;;  %v19036_v58 = vld [vmem:[%s21553_s16 + $0xa98] ss:$48 sps:$4 sm:$0xff]  }
 0x3df   : > { %4034 = vmatmul.mubr.bf16.vlgmr.msra.gmra.mrb[8].mxu0 %v21865_v42  ;;  %4109 = vmatprep.subr.bf16.mxu1 %v19011_v60 }
 0x3e0   : > { %4155 = vmatpush1.bf16.msra.mxu0 %v18780_v1  ;;  %4043 = vmatprep.mubr.bf16.mxu0 %v21867_v43  ;;  %v19014_v1 = vld [vmem:[%s21553_s16 + $0x79c] ss:$48 sps:$4 sm:$0xff]  }
 0x3e1   : > { %4156 = vmatprep.subr.bf16.mxu0 %v18788_v2  ;;  %v18865_v2 = vld [vmem:[%s21553_s16 + $0x560] ss:$48 sps:$4 sm:$0xff]  }
 0x3e2   : > { %4110 = vmatpush1.bf16.msra.mxu1 %v19009_v0  ;;  %v19041_v0 = vld [vmem:[%s21553_s16 + $0xafc] ss:$48 sps:$4 sm:$0xff]  }
 0x3e3   : > { %4111 = vmatprep.subr.bf16.mxu1 %v19014_v1 }
 0x3e4   : > { %4157 = vmatpush1.bf16.msra.mxu0 %v18786_v5  ;;  %v19017_v5 = vld [vmem:[%s21553_s16 + $0x7fc] ss:$48 sps:$4 sm:$0xff]  }
 0x3e5   : > { %4158 = vmatprep.subr.bf16.mxu0 %v18794_v6  ;;  %v18871_v6 = vld [vmem:[%s21553_s16 + $0x5c0] ss:$48 sps:$4 sm:$0xff]  }
 0x3e6   : > { %4112 = vmatpush1.bf16.msra.mxu1 %v19012_v4 }
 0x3e7   : > { %4044 = vmatmul.mubr.bf16.gmra.mrb[12].mxu0 %v21879_v55  ;;  %4113 = vmatprep.subr.bf16.mxu1 %v19017_v5 }
 0x3e8   : > { %4159 = vmatpush1.bf16.msra.mxu0 %v18792_v10  ;;  %4186 = vmatprep.mubr.bf16.mxu0 %v21784_v26  ;;  %v18877_v10 = vld [vmem:[%s21553_s16 + $0x620] ss:$48 sps:$4 sm:$0xff]  }
 0x3e9   : > { %4160 = vmatprep.subr.bf16.mxu0 %v18800_v11  ;;  %v18885_v11 = vld [vmem:[%s21553_s16 + $0x684] ss:$48 sps:$4 sm:$0xff]  }
 0x3ea   : > { %4114 = vmatpush1.bf16.msra.mxu1 %v19015_v8 }
 0x3eb   : > { %4115 = vmatprep.subr.bf16.mxu1 %v19020_v9  ;;  %v19044_v9 = vld [vmem:[%s21553_s16 + $0xb5c] ss:$48 sps:$4 sm:$0xff]  }
 0x3ec   : > { %4161 = vmatpush1.bf16.msra.mxu0 %v18798_v13  ;;  %v19023_v13 = vld [vmem:[%s21553_s16 + $0x8bc] ss:$48 sps:$4 sm:$0xff]  }
 0x3ed   : > { %4162 = vmatprep.subr.bf16.mxu0 %v18806_v15  ;;  %v18891_v15 = vld [vmem:[%s21553_s16 + $0x6e4] ss:$48 sps:$4 sm:$0xff]  }
 0x3ee   : > { %4116 = vmatpush1.bf16.msra.mxu1 %v19018_v12  ;;  %v18939_v12 = vld [vmem:[%s21553_s16 + $0x9e4] ss:$48 sps:$4 sm:$0xff]  }
 0x3ef   : > { %4117 = vmatprep.subr.bf16.mxu1 %v19023_v13  ;;  %v19047_v13 = vld [vmem:[%s21553_s16 + $0xbbc] ss:$48 sps:$4 sm:$0xff]  }
 0x3f0   : > { %4163 = vmatpush1.bf16.msra.mxu0 %v18804_v18  ;;  %v18889_v18 = vld [vmem:[%s21553_s16 + $0x6e0] ss:$48 sps:$4 sm:$0xff]  }
 0x3f1   : > { %4164 = vmatprep.subr.bf16.mxu0 %v18812_v19  ;;  %v18897_v19 = vld [vmem:[%s21553_s16 + $0x744] ss:$48 sps:$4 sm:$0xff]  }
 0x3f2   : > { %4118 = vmatpush1.bf16.msra.mxu1 %v19021_v16  ;;  %v18945_v16 = vld [vmem:[%s21553_s16 + $0xa44] ss:$48 sps:$4 sm:$0xff]  }
 0x3f3   : > { %4119 = vmatprep.subr.bf16.mxu1 %v19026_v17  ;;  %v19048_v17 = vld [vmem:[%s21553_s16 + $0x28] ss:$48 sps:$4 sm:$0xff]  }
 0x3f4   : > { %4165 = vmatpush1.bf16.msra.mxu0 %v18810_v22  ;;  %v24481_v22 = vlaneseq }
 0x3f5   : > { %4166 = vmatprep.subr.bf16.mxu0 %v18818_v23  ;;  %v18895_v23 = vld [vmem:[%s21553_s16 + $0x740] ss:$48 sps:$4 sm:$0xff]  }
 0x3f6   : > { %4120 = vmatpush1.bf16.msra.mxu1 %v19024_v20  ;;  %v18951_v20 = vld [vmem:[%s21553_s16 + $0xaa4] ss:$48 sps:$4 sm:$0xff]  }
 0x3f7   : > { %4121 = vmatprep.subr.bf16.mxu1 %v19029_v21  ;;  %v19053_v21 = vld [vmem:[%s21553_s16 + $0x8c] ss:$48 sps:$4 sm:$0xff]  }
 0x3f8   : > { %4167 = vmatpush1.bf16.msra.mxu0 %v18816_v27  ;;  %v19032_v27 = vld [vmem:[%s21553_s16 + $0x9dc] ss:$48 sps:$4 sm:$0xff]  }
 0x3f9   : > { %4168 = vmatprep.subr.bf16.mxu0 %v18824_v28  ;;  %v22108_v28 = vshrl.u32 %v24481_v22, 7 }
 0x3fa   : > { %4122 = vmatpush1.bf16.msra.mxu1 %v19027_v25  ;;  %v18957_v25 = vld [vmem:[%s21553_s16 + $0xb04] ss:$48 sps:$4 sm:$0xff]  }
 0x3fb   : > { %24561 = vst [vmem:[#allocation41_spill] sm:$0xff] %v22108_v28  ;;  %v22115_v33 = vsub.s32 0, %v22108_v28  ;;  %v22118_v34 = vsub.s32 1, %v22108_v28  ;;  %4123 = vmatprep.subr.bf16.mxu1 %v19032_v27  ;;  %v19054_v27 = vld [vmem:[%s21553_s16 + $0xe8] ss:$48 sps:$4 sm:$0xff]  }
 0x3fc   : > { %4169 = vmatpush1.bf16.msra.mxu0 %v18822_v31  ;;  %v19030_v31 = vld [vmem:[%s21553_s16 + $0x9d8] ss:$48 sps:$4 sm:$0xff]  }
 0x3fd   : > { %4170 = vmatprep.subr.bf16.mxu0 %v18830_v32  ;;  %v1762_v32 = vld [vmem:[%s21565_s26] sm:$0xff] }
 0x3fe   : > { %v1769_v37 = vrot.slane %v1762_v32, %v22115_v33  ;;  %4124 = vmatpush1.bf16.msra.mxu1 %v19030_v31  ;;  %v18963_v31 = vld [vmem:[%s21553_s16 + $0xb64] ss:$48 sps:$4 sm:$0xff]  }
 0x3ff   : > { %4125 = vmatprep.subr.bf16.mxu1 %v19035_v38  ;;  %v18969_v38 = vld [vmem:[%s21553_s16 + $0xbc4] ss:$48 sps:$4 sm:$0xff]  }
 0x400   : > { %4171 = vmatpush1.bf16.msra.mxu0 %v18828_v35  ;;  %v18907_v35 = vld [vmem:[%s21553_s16 + $0x800] ss:$48 sps:$4 sm:$0xff]  }
 0x401   : > { %4172 = vmatprep.subr.bf16.mxu0 %v18836_v36  ;;  %v18915_v36 = vld [vmem:[%s21553_s16 + $0x864] ss:$48 sps:$4 sm:$0xff]  }
 0x402   : > { %4126 = vmatpush1.bf16.msra.mxu1 %v19033_v44  ;;  %v19063_v44 = vld [vmem:[%s21553_s16 + $0x208] ss:$48 sps:$4 sm:$0xff]  }
 0x403   : > { %4127 = vmatprep.subr.bf16.mxu1 %v19038_v53  ;;  %v19074_v53 = vld [vmem:[%s21553_s16 + $0x32c] ss:$48 sps:$4 sm:$0xff]  }
 0x404   : > { %4173 = vmatpush1.bf16.msra.mxu0 %v18834_v39 }
 0x405   : > { %4174 = vmatprep.subr.bf16.mxu0 %v18843_v40  ;;  %v22125_v40 = vrot.slane %v1762_v32, %v22118_v34  ;;  %v19059_v32 = vld [vmem:[%s21553_s16 + $0x14c] ss:$48 sps:$4 sm:$0xff]  }
 0x406   : > { %4128 = vmatpush1.bf16.msra.mxu1 %v19036_v58  ;;  %v19077_v58 = vld [vmem:[%s21553_s16 + $0x38c] ss:$48 sps:$4 sm:$0xff]  }
 0x407   : > { %4129 = vmatprep.subr.bf16.mxu1 %v19041_v0  ;;  %v19080_v0 = vld [vmem:[%s21553_s16 + $0x3ec] ss:$48 sps:$4 sm:$0xff]  }
 0x408   : > { %4175 = vmatpush1.bf16.msra.mxu0 %v18841_v45 }
 0x409   : > { %4176 = vmatprep.subr.bf16.mxu0 %v18849_v46  ;;  %v18921_v46 = vld [vmem:[%s21553_s16 + $0x8c4] ss:$48 sps:$4 sm:$0xff]  }
 0x40c   : > { %4177 = vmatpush1.bf16.msra.mxu0 %v18847_v49 }
 0x40d   : > { %4178 = vmatprep.subr.bf16.mxu0 %v18855_v51 }
 0x410   : > { %4179 = vmatpush1.bf16.msra.mxu0 %v18853_v56 }
 0x411   : > { %4180 = vmatprep.subr.bf16.mxu0 %v18861_v57  ;;  %v18919_v57 = vld [vmem:[%s21553_s16 + $0x8c0] ss:$48 sps:$4 sm:$0xff]  }
 0x414   : > { %4181 = vmatpush1.bf16.msra.mxu0 %v18859_v61  ;;  %v18927_v61 = vld [vmem:[%s21553_s16 + $0x924] ss:$48 sps:$4 sm:$0xff]  }
 0x415   : > { %4182 = vmatprep.subr.bf16.mxu0 %v18867_v63 }
 0x418   : > { %4183 = vmatpush1.bf16.msra.mxu0 %v18865_v2  ;;  %v18925_v2 = vld [vmem:[%s21553_s16 + $0x920] ss:$48 sps:$4 sm:$0xff]  }
 0x419   : > { %4184 = vmatprep.subr.bf16.mxu0 %v18873_v3  ;;  %v19039_v3 = vld [vmem:[%s21553_s16 + $0xaf8] ss:$48 sps:$4 sm:$0xff]  }
 0x41a   : > { %4130 = vmatpush1.bf16.msra.mxu1 %v19039_v3  ;;  %v19081_v3 = vld [vmem:[%s21553_s16 + $0x448] ss:$48 sps:$4 sm:$0xff]  }
 0x41b   : > { %4131 = vmatprep.subr.bf16.mxu1 %v19044_v9  ;;  %v19095_v9 = vld [vmem:[%s21553_s16 + $0x5cc] ss:$48 sps:$4 sm:$0xff]  }
 0x41c   : > { %4185 = vmatpush1.bf16.msra.mxu0 %v18871_v6  ;;  %v18933_v6 = vld [vmem:[%s21553_s16 + $0x984] ss:$48 sps:$4 sm:$0xff]  }
 0x41d   : > { %4205 = vmatprep.subr.bf16.mxu0 %v18879_v7 }
 0x41f   : > { %4187 = vmatmul.mubr.bf16.vlgmr.msra.gmra.mrb[16].mxu0 %v21808_v50 }
 0x420   : > { %4206 = vmatpush1.bf16.msra.mxu0 %v18877_v10  ;;  %4196 = vmatprep.mubr.bf16.mxu0 %v21811_v52  ;;  %v18931_v10 = vld [vmem:[%s21553_s16 + $0x980] ss:$48 sps:$4 sm:$0xff]  }
 0x421   : > { %4207 = vmatprep.subr.bf16.mxu0 %v18885_v11  ;;  %v19042_v11 = vld [vmem:[%s21553_s16 + $0xb58] ss:$48 sps:$4 sm:$0xff]  }
 0x422   : > { %4132 = vmatpush1.bf16.msra.mxu1 %v19042_v11  ;;  %v19098_v11 = vld [vmem:[%s21553_s16 + $0x62c] ss:$48 sps:$4 sm:$0xff]  }
 0x423   : > { %4133 = vmatprep.subr.bf16.mxu1 %v19047_v13  ;;  %v19101_v13 = vld [vmem:[%s21553_s16 + $0x68c] ss:$48 sps:$4 sm:$0xff]  }
 0x424   : > { %4208 = vmatpush1.bf16.msra.mxu0 %v18883_v14  ;;  %v18937_v14 = vld [vmem:[%s21553_s16 + $0x9e0] ss:$48 sps:$4 sm:$0xff]  }
 0x425   : > { %4209 = vmatprep.subr.bf16.mxu0 %v18891_v15  ;;  %v19045_v15 = vld [vmem:[%s21553_s16 + $0xbb8] ss:$48 sps:$4 sm:$0xff]  }
 0x426   : > { %4134 = vmatpush1.bf16.msra.mxu1 %v19045_v15  ;;  %v19104_v15 = vld [vmem:[%s21553_s16 + $0x6ec] ss:$48 sps:$4 sm:$0xff]  }
 0x427   : > { %4197 = vmatmul.mubr.bf16.gmra.mrb[20].mxu0 %v21818_v59 }
 0x428   : > { %4210 = vmatpush1.bf16.msra.mxu0 %v18889_v18  ;;  %4237 = vmatprep.mubr.bf16.mxu0 %v21822_v62  ;;  %v19050_v18 = vld [vmem:[%s21553_s16 + $0x2c] ss:$48 sps:$4 sm:$0xff]  }
 0x429   : > { %4211 = vmatprep.subr.bf16.mxu0 %v18897_v19  ;;  %v18943_v19 = vld [vmem:[%s21553_s16 + $0xa40] ss:$48 sps:$4 sm:$0xff]   ;;  %4256 = vmatprep.subr.bf16.mxu1 %v19050_v18  ;;  %v19105_v18 = vld [vmem:[%s21553_s16 + $0x748] ss:$48 sps:$4 sm:$0xff]  }
 0x42a   : > { %4136 = vmatmul.mubr.bf16.vlgmr.msra.gmra.mrb[8].mxu1 %v21865_v42 }
 0x42b   : > { %4257 = vmatpush1.bf16.msra.mxu1 %v19048_v17  ;;  %4145 = vmatprep.mubr.bf16.mxu1 %v21867_v43  ;;  %v19107_v17 = vld [vmem:[%s21553_s16 + $0x74c] ss:$48 sps:$4 sm:$0xff]  }
 0x42c   : > { %4212 = vmatpush1.bf16.msra.mxu0 %v18895_v23  ;;  %v18949_v23 = vld [vmem:[%s21553_s16 + $0xaa0] ss:$48 sps:$4 sm:$0xff]   ;;  %4258 = vmatprep.subr.bf16.mxu1 %v19053_v21  ;;  %v19116_v21 = vld [vmem:[%s21553_s16 + $0x86c] ss:$48 sps:$4 sm:$0xff]  }
 0x42d   : > { %4213 = vmatprep.subr.bf16.mxu0 %v18903_v24  ;;  %v19051_v24 = vld [vmem:[%s21553_s16 + $0x88] ss:$48 sps:$4 sm:$0xff]  }
 0x42f   : > { %4259 = vmatpush1.bf16.msra.mxu1 %v19051_v24  ;;  %v19122_v24 = vld [vmem:[%s21553_s16 + $0x92c] ss:$48 sps:$4 sm:$0xff]  }
 0x430   : > { %4214 = vmatpush1.bf16.msra.mxu0 %v18901_v29  ;;  %v19056_v29 = vld [vmem:[%s21553_s16 + $0xec] ss:$48 sps:$4 sm:$0xff]  }
 0x431   : > { %4215 = vmatprep.subr.bf16.mxu0 %v18909_v30  ;;  %v18955_v30 = vld [vmem:[%s21553_s16 + $0xb00] ss:$48 sps:$4 sm:$0xff]   ;;  %4260 = vmatprep.subr.bf16.mxu1 %v19056_v29  ;;  %v19123_v29 = vld [vmem:[%s21553_s16 + $0x988] ss:$48 sps:$4 sm:$0xff]  }
 0x432   : > { %v3831_v39 = vpop.f32.mrb[0].mxu0  ;;  %4146 = vmatmul.mubr.bf16.gmra.mrb[12].mxu1 %v21879_v55 }
 0x433   : > { %v3833_v45 = vpop.f32.mrb[1].mxu0  ;;  %v22130_v48 = vadd.f32 %v3831_v39, %v1769_v37  ;;  %4261 = vmatpush1.bf16.msra.mxu1 %v19054_v27  ;;  %4288 = vmatprep.mubr.bf16.mxu1 %v21784_v26  ;;  %v19060_v39 = vld [vmem:[%s21553_s16 + $0x1a8] ss:$48 sps:$4 sm:$0xff]   ;;  %v19125_v27 = vld [vmem:[%s21553_s16 + $0x98c] ss:$48 sps:$4 sm:$0xff]  }
 0x434   : > { %v3835_v47 = vpop.f32.mrb[2].mxu0  ;;  %4216 = vmatpush1.bf16.msra.mxu0 %v18907_v35  ;;  %v22136_v54 = vadd.f32 %v3833_v45, %v22125_v40  ;;  %v18961_v35 = vld [vmem:[%s21553_s16 + $0xb60] ss:$48 sps:$4 sm:$0xff]   ;;  %4262 = vmatprep.subr.bf16.mxu1 %v19059_v32  ;;  %v19065_v45 = vld [vmem:[%s21553_s16 + $0x20c] ss:$48 sps:$4 sm:$0xff]  }
 0x435   : > { %v22132_v49 = vadd.f32 %v3835_v47, %v1769_v37  ;;  %v3837_v51 = vpop.f32.mrb[3].mxu0  ;;  %4217 = vmatprep.subr.bf16.mxu0 %v18915_v36  ;;  %v19057_v36 = vld [vmem:[%s21553_s16 + $0x148] ss:$48 sps:$4 sm:$0xff]   ;;  %v19071_v47 = vld [vmem:[%s21553_s16 + $0x2cc] ss:$48 sps:$4 sm:$0xff]  }
 0x436   : > { %v22139_v56 = vadd.f32 %v3837_v51, %v22125_v40  ;;  %v19066_v26 = vld [vmem:[%s21553_s16 + $0x268] ss:$48 sps:$4 sm:$0xff]   ;;  %v19131_v32 = vld [vmem:[%s21553_s16 + $0xa4c] ss:$48 sps:$4 sm:$0xff]  }
 0x437   : > { %v4358_v60 = vpack.c.bf16 %v22132_v49, %v22130_v48  ;;  %4263 = vmatpush1.bf16.msra.mxu1 %v19057_v36  ;;  %v19069_v51 = vld [vmem:[%s21553_s16 + $0x2c8] ss:$48 sps:$4 sm:$0xff]   ;;  %v19089_v49 = vld [vmem:[%s21553_s16 + $0x50c] ss:$48 sps:$4 sm:$0xff]   ;;  %v22246_v36 = vsub.s32 5, %v22108_v28 }
 0x438   : > { %v4359_v63 = vpack.c.bf16 %v22139_v56, %v22136_v54  ;;  %4218 = vmatpush1.bf16.msra.mxu0 %v18913_v41  ;;  %v18967_v41 = vld [vmem:[%s21553_s16 + $0xbc0] ss:$48 sps:$4 sm:$0xff]   ;;  %v19084_v48 = vld [vmem:[%s21553_s16 + $0x4a8] ss:$48 sps:$4 sm:$0xff]  }
 0x439   : > { %4219 = vmatprep.subr.bf16.mxu0 %v18921_v46  ;;  %v19068_v46 = vld [vmem:[%s21553_s16 + $0x26c] ss:$48 sps:$4 sm:$0xff]  }
 0x43a   : > { %v3841_v1 = vpop.f32.mrb[4].mxu0 }
 0x43b   : > { %v22151_v4 = vadd.f32 %v3841_v1, %v1769_v37  ;;  %v22153_v5 = vpop.f32.mrb[5].mxu0  ;;  %v19062_v37 = vld [vmem:[%s21553_s16 + $0x1ac] ss:$48 sps:$4 sm:$0xff]   ;;  %v19078_v1 = vld [vmem:[%s21553_s16 + $0x3e8] ss:$48 sps:$4 sm:$0xff]  }
 0x43c   : > { %v3845_v7 = vpop.f32.mrb[6].mxu0  ;;  %4220 = vmatpush1.bf16.msra.mxu0 %v18919_v57  ;;  %4264 = vmatprep.subr.bf16.mxu1 %v19062_v37  ;;  %v19072_v57 = vld [vmem:[%s21553_s16 + $0x328] ss:$48 sps:$4 sm:$0xff]  }
 0x43d   : > { %v3846_v8 = vpop.f32.mrb[7].mxu0  ;;  %4221 = vmatprep.subr.bf16.mxu0 %v18927_v61  ;;  %4265 = vmatpush1.bf16.msra.mxu1 %v19060_v39  ;;  %v19075_v61 = vld [vmem:[%s21553_s16 + $0x388] ss:$48 sps:$4 sm:$0xff]   ;;  %v19092_v7 = vld [vmem:[%s21553_s16 + $0x56c] ss:$48 sps:$4 sm:$0xff]  }
 0x43e   : > { %4266 = vmatprep.subr.bf16.mxu1 %v19065_v45  ;;  %v19090_v8 = vld [vmem:[%s21553_s16 + $0x568] ss:$48 sps:$4 sm:$0xff]   ;;  %v22251_v39 = vld [vmem:[%s21565_s26] sm:$0xff] }
 0x43f   : > { %v19129_v37 = vld [vmem:[%s21553_s16 + $0xa48] ss:$48 sps:$4 sm:$0xff]   ;;  %v1789_v45 = vrot.slane %v22251_v39, %v22246_v36 }
 0x440   : > { %4222 = vmatpush1.bf16.msra.mxu0 %v18925_v2  ;;  %v19083_v2 = vld [vmem:[%s21553_s16 + $0x44c] ss:$48 sps:$4 sm:$0xff]  }
 0x441   : > { %4223 = vmatprep.subr.bf16.mxu0 %v18933_v6  ;;  %4267 = vmatpush1.bf16.msra.mxu1 %v19063_v44  ;;  %v19086_v6 = vld [vmem:[%s21553_s16 + $0x4ac] ss:$48 sps:$4 sm:$0xff]  }
 0x442   : > { %4268 = vmatprep.subr.bf16.mxu1 %v19068_v46 }
 0x444   : > { %4224 = vmatpush1.bf16.msra.mxu0 %v18931_v10  ;;  %v19093_v10 = vld [vmem:[%s21553_s16 + $0x5c8] ss:$48 sps:$4 sm:$0xff]  }
 0x445   : > { %4225 = vmatprep.subr.bf16.mxu0 %v18939_v12  ;;  %4269 = vmatpush1.bf16.msra.mxu1 %v19066_v26  ;;  %v19096_v12 = vld [vmem:[%s21553_s16 + $0x628] ss:$48 sps:$4 sm:$0xff]  }
 0x446   : > { %4270 = vmatprep.subr.bf16.mxu1 %v19071_v47  ;;  %v19132_v26 = vld [vmem:[%s21553_s16 + $0xaa8] ss:$48 sps:$4 sm:$0xff]  }
 0x448   : > { %4226 = vmatpush1.bf16.msra.mxu0 %v18937_v14  ;;  %v19099_v14 = vld [vmem:[%s21553_s16 + $0x688] ss:$48 sps:$4 sm:$0xff]  }
 0x449   : > { %4227 = vmatprep.subr.bf16.mxu0 %v18945_v16  ;;  %4271 = vmatpush1.bf16.msra.mxu1 %v19069_v51  ;;  %v19102_v16 = vld [vmem:[%s21553_s16 + $0x6e8] ss:$48 sps:$4 sm:$0xff]  }
 0x44a   : > { %4272 = vmatprep.subr.bf16.mxu1 %v19074_v53 }
 0x44c   : > { %4228 = vmatpush1.bf16.msra.mxu0 %v18943_v19  ;;  %v19110_v19 = vld [vmem:[%s21553_s16 + $0x7ac] ss:$48 sps:$4 sm:$0xff]  }
 0x44d   : > { %4229 = vmatprep.subr.bf16.mxu0 %v18951_v20  ;;  %4273 = vmatpush1.bf16.msra.mxu1 %v19072_v57  ;;  %v19111_v20 = vld [vmem:[%s21553_s16 + $0x808] ss:$48 sps:$4 sm:$0xff]  }
 0x44e   : > { %4274 = vmatprep.subr.bf16.mxu1 %v19077_v58 }
 0x450   : > { %4230 = vmatpush1.bf16.msra.mxu0 %v18949_v23  ;;  %v19114_v23 = vld [vmem:[%s21553_s16 + $0x868] ss:$48 sps:$4 sm:$0xff]  }
 0x451   : > { %4231 = vmatprep.subr.bf16.mxu0 %v18957_v25  ;;  %4275 = vmatpush1.bf16.msra.mxu1 %v19075_v61  ;;  %v19120_v25 = vld [vmem:[%s21553_s16 + $0x928] ss:$48 sps:$4 sm:$0xff]  }
 0x452   : > { %4276 = vmatprep.subr.bf16.mxu1 %v19080_v0  ;;  %v19137_v0 = vld [vmem:[%s21553_s16 + $0xb0c] ss:$48 sps:$4 sm:$0xff]  }
 0x454   : > { %4232 = vmatpush1.bf16.msra.mxu0 %v18955_v30  ;;  %v19128_v30 = vld [vmem:[%s21553_s16 + $0x9ec] ss:$48 sps:$4 sm:$0xff]  }
 0x455   : > { %4233 = vmatprep.subr.bf16.mxu0 %v18963_v31  ;;  %4277 = vmatpush1.bf16.msra.mxu1 %v19078_v1  ;;  %v19126_v31 = vld [vmem:[%s21553_s16 + $0x9e8] ss:$48 sps:$4 sm:$0xff]  }
 0x456   : > { %4278 = vmatprep.subr.bf16.mxu1 %v19083_v2 }
 0x458   : > { %4234 = vmatpush1.bf16.msra.mxu0 %v18961_v35  ;;  %v22243_v35 = vsub.s32 4, %v22108_v28 }
 0x459   : > { %4235 = vmatprep.subr.bf16.mxu0 %v18969_v38  ;;  %4279 = vmatpush1.bf16.msra.mxu1 %v19081_v3  ;;  %v19134_v38 = vld [vmem:[%s21553_s16 + $0xaac] ss:$48 sps:$4 sm:$0xff]   ;;  %v19135_v3 = vld [vmem:[%s21553_s16 + $0xb08] ss:$48 sps:$4 sm:$0xff]  }
 0x45a   : > { %4280 = vmatprep.subr.bf16.mxu1 %v19086_v6 }
 0x45c   : > { %4236 = vmatpush1.bf16.msra.mxu0 %v18967_v41  ;;  %v1785_v41 = vrot.slane %v22251_v39, %v22243_v35 }
 0x45d   : > { %4281 = vmatpush1.bf16.msra.mxu1 %v19084_v48  ;;  %v19140_v48 = vld [vmem:[%s21553_s16 + $0xb6c] ss:$48 sps:$4 sm:$0xff]  }
 0x45e   : > { %4282 = vmatprep.subr.bf16.mxu1 %v19089_v49 }
 0x45f   : > { %4238 = vmatmul.mubr.bf16.vlgmr.msra.gmra.mrb[16].mxu0 %v21865_v42 }
 0x460   : > { %4247 = vmatprep.mubr.bf16.mxu0 %v21867_v43 }
 0x467   : > { %4248 = vmatmul.mubr.bf16.gmra.mrb[20].mxu0 %v21879_v55 }
 0x468   : > { %18007 = vmatprep.mubr.bf16.mxu0 %v4358_v60  ;;  %v19087_v60 = vld [vmem:[%s21553_s16 + $0x508] ss:$48 sps:$4 sm:$0xff]  }
 0x469   : > { %4283 = vmatpush1.bf16.msra.mxu1 %v19087_v60 }
 0x46a   : > { %4284 = vmatprep.subr.bf16.mxu1 %v19092_v7 }
 0x46d   : > { %4285 = vmatpush1.bf16.msra.mxu1 %v19090_v8 }
 0x46e   : > { %4286 = vmatprep.subr.bf16.mxu1 %v19095_v9 }
 0x471   : > { %4287 = vmatpush1.bf16.msra.mxu1 %v19093_v10  ;;  %v19138_v10 = vld [vmem:[%s21553_s16 + $0xb68] ss:$48 sps:$4 sm:$0xff]  }
 0x472   : > { %4307 = vmatprep.subr.bf16.mxu1 %v19098_v11  ;;  %v19143_v11 = vld [vmem:[%s21553_s16 + $0xbcc] ss:$48 sps:$4 sm:$0xff]  }
 0x474   : > { %4289 = vmatmul.mubr.bf16.vlgmr.msra.gmra.mrb[16].mxu1 %v21808_v50  ;;  %v19108_v50 = vld [vmem:[%s21553_s16 + $0x7a8] ss:$48 sps:$4 sm:$0xff]  }
 0x475   : > { %4308 = vmatpush1.bf16.msra.mxu1 %v19096_v12  ;;  %4298 = vmatprep.mubr.bf16.mxu1 %v21811_v52  ;;  %v19113_v52 = vld [vmem:[%s21553_s16 + $0x80c] ss:$48 sps:$4 sm:$0xff]   ;;  %v19141_v12 = vld [vmem:[%s21553_s16 + $0xbc8] ss:$48 sps:$4 sm:$0xff]  }
 0x476   : > { %4309 = vmatprep.subr.bf16.mxu1 %v19101_v13 }
 0x479   : > { %4310 = vmatpush1.bf16.msra.mxu1 %v19099_v14  ;;  %v4370_v14 = vpack.c.bf16 %v22151_v4, %v22151_v4  ;;  %v22275_v4 = vld [vmem:[%s21565_s26 + $0x8] sm:$0xf]  ;;  %s24563_s26 = scalar_lea.vmem [#allocation10], %s21573_s15 }
 0x47a   : > { %4311 = vmatprep.subr.bf16.mxu1 %v19104_v15 }
 0x47c   : > { %4299 = vmatmul.mubr.bf16.gmra.mrb[20].mxu1 %v21818_v59  ;;  %v19119_v59 = vld [vmem:[%s21553_s16 + $0x8cc] ss:$48 sps:$4 sm:$0xff]  }
 0x47d   : > { %4312 = vmatpush1.bf16.msra.mxu1 %v19102_v16  ;;  %4339 = vmatprep.mubr.bf16.mxu1 %v21822_v62  ;;  %v19117_v62 = vld [vmem:[%s21553_s16 + $0x8c8] ss:$48 sps:$4 sm:$0xff]   ;;  %v18072_v16 = vadd.f32 %v22153_v5, %v22125_v40  ;;  %v22282_v40 = vsub.s32 2, %v22108_v28  ;;  %v3933_v5 = vpop.f32.mrb[0].mxu1  ;;  %s24562_s16 = scalar_lea.vmem [#allocation8], %s21573_s15 }
 0x47e   : > { %4313 = vmatprep.subr.bf16.mxu1 %v19107_v17 }
 0x47f   : > { %v4371_v17 = vpack.c.bf16 %v18072_v16, %v18072_v16 }
 0x481   : > { %4314 = vmatpush1.bf16.msra.mxu1 %v19105_v18 }
 0x482   : > { %4315 = vmatprep.subr.bf16.mxu1 %v19110_v19 }
 0x485   : > { %4316 = vmatpush1.bf16.msra.mxu1 %v19108_v50 }
 0x486   : > { %4317 = vmatprep.subr.bf16.mxu1 %v19113_v52 }
 0x489   : > { %4318 = vmatpush1.bf16.msra.mxu1 %v19111_v20  ;;  %v22285_v20 = vsub.s32 3, %v22108_v28 }
 0x48a   : > { %4319 = vmatprep.subr.bf16.mxu1 %v19116_v21 }
 0x48d   : > { %4320 = vmatpush1.bf16.msra.mxu1 %v19114_v23  ;;  %v3935_v23 = vpop.f32.mrb[1].mxu1 }
 0x48e   : > { %4321 = vmatprep.subr.bf16.mxu1 %v19119_v59 }
 0x491   : > { %4322 = vmatpush1.bf16.msra.mxu1 %v19117_v62  ;;  %v22291_v62 = vrot.slane %v22251_v39, %v22282_v40 }
 0x492   : > { %4323 = vmatprep.subr.bf16.mxu1 %v19122_v24  ;;  %v22295_v24 = vrot.slane %v22251_v39, %v22285_v20 }
 0x495   : > { %4324 = vmatpush1.bf16.msra.mxu1 %v19120_v25  ;;  %v3937_v25 = vpop.f32.mrb[2].mxu1 }
 0x496   : > { %4325 = vmatprep.subr.bf16.mxu1 %v19125_v27  ;;  %v3939_v27 = vpop.f32.mrb[3].mxu1 }
 0x499   : > { %4326 = vmatpush1.bf16.msra.mxu1 %v19123_v29 }
 0x49a   : > { %4327 = vmatprep.subr.bf16.mxu1 %v19128_v30  ;;  %v22298_v30 = vadd.f32 %v3933_v5, %v22291_v62 }
 0x49d   : > { %4328 = vmatpush1.bf16.msra.mxu1 %v19126_v31  ;;  %v22301_v31 = vadd.f32 %v3935_v23, %v22295_v24 }
 0x49e   : > { %4329 = vmatprep.subr.bf16.mxu1 %v19131_v32  ;;  %v22304_v32 = vadd.f32 %v3937_v25, %v22291_v62 }
 0x4a1   : > { %4330 = vmatpush1.bf16.msra.mxu1 %v19129_v37  ;;  %v22307_v37 = vadd.f32 %v3939_v27, %v22295_v24 }
 0x4a2   : > { %4331 = vmatprep.subr.bf16.mxu1 %v19134_v38 }
 0x4a5   : > { %4332 = vmatpush1.bf16.msra.mxu1 %v19132_v26  ;;  %v4361_v26 = vpack.c.bf16 %v22307_v37, %v22301_v31  ;;  %v19147_v31 = vld [vmem:[%s21575_s3 + $0x28] ss:$16 sps:$4 sm:$0xff]   ;;  %v19152_v37 = vld [vmem:[%s21575_s3 + $0x4c] ss:$16 sps:$4 sm:$0xff]  }
 0x4a6   : > { %4333 = vmatprep.subr.bf16.mxu1 %v19137_v0 }
 0x4a9   : > { %4334 = vmatpush1.bf16.msra.mxu1 %v19135_v3 }
 0x4aa   : > { %4335 = vmatprep.subr.bf16.mxu1 %v19140_v48 }
 0x4ad   : > { %4336 = vmatpush1.bf16.msra.mxu1 %v19138_v10 }
 0x4ae   : > { %4337 = vmatprep.subr.bf16.mxu1 %v19143_v11 }
 0x4b1   : > { %4338 = vmatpush1.bf16.msra.mxu1 %v19141_v12 }
 0x4b2   : > { %v4035_v44 = vpop.f32.mrb[8].mxu0 }
 0x4b3   : > { %v4037_v46 = vpop.f32.mrb[9].mxu0  ;;  %v18079_v51 = vadd.f32 %v4035_v44, %v1785_v41 }
 0x4b4   : > { %v4039_v47 = vpop.f32.mrb[10].mxu0  ;;  %v18080_v58 = vadd.f32 %v4037_v46, %v1789_v45  ;;  %4340 = vmatmul.mubr.bf16.vlgmr.msra.gmra.mrb[16].mxu1 %v21865_v42  ;;  %v1801_v42 = vrot.slane %v22275_v4, %v22115_v33  ;;  %v4360_v46 = vpack.c.bf16 %v22304_v32, %v22298_v30 }
 0x4b5   : > { %v18081_v53 = vadd.f32 %v4039_v47, %v1785_v41  ;;  %v4041_v57 = vpop.f32.mrb[11].mxu0  ;;  %4349 = vmatprep.mubr.bf16.mxu1 %v21867_v43  ;;  %v1805_v43 = vrot.slane %v22275_v4, %v22118_v34 }
 0x4b6   : > { %v18082_v61 = vadd.f32 %v4041_v57, %v1789_v45  ;;  %v22319_v57 = vand.u32 127, %v24481_v22 }
 0x4b7   : > { %v4362_v1 = vpack.c.bf16 %v18081_v53, %v18079_v51 }
 0x4b8   : > { %v4363_v2 = vpack.c.bf16 %v18082_v61, %v18080_v58  ;;  %vm4384_vm1 = vcmp.lt.s32.totalorder %v22319_v57, 17 }
 0x4b9   : > { %18003 = vmatprep.subr.bf16.mxu0 %v4362_v1 }
 0x4ba   : > { %v4045_v6 = vpop.f32.mrb[12].mxu0  ;;  %18004 = vmatpush3.bf16.xpose.msra.mxu0 %v4362_v1 }
 0x4bb   : > { %v18083_v49 = vadd.f32 %v4045_v6, %v1785_v41  ;;  %v4047_v60 = vpop.f32.mrb[13].mxu0 }
 0x4bc   : > { %v4049_v7 = vpop.f32.mrb[14].mxu0  ;;  %v18084_v13 = vadd.f32 %v4047_v60, %v1789_v45  ;;  %4350 = vmatmul.mubr.bf16.gmra.mrb[20].mxu1 %v21879_v55 }
 0x4bd   : > { %v4374_v8 = vpack.c.bf16 %v18083_v49, %v18083_v49  ;;  %v4050_v9 = vpop.f32.mrb[15].mxu0 }
 0x4be   : > { %v4375_v15 = vpack.c.bf16 %v18084_v13, %v18084_v13 }
 0x4bf   : > { %18005 = vmatprep.subr.bf16.mxu0 %v4374_v8 }
 0x4c2   : > { %18006 = vmatpush3.bf16.xpose.msra.mxu0 %v4374_v8 }
 0x4c3   : > { %18019 = vmatprep.subr.bf16.mxu0 %v4363_v2 }
 0x4c9   : > { %18008 = vmatmul.mubr.bf16.vlgmr.msra.gmra.mrb[24].mxu0 %v4370_v14 }
 0x4ca   : > { %18020 = vmatpush3.bf16.xpose.msra.mxu0 %v4363_v2  ;;  %18023 = vmatprep.mubr.bf16.mxu0 %v4359_v63 }
 0x4cb   : > { %18021 = vmatprep.subr.bf16.mxu0 %v4375_v15 }
 0x4d2   : > { %18022 = vmatpush3.bf16.xpose.msra.mxu0 %v4375_v15 }
 0x4d9   : > { %18024 = vmatmul.mubr.bf16.vlgmr.msra.gmra.mrb[28].mxu0 %v4371_v17 }
 0x532   : > { %v4239_v18 = vpop.f32.mrb[16].mxu0 }
 0x533   : > { %v18091_v54 = vadd.f32 %v4239_v18, %v1801_v42  ;;  %v4241_v56 = vpop.f32.mrb[17].mxu0 }
 0x534   : > { %v18092_v63 = vadd.f32 %v4241_v56, %v1805_v43  ;;  %v4243_v19 = vpop.f32.mrb[18].mxu0 }
 0x535   : > { %v18093_v55 = vadd.f32 %v4243_v19, %v1801_v42  ;;  %v4245_v50 = vpop.f32.mrb[19].mxu0  ;;  %v22361_v19 = vsub.s32 6, %v22108_v28 }
 0x536   : > { %v18094_v52 = vadd.f32 %v4245_v50, %v1805_v43 }
 0x537   : > { %v4366_v21 = vpack.c.bf16 %v18093_v55, %v18091_v54  ;;  %v22364_v55 = vsub.s32 7, %v22108_v28  ;;  %v22370_v5 = vrot.slane %v22251_v39, %v22361_v19  ;;  %v6536_v28 = vld [vmem:[%s21592_s19 + $0xc60] sm:$0xff] }
 0x538   : > { %v22287_v59 = vpack.c.bf16 %v18094_v52, %v18092_v63  ;;  %v22358_v63 = vpop.f32.mrb[4].mxu1 }
 0x539   : > { %18011 = vmatprep.subr.bf16.mxu1 %v4366_v21  ;;  %v22366_v50 = vpop.f32.mrb[5].mxu1 }
 0x53a   : > { %v4249_v29 = vpop.f32.mrb[20].mxu0  ;;  %18012 = vmatpush3.bf16.msra.mxu1 %v4366_v21  ;;  %v3947_v52 = vpop.f32.mrb[6].mxu1  ;;  %v1797_v21 = vrot.slane %v22251_v39, %v22364_v55 }
 0x53b   : > { %v18095_v38 = vadd.f32 %v4249_v29, %v1801_v42  ;;  %v4251_v41 = vpop.f32.mrb[21].mxu0  ;;  %v3948_v23 = vpop.f32.mrb[7].mxu1 }
 0x53c   : > { %v22309_v44 = vadd.f32 %v4251_v41, %v1805_v43  ;;  %v4253_v45 = vpop.f32.mrb[22].mxu0  ;;  %v4137_v25 = vpop.f32.mrb[8].mxu1 }
 0x53d   : > { %v4378_v47 = vpack.c.bf16 %v18095_v38, %v18095_v38  ;;  %v4254_v51 = vpop.f32.mrb[23].mxu0  ;;  %v18085_v27 = vadd.f32 %v4137_v25, %v22370_v5  ;;  %v4139_v29 = vpop.f32.mrb[9].mxu1 }
 0x53e   : > { %v18086_v38 = vadd.f32 %v4139_v29, %v1797_v21  ;;  %v4141_v41 = vpop.f32.mrb[10].mxu1 }
 0x53f   : > { %v4483_v53 = vsel %vm4481_vm0, %v4378_v47, 0  ;;  %18359 = vmatprep.subr.msk.bf16.mxu1 %vm4481_vm0, %v4378_v47  ;;  %v18087_v45 = vadd.f32 %v4141_v41, %v22370_v5  ;;  %v4143_v47 = vpop.f32.mrb[11].mxu1 }
 0x540   : > { %18014 = vmatpush3.bf16.msra.mxu1 %v4483_v53  ;;  %v18088_v51 = vadd.f32 %v4143_v47, %v1797_v21  ;;  %v22376_v53 = vpop.f32.mrb[12].mxu1 }
 0x541   : > { %18027 = vmatprep.subr.bf16.mxu1 %v22287_v59 }
 0x542   : > { %v22382_v39 = vpack.c.bf16 %v18088_v51, %v18086_v38 }
 0x59c   : > { %v18009_v58 = vpop.f32.mrb[24].mxu0 }
 0x59d   : > { %v4435_v61 = vmul.f32 0.088388346, %v18009_v58  ;;  %v4419_v0 = vpop.f32.mrb[25].mxu0  ;;  %v22378_v58 = vpack.c.bf16 %v18087_v45, %v18085_v27 }
 0x59e   : > { %v4433_v1 = vmul.f32 0.088388346, %v4419_v0  ;;  %v18010_v2 = vpop.f32.mrb[26].mxu0  ;;  %v1809_v0 = vrot.slane %v22275_v4, %v22282_v40 }
 0x59f   : > { %v4422_v3 = vpop.f32.mrb[27].mxu0  ;;  %v22324_v6 = vsel %vm4384_vm1, %v4435_v61, -1e+30  ;;  %v4149_v61 = vpop.f32.mrb[13].mxu1 }
 0x5a0   : > { %v4434_v48 = vmul.f32 0.088388346, %v4422_v3  ;;  %v4446_v49 = vsel %vm4439_vm2, %v22324_v6, -inf  ;;  %v22330_v60 = vsel %vm4384_vm1, %v4433_v1, -1e+30  ;;  %v22384_v1 = vadd.f32 %v4149_v61, %v1797_v21  ;;  %v4151_v2 = vpop.f32.mrb[14].mxu1 }
 0x5a1   : > { %4447 = vmax.xlane.f32.xlu1 %v4446_v49  ;;  %v4440_v7 = vsel %vm4439_vm2, %v22330_v60, -inf  ;;  %v22388_v3 = vrot.slane %v22275_v4, %v22285_v20 }
 0x5a2   : > { %4441 = vmax.xlane.f32.xlu0 %v4440_v7  ;;  %v22336_v8 = vsel %vm4384_vm1, %v4434_v48, -1e+30  ;;  %v4152_v48 = vpop.f32.mrb[15].mxu1 }
 0x5a3   : > { %v4443_v9 = vsel %vm4439_vm2, %v22336_v8, -inf  ;;  %v4341_v49 = vpop.f32.mrb[16].mxu1 }
 0x5a4   : > { %v18097_v7 = vadd.f32 %v4341_v49, %v1809_v0 }
 0x5a6   : > { %4444 = vmax.xlane.f32.xlu0 %v4443_v9  ;;  %v4343_v9 = vpop.f32.mrb[17].mxu1 }
 0x5ac   : > { %v18025_v10 = vpop.f32.mrb[28].mxu0 }
 0x5ad   : > { %v4567_v11 = vpop.f32.mrb[29].mxu0  ;;  %v4583_v12 = vmul.f32 0.088388346, %v18025_v10  ;;  %v18098_v10 = vadd.f32 %v4343_v9, %v22388_v3 }
 0x5ae   : > { %v4581_v13 = vmul.f32 0.088388346, %v4567_v11  ;;  %v18026_v14 = vpop.f32.mrb[30].mxu0  ;;  %v4345_v11 = vpop.f32.mrb[18].mxu1 }
 0x5af   : > { %v4570_v15 = vpop.f32.mrb[31].mxu0  ;;  %v22352_v18 = vsel %vm4384_vm1, %v4583_v12, -1e+30  ;;  %v18099_v12 = vadd.f32 %v4345_v11, %v1809_v0 }
 0x5b0   : > { %v4582_v16 = vmul.f32 0.088388346, %v4570_v15  ;;  %v22342_v17 = vsel %vm4384_vm1, %v4581_v13, -1e+30  ;;  %v4593_v56 = vsel %vm4439_vm2, %v22352_v18, -inf  ;;  %v4347_v13 = vpop.f32.mrb[19].mxu1 }
 0x5b1   : > { %v4587_v42 = vsel %vm4439_vm2, %v22342_v17, -inf  ;;  %v18100_v14 = vadd.f32 %v4347_v13, %v22388_v3  ;;  %v4351_v15 = vpop.f32.mrb[20].mxu1 }
 0x5b2   : > { %4588 = vmax.xlane.f32.xlu1 %v4587_v42  ;;  %v22348_v43 = vsel %vm4384_vm1, %v4582_v16, -1e+30  ;;  %v4368_v16 = vpack.c.bf16 %v18099_v12, %v18097_v7  ;;  %v18101_v42 = vadd.f32 %v4351_v15, %v1809_v0 }
 0x5b3   : > { %v4590_v54 = vsel %vm4439_vm2, %v22348_v43, -inf }
 0x5b4   : > { %4591 = vmax.xlane.f32.xlu0 %v4590_v54  ;;  %v22392_v54 = vpack.c.bf16 %v18100_v14, %v18098_v10  ;;  %18043 = vmatprep.subr.bf16.mxu0 %v4368_v16 }
 0x5b5   : > { %18044 = vmatpush3.bf16.msra.mxu0 %v4368_v16 }
 0x5b6   : > { %4594 = vmax.xlane.f32.xlu1 %v4593_v56  ;;  %v4380_v56 = vpack.c.bf16 %v18101_v42, %v18101_v42  ;;  %v4353_v42 = vpop.f32.mrb[21].mxu1 }
 0x5b8   : > { %v4775_v4 = vsel %vm4481_vm0, %v4380_v56, 0  ;;  %18361 = vmatprep.subr.msk.bf16.mxu0 %vm4481_vm0, %v4380_v56  ;;  %v4355_v56 = vpop.f32.mrb[22].mxu1 }
 0x5b9   : > { %18046 = vmatpush3.bf16.msra.mxu0 %v4775_v4 }
 0x5ba   : > { %18051 = vmatprep.subr.bf16.mxu0 %v22382_v39 }
 0x62e   : > { %v4448_v52 = vpop.xlane.xlu1 %4447 }
 0x62f   : > { %v4451_v21 = vsub.f32 %v22324_v6, %v4448_v52  ;;  %v4442_v23 = vpop.xlane.xlu0 %4441 }
 0x630   : > { %v4449_v25 = vsub.f32 %v22330_v60, %v4442_v23 }
 0x631   : > { %v4456_v27 = vmul.f32 1.442695, %v4451_v21 }
 0x632   : > { %v4452_v29 = vmul.f32 1.442695, %v4449_v25 }
 0x633   : > { %v4445_v38 = vpop.xlane.xlu0 %4444 }
 0x634   : > { %20104 = vpow2.f32 %v4452_v29  ;;  %v4450_v41 = vsub.f32 %v22336_v8, %v4445_v38 }
 0x635   : > { %20106 = vpow2.f32 %v4456_v27 }
 0x636   : > { %v4454_v45 = vmul.f32 1.442695, %v4450_v41 }
 0x638   : > { %20108 = vpow2.f32 %v4454_v45 }
 0x63e   : > { %v20105_v47 = vpop.eup %20104 }
 0x63f   : > { %v4589_v51 = vpop.xlane.xlu1 %4588  ;;  %v4458_v61 = vsel %vm4439_vm2, %v20105_v47, 0.0  ;;  %v20107_v0 = vpop.eup %20106 }
 0x640   : > { %v4596_v2 = vsub.f32 %v22342_v17, %v4589_v51  ;;  %4459 = vadd.xlane.f32.xlu0 %v4458_v61  ;;  %v4464_v9 = vsel %vm4439_vm2, %v20107_v0, 0.0 }
 0x641   : > { %v4592_v6 = vpop.xlane.xlu0 %4591 }
 0x642   : > { %v20109_v48 = vpop.eup %20108  ;;  %v4599_v60 = vmul.f32 1.442695, %v4596_v2  ;;  %v4597_v49 = vsub.f32 %v22348_v43, %v4592_v6 }
 0x643   : > { %v4595_v7 = vpop.xlane.xlu1 %4594  ;;  %v4461_v8 = vsel %vm4439_vm2, %v20109_v48, 0.0 }
 0x644   : > { %20110 = vpow2.f32 %v4599_v60  ;;  %v4601_v10 = vmul.f32 1.442695, %v4597_v49  ;;  %v4598_v11 = vsub.f32 %v22352_v18, %v4595_v7  ;;  %4465 = vadd.xlane.f32.xlu0 %v4464_v9  ;;  %4462 = vadd.xlane.f32.xlu1 %v4461_v8  ;;  %v4356_v18 = vpop.f32.mrb[23].mxu1  ;;  %v4379_v60 = vpack.c.bf16 %v22309_v44, %v22309_v44 }
 0x645   : > { %v18089_v44 = vadd.f32 %v22376_v53, %v22370_v5  ;;  %v18102_v5 = vadd.f32 %v4353_v42, %v22388_v3 }
 0x646   : > { %20112 = vpow2.f32 %v4601_v10  ;;  %v4603_v12 = vmul.f32 1.442695, %v4598_v11 }
 0x647   : > { %v4376_v11 = vpack.c.bf16 %v18089_v44, %v18089_v44 }
 0x648   : > { %20114 = vpow2.f32 %v4603_v12  ;;  %v18077_v12 = vadd.f32 %v22358_v63, %v22291_v62 }
 0x64a   : > { %v4372_v53 = vpack.c.bf16 %v18077_v12, %v18077_v12 }
 0x64e   : > { %v20111_v17 = vpop.eup %20110 }
 0x64f   : > { %v4605_v13 = vsel %vm4439_vm2, %v20111_v17, 0.0 }
 0x650   : > { %v20113_v14 = vpop.eup %20112  ;;  %4606 = vadd.xlane.f32.xlu1 %v4605_v13 }
 0x651   : > { %v4608_v43 = vsel %vm4439_vm2, %v20113_v14, 0.0 }
 0x652   : > { %v20115_v15 = vpop.eup %20114  ;;  %4609 = vadd.xlane.f32.xlu0 %v4608_v43 }
 0x653   : > { %v4611_v16 = vsel %vm4439_vm2, %v20115_v15, 0.0 }
 0x654   : > { %4612 = vadd.xlane.f32.xlu1 %v4611_v16 }
 0x6cd   : > { %v4460_v4 = vpop.xlane.xlu0 %4459 }
 0x6ce   : > { %20116 = vrcp.f32 %v4460_v4 }
 0x6d1   : > { %v4463_v52 = vpop.xlane.xlu1 %4462  ;;  %v4466_v21 = vpop.xlane.xlu0 %4465 }
 0x6d2   : > { %20118 = vrcp.f32 %v4463_v52 }
 0x6d3   : > { %20120 = vrcp.f32 %v4466_v21 }
 0x6d8   : > { %v20117_v23 = vpop.eup %20116 }
 0x6d9   : > { %v4470_v38 = vmul.f32 %v20117_v23, %v20105_v47  ;;  %v4629_v47 = vsel %vm4481_vm0, %v4379_v60, 0 }
 0x6dc   : > { %v20119_v25 = vpop.eup %20118 }
 0x6dd   : > { %v20121_v27 = vpop.eup %20120  ;;  %v4607_v29 = vpop.xlane.xlu1 %4606  ;;  %v4471_v41 = vmul.f32 %v20119_v25, %v20109_v48 }
 0x6de   : > { %v4472_v45 = vmul.f32 %v20121_v27, %v20107_v0  ;;  %20122 = vrcp.f32 %v4607_v29 }
 0x6df   : > { %v4610_v51 = vpop.xlane.xlu0 %4609  ;;  %v4473_v61 = vpack.c.bf16 %v4471_v41, %v4470_v38 }
 0x6e0   : > { %v4474_v2 = vpack.c.bf16 %v4472_v45, %v4472_v45  ;;  %20124 = vrcp.f32 %v4610_v51 }
 0x6e1   : > { %v4613_v6 = vpop.xlane.xlu1 %4612  ;;  %18015 = vmatprep.mubr.msk.bf16.mxu1 %vm4439_vm2, %v4473_v61 }
 0x6e2   : > { %20126 = vrcp.f32 %v4613_v6  ;;  %18016 = vmatmul.mubr.msk.bf16.vlgmr.msra.gmra.mrb[24].mxu1 %vm4439_vm2, %v4474_v2 }
 0x6e3   : > { %18028 = vmatpush3.bf16.msra.mxu1 %v22287_v59 }
 0x6e4   : > { %18360 = vmatprep.subr.msk.bf16.mxu1 %vm4481_vm0, %v4379_v60 }
 0x6e7   : > { %18030 = vmatpush3.bf16.msra.mxu1 %v4629_v47 }
 0x6e8   : > { %v20123_v0 = vpop.eup %20122  ;;  %18035 = vmatprep.subr.bf16.mxu1 %v22378_v58 }
 0x6e9   : > { %v4617_v49 = vmul.f32 %v20123_v0, %v20111_v17  ;;  %v4381_v17 = vpack.c.bf16 %v18102_v5, %v18102_v5 }
 0x6ea   : > { %v20125_v48 = vpop.eup %20124 }
 0x6eb   : > { %v4618_v7 = vmul.f32 %v20125_v48, %v20113_v14 }
 0x6ec   : > { %v20127_v9 = vpop.eup %20126 }
 0x6ed   : > { %v4619_v8 = vmul.f32 %v20127_v9, %v20115_v15  ;;  %v4620_v10 = vpack.c.bf16 %v4618_v7, %v4617_v49 }
 0x6ef   : > { %18031 = vmatprep.mubr.msk.bf16.mxu1 %vm4439_vm2, %v4620_v10  ;;  %v4621_v59 = vpack.c.bf16 %v4619_v8, %v4619_v8 }
 0x6f1   : > { %18032 = vmatmul.mubr.msk.bf16.vlgmr.msra.gmra.mrb[28].mxu1 %vm4439_vm2, %v4621_v59 }
 0x6f2   : > { %18036 = vmatpush3.bf16.xpose.msra.mxu1 %v22378_v58  ;;  %18039 = vmatprep.mubr.bf16.mxu1 %v4360_v46  ;;  %v4921_v58 = vsel %vm4481_vm0, %v4381_v17, 0 }
 0x6f3   : > { %18037 = vmatprep.subr.bf16.mxu1 %v4376_v11 }
 0x6fa   : > { %18038 = vmatpush3.bf16.xpose.msra.mxu1 %v4376_v11 }
 0x6fb   : > { %18059 = vmatprep.subr.bf16.mxu1 %v22392_v54 }
 0x701   : > { %18040 = vmatmul.mubr.bf16.vlgmr.msra.gmra.mrb[32].mxu1 %v4372_v53 }
 0x702   : > { %18060 = vmatpush3.bf16.msra.mxu1 %v22392_v54 }
 0x703   : > { %18362 = vmatprep.subr.msk.bf16.mxu1 %vm4481_vm0, %v4381_v17 }
 0x706   : > { %18062 = vmatpush3.bf16.msra.mxu1 %v4921_v58 }
 0x7b5   : > { %v22432_v30 = vpop.f32.mrb[24].mxu1 }
 0x7b6   : > { %v4519_v32 = vpop.f32.mrb[25].mxu1 }
 0x7b7   : > { %v18018_v46 = vpop.f32.mrb[26].mxu1 }
 0x7b8   : > { %v4522_v13 = vpop.f32.mrb[27].mxu1 }
 0x7b9   : > { %v22434_v62 = vpack.c.bf16 %v4522_v13, %v4519_v32 }
 0x7c4   : > { %v22436_v63 = vpop.f32.mrb[28].mxu1 }
 0x7c5   : > { %v4665_v3 = vpop.f32.mrb[29].mxu1 }
 0x7c6   : > { %v18034_v14 = vpop.f32.mrb[30].mxu1 }
 0x7c7   : > { %v4668_v43 = vpop.f32.mrb[31].mxu1  ;;  %v19146_v14 = vld [vmem:[%s21575_s3 + $0xc] ss:$16 sps:$4 sm:$0xff]  }
 0x7c8   : > { %v22438_v15 = vpack.c.bf16 %v4668_v43, %v4665_v3  ;;  %v4377_v3 = vpack.c.bf16 %v22384_v1, %v22384_v1  ;;  %v18078_v43 = vadd.f32 %v22366_v50, %v22295_v24  ;;  %v19144_v1 = vld [vmem:[%s21575_s3 + $0x8] ss:$16 sps:$4 sm:$0xff]   ;;  %v19155_v24 = vld [vmem:[%s21575_s3 + $0x6c] ss:$16 sps:$4 sm:$0xff]  }
 0x7c9   : > { %v19153_v50 = vld [vmem:[%s21575_s3 + $0x68] ss:$16 sps:$4 sm:$0xff]  }
 0x7d4   : > { %v18041_v54 = vpop.f32.mrb[32].mxu1 }
 0x7d5   : > { %v4713_v16 = vpop.f32.mrb[33].mxu1  ;;  %v4729_v42 = vmul.f32 0.088388346, %v18041_v54  ;;  %v4373_v54 = vpack.c.bf16 %v18078_v43, %v18078_v43 }
 0x7d6   : > { %v4727_v56 = vmul.f32 0.088388346, %v4713_v16  ;;  %v18042_v18 = vpop.f32.mrb[34].mxu1  ;;  %v19149_v16 = vld [vmem:[%s21575_s3 + $0x2c] ss:$16 sps:$4 sm:$0xff]  }
 0x7d7   : > { %v4716_v4 = vpop.f32.mrb[35].mxu1  ;;  %v4732_v27 = vsel %vm4384_vm1, %v4729_v42, -1e+30  ;;  %v19156_v42 = vld [vmem:[%s21575_s3 + $0x88] ss:$16 sps:$4 sm:$0xff]  }
 0x7d8   : > { %v4728_v52 = vmul.f32 0.088388346, %v4716_v4  ;;  %v4730_v21 = vsel %vm4384_vm1, %v4727_v56, -1e+30  ;;  %v4739_v38 = vsel %vm4439_vm2, %v4732_v27, -inf }
 0x7d9   : > { %v4733_v23 = vsel %vm4439_vm2, %v4730_v21, -inf  ;;  %v19161_v56 = vld [vmem:[%s21575_s3 + $0xac] ss:$16 sps:$4 sm:$0xff]   ;;  %v19159_v18 = vld [vmem:[%s21575_s3 + $0xa8] ss:$16 sps:$4 sm:$0xff]  }
 0x7da   : > { %4734 = vmax.xlane.f32.xlu0 %v4733_v23  ;;  %v4731_v25 = vsel %vm4384_vm1, %v4728_v52, -1e+30  ;;  %v19164_v4 = vld [vmem:[%s21575_s3 + $0xcc] ss:$16 sps:$4 sm:$0xff]   ;;  %v19162_v52 = vld [vmem:[%s21575_s3 + $0xc8] ss:$16 sps:$4 sm:$0xff]  }
 0x7db   : > { %v4736_v29 = vsel %vm4439_vm2, %v4731_v25, -inf  ;;  %v19165_v23 = vld [vmem:[%s21575_s3 + $0xe8] ss:$16 sps:$4 sm:$0xff]  }
 0x7dc   : > { %4737 = vmax.xlane.f32.xlu1 %v4736_v29  ;;  %v19173_v29 = vld [vmem:[%s21575_s3 + $0x12c] ss:$16 sps:$4 sm:$0xff]  }
 0x7de   : > { %4740 = vmax.xlane.f32.xlu0 %v4739_v38  ;;  %v19171_v38 = vld [vmem:[%s21575_s3 + $0x128] ss:$16 sps:$4 sm:$0xff]  }
 0x867   : > { %v4735_v41 = vpop.xlane.xlu0 %4734 }
 0x868   : > { %v4742_v45 = vsub.f32 %v4730_v21, %v4735_v41  ;;  %v19167_v21 = vld [vmem:[%s21575_s3 + $0xec] ss:$16 sps:$4 sm:$0xff]  }
 0x869   : > { %v4738_v51 = vpop.xlane.xlu1 %4737  ;;  %v19176_v41 = vld [vmem:[%s21575_s3 + $0x14c] ss:$16 sps:$4 sm:$0xff]  }
 0x86a   : > { %v4745_v61 = vmul.f32 1.442695, %v4742_v45  ;;  %v4743_v2 = vsub.f32 %v4731_v25, %v4738_v51  ;;  %v19170_v25 = vld [vmem:[%s21575_s3 + $0x10c] ss:$16 sps:$4 sm:$0xff]   ;;  %v19174_v45 = vld [vmem:[%s21575_s3 + $0x148] ss:$16 sps:$4 sm:$0xff]  }
 0x86b   : > { %v4741_v6 = vpop.xlane.xlu0 %4740  ;;  %v19179_v51 = vld [vmem:[%s21575_s3 + $0x16c] ss:$16 sps:$4 sm:$0xff]  }
 0x86c   : > { %20128 = vpow2.f32 %v4745_v61  ;;  %v4747_v60 = vmul.f32 1.442695, %v4743_v2  ;;  %v4744_v47 = vsub.f32 %v4732_v27, %v4741_v6  ;;  %v19168_v27 = vld [vmem:[%s21575_s3 + $0x108] ss:$16 sps:$4 sm:$0xff]   ;;  %v19182_v2 = vld [vmem:[%s21575_s3 + $0x18c] ss:$16 sps:$4 sm:$0xff]  }
 0x86d   : > { %v19177_v61 = vld [vmem:[%s21575_s3 + $0x168] ss:$16 sps:$4 sm:$0xff]  }
 0x86e   : > { %20130 = vpow2.f32 %v4747_v60  ;;  %v4749_v0 = vmul.f32 1.442695, %v4744_v47  ;;  %v19180_v6 = vld [vmem:[%s21575_s3 + $0x188] ss:$16 sps:$4 sm:$0xff]   ;;  %v19185_v60 = vld [vmem:[%s21575_s3 + $0x1ac] ss:$16 sps:$4 sm:$0xff]  }
 0x86f   : > { %v19183_v47 = vld [vmem:[%s21575_s3 + $0x1a8] ss:$16 sps:$4 sm:$0xff]  }
 0x870   : > { %20132 = vpow2.f32 %v4749_v0  ;;  %v19188_v0 = vld [vmem:[%s21575_s3 + $0x1cc] ss:$16 sps:$4 sm:$0xff]  }
 0x876   : > { %v20129_v48 = vpop.eup %20128 }
 0x877   : > { %v4751_v49 = vsel %vm4439_vm2, %v20129_v48, 0.0 }
 0x878   : > { %v20131_v7 = vpop.eup %20130  ;;  %4752 = vadd.xlane.f32.xlu1 %v4751_v49  ;;  %v19191_v49 = vld [vmem:[%s21575_s3 + $0x1ec] ss:$16 sps:$4 sm:$0xff]  }
 0x879   : > { %v4754_v9 = vsel %vm4439_vm2, %v20131_v7, 0.0 }
 0x87a   : > { %v20133_v44 = vpop.eup %20132  ;;  %4755 = vadd.xlane.f32.xlu0 %v4754_v9  ;;  %v22497_v9 = vpack.c.bf16 %v22436_v63, %v22436_v63 }
 0x87b   : > { %v4757_v8 = vsel %vm4439_vm2, %v20133_v44, 0.0 }
 0x87c   : > { %4758 = vadd.xlane.f32.xlu1 %v4757_v8 }
 0x905   : > { %v4753_v10 = vpop.xlane.xlu1 %4752 }
 0x906   : > { %20134 = vrcp.f32 %v4753_v10 }
 0x907   : > { %v4756_v59 = vpop.xlane.xlu0 %4755 }
 0x908   : > { %20136 = vrcp.f32 %v4756_v59 }
 0x909   : > { %v4759_v11 = vpop.xlane.xlu1 %4758 }
 0x90a   : > { %20138 = vrcp.f32 %v4759_v11 }
 0x910   : > { %v20135_v12 = vpop.eup %20134 }
 0x911   : > { %v4763_v53 = vmul.f32 %v20135_v12, %v20129_v48  ;;  %v19186_v48 = vld [vmem:[%s21575_s3 + $0x1c8] ss:$16 sps:$4 sm:$0xff]  }
 0x912   : > { %v20137_v5 = vpop.eup %20136 }
 0x913   : > { %v4764_v17 = vmul.f32 %v20137_v5, %v20131_v7  ;;  %v19189_v7 = vld [vmem:[%s21575_s3 + $0x1e8] ss:$16 sps:$4 sm:$0xff]  }
 0x914   : > { %v20139_v58 = vpop.eup %20138 }
 0x915   : > { %v4765_v32 = vmul.f32 %v20139_v58, %v20133_v44  ;;  %v4766_v46 = vpack.c.bf16 %v4764_v17, %v4763_v53  ;;  %v22503_v44 = vpack.c.bf16 %v22432_v30, %v22432_v30 }
 0x917   : > { %18047 = vmatprep.mubr.msk.bf16.mxu0 %vm4439_vm2, %v4766_v46  ;;  %v4767_v13 = vpack.c.bf16 %v4765_v32, %v4765_v32 }
 0x919   : > { %18048 = vmatmul.mubr.msk.bf16.vlgmr.msra.gmra.mrb[32].mxu0 %vm4439_vm2, %v4767_v13 }
 0x91a   : > { %18052 = vmatpush3.bf16.xpose.msra.mxu0 %v22382_v39  ;;  %18055 = vmatprep.mubr.bf16.mxu0 %v4361_v26  ;;  %v19150_v26 = vld [vmem:[%s21575_s3 + $0x48] ss:$16 sps:$4 sm:$0xff]   ;;  %v19158_v39 = vld [vmem:[%s21575_s3 + $0x8c] ss:$16 sps:$4 sm:$0xff]  }
 0x91b   : > { %18053 = vmatprep.subr.bf16.mxu0 %v4377_v3 }
 0x922   : > { %18054 = vmatpush3.bf16.xpose.msra.mxu0 %v4377_v3 }
 0x923   : > { %5871 = vmatprep.subr.bf16.mxu0 %v19146_v14 }
 0x929   : > { %18056 = vmatmul.mubr.bf16.vlgmr.msra.gmra.mrb[36].mxu0 %v4373_v54 }
 0x92a   : > { %5872 = vmatpush1.bf16.msra.mxu0 %v19144_v1  ;;  %5903 = vmatprep.mubr.bf16.mxu0 %v22438_v15 }
 0x92b   : > { %5873 = vmatprep.subr.bf16.mxu0 %v19149_v16 }
 0x92e   : > { %5874 = vmatpush1.bf16.msra.mxu0 %v19147_v31 }
 0x92f   : > { %5875 = vmatprep.subr.bf16.mxu0 %v19152_v37 }
 0x932   : > { %5876 = vmatpush1.bf16.msra.mxu0 %v19150_v26 }
 0x933   : > { %5877 = vmatprep.subr.bf16.mxu0 %v19155_v24 }
 0x936   : > { %5878 = vmatpush1.bf16.msra.mxu0 %v19153_v50 }
 0x937   : > { %5879 = vmatprep.subr.bf16.mxu0 %v19158_v39 }
 0x93a   : > { %5880 = vmatpush1.bf16.msra.mxu0 %v19156_v42 }
 0x93b   : > { %5881 = vmatprep.subr.bf16.mxu0 %v19161_v56 }
 0x93e   : > { %5882 = vmatpush1.bf16.msra.mxu0 %v19159_v18 }
 0x93f   : > { %5883 = vmatprep.subr.bf16.mxu0 %v19164_v4 }
 0x942   : > { %5884 = vmatpush1.bf16.msra.mxu0 %v19162_v52 }
 0x943   : > { %5885 = vmatprep.subr.bf16.mxu0 %v19167_v21 }
 0x946   : > { %5886 = vmatpush1.bf16.msra.mxu0 %v19165_v23 }
 0x947   : > { %5887 = vmatprep.subr.bf16.mxu0 %v19170_v25 }
 0x94a   : > { %5888 = vmatpush1.bf16.msra.mxu0 %v19168_v27 }
 0x94b   : > { %5889 = vmatprep.subr.bf16.mxu0 %v19173_v29 }
 0x94e   : > { %5890 = vmatpush1.bf16.msra.mxu0 %v19171_v38  ;;  %v19194_v38 = vld [vmem:[%s21575_s3 + $0x4] ss:$16 sps:$4 sm:$0xff]  }
 0x94f   : > { %5891 = vmatprep.subr.bf16.mxu0 %v19176_v41  ;;  %5769 = vmatprep.subr.bf16.mxu1 %v19194_v38  ;;  %v19243_v41 = vld [vmem:[%s21575_s3 + $0x208] ss:$16 sps:$4 sm:$0xff]   ;;  %v19198_v38 = vld [vmem:[%s21575_s3 + $0x40] ss:$16 sps:$4 sm:$0xff]  }
 0x952   : > { %5892 = vmatpush1.bf16.msra.mxu0 %v19174_v45  ;;  %v19245_v45 = vld [vmem:[%s21575_s3 + $0x20c] ss:$16 sps:$4 sm:$0xff]  }
 0x953   : > { %5893 = vmatprep.subr.bf16.mxu0 %v19179_v51  ;;  %v19251_v51 = vld [vmem:[%s21575_s3 + $0x22c] ss:$16 sps:$4 sm:$0xff]  }
 0x956   : > { %5894 = vmatpush1.bf16.msra.mxu0 %v19177_v61  ;;  %v19249_v61 = vld [vmem:[%s21575_s3 + $0x228] ss:$16 sps:$4 sm:$0xff]  }
 0x957   : > { %5895 = vmatprep.subr.bf16.mxu0 %v19182_v2  ;;  %v19257_v2 = vld [vmem:[%s21575_s3 + $0x24c] ss:$16 sps:$4 sm:$0xff]  }
 0x95a   : > { %5896 = vmatpush1.bf16.msra.mxu0 %v19180_v6  ;;  %v19255_v6 = vld [vmem:[%s21575_s3 + $0x248] ss:$16 sps:$4 sm:$0xff]  }
 0x95b   : > { %5897 = vmatprep.subr.bf16.mxu0 %v19185_v60  ;;  %v19263_v60 = vld [vmem:[%s21575_s3 + $0x26c] ss:$16 sps:$4 sm:$0xff]  }
 0x95e   : > { %5898 = vmatpush1.bf16.msra.mxu0 %v19183_v47  ;;  %v19261_v47 = vld [vmem:[%s21575_s3 + $0x268] ss:$16 sps:$4 sm:$0xff]  }
 0x95f   : > { %5899 = vmatprep.subr.bf16.mxu0 %v19188_v0  ;;  %v19269_v0 = vld [vmem:[%s21575_s3 + $0x28c] ss:$16 sps:$4 sm:$0xff]  }
 0x962   : > { %5900 = vmatpush1.bf16.msra.mxu0 %v19186_v48  ;;  %v19267_v48 = vld [vmem:[%s21575_s3 + $0x288] ss:$16 sps:$4 sm:$0xff]  }
 0x963   : > { %5901 = vmatprep.subr.bf16.mxu0 %v19191_v49  ;;  %v19275_v49 = vld [vmem:[%s21575_s3 + $0x2ac] ss:$16 sps:$4 sm:$0xff]  }
 0x966   : > { %5902 = vmatpush1.bf16.msra.mxu0 %v19189_v7  ;;  %v19273_v7 = vld [vmem:[%s21575_s3 + $0x2a8] ss:$16 sps:$4 sm:$0xff]  }
 0x967   : > { %5922 = vmatprep.subr.bf16.mxu0 %v19245_v45  ;;  %v19201_v45 = vld [vmem:[%s21575_s3 + $0x60] ss:$16 sps:$4 sm:$0xff]  }
 0x969   : > { %5904 = vmatmul.mubr.bf16.vlgmr.msra.gmra.mrb[40].mxu0 %v22434_v62 }
 0x96a   : > { %5913 = vmatprep.mubr.bf16.mxu0 %v22497_v9  ;;  %5923 = vmatpush1.bf16.msra.mxu0 %v19243_v41  ;;  %v19203_v41 = vld [vmem:[%s21575_s3 + $0x64] ss:$16 sps:$4 sm:$0xff]  }
 0x96b   : > { %5924 = vmatprep.subr.bf16.mxu0 %v19251_v51  ;;  %v19206_v51 = vld [vmem:[%s21575_s3 + $0x84] ss:$16 sps:$4 sm:$0xff]  }
 0x96e   : > { %5925 = vmatpush1.bf16.msra.mxu0 %v19249_v61  ;;  %v19209_v61 = vld [vmem:[%s21575_s3 + $0xa4] ss:$16 sps:$4 sm:$0xff]  }
 0x96f   : > { %5926 = vmatprep.subr.bf16.mxu0 %v19257_v2  ;;  %v19207_v2 = vld [vmem:[%s21575_s3 + $0xa0] ss:$16 sps:$4 sm:$0xff]  }
 0x971   : > { %5914 = vmatmul.mubr.bf16.gmra.mrb[44].mxu0 %v22503_v44 }
 0x972   : > { %5927 = vmatpush1.bf16.msra.mxu0 %v19255_v6  ;;  %v19212_v6 = vld [vmem:[%s21575_s3 + $0xc4] ss:$16 sps:$4 sm:$0xff]  }
 0x973   : > { %5928 = vmatprep.subr.bf16.mxu0 %v19263_v60  ;;  %v19210_v60 = vld [vmem:[%s21575_s3 + $0xc0] ss:$16 sps:$4 sm:$0xff]  }
 0x976   : > { %5929 = vmatpush1.bf16.msra.mxu0 %v19261_v47  ;;  %v19215_v47 = vld [vmem:[%s21575_s3 + $0xe4] ss:$16 sps:$4 sm:$0xff]  }
 0x977   : > { %5930 = vmatprep.subr.bf16.mxu0 %v19269_v0  ;;  %v19213_v0 = vld [vmem:[%s21575_s3 + $0xe0] ss:$16 sps:$4 sm:$0xff]  }
 0x97a   : > { %5931 = vmatpush1.bf16.msra.mxu0 %v19267_v48  ;;  %v19218_v48 = vld [vmem:[%s21575_s3 + $0x104] ss:$16 sps:$4 sm:$0xff]  }
 0x97b   : > { %5932 = vmatprep.subr.bf16.mxu0 %v19275_v49  ;;  %v19216_v49 = vld [vmem:[%s21575_s3 + $0x100] ss:$16 sps:$4 sm:$0xff]  }
 0x97e   : > { %5933 = vmatpush1.bf16.msra.mxu0 %v19273_v7  ;;  %v19221_v7 = vld [vmem:[%s21575_s3 + $0x124] ss:$16 sps:$4 sm:$0xff]  }
 0x9ec   : > { %v22506_v8 = vpop.f32.mrb[32].mxu0 }
 0x9ed   : > { %v4811_v10 = vpop.f32.mrb[33].mxu0 }
 0x9ee   : > { %v18050_v59 = vpop.f32.mrb[34].mxu0 }
 0x9ef   : > { %v4814_v11 = vpop.f32.mrb[35].mxu0  ;;  %v19279_v59 = vld [vmem:[%s21575_s3 + $0x2c8] ss:$16 sps:$4 sm:$0xff]  }
 0x9f0   : > { %v22508_v12 = vpack.c.bf16 %v4814_v11, %v4811_v10  ;;  %v19281_v10 = vld [vmem:[%s21575_s3 + $0x2cc] ss:$16 sps:$4 sm:$0xff]  }
 0x9f1   : > { %5934 = vmatprep.subr.bf16.mxu0 %v19281_v10  ;;  %v19287_v11 = vld [vmem:[%s21575_s3 + $0x2ec] ss:$16 sps:$4 sm:$0xff]   ;;  %v19219_v10 = vld [vmem:[%s21575_s3 + $0x120] ss:$16 sps:$4 sm:$0xff]  }
 0x9f2   : > { %5935 = vmatpush1.bf16.msra.mxu0 %v19279_v59  ;;  %v19224_v59 = vld [vmem:[%s21575_s3 + $0x144] ss:$16 sps:$4 sm:$0xff]  }
 0x9f3   : > { %5936 = vmatprep.subr.bf16.mxu0 %v19287_v11  ;;  %v19222_v11 = vld [vmem:[%s21575_s3 + $0x140] ss:$16 sps:$4 sm:$0xff]  }
 0x9fc   : > { %v18057_v5 = vpop.f32.mrb[36].mxu0 }
 0x9fd   : > { %v4859_v63 = vpop.f32.mrb[37].mxu0  ;;  %v4875_v53 = vmul.f32 0.088388346, %v18057_v5  ;;  %v19285_v5 = vld [vmem:[%s21575_s3 + $0x2e8] ss:$16 sps:$4 sm:$0xff]  }
 0x9fe   : > { %v4873_v17 = vmul.f32 0.088388346, %v4859_v63  ;;  %v18058_v58 = vpop.f32.mrb[38].mxu0  ;;  %v19293_v63 = vld [vmem:[%s21575_s3 + $0x30c] ss:$16 sps:$4 sm:$0xff]   ;;  %5937 = vmatpush1.bf16.msra.mxu0 %v19285_v5 }
 0x9ff   : > { %v4862_v32 = vpop.f32.mrb[39].mxu0  ;;  %v4878_v14 = vsel %vm4384_vm1, %v4875_v53, -1e+30  ;;  %v19291_v53 = vld [vmem:[%s21575_s3 + $0x308] ss:$16 sps:$4 sm:$0xff]   ;;  %5938 = vmatprep.subr.bf16.mxu0 %v19293_v63 }
 0xa00   : > { %v4874_v46 = vmul.f32 0.088388346, %v4862_v32  ;;  %v4876_v30 = vsel %vm4384_vm1, %v4873_v17, -1e+30  ;;  %v4885_v1 = vsel %vm4439_vm2, %v4878_v14, -inf }
 0xa01   : > { %v4879_v13 = vsel %vm4439_vm2, %v4876_v30, -inf  ;;  %v19299_v17 = vld [vmem:[%s21575_s3 + $0x32c] ss:$16 sps:$4 sm:$0xff]   ;;  %v19297_v32 = vld [vmem:[%s21575_s3 + $0x328] ss:$16 sps:$4 sm:$0xff]  }
 0xa02   : > { %4880 = vmax.xlane.f32.xlu0 %v4879_v13  ;;  %v4877_v3 = vsel %vm4384_vm1, %v4874_v46, -1e+30  ;;  %5939 = vmatpush1.bf16.msra.mxu0 %v19291_v53  ;;  %v19305_v46 = vld [vmem:[%s21575_s3 + $0x34c] ss:$16 sps:$4 sm:$0xff]   ;;  %v19227_v5 = vld [vmem:[%s21575_s3 + $0x164] ss:$16 sps:$4 sm:$0xff]  }
 0xa03   : > { %v4882_v43 = vsel %vm4439_vm2, %v4877_v3, -inf  ;;  %5940 = vmatprep.subr.bf16.mxu0 %v19299_v17  ;;  %v19225_v63 = vld [vmem:[%s21575_s3 + $0x160] ss:$16 sps:$4 sm:$0xff]   ;;  %v19230_v53 = vld [vmem:[%s21575_s3 + $0x184] ss:$16 sps:$4 sm:$0xff]  }
 0xa04   : > { %4883 = vmax.xlane.f32.xlu1 %v4882_v43  ;;  %v19309_v43 = vld [vmem:[%s21575_s3 + $0x368] ss:$16 sps:$4 sm:$0xff]   ;;  %v19228_v17 = vld [vmem:[%s21575_s3 + $0x180] ss:$16 sps:$4 sm:$0xff]  }
 0xa06   : > { %4886 = vmax.xlane.f32.xlu0 %v4885_v1  ;;  %5941 = vmatpush1.bf16.msra.mxu0 %v19297_v32  ;;  %v19317_v1 = vld [vmem:[%s21575_s3 + $0x38c] ss:$16 sps:$4 sm:$0xff]   ;;  %v19231_v32 = vld [vmem:[%s21575_s3 + $0x1a0] ss:$16 sps:$4 sm:$0xff]  }
 0xa07   : > { %5942 = vmatprep.subr.bf16.mxu0 %v19305_v46  ;;  %v19236_v46 = vld [vmem:[%s21575_s3 + $0x1c4] ss:$16 sps:$4 sm:$0xff]  }
 0xa44   : > { %v22519_v54 = vpop.f32.mrb[44].mxu0 }
 0xa45   : > { %v22521_v16 = vpop.f32.mrb[45].mxu0 }
 0xa46   : > { %v5919_v31 = vpop.f32.mrb[46].mxu0 }
 0xa47   : > { %v5920_v37 = vpop.f32.mrb[47].mxu0 }
 0xa48   : > { %v19315_v37 = vld [vmem:[%s21575_s3 + $0x388] ss:$16 sps:$4 sm:$0xff]  }
 0xa8f   : > { %v4881_v26 = vpop.xlane.xlu0 %4880 }
 0xa90   : > { %v4888_v24 = vsub.f32 %v4876_v30, %v4881_v26 }
 0xa91   : > { %v4884_v50 = vpop.xlane.xlu1 %4883 }
 0xa92   : > { %v4891_v39 = vmul.f32 1.442695, %v4888_v24  ;;  %v4889_v42 = vsub.f32 %v4877_v3, %v4884_v50  ;;  %v19303_v3 = vld [vmem:[%s21575_s3 + $0x348] ss:$16 sps:$4 sm:$0xff]   ;;  %v19323_v24 = vld [vmem:[%s21575_s3 + $0x3ac] ss:$16 sps:$4 sm:$0xff]  }
 0xa93   : > { %v4887_v56 = vpop.xlane.xlu0 %4886  ;;  %5943 = vmatpush1.bf16.msra.mxu0 %v19303_v3  ;;  %v19237_v3 = vld [vmem:[%s21575_s3 + $0x1e0] ss:$16 sps:$4 sm:$0xff]  }
 0xa94   : > { %20140 = vpow2.f32 %v4891_v39  ;;  %v4893_v57 = vmul.f32 1.442695, %v4889_v42  ;;  %v4890_v18 = vsub.f32 %v4878_v14, %v4887_v56  ;;  %v19311_v14 = vld [vmem:[%s21575_s3 + $0x36c] ss:$16 sps:$4 sm:$0xff]  }
 0xa95   : > { %5944 = vmatprep.subr.bf16.mxu0 %v19311_v14  ;;  %v19242_v14 = vld [vmem:[%s21575_s3 + $0x204] ss:$16 sps:$4 sm:$0xff]  }
 0xa96   : > { %20142 = vpow2.f32 %v4893_v57  ;;  %v4895_v4 = vmul.f32 1.442695, %v4890_v18  ;;  %v19321_v18 = vld [vmem:[%s21575_s3 + $0x3a8] ss:$16 sps:$4 sm:$0xff]  }
 0xa97   : > { %5945 = vmatpush1.bf16.msra.mxu0 %v19309_v43  ;;  %v19240_v43 = vld [vmem:[%s21575_s3 + $0x200] ss:$16 sps:$4 sm:$0xff]  }
 0xa98   : > { %20144 = vpow2.f32 %v4895_v4  ;;  %5946 = vmatprep.subr.bf16.mxu0 %v19317_v1  ;;  %v19192_v4 = vld [vmem:[%s21575_s3] ss:$16 sps:$4 sm:$0xff]   ;;  %v19248_v1 = vld [vmem:[%s21575_s3 + $0x224] ss:$16 sps:$4 sm:$0xff]  }
 0xa9b   : > { %5947 = vmatpush1.bf16.msra.mxu0 %v19315_v37  ;;  %v19254_v37 = vld [vmem:[%s21575_s3 + $0x244] ss:$16 sps:$4 sm:$0xff]  }
 0xa9c   : > { %5948 = vmatprep.subr.bf16.mxu0 %v19323_v24  ;;  %v19260_v24 = vld [vmem:[%s21575_s3 + $0x264] ss:$16 sps:$4 sm:$0xff]  }
 0xa9e   : > { %v22523_v52 = vpop.eup %20140 }
 0xa9f   : > { %v4897_v21 = vsel %vm4439_vm2, %v22523_v52, 0.0  ;;  %5949 = vmatpush1.bf16.msra.mxu0 %v19321_v18  ;;  %v19284_v18 = vld [vmem:[%s21575_s3 + $0x2e4] ss:$16 sps:$4 sm:$0xff]  }
 0xaa0   : > { %v22527_v23 = vpop.eup %20142  ;;  %4898 = vadd.xlane.f32.xlu1 %v4897_v21 }
 0xaa1   : > { %v4900_v25 = vsel %vm4439_vm2, %v22527_v23, 0.0 }
 0xaa2   : > { %v22531_v27 = vpop.eup %20144  ;;  %4901 = vadd.xlane.f32.xlu0 %v4900_v25  ;;  %v19197_v25 = vld [vmem:[%s21575_s3 + $0x24] ss:$16 sps:$4 sm:$0xff]  }
 0xaa3   : > { %v4903_v29 = vsel %vm4439_vm2, %v22531_v27, 0.0 }
 0xaa4   : > { %4904 = vadd.xlane.f32.xlu1 %v4903_v29  ;;  %v19329_v29 = vld [vmem:[%s21575_s3 + $0x3cc] ss:$16 sps:$4 sm:$0xff]  }
 0xaa5   : > { %5950 = vmatprep.subr.bf16.mxu0 %v19329_v29  ;;  %v19288_v29 = vld [vmem:[%s21575_s3 + $0x300] ss:$16 sps:$4 sm:$0xff]  }
 0xb2d   : > { %v4899_v58 = vpop.xlane.xlu1 %4898 }
 0xb2e   : > { %20146 = vrcp.f32 %v4899_v58  ;;  %v19233_v58 = vld [vmem:[%s21575_s3 + $0x1a4] ss:$16 sps:$4 sm:$0xff]  }
 0xb2f   : > { %v4902_v30 = vpop.xlane.xlu0 %4901 }
 0xb30   : > { %20148 = vrcp.f32 %v4902_v30  ;;  %v19234_v30 = vld [vmem:[%s21575_s3 + $0x1c0] ss:$16 sps:$4 sm:$0xff]  }
 0xb31   : > { %v4905_v13 = vpop.xlane.xlu1 %4904 }
 0xb32   : > { %20150 = vrcp.f32 %v4905_v13  ;;  %v19239_v13 = vld [vmem:[%s21575_s3 + $0x1e4] ss:$16 sps:$4 sm:$0xff]  }
 0xb38   : > { %v20147_v31 = vpop.eup %20146 }
 0xb39   : > { %v4909_v50 = vmul.f32 %v20147_v31, %v22523_v52  ;;  %v19327_v52 = vld [vmem:[%s21575_s3 + $0x3c8] ss:$16 sps:$4 sm:$0xff]   ;;  %v19246_v31 = vld [vmem:[%s21575_s3 + $0x220] ss:$16 sps:$4 sm:$0xff]  }
 0xb3a   : > { %v20149_v26 = vpop.eup %20148  ;;  %5951 = vmatpush1.bf16.msra.mxu0 %v19327_v52  ;;  %v19296_v52 = vld [vmem:[%s21575_s3 + $0x324] ss:$16 sps:$4 sm:$0xff]  }
 0xb3b   : > { %v4910_v39 = vmul.f32 %v20149_v26, %v22527_v23  ;;  %v19195_v23 = vld [vmem:[%s21575_s3 + $0x20] ss:$16 sps:$4 sm:$0xff]  }
 0xb3c   : > { %v20151_v42 = vpop.eup %20150  ;;  %v19252_v26 = vld [vmem:[%s21575_s3 + $0x240] ss:$16 sps:$4 sm:$0xff]  }
 0xb3d   : > { %v4911_v56 = vmul.f32 %v20151_v42, %v22531_v27  ;;  %v4912_v57 = vpack.c.bf16 %v4910_v39, %v4909_v50  ;;  %v19200_v27 = vld [vmem:[%s21575_s3 + $0x44] ss:$16 sps:$4 sm:$0xff]   ;;  %v19264_v50 = vld [vmem:[%s21575_s3 + $0x280] ss:$16 sps:$4 sm:$0xff]  }
 0xb3e   : > { %v19272_v39 = vld [vmem:[%s21575_s3 + $0x2a4] ss:$16 sps:$4 sm:$0xff]   ;;  %v19270_v42 = vld [vmem:[%s21575_s3 + $0x2a0] ss:$16 sps:$4 sm:$0xff]  }
 0xb3f   : > { %18063 = vmatprep.mubr.msk.bf16.mxu1 %vm4439_vm2, %v4912_v57  ;;  %v4913_v21 = vpack.c.bf16 %v4911_v56, %v4911_v56  ;;  %v19278_v56 = vld [vmem:[%s21575_s3 + $0x2c4] ss:$16 sps:$4 sm:$0xff]   ;;  %v19335_v57 = vld [vmem:[%s21575_s3 + $0x3ec] ss:$16 sps:$4 sm:$0xff]  }
 0xb40   : > { %5952 = vmatprep.subr.bf16.mxu0 %v19335_v57 }
 0xb41   : > { %18064 = vmatmul.mubr.msk.bf16.vlgmr.msra.gmra.mrb[36].mxu1 %vm4439_vm2, %v4913_v21  ;;  %v19282_v21 = vld [vmem:[%s21575_s3 + $0x2e0] ss:$16 sps:$4 sm:$0xff]  }
 0xb42   : > { %5770 = vmatpush1.bf16.msra.mxu1 %v19192_v4  ;;  %5801 = vmatprep.mubr.bf16.mxu1 %v22438_v15  ;;  %v19204_v15 = vld [vmem:[%s21575_s3 + $0x80] ss:$16 sps:$4 sm:$0xff]   ;;  %v19333_v4 = vld [vmem:[%s21575_s3 + $0x3e8] ss:$16 sps:$4 sm:$0xff]  }
 0xb43   : > { %5771 = vmatprep.subr.bf16.mxu1 %v19197_v25  ;;  %5953 = vmatpush1.bf16.msra.mxu0 %v19333_v4  ;;  %v19290_v25 = vld [vmem:[%s21575_s3 + $0x304] ss:$16 sps:$4 sm:$0xff]  }
 0xb46   : > { %5772 = vmatpush1.bf16.msra.mxu1 %v19195_v23  ;;  %v19294_v23 = vld [vmem:[%s21575_s3 + $0x320] ss:$16 sps:$4 sm:$0xff]  }
 0xb47   : > { %5773 = vmatprep.subr.bf16.mxu1 %v19200_v27  ;;  %v19302_v27 = vld [vmem:[%s21575_s3 + $0x344] ss:$16 sps:$4 sm:$0xff]  }
 0xb4a   : > { %5774 = vmatpush1.bf16.msra.mxu1 %v19198_v38  ;;  %v19300_v38 = vld [vmem:[%s21575_s3 + $0x340] ss:$16 sps:$4 sm:$0xff]  }
 0xb4b   : > { %5775 = vmatprep.subr.bf16.mxu1 %v19203_v41  ;;  %v19308_v41 = vld [vmem:[%s21575_s3 + $0x364] ss:$16 sps:$4 sm:$0xff]  }
 0xb4e   : > { %5776 = vmatpush1.bf16.msra.mxu1 %v19201_v45  ;;  %v19306_v45 = vld [vmem:[%s21575_s3 + $0x360] ss:$16 sps:$4 sm:$0xff]  }
 0xb4f   : > { %5777 = vmatprep.subr.bf16.mxu1 %v19206_v51  ;;  %v19314_v51 = vld [vmem:[%s21575_s3 + $0x384] ss:$16 sps:$4 sm:$0xff]  }
 0xb52   : > { %5778 = vmatpush1.bf16.msra.mxu1 %v19204_v15  ;;  %v19312_v15 = vld [vmem:[%s21575_s3 + $0x380] ss:$16 sps:$4 sm:$0xff]  }
 0xb53   : > { %5779 = vmatprep.subr.bf16.mxu1 %v19209_v61  ;;  %v19320_v61 = vld [vmem:[%s21575_s3 + $0x3a4] ss:$16 sps:$4 sm:$0xff]  }
 0xb56   : > { %5780 = vmatpush1.bf16.msra.mxu1 %v19207_v2  ;;  %v19318_v2 = vld [vmem:[%s21575_s3 + $0x3a0] ss:$16 sps:$4 sm:$0xff]  }
 0xb57   : > { %5781 = vmatprep.subr.bf16.mxu1 %v19212_v6  ;;  %v19326_v6 = vld [vmem:[%s21575_s3 + $0x3c4] ss:$16 sps:$4 sm:$0xff]  }
 0xb5a   : > { %5782 = vmatpush1.bf16.msra.mxu1 %v19210_v60  ;;  %v19324_v60 = vld [vmem:[%s21575_s3 + $0x3c0] ss:$16 sps:$4 sm:$0xff]  }
 0xb5b   : > { %5783 = vmatprep.subr.bf16.mxu1 %v19215_v47  ;;  %v19332_v47 = vld [vmem:[%s21575_s3 + $0x3e4] ss:$16 sps:$4 sm:$0xff]  }
 0xb5e   : > { %5784 = vmatpush1.bf16.msra.mxu1 %v19213_v0  ;;  %v19330_v0 = vld [vmem:[%s21575_s3 + $0x3e0] ss:$16 sps:$4 sm:$0xff]  }
 0xb5f   : > { %5785 = vmatprep.subr.bf16.mxu1 %v19218_v48 }
 0xb62   : > { %5786 = vmatpush1.bf16.msra.mxu1 %v19216_v49 }
 0xb63   : > { %5787 = vmatprep.subr.bf16.mxu1 %v19221_v7 }
 0xb66   : > { %5788 = vmatpush1.bf16.msra.mxu1 %v19219_v10 }
 0xb67   : > { %5789 = vmatprep.subr.bf16.mxu1 %v19224_v59 }
 0xb6a   : > { %5790 = vmatpush1.bf16.msra.mxu1 %v19222_v11 }
 0xb6b   : > { %5791 = vmatprep.subr.bf16.mxu1 %v19227_v5  ;;  %v4977_v5 = vpack.c.bf16 %v22506_v8, %v22506_v8 }
 0xb6e   : > { %5792 = vmatpush1.bf16.msra.mxu1 %v19225_v63 }
 0xb6f   : > { %5793 = vmatprep.subr.bf16.mxu1 %v19230_v53 }
 0xb72   : > { %5794 = vmatpush1.bf16.msra.mxu1 %v19228_v17 }
 0xb73   : > { %5795 = vmatprep.subr.bf16.mxu1 %v19233_v58 }
 0xb76   : > { %5796 = vmatpush1.bf16.msra.mxu1 %v19231_v32  ;;  %v5107_v32 = vld [vmem:[%s24562_s16] sm:$0xf] }
 0xb77   : > { %5797 = vmatprep.subr.bf16.mxu1 %v19236_v46  ;;  %v5112_v46 = vrot.slane %v5107_v32, %v22115_v33  ;;  %v5124_v8 = vrot.slane %v5107_v32, %v22285_v20 }
 0xb7a   : > { %5798 = vmatpush1.bf16.msra.mxu1 %v19234_v30  ;;  %v5120_v30 = vrot.slane %v5107_v32, %v22282_v40 }
 0xb7b   : > { %5799 = vmatprep.subr.bf16.mxu1 %v19239_v13  ;;  %v5116_v13 = vrot.slane %v5107_v32, %v22118_v34 }
 0xb7e   : > { %5800 = vmatpush1.bf16.msra.mxu1 %v19237_v3 }
 0xb7f   : > { %5820 = vmatprep.subr.bf16.mxu1 %v19242_v14 }
 0xb81   : > { %5802 = vmatmul.mubr.bf16.vlgmr.msra.gmra.mrb[40].mxu1 %v22434_v62  ;;  %v19258_v62 = vld [vmem:[%s21575_s3 + $0x260] ss:$16 sps:$4 sm:$0xff]  }
 0xb82   : > { %5811 = vmatprep.mubr.bf16.mxu1 %v22497_v9  ;;  %5821 = vmatpush1.bf16.msra.mxu1 %v19240_v43  ;;  %v19266_v9 = vld [vmem:[%s21575_s3 + $0x284] ss:$16 sps:$4 sm:$0xff]  }
 0xb83   : > { %5822 = vmatprep.subr.bf16.mxu1 %v19248_v1 }
 0xb86   : > { %5823 = vmatpush1.bf16.msra.mxu1 %v19246_v31 }
 0xb87   : > { %5824 = vmatprep.subr.bf16.mxu1 %v19254_v37 }
 0xb89   : > { %5812 = vmatmul.mubr.bf16.gmra.mrb[44].mxu1 %v22503_v44  ;;  %v19276_v44 = vld [vmem:[%s21575_s3 + $0x2c0] ss:$16 sps:$4 sm:$0xff]   ;;  %s24564_s3 = scalar_lea.vmem [#allocation11], %s21573_s15 }
 0xb8a   : > { %5825 = vmatpush1.bf16.msra.mxu1 %v19252_v26 }
 0xb8b   : > { %5826 = vmatprep.subr.bf16.mxu1 %v19260_v24 }
 0xb8e   : > { %5827 = vmatpush1.bf16.msra.mxu1 %v19258_v62  ;;  %v20165_v62 = vld [vmem:[#allocation2] sm:$0xff] }
 0xb8f   : > { %5828 = vmatprep.subr.bf16.mxu1 %v19266_v9 }
 0xb92   : > { %5829 = vmatpush1.bf16.msra.mxu1 %v19264_v50 }
 0xb93   : > { %5830 = vmatprep.subr.bf16.mxu1 %v19272_v39 }
 0xb96   : > { %5831 = vmatpush1.bf16.msra.mxu1 %v19270_v42 }
 0xb97   : > { %5832 = vmatprep.subr.bf16.mxu1 %v19278_v56  ;;  %v20166_v56 = vld [vmem:[#allocation2 + $0x8] sm:$0xff] }
 0xb9a   : > { %5833 = vmatpush1.bf16.msra.mxu1 %v19276_v44 }
 0xb9b   : > { %5834 = vmatprep.subr.bf16.mxu1 %v19284_v18 }
 0xb9e   : > { %5835 = vmatpush1.bf16.msra.mxu1 %v19282_v21  ;;  %v20167_v21 = vld [vmem:[#allocation2 + $0x20] sm:$0xff] }
 0xb9f   : > { %5836 = vmatprep.subr.bf16.mxu1 %v19290_v25 }
 0xba2   : > { %5837 = vmatpush1.bf16.msra.mxu1 %v19288_v29 }
 0xba3   : > { %5838 = vmatprep.subr.bf16.mxu1 %v19296_v52  ;;  %v20168_v52 = vld [vmem:[#allocation2 + $0x10] sm:$0xff] }
 0xba6   : > { %5839 = vmatpush1.bf16.msra.mxu1 %v19294_v23 }
 0xba7   : > { %5840 = vmatprep.subr.bf16.mxu1 %v19302_v27 }
 0xbaa   : > { %5841 = vmatpush1.bf16.msra.mxu1 %v19300_v38  ;;  %v20169_v38 = vld [vmem:[#allocation2 + $0x28] sm:$0xff] }
 0xbab   : > { %5842 = vmatprep.subr.bf16.mxu1 %v19308_v41 }
 0xbae   : > { %5843 = vmatpush1.bf16.msra.mxu1 %v19306_v45  ;;  %v5916_v45 = vadd.f32 %v22519_v54, %v5120_v30 }
 0xbaf   : > { %5844 = vmatprep.subr.bf16.mxu1 %v19314_v51  ;;  %v5918_v51 = vadd.f32 %v22521_v16, %v5124_v8 }
 0xbb2   : > { %5845 = vmatpush1.bf16.msra.mxu1 %v19312_v15 }
 0xbb3   : > { %5846 = vmatprep.subr.bf16.mxu1 %v19320_v61 }
 0xbb6   : > { %5847 = vmatpush1.bf16.msra.mxu1 %v19318_v2  ;;  %v20170_v2 = vld [vmem:[#allocation2 + $0x18] sm:$0xff] }
 0xbb7   : > { %5848 = vmatprep.subr.bf16.mxu1 %v19326_v6 }
 0xbba   : > { %5849 = vmatpush1.bf16.msra.mxu1 %v19324_v60  ;;  %v20171_v60 = vld [vmem:[#allocation2 + $0x30] sm:$0xff] }
 0xbbb   : > { %5850 = vmatprep.subr.bf16.mxu1 %v19332_v47 }
 0xbbe   : > { %5851 = vmatpush1.bf16.msra.mxu1 %v19330_v0 }
 0xc14   : > { %v18065_v48 = vpop.f32.mrb[36].mxu1 }
 0xc15   : > { %v4957_v49 = vpop.f32.mrb[37].mxu1  ;;  %v4978_v11 = vpack.c.bf16 %v18065_v48, %v18065_v48 }
 0xc16   : > { %v18066_v7 = vpop.f32.mrb[38].mxu1 }
 0xc17   : > { %v4960_v10 = vpop.f32.mrb[39].mxu1 }
 0xc18   : > { %v4974_v59 = vpack.c.bf16 %v4960_v10, %v4957_v49  ;;  %v20172_v10 = vld [vmem:[#allocation2 + $0x38] sm:$0xff] }
 0xc1a   : > { %5852 = vmatprep.mubr.bf16.mxu1 %v4974_v59  ;;  %5954 = vmatprep.mubr.bf16.mxu0 %v4974_v59 }
 0xc1b   : > { %5853 = vmatmul.mubr.bf16.vlgmr.msra.gmra.mrb[40].mxu1 %v22508_v12  ;;  %5955 = vmatmul.mubr.bf16.vlgmr.msra.gmra.mrb[40].mxu0 %v22508_v12 }
 0xc1c   : > { %5862 = vmatprep.mubr.bf16.mxu1 %v4978_v11  ;;  %5964 = vmatprep.mubr.bf16.mxu0 %v4978_v11 }
 0xc23   : > { %5863 = vmatmul.mubr.bf16.gmra.mrb[48].mxu1 %v4977_v5  ;;  %5965 = vmatmul.mubr.bf16.gmra.mrb[48].mxu0 %v4977_v5 }
 0xc5c   : > { %v5813_v63 = vpop.f32.mrb[44].mxu1 }
 0xc5d   : > { %v5815_v53 = vpop.f32.mrb[45].mxu1  ;;  %v5814_v15 = vadd.f32 %v5813_v63, %v5112_v46 }
 0xc5e   : > { %v5817_v17 = vpop.f32.mrb[46].mxu1  ;;  %v5816_v61 = vadd.f32 %v5815_v53, %v5116_v13 }
 0xc5f   : > { %v5818_v58 = vpop.f32.mrb[47].mxu1 }
 0xcee   : > { %v5854_v12 = vpop.f32.mrb[40].mxu1  ;;  %v5956_v3 = vpop.f32.mrb[40].mxu0 }
 0xcef   : > { %v18103_v14 = vadd.f32 %v5854_v12, %v5112_v46  ;;  %v5856_v43 = vpop.f32.mrb[41].mxu1  ;;  %v5958_v1 = vpop.f32.mrb[41].mxu0  ;;  %v18107_v31 = vadd.f32 %v5956_v3, %v5120_v30 }
 0xcf0   : > { %v18104_v37 = vadd.f32 %v5856_v43, %v5116_v13  ;;  %v5858_v26 = vpop.f32.mrb[42].mxu1  ;;  %v5960_v24 = vpop.f32.mrb[42].mxu0  ;;  %v18108_v57 = vadd.f32 %v5958_v1, %v5124_v8 }
 0xcf1   : > { %v22650_v9 = vadd.f32 %v20165_v62, %v18103_v14  ;;  %v18105_v50 = vadd.f32 %v5858_v26, %v5112_v46  ;;  %v5860_v39 = vpop.f32.mrb[43].mxu1  ;;  %v5962_v42 = vpop.f32.mrb[43].mxu0  ;;  %v18109_v18 = vadd.f32 %v5960_v24, %v5120_v30  ;;  %v22656_v23 = vadd.f32 %v20168_v52, %v18107_v31  ;;  %v20173_v30 = vld [vmem:[#allocation2 + $0x40] sm:$0xff]  ;;  %v20174_v14 = vld [vmem:[#allocation2 + $0x48] sm:$0xff]  ;;  %v20176_v26 = vld [vmem:[#allocation2 + $0x58] sm:$0xff] }
 0xcf2   : > { %v22652_v44 = vadd.f32 %v20166_v56, %v18104_v37  ;;  %v18106_v4 = vadd.f32 %v5860_v39, %v5116_v13  ;;  %v18110_v29 = vadd.f32 %v5962_v42, %v5124_v8  ;;  %v22664_v6 = vadd.f32 %v20170_v2, %v18108_v57  ;;  %v20175_v8 = vld [vmem:[#allocation2 + $0x50] sm:$0xff]  ;;  %v6141_v56 = vld [vmem:[%s21592_s19 + $0x8] sm:$0xff] }
 0xcf3   : > { %v22654_v25 = vadd.f32 %v20167_v21, %v18105_v50  ;;  %v22666_v47 = vadd.f32 %v20171_v60, %v18109_v18  ;;  %v6140_v39 = vld [vmem:[%s21592_s19] sm:$0xff]  ;;  %v6173_v60 = vld [vmem:[%s21592_s19 + $0x108] sm:$0xff] }
 0xcf4   : > { %v5987_v27 = vadd.f32 %v22652_v44, %v22650_v9  ;;  %v22660_v41 = vadd.f32 %v20169_v38, %v18106_v4  ;;  %v22671_v59 = vadd.f32 %v20172_v10, %v18110_v29  ;;  %v6148_v42 = vld [vmem:[%s21592_s19 + $0x40] sm:$0xff]  ;;  %v6149_v4 = vld [vmem:[%s21592_s19 + $0x48] sm:$0xff] }
 0xcf5   : > { %v16742_v57 = vcombine.low %v6140_v39, %v6148_v42  ;;  %v16743_v18 = vcombine.high %v6140_v39, %v6148_v42  ;;  %v6156_v21 = vld [vmem:[%s21592_s19 + $0x80] sm:$0xff]  ;;  %v16744_v52 = vcombine.low %v6141_v56, %v6149_v4 }
 0xcf6   : > { %v5992_v0 = vadd.f32 %v22660_v41, %v22654_v25  ;;  %v5864_v48 = vpop.f32.mrb[48].mxu1  ;;  %v5966_v49 = vpop.f32.mrb[48].mxu0  ;;  %v5988_v7 = vadd.f32 %v5987_v27, %v22656_v23  ;;  %v6164_v29 = vld [vmem:[%s21592_s19 + $0xc0] sm:$0xff]  ;;  %v16745_v27 = vcombine.high %v6141_v56, %v6149_v4 }
 0xcf7   : > { %v5865_v54 = vadd.f32 %v5864_v48, %v5814_v15  ;;  %v5967_v16 = vadd.f32 %v5966_v49, %v5916_v45  ;;  %v5866_v11 = vpop.f32.mrb[49].mxu1  ;;  %v5968_v5 = vpop.f32.mrb[49].mxu0  ;;  %v16759_v38 = vcombine.high %v6156_v21, %v6164_v29  ;;  %v6157_v45 = vld [vmem:[%s21592_s19 + $0x88] sm:$0xff]  ;;  %v6172_v15 = vld [vmem:[%s21592_s19 + $0x100] sm:$0xff]  ;;  %9296 = vmatprep.subr.bf16.mxu1 %v16743_v18  ;;  %v16758_v48 = vcombine.low %v6156_v21, %v6164_v29 }
 0xcf8   : > { %v5867_v63 = vadd.f32 %v5866_v11, %v5816_v61  ;;  %v5969_v53 = vadd.f32 %v5968_v5, %v5918_v51  ;;  %v5868_v17 = vpop.f32.mrb[50].mxu1  ;;  %v5970_v58 = vpop.f32.mrb[50].mxu0  ;;  %v5989_v32 = vadd.f32 %v5988_v7, %v22664_v6  ;;  %v5993_v46 = vadd.f32 %v5992_v0, %v22666_v47  ;;  %v6165_v51 = vld [vmem:[%s21592_s19 + $0xc8] sm:$0xff]  ;;  %v6180_v2 = vld [vmem:[%s21592_s19 + $0x140] sm:$0xff]  ;;  %9398 = vmatprep.subr.bf16.mxu0 %v16745_v27 }
 0xcf9   : > { %v22675_v13 = vadd.f32 %v20173_v30, %v5865_v54  ;;  %v5869_v12 = vpop.f32.mrb[51].mxu1  ;;  %v5971_v3 = vpop.f32.mrb[51].mxu0  ;;  %v22680_v31 = vadd.f32 %v20175_v8, %v5967_v16  ;;  %v16761_v61 = vcombine.high %v6157_v45, %v6165_v51  ;;  %v6181_v0 = vld [vmem:[%s21592_s19 + $0x148] sm:$0xff]  ;;  %9297 = vmatpush1.bf16.msra.mxu1 %v16742_v57  ;;  %9399 = vmatpush1.bf16.msra.mxu0 %v16744_v52  ;;  %v6188_v54 = vld [vmem:[%s21592_s19 + $0x180] sm:$0xff] }
 0xcfa   : > { %v22677_v43 = vadd.f32 %v20174_v14, %v5867_v63  ;;  %5990 = vadd.xlane.f32.xlu0 %v5989_v32  ;;  %v5994_v1 = vadd.f32 %v5993_v46, %v22671_v59  ;;  %v22684_v24 = vadd.f32 %v20176_v26, %v5969_v53  ;;  %9298 = vmatprep.subr.bf16.mxu1 %v16759_v38  ;;  %v6196_v16 = vld [vmem:[%s21592_s19 + $0x1c0] sm:$0xff]  ;;  %v6189_v11 = vld [vmem:[%s21592_s19 + $0x188] sm:$0xff] }
 0xcfb   : > { %v16760_v49 = vcombine.low %v6157_v45, %v6165_v51  ;;  %v16775_v7 = vcombine.high %v6172_v15, %v6180_v2  ;;  %9400 = vmatprep.subr.bf16.mxu0 %v16761_v61  ;;  %v16777_v10 = vcombine.high %v6173_v60, %v6181_v0  ;;  %v6197_v5 = vld [vmem:[%s21592_s19 + $0x1c8] sm:$0xff]  ;;  %v16774_v63 = vcombine.low %v6172_v15, %v6180_v2  ;;  %v6204_v32 = vld [vmem:[%s21592_s19 + $0x200] sm:$0xff] }
 0xcfc   : > { %v5997_v37 = vadd.f32 %v22677_v43, %v22675_v13  ;;  %5995 = vadd.xlane.f32.xlu1 %v5994_v1  ;;  %v16776_v53 = vcombine.low %v6173_v60, %v6181_v0  ;;  %v16791_v17 = vcombine.high %v6188_v54, %v6196_v16  ;;  %v16793_v58 = vcombine.high %v6189_v11, %v6197_v5  ;;  %v6212_v46 = vld [vmem:[%s21592_s19 + $0x240] sm:$0xff]  ;;  %v6205_v30 = vld [vmem:[%s21592_s19 + $0x208] sm:$0xff] }
 0xcfd   : > { %9299 = vmatpush1.bf16.msra.mxu1 %v16758_v48  ;;  %9401 = vmatpush1.bf16.msra.mxu0 %v16760_v49  ;;  %v6213_v12 = vld [vmem:[%s21592_s19 + $0x248] sm:$0xff]  ;;  %v16790_v3 = vcombine.low %v6188_v54, %v6196_v16  ;;  %v16792_v14 = vcombine.low %v6189_v11, %v6197_v5  ;;  %v16807_v1 = vcombine.high %v6204_v32, %v6212_v46  ;;  %v6228_v26 = vld [vmem:[%s21592_s19 + $0x2c0] sm:$0xff] }
 0xcfe   : > { %v5998_v62 = vadd.f32 %v5997_v37, %v22680_v31  ;;  %9300 = vmatprep.subr.bf16.mxu1 %v16775_v7  ;;  %9402 = vmatprep.subr.bf16.mxu0 %v16777_v10  ;;  %v16809_v8 = vcombine.high %v6205_v30, %v6213_v12  ;;  %v6220_v37 = vld [vmem:[%s21592_s19 + $0x280] sm:$0xff]  ;;  %v16806_v39 = vcombine.low %v6204_v32, %v6212_v46  ;;  %v6237_v21 = vld [vmem:[%s21592_s19 + $0x308] sm:$0xff] }
 0xcff   : > { %v16808_v42 = vcombine.low %v6205_v30, %v6213_v12  ;;  %v16823_v56 = vcombine.high %v6220_v37, %v6228_v26  ;;  %v6236_v18 = vld [vmem:[%s21592_s19 + $0x300] sm:$0xff]  ;;  %v6245_v29 = vld [vmem:[%s21592_s19 + $0x348] sm:$0xff]  ;;  %v16822_v52 = vcombine.low %v6220_v37, %v6228_v26 }
 0xd00   : > { %v5999_v50 = vadd.f32 %v5998_v62, %v22684_v24  ;;  %v6221_v62 = vld [vmem:[%s21592_s19 + $0x288] sm:$0xff]  ;;  %v6244_v4 = vld [vmem:[%s21592_s19 + $0x340] sm:$0xff]  ;;  %v16841_v45 = vcombine.high %v6237_v21, %v6245_v29  ;;  %v16840_v0 = vcombine.low %v6237_v21, %v6245_v29 }
 0xd01   : > { %9301 = vmatpush1.bf16.msra.mxu1 %v16774_v63  ;;  %9403 = vmatpush1.bf16.msra.mxu0 %v16776_v53  ;;  %v16839_v38 = vcombine.high %v6236_v18, %v6244_v4  ;;  %v6252_v51 = vld [vmem:[%s21592_s19 + $0x380] sm:$0xff]  ;;  %v6253_v61 = vld [vmem:[%s21592_s19 + $0x388] sm:$0xff]  ;;  %v16838_v60 = vcombine.low %v6236_v18, %v6244_v4 }
 0xd02   : > { %6000 = vadd.xlane.f32.xlu0 %v5999_v50  ;;  %9302 = vmatprep.subr.bf16.mxu1 %v16791_v17  ;;  %v6229_v50 = vld [vmem:[%s21592_s19 + $0x2c8] sm:$0xff]  ;;  %v6260_v15 = vld [vmem:[%s21592_s19 + $0x3c0] sm:$0xff] }
 0xd03   : > { %9404 = vmatprep.subr.bf16.mxu0 %v16793_v58  ;;  %v16825_v57 = vcombine.high %v6221_v62, %v6229_v50  ;;  %v16824_v27 = vcombine.low %v6221_v62, %v6229_v50  ;;  %v6261_v2 = vld [vmem:[%s21592_s19 + $0x3c8] sm:$0xff]  ;;  %v16855_v48 = vcombine.high %v6252_v51, %v6260_v15  ;;  %v6268_v7 = vld [vmem:[%s21592_s19 + $0x400] sm:$0xff]  ;;  %v16854_v11 = vcombine.low %v6252_v51, %v6260_v15 }
 0xd04   : > { %v16857_v49 = vcombine.high %v6253_v61, %v6261_v2  ;;  %v6276_v10 = vld [vmem:[%s21592_s19 + $0x440] sm:$0xff]  ;;  %v6269_v54 = vld [vmem:[%s21592_s19 + $0x408] sm:$0xff]  ;;  %v16856_v5 = vcombine.low %v6253_v61, %v6261_v2 }
 0xd05   : > { %9303 = vmatpush1.bf16.msra.mxu1 %v16790_v3  ;;  %9405 = vmatpush1.bf16.msra.mxu0 %v16792_v14  ;;  %v6277_v16 = vld [vmem:[%s21592_s19 + $0x448] sm:$0xff]  ;;  %v16871_v63 = vcombine.high %v6268_v7, %v6276_v10  ;;  %v6284_v17 = vld [vmem:[%s21592_s19 + $0x480] sm:$0xff]  ;;  %v16870_v30 = vcombine.low %v6268_v7, %v6276_v10 }
 0xd06   : > { %9304 = vmatprep.subr.bf16.mxu1 %v16807_v1  ;;  %9406 = vmatprep.subr.bf16.mxu0 %v16809_v8  ;;  %v16873_v53 = vcombine.high %v6269_v54, %v6277_v16  ;;  %v6292_v58 = vld [vmem:[%s21592_s19 + $0x4c0] sm:$0xff]  ;;  %v6285_v32 = vld [vmem:[%s21592_s19 + $0x488] sm:$0xff]  ;;  %v16872_v12 = vcombine.low %v6269_v54, %v6277_v16 }
 0xd07   : > { %v6293_v46 = vld [vmem:[%s21592_s19 + $0x4c8] sm:$0xff]  ;;  %v16887_v3 = vcombine.high %v6284_v17, %v6292_v58  ;;  %v16886_v1 = vcombine.low %v6284_v17, %v6292_v58  ;;  %v6300_v16 = vld [vmem:[%s21592_s19 + $0x500] sm:$0xff] }
 0xd08   : > { %v16889_v14 = vcombine.high %v6285_v32, %v6293_v46  ;;  %v16888_v8 = vcombine.low %v6285_v32, %v6293_v46  ;;  %v6316_v46 = vld [vmem:[%s21592_s19 + $0x580] sm:$0xff] }
 0xd09   : > { %9305 = vmatpush1.bf16.msra.mxu1 %v16806_v39  ;;  %9407 = vmatpush1.bf16.msra.mxu0 %v16808_v42 }
 0xd0a   : > { %9306 = vmatprep.subr.bf16.mxu1 %v16823_v56  ;;  %9408 = vmatprep.subr.bf16.mxu0 %v16825_v57 }
 0xd0d   : > { %9307 = vmatpush1.bf16.msra.mxu1 %v16822_v52  ;;  %9409 = vmatpush1.bf16.msra.mxu0 %v16824_v27 }
 0xd0e   : > { %9308 = vmatprep.subr.bf16.mxu1 %v16839_v38  ;;  %9410 = vmatprep.subr.bf16.mxu0 %v16841_v45 }
 0xd11   : > { %9309 = vmatpush1.bf16.msra.mxu1 %v16838_v60  ;;  %9411 = vmatpush1.bf16.msra.mxu0 %v16840_v0 }
 0xd12   : > { %9310 = vmatprep.subr.bf16.mxu1 %v16855_v48  ;;  %9412 = vmatprep.subr.bf16.mxu0 %v16857_v49 }
 0xd15   : > { %9311 = vmatpush1.bf16.msra.mxu1 %v16854_v11  ;;  %9413 = vmatpush1.bf16.msra.mxu0 %v16856_v5  ;;  %v6308_v11 = vld [vmem:[%s21592_s19 + $0x540] sm:$0xff]  ;;  %v6301_v5 = vld [vmem:[%s21592_s19 + $0x508] sm:$0xff] }
 0xd16   : > { %9312 = vmatprep.subr.bf16.mxu1 %v16871_v63  ;;  %9414 = vmatprep.subr.bf16.mxu0 %v16873_v53  ;;  %v16903_v63 = vcombine.high %v6300_v16, %v6308_v11  ;;  %v6309_v53 = vld [vmem:[%s21592_s19 + $0x548] sm:$0xff]  ;;  %v16902_v17 = vcombine.low %v6300_v16, %v6308_v11 }
 0xd17   : > { %v16904_v58 = vcombine.low %v6301_v5, %v6309_v53  ;;  %v16905_v32 = vcombine.high %v6301_v5, %v6309_v53 }
 0xd19   : > { %9313 = vmatpush1.bf16.msra.mxu1 %v16870_v30  ;;  %9415 = vmatpush1.bf16.msra.mxu0 %v16872_v12  ;;  %v6324_v30 = vld [vmem:[%s21592_s19 + $0x5c0] sm:$0xff]  ;;  %v6317_v12 = vld [vmem:[%s21592_s19 + $0x588] sm:$0xff] }
 0xd1a   : > { %9314 = vmatprep.subr.bf16.mxu1 %v16887_v3  ;;  %9416 = vmatprep.subr.bf16.mxu0 %v16889_v14  ;;  %v16919_v3 = vcombine.high %v6316_v46, %v6324_v30  ;;  %v6325_v14 = vld [vmem:[%s21592_s19 + $0x5c8] sm:$0xff] }
 0xd1d   : > { %9315 = vmatpush1.bf16.msra.mxu1 %v16886_v1  ;;  %9417 = vmatpush1.bf16.msra.mxu0 %v16888_v8  ;;  %v16918_v1 = vcombine.low %v6316_v46, %v6324_v30  ;;  %v16920_v8 = vcombine.low %v6317_v12, %v6325_v14  ;;  %v22819_v46 = vld [vmem:[%s21592_s19 + $0x808] sm:$0xff] }
 0xd1e   : > { %9316 = vmatprep.subr.bf16.mxu1 %v16903_v63  ;;  %9418 = vmatprep.subr.bf16.mxu0 %v16905_v32  ;;  %v22816_v32 = vld [vmem:[%s21592_s19 + $0x840] sm:$0xff] }
 0xd21   : > { %9317 = vmatpush1.bf16.msra.mxu1 %v16902_v17  ;;  %9419 = vmatpush1.bf16.msra.mxu0 %v16904_v58  ;;  %v22813_v58 = vld [vmem:[%s21592_s19 + $0x800] sm:$0xff] }
 0xd22   : > { %9318 = vmatprep.subr.bf16.mxu1 %v16919_v3  ;;  %v16999_v30 = vcombine.high %v22813_v58, %v22816_v32  ;;  %v16998_v3 = vcombine.low %v22813_v58, %v22816_v32 }
 0xd25   : > { %9319 = vmatpush1.bf16.msra.mxu1 %v16918_v1 }
 0xd87   : > { %v5991_v37 = vpop.xlane.xlu0 %5990 }
 0xd88   : > { %v6003_v26 = vmul.f32 0.001953125, %v5991_v37  ;;  %v16921_v37 = vcombine.high %v6317_v12, %v6325_v14  ;;  %v22824_v12 = vld [vmem:[%s21592_s19 + $0x848] sm:$0xff] }
 0xd89   : > { %v5996_v62 = vpop.xlane.xlu1 %5995  ;;  %v17000_v14 = vcombine.low %v22819_v46, %v22824_v12  ;;  %v17001_v1 = vcombine.high %v22819_v46, %v22824_v12  ;;  %v6444_v12 = vld [vmem:[%s21592_s19 + $0x980] sm:$0xff] }
 0xd8a   : > { %v22729_v50 = vsub.f32 %v22650_v9, %v6003_v26  ;;  %v22732_v39 = vsub.f32 %v22652_v44, %v6003_v26  ;;  %v6004_v42 = vmul.f32 0.001953125, %v5996_v62  ;;  %v22735_v56 = vsub.f32 %v22656_v23, %v6003_v26  ;;  %9420 = vmatprep.subr.bf16.mxu0 %v16921_v37  ;;  %v6340_v62 = vld [vmem:[%s21592_s19 + $0x640] sm:$0xff] }
 0xd8b   : > { %v22738_v57 = vsub.f32 %v22664_v6, %v6003_v26  ;;  %v6332_v26 = vld [vmem:[%s21592_s19 + $0x600] sm:$0xff]  ;;  %9421 = vmatpush1.bf16.msra.mxu0 %v16920_v8 }
 0xd8c   : > { %v22741_v18 = vsub.f32 %v22654_v25, %v6004_v42  ;;  %v22744_v4 = vsub.f32 %v22660_v41, %v6004_v42  ;;  %v6018_v9 = vmul.f32 %v22729_v50, %v22729_v50  ;;  %v6019_v44 = vmul.f32 %v22732_v39, %v22732_v39 }
 0xd8d   : > { %v22751_v21 = vsub.f32 %v22666_v47, %v6004_v42  ;;  %v22754_v23 = vsub.f32 %v22671_v59, %v6004_v42  ;;  %v6020_v6 = vmul.f32 %v22735_v56, %v22735_v56  ;;  %v6021_v27 = vmul.f32 %v22738_v57, %v22738_v57  ;;  %v6333_v42 = vld [vmem:[%s21592_s19 + $0x608] sm:$0xff] }
 0xd8e   : > { %v6030_v25 = vadd.f32 %v6019_v44, %v6018_v9  ;;  %v6022_v41 = vmul.f32 %v22741_v18, %v22741_v18  ;;  %v6023_v29 = vmul.f32 %v22744_v4, %v22744_v4  ;;  %v16935_v9 = vcombine.high %v6332_v26, %v6340_v62  ;;  %v6341_v44 = vld [vmem:[%s21592_s19 + $0x648] sm:$0xff] }
 0xd8f   : > { %v6001_v52 = vpop.xlane.xlu0 %6000  ;;  %v6024_v59 = vmul.f32 %v22751_v21, %v22751_v21  ;;  %v6025_v51 = vmul.f32 %v22754_v23, %v22754_v23 }
 0xd90   : > { %v6005_v38 = vmul.f32 0.001953125, %v6001_v52  ;;  %v6031_v47 = vadd.f32 %v6030_v25, %v6020_v6  ;;  %v6035_v45 = vadd.f32 %v6023_v29, %v6022_v41  ;;  %v16934_v6 = vcombine.low %v6332_v26, %v6340_v62  ;;  %9320 = vmatprep.subr.bf16.mxu1 %v16935_v9  ;;  %v6348_v29 = vld [vmem:[%s21592_s19 + $0x680] sm:$0xff] }
 0xd91   : > { %v16936_v25 = vcombine.low %v6333_v42, %v6341_v44  ;;  %v16937_v41 = vcombine.high %v6333_v42, %v6341_v44  ;;  %v6356_v52 = vld [vmem:[%s21592_s19 + $0x6c0] sm:$0xff] }
 0xd92   : > { %v22769_v15 = vsub.f32 %v22675_v13, %v6005_v38  ;;  %v22772_v61 = vsub.f32 %v22677_v43, %v6005_v38  ;;  %v6032_v2 = vadd.f32 %v6031_v47, %v6021_v27  ;;  %v6036_v60 = vadd.f32 %v6035_v45, %v6024_v59  ;;  %9321 = vmatpush1.bf16.msra.mxu1 %v16934_v6  ;;  %v6349_v27 = vld [vmem:[%s21592_s19 + $0x688] sm:$0xff]  ;;  %v6364_v45 = vld [vmem:[%s21592_s19 + $0x700] sm:$0xff] }
 0xd93   : > { %v22775_v0 = vsub.f32 %v22680_v31, %v6005_v38  ;;  %v22778_v49 = vsub.f32 %v22684_v24, %v6005_v38  ;;  %9422 = vmatprep.subr.bf16.mxu0 %v16937_v41  ;;  %v16950_v38 = vcombine.low %v6348_v29, %v6356_v52  ;;  %v16951_v47 = vcombine.high %v6348_v29, %v6356_v52  ;;  %v6357_v59 = vld [vmem:[%s21592_s19 + $0x6c8] sm:$0xff]  ;;  %v5985_v41 = vld [vmem:[%s24563_s26] sm:$0xf]  ;;  %v5986_v29 = vld [vmem:[%s24564_s3] sm:$0xf] }
 0xd94   : > { %6033 = vadd.xlane.f32.xlu1 %v6032_v2  ;;  %v6037_v48 = vadd.f32 %v6036_v60, %v6025_v51  ;;  %v6026_v13 = vmul.f32 %v22769_v15, %v22769_v15  ;;  %v6027_v43 = vmul.f32 %v22772_v61, %v22772_v61  ;;  %9423 = vmatpush1.bf16.msra.mxu0 %v16936_v25  ;;  %v6372_v51 = vld [vmem:[%s21592_s19 + $0x740] sm:$0xff] }
 0xd95   : > { %v6028_v7 = vmul.f32 %v22775_v0, %v22775_v0  ;;  %v6029_v31 = vmul.f32 %v22778_v49, %v22778_v49  ;;  %v16952_v2 = vcombine.low %v6349_v27, %v6357_v59  ;;  %v16953_v60 = vcombine.high %v6349_v27, %v6357_v59  ;;  %9322 = vmatprep.subr.bf16.mxu1 %v16951_v47 }
 0xd96   : > { %6038 = vadd.xlane.f32.xlu0 %v6037_v48  ;;  %v6040_v10 = vadd.f32 %v6027_v43, %v6026_v13  ;;  %v16967_v48 = vcombine.high %v6364_v45, %v6372_v51  ;;  %v6365_v13 = vld [vmem:[%s21592_s19 + $0x708] sm:$0xff]  ;;  %9323 = vmatpush1.bf16.msra.mxu1 %v16950_v38  ;;  %v16966_v16 = vcombine.low %v6364_v45, %v6372_v51 }
 0xd97   : > { %v6373_v43 = vld [vmem:[%s21592_s19 + $0x748] sm:$0xff]  ;;  %9424 = vmatprep.subr.bf16.mxu0 %v16953_v60  ;;  %v6074_v52 = vrot.slane %v5985_v41, %v22118_v34  ;;  %v6070_v27 = vrot.slane %v5985_v41, %v22115_v33  ;;  %v6078_v47 = vrot.slane %v5985_v41, %v22282_v40  ;;  %v6107_v60 = vrot.slane %v5986_v29, %v22118_v34 }
 0xd98   : > { %v6041_v54 = vadd.f32 %v6040_v10, %v6028_v7  ;;  %v6380_v7 = vld [vmem:[%s21592_s19 + $0x780] sm:$0xff]  ;;  %v16969_v10 = vcombine.high %v6365_v13, %v6373_v43  ;;  %9425 = vmatpush1.bf16.msra.mxu0 %v16952_v2  ;;  %9324 = vmatprep.subr.bf16.mxu1 %v16967_v48  ;;  %v16968_v11 = vcombine.low %v6365_v13, %v6373_v43 }
 0xd99   : > { %v6103_v48 = vrot.slane %v5986_v29, %v22115_v33  ;;  %v6111_v13 = vrot.slane %v5986_v29, %v22282_v40 }
 0xd9a   : > { %v6042_v24 = vadd.f32 %v6041_v54, %v6029_v31  ;;  %v6388_v31 = vld [vmem:[%s21592_s19 + $0x7c0] sm:$0xff]  ;;  %v6381_v54 = vld [vmem:[%s21592_s19 + $0x788] sm:$0xff]  ;;  %9426 = vmatprep.subr.bf16.mxu0 %v16969_v10  ;;  %9325 = vmatpush1.bf16.msra.mxu1 %v16966_v16 }
 0xd9b   : > { %v16983_v5 = vcombine.high %v6380_v7, %v6388_v31  ;;  %v16982_v53 = vcombine.low %v6380_v7, %v6388_v31 }
 0xd9c   : > { %6043 = vadd.xlane.f32.xlu1 %v6042_v24  ;;  %v6389_v24 = vld [vmem:[%s21592_s19 + $0x7c8] sm:$0xff]  ;;  %9427 = vmatpush1.bf16.msra.mxu0 %v16968_v11 }
 0xd9d   : > { %v16985_v63 = vcombine.high %v6381_v54, %v6389_v24  ;;  %9326 = vmatprep.subr.bf16.mxu1 %v16983_v5  ;;  %v16984_v17 = vcombine.low %v6381_v54, %v6389_v24  ;;  %v6412_v24 = vld [vmem:[%s21592_s19 + $0x880] sm:$0xff] }
 0xd9e   : > { %9327 = vmatpush1.bf16.msra.mxu1 %v16982_v53 }
 0xd9f   : > { %9428 = vmatprep.subr.bf16.mxu0 %v16985_v63  ;;  %9347 = vmatprep.subr.bf16.mxu1 %v16999_v30  ;;  %v6421_v30 = vld [vmem:[%s21592_s19 + $0x8c8] sm:$0xff] }
 0xda0   : > { %9429 = vmatpush1.bf16.msra.mxu0 %v16984_v17  ;;  %v6420_v17 = vld [vmem:[%s21592_s19 + $0x8c0] sm:$0xff] }
 0xda1   : > { %9449 = vmatprep.subr.bf16.mxu0 %v17001_v1 }
 0xe21   : > { %v6034_v8 = vpop.xlane.xlu1 %6033 }
 0xe22   : > { %v6045_v37 = vmul.f32 0.001953125, %v6034_v8  ;;  %v22866_v8 = vrot.slane %v5985_v41, %v22285_v20 }
 0xe23   : > { %v6039_v26 = vpop.xlane.xlu0 %6038 }
 0xe24   : > { %v6048_v62 = vadd.f32 1e-05, %v6045_v37  ;;  %v6046_v42 = vmul.f32 0.001953125, %v6039_v26 }
 0xe26   : > { %20152 = vrsqrt.f32 %v6048_v62  ;;  %v6049_v9 = vadd.f32 1e-05, %v6046_v42 }
 0xe28   : > { %20154 = vrsqrt.f32 %v6049_v9  ;;  %v17015_v9 = vcombine.high %v6412_v24, %v6420_v17 }
 0xe29   : > { %v6044_v44 = vpop.xlane.xlu1 %6043 }
 0xe2a   : > { %v6047_v6 = vmul.f32 0.001953125, %v6044_v44 }
 0xe2c   : > { %v6050_v25 = vadd.f32 1e-05, %v6047_v6 }
 0xe2e   : > { %20156 = vrsqrt.f32 %v6050_v25 }
 0xe30   : > { %v20153_v38 = vpop.eup %20152 }
 0xe31   : > { %v6055_v59 = vmul.f32 %v20153_v38, %v22732_v39  ;;  %v6054_v45 = vmul.f32 %v20153_v38, %v22729_v50  ;;  %v6056_v51 = vmul.f32 %v20153_v38, %v22735_v56  ;;  %v6057_v6 = vmul.f32 %v20153_v38, %v22738_v57 }
 0xe32   : > { %v20155_v2 = vpop.eup %20154  ;;  %v22895_v57 = vrot.slane %v5986_v29, %v22285_v20 }
 0xe33   : > { %v6059_v43 = vmul.f32 %v20155_v2, %v22744_v4  ;;  %v6088_v7 = vmul.f32 %v6074_v52, %v6055_v59  ;;  %v6058_v10 = vmul.f32 %v20155_v2, %v22741_v18  ;;  %v6087_v39 = vmul.f32 %v6070_v27, %v6054_v45  ;;  %v6413_v18 = vld [vmem:[%s21592_s19 + $0x888] sm:$0xff]  ;;  %v6428_v59 = vld [vmem:[%s21592_s19 + $0x900] sm:$0xff] }
 0xe34   : > { %v6060_v50 = vmul.f32 %v20155_v2, %v22751_v21  ;;  %v6089_v31 = vmul.f32 %v6078_v47, %v6056_v51  ;;  %v6061_v1 = vmul.f32 %v20155_v2, %v22754_v23  ;;  %v17017_v44 = vcombine.high %v6413_v18, %v6421_v30  ;;  %v6437_v51 = vld [vmem:[%s21592_s19 + $0x948] sm:$0xff] }
 0xe35   : > { %v6092_v56 = vmul.f32 %v6074_v52, %v6059_v43  ;;  %v6091_v54 = vmul.f32 %v6070_v27, %v6058_v10  ;;  %v22851_v5 = vadd.f32 %v6107_v60, %v6088_v7  ;;  %v22855_v4 = vadd.f32 %v6103_v48, %v6087_v39 }
 0xe36   : > { %v6093_v16 = vmul.f32 %v6078_v47, %v6060_v50  ;;  %v22849_v11 = vadd.f32 %v6111_v13, %v6089_v31  ;;  %v6094_v2 = vmul.f32 %v22866_v8, %v6061_v1  ;;  %v6460_v50 = vld [vmem:[%s21592_s19 + $0xa00] sm:$0xff] }
 0xe37   : > { %v22853_v63 = vadd.f32 %v6107_v60, %v6092_v56  ;;  %v22857_v53 = vadd.f32 %v6103_v48, %v6091_v54  ;;  %v6468_v54 = vld [vmem:[%s21592_s19 + $0xa40] sm:$0xff] }
 0xe38   : > { %v22862_v21 = vpop.eup %20156  ;;  %v22868_v37 = vadd.f32 %v6111_v13, %v6093_v16  ;;  %v6469_v16 = vld [vmem:[%s21592_s19 + $0xa48] sm:$0xff]  ;;  %v17063_v1 = vcombine.high %v6460_v50, %v6468_v54 }
 0xe39   : > { %v22872_v26 = vpack.c.bf16 %v22853_v63, %v22851_v5  ;;  %v22876_v62 = vpack.c.bf16 %v22857_v53, %v22855_v4  ;;  %v6063_v42 = vmul.f32 %v22862_v21, %v22772_v61  ;;  %v6062_v23 = vmul.f32 %v22862_v21, %v22769_v15  ;;  %v6436_v61 = vld [vmem:[%s21592_s19 + $0x940] sm:$0xff]  ;;  %v6429_v15 = vld [vmem:[%s21592_s19 + $0x908] sm:$0xff] }
 0xe3a   : > { %24565 = vst [vmem:[#allocation42_spill] sm:$0xff] %v22868_v37  ;;  %v6064_v25 = vmul.f32 %v22862_v21, %v22775_v0  ;;  %v17031_v32 = vcombine.high %v6428_v59, %v6436_v61  ;;  %v17033_v46 = vcombine.high %v6429_v15, %v6437_v51  ;;  %v17032_v7 = vcombine.low %v6429_v15, %v6437_v51  ;;  %v6500_v15 = vld [vmem:[%s21592_s19 + $0xb40] sm:$0xff]  ;;  %v6493_v51 = vld [vmem:[%s21592_s19 + $0xb08] sm:$0xff] }
 0xe3b   : > { %9328 = vmatprep.mubr.bf16.mxu1 %v22872_v26  ;;  %9430 = vmatprep.mubr.bf16.mxu0 %v22872_v26  ;;  %v6096_v41 = vmul.f32 %v6074_v52, %v6063_v42  ;;  %v6095_v45 = vmul.f32 %v6070_v27, %v6062_v23  ;;  %v17014_v52 = vcombine.low %v6412_v24, %v6420_v17  ;;  %v6461_v24 = vld [vmem:[%s21592_s19 + $0xa08] sm:$0xff]  ;;  %v6476_v23 = vld [vmem:[%s21592_s19 + $0xa80] sm:$0xff] }
 0xe3c   : > { %9329 = vmatmul.mubr.bf16.vlgmr.msra.gmra.mrb[52].mxu1 %v22876_v62  ;;  %9431 = vmatmul.mubr.bf16.vlgmr.msra.gmra.mrb[52].mxu0 %v22876_v62  ;;  %v6097_v0 = vmul.f32 %v6078_v47, %v6064_v25  ;;  %v17016_v27 = vcombine.low %v6413_v18, %v6421_v30  ;;  %v6090_v47 = vmul.f32 %v22866_v8, %v6057_v6  ;;  %v6485_v6 = vld [vmem:[%s21592_s19 + $0xac8] sm:$0xff] }
 0xe3d   : > { %9348 = vmatpush1.bf16.msra.mxu1 %v16998_v3  ;;  %9450 = vmatpush1.bf16.msra.mxu0 %v17000_v14  ;;  %v22903_v38 = vadd.f32 %v6107_v60, %v6096_v41  ;;  %v22905_v29 = vadd.f32 %v6103_v48, %v6095_v45  ;;  %v22916_v3 = vadd.f32 %v22895_v57, %v6094_v2  ;;  %v6452_v14 = vld [vmem:[%s21592_s19 + $0x9c0] sm:$0xff]  ;;  %v6445_v60 = vld [vmem:[%s21592_s19 + $0x988] sm:$0xff] }
 0xe3e   : > { %9349 = vmatprep.subr.bf16.mxu1 %v17015_v9  ;;  %9451 = vmatprep.subr.bf16.mxu0 %v17017_v44  ;;  %v22908_v43 = vadd.f32 %v6111_v13, %v6097_v0  ;;  %v6453_v48 = vld [vmem:[%s21592_s19 + $0x9c8] sm:$0xff]  ;;  %v17030_v13 = vcombine.low %v6428_v59, %v6436_v61  ;;  %v22928_v39 = vadd.f32 %v22895_v57, %v6090_v47  ;;  %v6484_v9 = vld [vmem:[%s21592_s19 + $0xac0] sm:$0xff] }
 0xe3f   : > { %24566 = vst [vmem:[#allocation43_spill] sm:$0xff] %v22903_v38  ;;  %24567 = vst [vmem:[#allocation44_spill] sm:$0xff] %v22905_v29  ;;  %v22912_v58 = vpack.c.bf16 %v22903_v38, %v22903_v38  ;;  %v22925_v10 = vpack.c.bf16 %v22905_v29, %v22905_v29  ;;  %v17047_v31 = vcombine.high %v6444_v12, %v6452_v14  ;;  %v6477_v44 = vld [vmem:[%s21592_s19 + $0xa88] sm:$0xff]  ;;  %v6492_v61 = vld [vmem:[%s21592_s19 + $0xb00] sm:$0xff] }
 0xe40   : > { %24568 = vst [vmem:[#allocation45_spill] sm:$0xff] %v22908_v43  ;;  %24569 = vst [vmem:[#allocation46_spill] sm:$0xff] %v22916_v3  ;;  %v17049_v56 = vcombine.high %v6445_v60, %v6453_v48  ;;  %v22938_v17 = vpack.c.bf16 %v22916_v3, %v22928_v39  ;;  %v17046_v18 = vcombine.low %v6444_v12, %v6452_v14  ;;  %v6501_v2 = vld [vmem:[%s21592_s19 + $0xb48] sm:$0xff]  ;;  %v6523_v38 = vld [vmem:[%s21592_s19 + $0xbf8] sm:$0xff] }
 0xe41   : > { %9350 = vmatpush1.bf16.msra.mxu1 %v17014_v52  ;;  %9452 = vmatpush1.bf16.msra.mxu0 %v17016_v27  ;;  %v17048_v30 = vcombine.low %v6445_v60, %v6453_v48  ;;  %v17065_v42 = vcombine.high %v6461_v24, %v6469_v16  ;;  %v17062_v25 = vcombine.low %v6460_v50, %v6468_v54  ;;  %v6509_v12 = vld [vmem:[%s21592_s19 + $0xb88] sm:$0xff]  ;;  %v6524_v50 = vld [vmem:[%s21592_s19 + $0xc00] sm:$0xff] }
 0xe42   : > { %9338 = vmatprep.mubr.bf16.mxu1 %v22912_v58  ;;  %9440 = vmatprep.mubr.bf16.mxu0 %v22912_v58  ;;  %v17064_v41 = vcombine.low %v6461_v24, %v6469_v16  ;;  %v17079_v59 = vcombine.high %v6476_v23, %v6484_v9  ;;  %v17081_v45 = vcombine.high %v6477_v44, %v6485_v6  ;;  %v6517_v14 = vld [vmem:[%s21592_s19 + $0xbc8] sm:$0xff] }
 0xe43   : > { %9351 = vmatprep.subr.bf16.mxu1 %v17031_v32  ;;  %9453 = vmatprep.subr.bf16.mxu0 %v17033_v46  ;;  %v17078_v0 = vcombine.low %v6476_v23, %v6484_v9  ;;  %v17080_v52 = vcombine.low %v6477_v44, %v6485_v6  ;;  %v17095_v27 = vcombine.high %v6492_v61, %v6500_v15  ;;  %v6508_v32 = vld [vmem:[%s21592_s19 + $0xb80] sm:$0xff]  ;;  %v6533_v54 = vld [vmem:[%s21592_s19 + $0xc48] sm:$0xff] }
 0xe44   : > { %9339 = vmatmul.mubr.bf16.gmra.mrb[56].mxu1 %v22925_v10  ;;  %9441 = vmatmul.mubr.bf16.gmra.mrb[56].mxu0 %v22925_v10  ;;  %v17097_v47 = vcombine.high %v6493_v51, %v6501_v2  ;;  %v6516_v46 = vld [vmem:[%s21592_s19 + $0xbc0] sm:$0xff]  ;;  %v17094_v60 = vcombine.low %v6492_v61, %v6500_v15  ;;  %v17096_v48 = vcombine.low %v6493_v51, %v6501_v2  ;;  %v6541_v23 = vld [vmem:[%s21592_s19 + $0xc88] sm:$0xff] }
 0xe45   : > { %9352 = vmatpush1.bf16.msra.mxu1 %v17030_v13  ;;  %9454 = vmatpush1.bf16.msra.mxu0 %v17032_v7  ;;  %v17111_v13 = vcombine.high %v6508_v32, %v6516_v46  ;;  %v17113_v7 = vcombine.high %v6509_v12, %v6517_v14  ;;  %v17110_v24 = vcombine.low %v6508_v32, %v6516_v46  ;;  %v6549_v9 = vld [vmem:[%s21592_s19 + $0xcc8] sm:$0xff] }
 0xe46   : > { %9379 = vmatprep.mubr.bf16.mxu1 %v22938_v17  ;;  %9481 = vmatprep.mubr.bf16.mxu0 %v22938_v17  ;;  %v17112_v16 = vcombine.low %v6509_v12, %v6517_v14  ;;  %v6557_v61 = vld [vmem:[%s21592_s19 + $0xd08] sm:$0xff]  ;;  %v17144_v2 = vcombine.low %v6541_v23, %v6549_v9 }
 0xe47   : > { %9353 = vmatprep.subr.bf16.mxu1 %v17047_v31  ;;  %9455 = vmatprep.subr.bf16.mxu0 %v17049_v56  ;;  %v6532_v31 = vld [vmem:[%s21592_s19 + $0xc40] sm:$0xff]  ;;  %v6525_v56 = vld [vmem:[%s21592_s19 + $0xc08] sm:$0xff] }
 0xe48   : > { %v17126_v44 = vcombine.low %v6524_v50, %v6532_v31  ;;  %v17128_v6 = vcombine.low %v6525_v56, %v6533_v54  ;;  %v6565_v15 = vld [vmem:[%s21592_s19 + $0xd48] sm:$0xff] }
 0xe49   : > { %9354 = vmatpush1.bf16.msra.mxu1 %v17046_v18  ;;  %9456 = vmatpush1.bf16.msra.mxu0 %v17048_v30  ;;  %v17127_v18 = vcombine.high %v6524_v50, %v6532_v31  ;;  %v17129_v30 = vcombine.high %v6525_v56, %v6533_v54  ;;  %v6573_v32 = vld [vmem:[%s21592_s19 + $0xd88] sm:$0xff]  ;;  %v17160_v14 = vcombine.low %v6557_v61, %v6565_v15 }
 0xe4a   : > { %9355 = vmatprep.subr.bf16.mxu1 %v17063_v1  ;;  %9457 = vmatprep.subr.bf16.mxu0 %v17065_v42  ;;  %v6540_v1 = vld [vmem:[%s21592_s19 + $0xc80] sm:$0xff]  ;;  %v6581_v46 = vld [vmem:[%s21592_s19 + $0xdc8] sm:$0xff] }
 0xe4b   : > { %v6548_v42 = vld [vmem:[%s21592_s19 + $0xcc0] sm:$0xff]  ;;  %v6589_v50 = vld [vmem:[%s21592_s19 + $0xe08] sm:$0xff]  ;;  %v17176_v54 = vcombine.low %v6573_v32, %v6581_v46 }
 0xe4c   : > { %v17142_v51 = vcombine.low %v6540_v1, %v6548_v42  ;;  %v6597_v31 = vld [vmem:[%s21592_s19 + $0xe48] sm:$0xff] }
 0xe4d   : > { %9356 = vmatpush1.bf16.msra.mxu1 %v17062_v25  ;;  %9458 = vmatpush1.bf16.msra.mxu0 %v17064_v41  ;;  %v17143_v25 = vcombine.high %v6540_v1, %v6548_v42  ;;  %v17145_v41 = vcombine.high %v6541_v23, %v6549_v9  ;;  %v6605_v1 = vld [vmem:[%s21592_s19 + $0xe88] sm:$0xff]  ;;  %v17192_v9 = vcombine.low %v6589_v50, %v6597_v31 }
 0xe4e   : > { %9357 = vmatprep.subr.bf16.mxu1 %v17079_v59  ;;  %9459 = vmatprep.subr.bf16.mxu0 %v17081_v45  ;;  %v6556_v59 = vld [vmem:[%s21592_s19 + $0xd00] sm:$0xff]  ;;  %v6613_v42 = vld [vmem:[%s21592_s19 + $0xec8] sm:$0xff] }
 0xe4f   : > { %v6564_v45 = vld [vmem:[%s21592_s19 + $0xd40] sm:$0xff] }
 0xe50   : > { %v17158_v12 = vcombine.low %v6556_v59, %v6564_v45 }
 0xe51   : > { %9358 = vmatpush1.bf16.msra.mxu1 %v17078_v0  ;;  %9460 = vmatpush1.bf16.msra.mxu0 %v17080_v52  ;;  %v17159_v0 = vcombine.high %v6556_v59, %v6564_v45  ;;  %v17161_v52 = vcombine.high %v6557_v61, %v6565_v15  ;;  %v6621_v59 = vld [vmem:[%s21592_s19 + $0xf08] sm:$0xff]  ;;  %v17208_v15 = vcombine.low %v6605_v1, %v6613_v42 }
 0xe52   : > { %9359 = vmatprep.subr.bf16.mxu1 %v17095_v27  ;;  %9461 = vmatprep.subr.bf16.mxu0 %v17097_v47  ;;  %v6572_v27 = vld [vmem:[%s21592_s19 + $0xd80] sm:$0xff]  ;;  %v6629_v45 = vld [vmem:[%s21592_s19 + $0xf48] sm:$0xff] }
 0xe53   : > { %v6580_v47 = vld [vmem:[%s21592_s19 + $0xdc0] sm:$0xff] }
 0xe54   : > { %v17174_v56 = vcombine.low %v6572_v27, %v6580_v47 }
 0xe55   : > { %9360 = vmatpush1.bf16.msra.mxu1 %v17094_v60  ;;  %9462 = vmatpush1.bf16.msra.mxu0 %v17096_v48  ;;  %v17175_v60 = vcombine.high %v6572_v27, %v6580_v47  ;;  %v17177_v48 = vcombine.high %v6573_v32, %v6581_v46  ;;  %v6637_v27 = vld [vmem:[%s21592_s19 + $0xf88] sm:$0xff]  ;;  %v6065_v32 = vmul.f32 %v22862_v21, %v22778_v49 }
 0xe56   : > { %9361 = vmatprep.subr.bf16.mxu1 %v17111_v13  ;;  %9463 = vmatprep.subr.bf16.mxu0 %v17113_v7  ;;  %v6588_v13 = vld [vmem:[%s21592_s19 + $0xe00] sm:$0xff]  ;;  %v6645_v47 = vld [vmem:[%s21592_s19 + $0xfc8] sm:$0xff] }
 0xe57   : > { %v6596_v7 = vld [vmem:[%s21592_s19 + $0xe40] sm:$0xff]  ;;  %v17240_v21 = vcombine.low %v6637_v27, %v6645_v47 }
 0xe58   : > { %v17190_v23 = vcombine.low %v6588_v13, %v6596_v7 }
 0xe59   : > { %9362 = vmatpush1.bf16.msra.mxu1 %v17110_v24  ;;  %9464 = vmatpush1.bf16.msra.mxu0 %v17112_v16  ;;  %v17191_v24 = vcombine.high %v6588_v13, %v6596_v7  ;;  %v17193_v16 = vcombine.high %v6589_v50, %v6597_v31  ;;  %v6150_v13 = vld [vmem:[%s21592_s19 + $0x50] sm:$0xff]  ;;  %v6143_v7 = vld [vmem:[%s21592_s19 + $0x18] sm:$0xff]  ;;  %v6098_v31 = vmul.f32 %v22866_v8, %v6065_v32 }
 0xe5a   : > { %9363 = vmatprep.subr.bf16.mxu1 %v17127_v18  ;;  %9465 = vmatprep.subr.bf16.mxu0 %v17129_v30  ;;  %v6604_v18 = vld [vmem:[%s21592_s19 + $0xe80] sm:$0xff]  ;;  %v6151_v50 = vld [vmem:[%s21592_s19 + $0x58] sm:$0xff]  ;;  %v23002_v8 = vpack.c.bf16 %v22868_v37, %v22849_v11 }
 0xe5b   : > { %v6612_v30 = vld [vmem:[%s21592_s19 + $0xec0] sm:$0xff]  ;;  %v6555_v37 = vld [vmem:[%s21592_s19 + $0xcf8] sm:$0xff] }
 0xe5c   : > { %v17206_v61 = vcombine.low %v6604_v18, %v6612_v30 }
 0xe5d   : > { %9364 = vmatpush1.bf16.msra.mxu1 %v17126_v44  ;;  %9466 = vmatpush1.bf16.msra.mxu0 %v17128_v6  ;;  %v17207_v44 = vcombine.high %v6604_v18, %v6612_v30  ;;  %v17209_v6 = vcombine.high %v6605_v1, %v6613_v42  ;;  %v6166_v18 = vld [vmem:[%s21592_s19 + $0xd0] sm:$0xff]  ;;  %v6159_v30 = vld [vmem:[%s21592_s19 + $0x98] sm:$0xff] }
 0xe5e   : > { %9365 = vmatprep.subr.bf16.mxu1 %v17143_v25  ;;  %9467 = vmatprep.subr.bf16.mxu0 %v17145_v41  ;;  %v6620_v25 = vld [vmem:[%s21592_s19 + $0xf00] sm:$0xff]  ;;  %v6167_v1 = vld [vmem:[%s21592_s19 + $0xd8] sm:$0xff] }
 0xe5f   : > { %v6628_v41 = vld [vmem:[%s21592_s19 + $0xf40] sm:$0xff] }
 0xe60   : > { %v17222_v46 = vcombine.low %v6620_v25, %v6628_v41 }
 0xe61   : > { %9366 = vmatpush1.bf16.msra.mxu1 %v17142_v51  ;;  %9468 = vmatpush1.bf16.msra.mxu0 %v17144_v2  ;;  %v17223_v51 = vcombine.high %v6620_v25, %v6628_v41  ;;  %v17225_v2 = vcombine.high %v6621_v59, %v6629_v45  ;;  %v6182_v25 = vld [vmem:[%s21592_s19 + $0x150] sm:$0xff]  ;;  %v6175_v41 = vld [vmem:[%s21592_s19 + $0x118] sm:$0xff] }
 0xe62   : > { %9367 = vmatprep.subr.bf16.mxu1 %v17159_v0  ;;  %9469 = vmatprep.subr.bf16.mxu0 %v17161_v52  ;;  %v6636_v0 = vld [vmem:[%s21592_s19 + $0xf80] sm:$0xff] }
 0xe63   : > { %v6644_v52 = vld [vmem:[%s21592_s19 + $0xfc0] sm:$0xff] }
 0xe64   : > { %v17238_v49 = vcombine.low %v6636_v0, %v6644_v52 }
 0xe65   : > { %9368 = vmatpush1.bf16.msra.mxu1 %v17158_v12  ;;  %9470 = vmatpush1.bf16.msra.mxu0 %v17160_v14  ;;  %v17224_v12 = vcombine.low %v6621_v59, %v6629_v45  ;;  %v17239_v14 = vcombine.high %v6636_v0, %v6644_v52  ;;  %v6183_v59 = vld [vmem:[%s21592_s19 + $0x158] sm:$0xff]  ;;  %v6198_v0 = vld [vmem:[%s21592_s19 + $0x1d0] sm:$0xff] }
 0xe66   : > { %9369 = vmatprep.subr.bf16.mxu1 %v17175_v60  ;;  %9471 = vmatprep.subr.bf16.mxu0 %v17177_v48  ;;  %v17241_v60 = vcombine.high %v6637_v27, %v6645_v47  ;;  %v6142_v48 = vld [vmem:[%s21592_s19 + $0x10] sm:$0xff]  ;;  %v6191_v52 = vld [vmem:[%s21592_s19 + $0x198] sm:$0xff]  ;;  %v23022_v47 = vpack.c.bf16 %v22908_v43, %v22908_v43 }
 0xe67   : > { %v16746_v42 = vcombine.low %v6142_v48, %v6150_v13  ;;  %v6199_v27 = vld [vmem:[%s21592_s19 + $0x1d8] sm:$0xff] }
 0xe68   : > { %v6515_v43 = vld [vmem:[%s21592_s19 + $0xbb8] sm:$0xff] }
 0xe69   : > { %9370 = vmatpush1.bf16.msra.mxu1 %v17174_v56  ;;  %9472 = vmatpush1.bf16.msra.mxu0 %v17176_v54  ;;  %v16747_v56 = vcombine.high %v6142_v48, %v6150_v13  ;;  %v16749_v54 = vcombine.high %v6143_v7, %v6151_v50  ;;  %v6214_v48 = vld [vmem:[%s21592_s19 + $0x250] sm:$0xff]  ;;  %v6207_v13 = vld [vmem:[%s21592_s19 + $0x218] sm:$0xff] }
 0xe6a   : > { %9371 = vmatprep.subr.bf16.mxu1 %v17191_v24  ;;  %9473 = vmatprep.subr.bf16.mxu0 %v17193_v16  ;;  %v22994_v24 = vadd.f32 %v22895_v57, %v6098_v31  ;;  %v6158_v16 = vld [vmem:[%s21592_s19 + $0x90] sm:$0xff]  ;;  %v16796_v31 = vcombine.low %v6191_v52, %v6199_v27 }
 0xe6b   : > { %v16762_v45 = vcombine.low %v6158_v16, %v6166_v18 }
 0xe6c   : > { %24570 = vst [vmem:[#allocation47_spill] sm:$0xff] %v22994_v24  ;;  %v23006_v57 = vpack.c.bf16 %v22994_v24, %v22994_v24 }
 0xe6d   : > { %9372 = vmatpush1.bf16.msra.mxu1 %v17190_v23  ;;  %9474 = vmatpush1.bf16.msra.mxu0 %v17192_v9  ;;  %v16748_v23 = vcombine.low %v6143_v7, %v6151_v50  ;;  %v16763_v9 = vcombine.high %v6158_v16, %v6166_v18  ;;  %v6215_v7 = vld [vmem:[%s21592_s19 + $0x258] sm:$0xff] }
 0xe6e   : > { %9373 = vmatprep.subr.bf16.mxu1 %v17207_v44  ;;  %9475 = vmatprep.subr.bf16.mxu0 %v17209_v6  ;;  %v16765_v44 = vcombine.high %v6159_v30, %v6167_v1  ;;  %v6174_v6 = vld [vmem:[%s21592_s19 + $0x110] sm:$0xff]  ;;  %v6223_v16 = vld [vmem:[%s21592_s19 + $0x298] sm:$0xff] }
 0xe6f   : > { %v16778_v32 = vcombine.low %v6174_v6, %v6182_v25  ;;  %v6231_v18 = vld [vmem:[%s21592_s19 + $0x2d8] sm:$0xff] }
 0xe71   : > { %9374 = vmatpush1.bf16.msra.mxu1 %v17206_v61  ;;  %9476 = vmatpush1.bf16.msra.mxu0 %v17208_v15  ;;  %v16764_v61 = vcombine.low %v6159_v30, %v6167_v1  ;;  %v16779_v15 = vcombine.high %v6174_v6, %v6182_v25  ;;  %v16812_v1 = vcombine.low %v6207_v13, %v6215_v7  ;;  %v6239_v6 = vld [vmem:[%s21592_s19 + $0x318] sm:$0xff] }
 0xe72   : > { %9375 = vmatprep.subr.bf16.mxu1 %v17223_v51  ;;  %9477 = vmatprep.subr.bf16.mxu0 %v17225_v2  ;;  %v16781_v51 = vcombine.high %v6175_v41, %v6183_v59  ;;  %v6190_v2 = vld [vmem:[%s21592_s19 + $0x190] sm:$0xff]  ;;  %v6247_v25 = vld [vmem:[%s21592_s19 + $0x358] sm:$0xff] }
 0xe73   : > { %v16794_v50 = vcombine.low %v6190_v2, %v6198_v0 }
 0xe75   : > { %9376 = vmatpush1.bf16.msra.mxu1 %v17222_v46  ;;  %9478 = vmatpush1.bf16.msra.mxu0 %v17224_v12  ;;  %v16780_v46 = vcombine.low %v6175_v41, %v6183_v59  ;;  %v16795_v12 = vcombine.high %v6190_v2, %v6198_v0  ;;  %v16828_v59 = vcombine.low %v6223_v16, %v6231_v18  ;;  %v6255_v2 = vld [vmem:[%s21592_s19 + $0x398] sm:$0xff] }
 0xe76   : > { %9377 = vmatprep.subr.bf16.mxu1 %v17239_v14  ;;  %9479 = vmatprep.subr.bf16.mxu0 %v17241_v60  ;;  %v16797_v14 = vcombine.high %v6191_v52, %v6199_v27  ;;  %v6206_v60 = vld [vmem:[%s21592_s19 + $0x210] sm:$0xff]  ;;  %v6263_v0 = vld [vmem:[%s21592_s19 + $0x3d8] sm:$0xff]  ;;  %v16844_v27 = vcombine.low %v6239_v6, %v6247_v25 }
 0xe77   : > { %v16810_v30 = vcombine.low %v6206_v60, %v6214_v48 }
 0xe79   : > { %9378 = vmatpush1.bf16.msra.mxu1 %v17238_v49  ;;  %9480 = vmatpush1.bf16.msra.mxu0 %v17240_v21  ;;  %v16811_v49 = vcombine.high %v6206_v60, %v6214_v48  ;;  %v16813_v21 = vcombine.high %v6207_v13, %v6215_v7  ;;  %v6271_v60 = vld [vmem:[%s21592_s19 + $0x418] sm:$0xff]  ;;  %v16860_v7 = vcombine.low %v6255_v2, %v6263_v0 }
 0xe7a   : > { %9500 = vmatprep.subr.bf16.mxu1 %v16747_v56  ;;  %9602 = vmatprep.subr.bf16.mxu0 %v16749_v54  ;;  %v6222_v56 = vld [vmem:[%s21592_s19 + $0x290] sm:$0xff]  ;;  %v6279_v48 = vld [vmem:[%s21592_s19 + $0x458] sm:$0xff] }
 0xe7b   : > { %v6230_v54 = vld [vmem:[%s21592_s19 + $0x2d0] sm:$0xff] }
 0xe7c   : > { %9380 = vmatmul.mubr.bf16.vlgmr.msra.gmra.mrb[52].mxu1 %v23002_v8  ;;  %9482 = vmatmul.mubr.bf16.vlgmr.msra.gmra.mrb[52].mxu0 %v23002_v8  ;;  %v16826_v41 = vcombine.low %v6222_v56, %v6230_v54 }
 0xe7d   : > { %9389 = vmatprep.mubr.bf16.mxu1 %v23006_v57  ;;  %9491 = vmatprep.mubr.bf16.mxu0 %v23006_v57 }
 0xe7e   : > { %9501 = vmatpush1.bf16.msra.mxu1 %v16746_v42  ;;  %9603 = vmatpush1.bf16.msra.mxu0 %v16748_v23  ;;  %v16827_v42 = vcombine.high %v6222_v56, %v6230_v54  ;;  %v16829_v23 = vcombine.high %v6223_v16, %v6231_v18  ;;  %v6287_v56 = vld [vmem:[%s21592_s19 + $0x498] sm:$0xff]  ;;  %v16876_v18 = vcombine.low %v6271_v60, %v6279_v48 }
 0xe7f   : > { %9502 = vmatprep.subr.bf16.mxu1 %v16763_v9  ;;  %9604 = vmatprep.subr.bf16.mxu0 %v16765_v44  ;;  %v6238_v9 = vld [vmem:[%s21592_s19 + $0x310] sm:$0xff]  ;;  %v6295_v54 = vld [vmem:[%s21592_s19 + $0x4d8] sm:$0xff] }
 0xe80   : > { %v6246_v44 = vld [vmem:[%s21592_s19 + $0x350] sm:$0xff] }
 0xe81   : > { %v16842_v52 = vcombine.low %v6238_v9, %v6246_v44 }
 0xe82   : > { %9503 = vmatpush1.bf16.msra.mxu1 %v16762_v45  ;;  %9605 = vmatpush1.bf16.msra.mxu0 %v16764_v61  ;;  %v16843_v45 = vcombine.high %v6238_v9, %v6246_v44  ;;  %v16845_v61 = vcombine.high %v6239_v6, %v6247_v25  ;;  %v6303_v9 = vld [vmem:[%s21592_s19 + $0x518] sm:$0xff]  ;;  %v16892_v25 = vcombine.low %v6287_v56, %v6295_v54 }
 0xe83   : > { %9504 = vmatprep.subr.bf16.mxu1 %v16779_v15  ;;  %9606 = vmatprep.subr.bf16.mxu0 %v16781_v51  ;;  %v6254_v15 = vld [vmem:[%s21592_s19 + $0x390] sm:$0xff]  ;;  %v6311_v44 = vld [vmem:[%s21592_s19 + $0x558] sm:$0xff] }
 0xe84   : > { %9390 = vmatmul.mubr.bf16.gmra.mrb[56].mxu1 %v23022_v47  ;;  %9492 = vmatmul.mubr.bf16.gmra.mrb[56].mxu0 %v23022_v47  ;;  %v6262_v51 = vld [vmem:[%s21592_s19 + $0x3d0] sm:$0xff] }
 0xe85   : > { %9532 = vmatprep.mubr.bf16.mxu1 %v22872_v26  ;;  %9634 = vmatprep.mubr.bf16.mxu0 %v22872_v26  ;;  %v16858_v13 = vcombine.low %v6254_v15, %v6262_v51 }
 0xe86   : > { %9505 = vmatpush1.bf16.msra.mxu1 %v16778_v32  ;;  %9607 = vmatpush1.bf16.msra.mxu0 %v16780_v46  ;;  %v16859_v32 = vcombine.high %v6254_v15, %v6262_v51  ;;  %v16861_v46 = vcombine.high %v6255_v2, %v6263_v0  ;;  %v6319_v15 = vld [vmem:[%s21592_s19 + $0x598] sm:$0xff]  ;;  %v16908_v0 = vcombine.low %v6303_v9, %v6311_v44 }
 0xe87   : > { %9506 = vmatprep.subr.bf16.mxu1 %v16795_v12  ;;  %9608 = vmatprep.subr.bf16.mxu0 %v16797_v14  ;;  %v6270_v12 = vld [vmem:[%s21592_s19 + $0x410] sm:$0xff]  ;;  %v6327_v51 = vld [vmem:[%s21592_s19 + $0x5d8] sm:$0xff] }
 0xe88   : > { %v6278_v14 = vld [vmem:[%s21592_s19 + $0x450] sm:$0xff] }
 0xe89   : > { %v16874_v16 = vcombine.low %v6270_v12, %v6278_v14 }
 0xe8a   : > { %9507 = vmatpush1.bf16.msra.mxu1 %v16794_v50  ;;  %9609 = vmatpush1.bf16.msra.mxu0 %v16796_v31  ;;  %v16875_v50 = vcombine.high %v6270_v12, %v6278_v14  ;;  %v16877_v31 = vcombine.high %v6271_v60, %v6279_v48  ;;  %v6335_v12 = vld [vmem:[%s21592_s19 + $0x618] sm:$0xff]  ;;  %v16924_v48 = vcombine.low %v6319_v15, %v6327_v51 }
 0xe8b   : > { %9508 = vmatprep.subr.bf16.mxu1 %v16811_v49  ;;  %9610 = vmatprep.subr.bf16.mxu0 %v16813_v21  ;;  %v6286_v49 = vld [vmem:[%s21592_s19 + $0x490] sm:$0xff]  ;;  %v6343_v14 = vld [vmem:[%s21592_s19 + $0x658] sm:$0xff] }
 0xe8c   : > { %v6294_v21 = vld [vmem:[%s21592_s19 + $0x4d0] sm:$0xff] }
 0xe8d   : > { %v16890_v6 = vcombine.low %v6286_v49, %v6294_v21 }
 0xe8e   : > { %9509 = vmatpush1.bf16.msra.mxu1 %v16810_v30  ;;  %9611 = vmatpush1.bf16.msra.mxu0 %v16812_v1  ;;  %v16891_v30 = vcombine.high %v6286_v49, %v6294_v21  ;;  %v16893_v1 = vcombine.high %v6287_v56, %v6295_v54  ;;  %v6351_v49 = vld [vmem:[%s21592_s19 + $0x698] sm:$0xff]  ;;  %v16940_v54 = vcombine.low %v6335_v12, %v6343_v14 }
 0xe8f   : > { %9510 = vmatprep.subr.bf16.mxu1 %v16827_v42  ;;  %9612 = vmatprep.subr.bf16.mxu0 %v16829_v23  ;;  %v6302_v42 = vld [vmem:[%s21592_s19 + $0x510] sm:$0xff]  ;;  %v6359_v21 = vld [vmem:[%s21592_s19 + $0x6d8] sm:$0xff] }
 0xe90   : > { %v6310_v23 = vld [vmem:[%s21592_s19 + $0x550] sm:$0xff] }
 0xe91   : > { %v16906_v2 = vcombine.low %v6302_v42, %v6310_v23 }
 0xe92   : > { %9511 = vmatpush1.bf16.msra.mxu1 %v16826_v41  ;;  %9613 = vmatpush1.bf16.msra.mxu0 %v16828_v59  ;;  %v16907_v41 = vcombine.high %v6302_v42, %v6310_v23  ;;  %v16909_v59 = vcombine.high %v6303_v9, %v6311_v44  ;;  %v6367_v42 = vld [vmem:[%s21592_s19 + $0x718] sm:$0xff]  ;;  %v16956_v44 = vcombine.low %v6351_v49, %v6359_v21 }
 0xe93   : > { %9512 = vmatprep.subr.bf16.mxu1 %v16843_v45  ;;  %9614 = vmatprep.subr.bf16.mxu0 %v16845_v61  ;;  %v6318_v45 = vld [vmem:[%s21592_s19 + $0x590] sm:$0xff]  ;;  %v6375_v23 = vld [vmem:[%s21592_s19 + $0x758] sm:$0xff] }
 0xe94   : > { %v6326_v61 = vld [vmem:[%s21592_s19 + $0x5d0] sm:$0xff] }
 0xe95   : > { %v16922_v60 = vcombine.low %v6318_v45, %v6326_v61 }
 0xe96   : > { %9513 = vmatpush1.bf16.msra.mxu1 %v16842_v52  ;;  %9615 = vmatpush1.bf16.msra.mxu0 %v16844_v27  ;;  %v16923_v52 = vcombine.high %v6318_v45, %v6326_v61  ;;  %v16925_v27 = vcombine.high %v6319_v15, %v6327_v51  ;;  %v6383_v45 = vld [vmem:[%s21592_s19 + $0x798] sm:$0xff]  ;;  %v16972_v51 = vcombine.low %v6367_v42, %v6375_v23 }
 0xe97   : > { %9514 = vmatprep.subr.bf16.mxu1 %v16859_v32  ;;  %9616 = vmatprep.subr.bf16.mxu0 %v16861_v46  ;;  %v6334_v32 = vld [vmem:[%s21592_s19 + $0x610] sm:$0xff]  ;;  %v6391_v61 = vld [vmem:[%s21592_s19 + $0x7d8] sm:$0xff] }
 0xe98   : > { %v6342_v46 = vld [vmem:[%s21592_s19 + $0x650] sm:$0xff] }
 0xe99   : > { %v16938_v56 = vcombine.low %v6334_v32, %v6342_v46 }
 0xe9a   : > { %9515 = vmatpush1.bf16.msra.mxu1 %v16858_v13  ;;  %9617 = vmatpush1.bf16.msra.mxu0 %v16860_v7  ;;  %v16939_v13 = vcombine.high %v6334_v32, %v6342_v46  ;;  %v16941_v7 = vcombine.high %v6335_v12, %v6343_v14  ;;  %v6399_v32 = vld [vmem:[%s21592_s19 + $0x818] sm:$0xff]  ;;  %v16988_v14 = vcombine.low %v6383_v45, %v6391_v61 }
 0xe9b   : > { %9516 = vmatprep.subr.bf16.mxu1 %v16875_v50  ;;  %9618 = vmatprep.subr.bf16.mxu0 %v16877_v31  ;;  %v6350_v50 = vld [vmem:[%s21592_s19 + $0x690] sm:$0xff]  ;;  %v6407_v46 = vld [vmem:[%s21592_s19 + $0x858] sm:$0xff] }
 0xe9c   : > { %v6358_v31 = vld [vmem:[%s21592_s19 + $0x6d0] sm:$0xff] }
 0xe9d   : > { %v16954_v9 = vcombine.low %v6350_v50, %v6358_v31 }
 0xe9e   : > { %9517 = vmatpush1.bf16.msra.mxu1 %v16874_v16  ;;  %9619 = vmatpush1.bf16.msra.mxu0 %v16876_v18  ;;  %v16955_v16 = vcombine.high %v6350_v50, %v6358_v31  ;;  %v16957_v18 = vcombine.high %v6351_v49, %v6359_v21  ;;  %v6415_v50 = vld [vmem:[%s21592_s19 + $0x898] sm:$0xff]  ;;  %v17004_v21 = vcombine.low %v6399_v32, %v6407_v46 }
 0xe9f   : > { %9518 = vmatprep.subr.bf16.mxu1 %v16891_v30  ;;  %9620 = vmatprep.subr.bf16.mxu0 %v16893_v1  ;;  %v6366_v30 = vld [vmem:[%s21592_s19 + $0x710] sm:$0xff]  ;;  %v6423_v31 = vld [vmem:[%s21592_s19 + $0x8d8] sm:$0xff] }
 0xea0   : > { %v6374_v1 = vld [vmem:[%s21592_s19 + $0x750] sm:$0xff] }
 0xea1   : > { %v16970_v15 = vcombine.low %v6366_v30, %v6374_v1 }
 0xea2   : > { %9519 = vmatpush1.bf16.msra.mxu1 %v16890_v6  ;;  %9621 = vmatpush1.bf16.msra.mxu0 %v16892_v25  ;;  %v16971_v6 = vcombine.high %v6366_v30, %v6374_v1  ;;  %v16973_v25 = vcombine.high %v6367_v42, %v6375_v23  ;;  %v6431_v30 = vld [vmem:[%s21592_s19 + $0x918] sm:$0xff]  ;;  %v17020_v23 = vcombine.low %v6415_v50, %v6423_v31 }
 0xea3   : > { %9520 = vmatprep.subr.bf16.mxu1 %v16907_v41  ;;  %9622 = vmatprep.subr.bf16.mxu0 %v16909_v59  ;;  %v6382_v41 = vld [vmem:[%s21592_s19 + $0x790] sm:$0xff]  ;;  %v6439_v1 = vld [vmem:[%s21592_s19 + $0x958] sm:$0xff] }
 0xea4   : > { %v6390_v59 = vld [vmem:[%s21592_s19 + $0x7d0] sm:$0xff] }
 0xea5   : > { %v16986_v12 = vcombine.low %v6382_v41, %v6390_v59 }
 0xea6   : > { %9521 = vmatpush1.bf16.msra.mxu1 %v16906_v2  ;;  %9623 = vmatpush1.bf16.msra.mxu0 %v16908_v0  ;;  %v16987_v2 = vcombine.high %v6382_v41, %v6390_v59  ;;  %v16989_v0 = vcombine.high %v6383_v45, %v6391_v61  ;;  %v6447_v41 = vld [vmem:[%s21592_s19 + $0x998] sm:$0xff]  ;;  %v17036_v61 = vcombine.low %v6431_v30, %v6439_v1 }
 0xea7   : > { %9522 = vmatprep.subr.bf16.mxu1 %v16923_v52  ;;  %9624 = vmatprep.subr.bf16.mxu0 %v16925_v27  ;;  %v6398_v52 = vld [vmem:[%s21592_s19 + $0x810] sm:$0xff]  ;;  %v6455_v59 = vld [vmem:[%s21592_s19 + $0x9d8] sm:$0xff] }
 0xea8   : > { %v6406_v27 = vld [vmem:[%s21592_s19 + $0x850] sm:$0xff] }
 0xea9   : > { %v17002_v49 = vcombine.low %v6398_v52, %v6406_v27 }
 0xeaa   : > { %9523 = vmatpush1.bf16.msra.mxu1 %v16922_v60  ;;  %9625 = vmatpush1.bf16.msra.mxu0 %v16924_v48  ;;  %v17003_v60 = vcombine.high %v6398_v52, %v6406_v27  ;;  %v17005_v48 = vcombine.high %v6399_v32, %v6407_v46  ;;  %v6463_v52 = vld [vmem:[%s21592_s19 + $0xa18] sm:$0xff]  ;;  %v17052_v46 = vcombine.low %v6447_v41, %v6455_v59 }
 0xeab   : > { %9524 = vmatprep.subr.bf16.mxu1 %v16939_v13  ;;  %9626 = vmatprep.subr.bf16.mxu0 %v16941_v7  ;;  %v6414_v13 = vld [vmem:[%s21592_s19 + $0x890] sm:$0xff]  ;;  %v6471_v27 = vld [vmem:[%s21592_s19 + $0xa58] sm:$0xff] }
 0xeac   : > { %v6422_v7 = vld [vmem:[%s21592_s19 + $0x8d0] sm:$0xff] }
 0xead   : > { %v17018_v42 = vcombine.low %v6414_v13, %v6422_v7 }
 0xeae   : > { %9525 = vmatpush1.bf16.msra.mxu1 %v16938_v56  ;;  %9627 = vmatpush1.bf16.msra.mxu0 %v16940_v54  ;;  %v17019_v56 = vcombine.high %v6414_v13, %v6422_v7  ;;  %v17021_v54 = vcombine.high %v6415_v50, %v6423_v31  ;;  %v6479_v13 = vld [vmem:[%s21592_s19 + $0xa98] sm:$0xff]  ;;  %v17068_v31 = vcombine.low %v6463_v52, %v6471_v27 }
 0xeaf   : > { %9526 = vmatprep.subr.bf16.mxu1 %v16955_v16  ;;  %9628 = vmatprep.subr.bf16.mxu0 %v16957_v18  ;;  %v6430_v16 = vld [vmem:[%s21592_s19 + $0x910] sm:$0xff]  ;;  %v6487_v7 = vld [vmem:[%s21592_s19 + $0xad8] sm:$0xff] }
 0xeb0   : > { %v6438_v18 = vld [vmem:[%s21592_s19 + $0x950] sm:$0xff] }
 0xeb1   : > { %v17034_v45 = vcombine.low %v6430_v16, %v6438_v18 }
 0xeb2   : > { %9527 = vmatpush1.bf16.msra.mxu1 %v16954_v9  ;;  %9629 = vmatpush1.bf16.msra.mxu0 %v16956_v44  ;;  %v17035_v9 = vcombine.high %v6430_v16, %v6438_v18  ;;  %v17037_v44 = vcombine.high %v6431_v30, %v6439_v1  ;;  %v6495_v16 = vld [vmem:[%s21592_s19 + $0xb18] sm:$0xff]  ;;  %v17084_v1 = vcombine.low %v6479_v13, %v6487_v7 }
 0xeb3   : > { %9528 = vmatprep.subr.bf16.mxu1 %v16971_v6  ;;  %9630 = vmatprep.subr.bf16.mxu0 %v16973_v25  ;;  %v6446_v6 = vld [vmem:[%s21592_s19 + $0x990] sm:$0xff]  ;;  %v6503_v18 = vld [vmem:[%s21592_s19 + $0xb58] sm:$0xff] }
 0xeb4   : > { %v6454_v25 = vld [vmem:[%s21592_s19 + $0x9d0] sm:$0xff] }
 0xeb5   : > { %v17050_v32 = vcombine.low %v6446_v6, %v6454_v25 }
 0xeb6   : > { %9529 = vmatpush1.bf16.msra.mxu1 %v16970_v15  ;;  %9631 = vmatpush1.bf16.msra.mxu0 %v16972_v51  ;;  %v17051_v15 = vcombine.high %v6446_v6, %v6454_v25  ;;  %v17053_v51 = vcombine.high %v6447_v41, %v6455_v59  ;;  %v6511_v6 = vld [vmem:[%s21592_s19 + $0xb98] sm:$0xff]  ;;  %v17100_v59 = vcombine.low %v6495_v16, %v6503_v18 }
 0xeb7   : > { %9530 = vmatprep.subr.bf16.mxu1 %v16987_v2  ;;  %9632 = vmatprep.subr.bf16.mxu0 %v16989_v0  ;;  %v6462_v2 = vld [vmem:[%s21592_s19 + $0xa10] sm:$0xff]  ;;  %v6519_v25 = vld [vmem:[%s21592_s19 + $0xbd8] sm:$0xff] }
 0xeb8   : > { %v6470_v0 = vld [vmem:[%s21592_s19 + $0xa50] sm:$0xff] }
 0xeb9   : > { %v17066_v50 = vcombine.low %v6462_v2, %v6470_v0 }
 0xeba   : > { %9531 = vmatpush1.bf16.msra.mxu1 %v16986_v12  ;;  %9633 = vmatpush1.bf16.msra.mxu0 %v16988_v14  ;;  %v17067_v12 = vcombine.high %v6462_v2, %v6470_v0  ;;  %v17069_v14 = vcombine.high %v6463_v52, %v6471_v27  ;;  %v6527_v2 = vld [vmem:[%s21592_s19 + $0xc18] sm:$0xff]  ;;  %v17116_v27 = vcombine.low %v6511_v6, %v6519_v25 }
 0xebb   : > { %9551 = vmatprep.subr.bf16.mxu1 %v17003_v60  ;;  %9653 = vmatprep.subr.bf16.mxu0 %v17005_v48  ;;  %v6478_v60 = vld [vmem:[%s21592_s19 + $0xa90] sm:$0xff]  ;;  %v6535_v0 = vld [vmem:[%s21592_s19 + $0xc58] sm:$0xff] }
 0xebc   : > { %v6486_v48 = vld [vmem:[%s21592_s19 + $0xad0] sm:$0xff] }
 0xebd   : > { %9533 = vmatmul.mubr.bf16.vlgmr.msra.gmra.mrb[60].mxu1 %v22876_v62  ;;  %9635 = vmatmul.mubr.bf16.vlgmr.msra.gmra.mrb[60].mxu0 %v22876_v62  ;;  %v17082_v30 = vcombine.low %v6478_v60, %v6486_v48 }
 0xebe   : > { %9542 = vmatprep.mubr.bf16.mxu1 %v22912_v58  ;;  %9552 = vmatpush1.bf16.msra.mxu1 %v17002_v49  ;;  %v17083_v49 = vcombine.high %v6478_v60, %v6486_v48  ;;  %v6543_v60 = vld [vmem:[%s21592_s19 + $0xc98] sm:$0xff] }
 0xebf   : > { %9644 = vmatprep.mubr.bf16.mxu0 %v22912_v58  ;;  %9654 = vmatpush1.bf16.msra.mxu0 %v17004_v21  ;;  %v17085_v21 = vcombine.high %v6479_v13, %v6487_v7  ;;  %v6551_v48 = vld [vmem:[%s21592_s19 + $0xcd8] sm:$0xff]  ;;  %v17132_v7 = vcombine.low %v6527_v2, %v6535_v0 }
 0xec0   : > { %9553 = vmatprep.subr.bf16.mxu1 %v17019_v56  ;;  %9655 = vmatprep.subr.bf16.mxu0 %v17021_v54  ;;  %v6494_v56 = vld [vmem:[%s21592_s19 + $0xb10] sm:$0xff] }
 0xec1   : > { %v6502_v54 = vld [vmem:[%s21592_s19 + $0xb50] sm:$0xff] }
 0xec2   : > { %9554 = vmatpush1.bf16.msra.mxu1 %v17018_v42  ;;  %v17099_v42 = vcombine.high %v6494_v56, %v6502_v54  ;;  %v17098_v41 = vcombine.low %v6494_v56, %v6502_v54  ;;  %v6559_v56 = vld [vmem:[%s21592_s19 + $0xd18] sm:$0xff] }
 0xec3   : > { %9656 = vmatpush1.bf16.msra.mxu0 %v17020_v23  ;;  %9555 = vmatprep.subr.bf16.mxu1 %v17035_v9  ;;  %v17101_v23 = vcombine.high %v6495_v16, %v6503_v18  ;;  %v6510_v9 = vld [vmem:[%s21592_s19 + $0xb90] sm:$0xff]  ;;  %v6567_v54 = vld [vmem:[%s21592_s19 + $0xd58] sm:$0xff]  ;;  %v17148_v18 = vcombine.low %v6543_v60, %v6551_v48 }
 0xec4   : > { %9657 = vmatprep.subr.bf16.mxu0 %v17037_v44  ;;  %v6518_v44 = vld [vmem:[%s21592_s19 + $0xbd0] sm:$0xff] }
 0xec5   : > { %9543 = vmatmul.mubr.bf16.gmra.mrb[64].mxu1 %v22925_v10  ;;  %9645 = vmatmul.mubr.bf16.gmra.mrb[64].mxu0 %v22925_v10  ;;  %v17114_v52 = vcombine.low %v6510_v9, %v6518_v44 }
 0xec6   : > { %9556 = vmatpush1.bf16.msra.mxu1 %v17034_v45  ;;  %9583 = vmatprep.mubr.bf16.mxu1 %v22938_v17  ;;  %v17115_v45 = vcombine.high %v6510_v9, %v6518_v44  ;;  %v6575_v9 = vld [vmem:[%s21592_s19 + $0xd98] sm:$0xff] }
 0xec7   : > { %9658 = vmatpush1.bf16.msra.mxu0 %v17036_v61  ;;  %9685 = vmatprep.mubr.bf16.mxu0 %v22938_v17  ;;  %v17117_v61 = vcombine.high %v6511_v6, %v6519_v25  ;;  %v6583_v44 = vld [vmem:[%s21592_s19 + $0xdd8] sm:$0xff]  ;;  %v17164_v25 = vcombine.low %v6559_v56, %v6567_v54 }
 0xec8   : > { %9557 = vmatprep.subr.bf16.mxu1 %v17051_v15  ;;  %9659 = vmatprep.subr.bf16.mxu0 %v17053_v51  ;;  %v6526_v15 = vld [vmem:[%s21592_s19 + $0xc10] sm:$0xff] }
 0xec9   : > { %v6534_v51 = vld [vmem:[%s21592_s19 + $0xc50] sm:$0xff] }
 0xeca   : > { %9558 = vmatpush1.bf16.msra.mxu1 %v17050_v32  ;;  %v17131_v32 = vcombine.high %v6526_v15, %v6534_v51  ;;  %v17130_v13 = vcombine.low %v6526_v15, %v6534_v51  ;;  %v6591_v15 = vld [vmem:[%s21592_s19 + $0xe18] sm:$0xff] }
 0xecb   : > { %9660 = vmatpush1.bf16.msra.mxu0 %v17052_v46  ;;  %9559 = vmatprep.subr.bf16.mxu1 %v17067_v12  ;;  %v17133_v46 = vcombine.high %v6527_v2, %v6535_v0  ;;  %v6542_v12 = vld [vmem:[%s21592_s19 + $0xc90] sm:$0xff]  ;;  %v6599_v51 = vld [vmem:[%s21592_s19 + $0xe58] sm:$0xff]  ;;  %v17180_v0 = vcombine.low %v6575_v9, %v6583_v44 }
 0xecc   : > { %9661 = vmatprep.subr.bf16.mxu0 %v17069_v14  ;;  %v6550_v14 = vld [vmem:[%s21592_s19 + $0xcd0] sm:$0xff] }
 0xecd   : > { %v17146_v16 = vcombine.low %v6542_v12, %v6550_v14 }
 0xece   : > { %9560 = vmatpush1.bf16.msra.mxu1 %v17066_v50  ;;  %v17147_v50 = vcombine.high %v6542_v12, %v6550_v14  ;;  %v6607_v12 = vld [vmem:[%s21592_s19 + $0xe98] sm:$0xff] }
 0xecf   : > { %9662 = vmatpush1.bf16.msra.mxu0 %v17068_v31  ;;  %9561 = vmatprep.subr.bf16.mxu1 %v17083_v49  ;;  %v17149_v31 = vcombine.high %v6543_v60, %v6551_v48  ;;  %v6558_v49 = vld [vmem:[%s21592_s19 + $0xd10] sm:$0xff]  ;;  %v6615_v14 = vld [vmem:[%s21592_s19 + $0xed8] sm:$0xff]  ;;  %v17196_v48 = vcombine.low %v6591_v15, %v6599_v51 }
 0xed0   : > { %9663 = vmatprep.subr.bf16.mxu0 %v17085_v21  ;;  %v6566_v21 = vld [vmem:[%s21592_s19 + $0xd50] sm:$0xff] }
 0xed1   : > { %v17162_v6 = vcombine.low %v6558_v49, %v6566_v21 }
 0xed2   : > { %9562 = vmatpush1.bf16.msra.mxu1 %v17082_v30  ;;  %v17163_v30 = vcombine.high %v6558_v49, %v6566_v21  ;;  %v6623_v49 = vld [vmem:[%s21592_s19 + $0xf18] sm:$0xff] }
 0xed3   : > { %9664 = vmatpush1.bf16.msra.mxu0 %v17084_v1  ;;  %9563 = vmatprep.subr.bf16.mxu1 %v17099_v42  ;;  %v17165_v1 = vcombine.high %v6559_v56, %v6567_v54  ;;  %v6574_v42 = vld [vmem:[%s21592_s19 + $0xd90] sm:$0xff]  ;;  %v6631_v21 = vld [vmem:[%s21592_s19 + $0xf58] sm:$0xff]  ;;  %v17212_v54 = vcombine.low %v6607_v12, %v6615_v14 }
 0xed4   : > { %9665 = vmatprep.subr.bf16.mxu0 %v17101_v23  ;;  %v6582_v23 = vld [vmem:[%s21592_s19 + $0xdd0] sm:$0xff] }
 0xed5   : > { %v17178_v2 = vcombine.low %v6574_v42, %v6582_v23 }
 0xed6   : > { %9564 = vmatpush1.bf16.msra.mxu1 %v17098_v41  ;;  %v17179_v41 = vcombine.high %v6574_v42, %v6582_v23  ;;  %v6639_v42 = vld [vmem:[%s21592_s19 + $0xf98] sm:$0xff] }
 0xed7   : > { %9666 = vmatpush1.bf16.msra.mxu0 %v17100_v59  ;;  %9565 = vmatprep.subr.bf16.mxu1 %v17115_v45  ;;  %v17181_v59 = vcombine.high %v6575_v9, %v6583_v44  ;;  %v6590_v45 = vld [vmem:[%s21592_s19 + $0xe10] sm:$0xff]  ;;  %v6647_v23 = vld [vmem:[%s21592_s19 + $0xfd8] sm:$0xff]  ;;  %v17228_v44 = vcombine.low %v6623_v49, %v6631_v21 }
 0xed8   : > { %9667 = vmatprep.subr.bf16.mxu0 %v17117_v61  ;;  %v6598_v61 = vld [vmem:[%s21592_s19 + $0xe50] sm:$0xff] }
 0xed9   : > { %v17194_v60 = vcombine.low %v6590_v45, %v6598_v61 }
 0xeda   : > { %9566 = vmatpush1.bf16.msra.mxu1 %v17114_v52  ;;  %v17195_v52 = vcombine.high %v6590_v45, %v6598_v61  ;;  %v6145_v45 = vld [vmem:[%s21592_s19 + $0x28] sm:$0xff] }
 0xedb   : > { %9668 = vmatpush1.bf16.msra.mxu0 %v17116_v27  ;;  %9567 = vmatprep.subr.bf16.mxu1 %v17131_v32  ;;  %v17197_v27 = vcombine.high %v6591_v15, %v6599_v51  ;;  %v6606_v32 = vld [vmem:[%s21592_s19 + $0xe90] sm:$0xff]  ;;  %v6153_v61 = vld [vmem:[%s21592_s19 + $0x68] sm:$0xff]  ;;  %v17244_v51 = vcombine.low %v6639_v42, %v6647_v23 }
 0xedc   : > { %9669 = vmatprep.subr.bf16.mxu0 %v17133_v46  ;;  %v6614_v46 = vld [vmem:[%s21592_s19 + $0xed0] sm:$0xff] }
 0xedd   : > { %v17210_v56 = vcombine.low %v6606_v32, %v6614_v46 }
 0xede   : > { %9568 = vmatpush1.bf16.msra.mxu1 %v17130_v13  ;;  %v17211_v13 = vcombine.high %v6606_v32, %v6614_v46  ;;  %v6161_v32 = vld [vmem:[%s21592_s19 + $0xa8] sm:$0xff] }
 0xedf   : > { %9670 = vmatpush1.bf16.msra.mxu0 %v17132_v7  ;;  %9569 = vmatprep.subr.bf16.mxu1 %v17147_v50  ;;  %v17213_v7 = vcombine.high %v6607_v12, %v6615_v14  ;;  %v6622_v50 = vld [vmem:[%s21592_s19 + $0xf10] sm:$0xff]  ;;  %v6169_v46 = vld [vmem:[%s21592_s19 + $0xe8] sm:$0xff]  ;;  %v16752_v14 = vcombine.low %v6145_v45, %v6153_v61 }
 0xee0   : > { %9671 = vmatprep.subr.bf16.mxu0 %v17149_v31  ;;  %v6630_v31 = vld [vmem:[%s21592_s19 + $0xf50] sm:$0xff] }
 0xee1   : > { %v17226_v9 = vcombine.low %v6622_v50, %v6630_v31 }
 0xee2   : > { %9570 = vmatpush1.bf16.msra.mxu1 %v17146_v16  ;;  %v17227_v16 = vcombine.high %v6622_v50, %v6630_v31  ;;  %v6177_v50 = vld [vmem:[%s21592_s19 + $0x128] sm:$0xff] }
 0xee3   : > { %9672 = vmatpush1.bf16.msra.mxu0 %v17148_v18  ;;  %9571 = vmatprep.subr.bf16.mxu1 %v17163_v30  ;;  %v17229_v18 = vcombine.high %v6623_v49, %v6631_v21  ;;  %v6638_v30 = vld [vmem:[%s21592_s19 + $0xf90] sm:$0xff]  ;;  %v6185_v31 = vld [vmem:[%s21592_s19 + $0x168] sm:$0xff]  ;;  %v16768_v21 = vcombine.low %v6161_v32, %v6169_v46 }
 0xee4   : > { %9673 = vmatprep.subr.bf16.mxu0 %v17165_v1  ;;  %v6646_v1 = vld [vmem:[%s21592_s19 + $0xfd0] sm:$0xff] }
 0xee5   : > { %v17242_v15 = vcombine.low %v6638_v30, %v6646_v1 }
 0xee6   : > { %9572 = vmatpush1.bf16.msra.mxu1 %v17162_v6  ;;  %v17243_v6 = vcombine.high %v6638_v30, %v6646_v1  ;;  %v6193_v30 = vld [vmem:[%s21592_s19 + $0x1a8] sm:$0xff] }
 0xee7   : > { %9674 = vmatpush1.bf16.msra.mxu0 %v17164_v25  ;;  %9573 = vmatprep.subr.bf16.mxu1 %v17179_v41  ;;  %v17245_v25 = vcombine.high %v6639_v42, %v6647_v23  ;;  %v6144_v41 = vld [vmem:[%s21592_s19 + $0x20] sm:$0xff]  ;;  %v6201_v1 = vld [vmem:[%s21592_s19 + $0x1e8] sm:$0xff]  ;;  %v16784_v23 = vcombine.low %v6177_v50, %v6185_v31 }
 0xee8   : > { %9675 = vmatprep.subr.bf16.mxu0 %v17181_v59  ;;  %v6152_v59 = vld [vmem:[%s21592_s19 + $0x60] sm:$0xff] }
 0xee9   : > { %v16750_v12 = vcombine.low %v6144_v41, %v6152_v59 }
 0xeea   : > { %9574 = vmatpush1.bf16.msra.mxu1 %v17178_v2  ;;  %v16751_v2 = vcombine.high %v6144_v41, %v6152_v59  ;;  %v6209_v41 = vld [vmem:[%s21592_s19 + $0x228] sm:$0xff] }
 0xeeb   : > { %9676 = vmatpush1.bf16.msra.mxu0 %v17180_v0  ;;  %9575 = vmatprep.subr.bf16.mxu1 %v17195_v52  ;;  %v16753_v0 = vcombine.high %v6145_v45, %v6153_v61  ;;  %v6160_v52 = vld [vmem:[%s21592_s19 + $0xa0] sm:$0xff]  ;;  %v6217_v59 = vld [vmem:[%s21592_s19 + $0x268] sm:$0xff]  ;;  %v16800_v61 = vcombine.low %v6193_v30, %v6201_v1 }
 0xeec   : > { %9677 = vmatprep.subr.bf16.mxu0 %v17197_v27  ;;  %v6168_v27 = vld [vmem:[%s21592_s19 + $0xe0] sm:$0xff] }
 0xeed   : > { %v16766_v49 = vcombine.low %v6160_v52, %v6168_v27 }
 0xeee   : > { %9576 = vmatpush1.bf16.msra.mxu1 %v17194_v60  ;;  %v16767_v60 = vcombine.high %v6160_v52, %v6168_v27  ;;  %v6225_v52 = vld [vmem:[%s21592_s19 + $0x2a8] sm:$0xff] }
 0xeef   : > { %9678 = vmatpush1.bf16.msra.mxu0 %v17196_v48  ;;  %9577 = vmatprep.subr.bf16.mxu1 %v17211_v13  ;;  %v16769_v48 = vcombine.high %v6161_v32, %v6169_v46  ;;  %v6176_v13 = vld [vmem:[%s21592_s19 + $0x120] sm:$0xff]  ;;  %v6233_v27 = vld [vmem:[%s21592_s19 + $0x2e8] sm:$0xff]  ;;  %v16816_v46 = vcombine.low %v6209_v41, %v6217_v59 }
 0xef0   : > { %9679 = vmatprep.subr.bf16.mxu0 %v17213_v7  ;;  %v6184_v7 = vld [vmem:[%s21592_s19 + $0x160] sm:$0xff] }
 0xef1   : > { %v16782_v42 = vcombine.low %v6176_v13, %v6184_v7 }
 0xef2   : > { %9578 = vmatpush1.bf16.msra.mxu1 %v17210_v56  ;;  %v16783_v56 = vcombine.high %v6176_v13, %v6184_v7  ;;  %v6241_v13 = vld [vmem:[%s21592_s19 + $0x328] sm:$0xff] }
 0xef3   : > { %9680 = vmatpush1.bf16.msra.mxu0 %v17212_v54  ;;  %9579 = vmatprep.subr.bf16.mxu1 %v17227_v16  ;;  %v16785_v54 = vcombine.high %v6177_v50, %v6185_v31  ;;  %v6192_v16 = vld [vmem:[%s21592_s19 + $0x1a0] sm:$0xff]  ;;  %v6249_v7 = vld [vmem:[%s21592_s19 + $0x368] sm:$0xff]  ;;  %v16832_v31 = vcombine.low %v6225_v52, %v6233_v27 }
 0xef4   : > { %9681 = vmatprep.subr.bf16.mxu0 %v17229_v18  ;;  %v6200_v18 = vld [vmem:[%s21592_s19 + $0x1e0] sm:$0xff] }
 0xef5   : > { %v16798_v45 = vcombine.low %v6192_v16, %v6200_v18 }
 0xef6   : > { %9580 = vmatpush1.bf16.msra.mxu1 %v17226_v9  ;;  %v16799_v9 = vcombine.high %v6192_v16, %v6200_v18  ;;  %v6257_v16 = vld [vmem:[%s21592_s19 + $0x3a8] sm:$0xff] }
 0xef7   : > { %9682 = vmatpush1.bf16.msra.mxu0 %v17228_v44  ;;  %9581 = vmatprep.subr.bf16.mxu1 %v17243_v6  ;;  %v16801_v44 = vcombine.high %v6193_v30, %v6201_v1  ;;  %v6208_v6 = vld [vmem:[%s21592_s19 + $0x220] sm:$0xff]  ;;  %v6265_v18 = vld [vmem:[%s21592_s19 + $0x3e8] sm:$0xff]  ;;  %v16848_v1 = vcombine.low %v6241_v13, %v6249_v7 }
 0xef8   : > { %9683 = vmatprep.subr.bf16.mxu0 %v17245_v25  ;;  %v6216_v25 = vld [vmem:[%s21592_s19 + $0x260] sm:$0xff] }
 0xef9   : > { %v16814_v32 = vcombine.low %v6208_v6, %v6216_v25 }
 0xefa   : > { %9582 = vmatpush1.bf16.msra.mxu1 %v17242_v15  ;;  %v16815_v15 = vcombine.high %v6208_v6, %v6216_v25  ;;  %v6273_v6 = vld [vmem:[%s21592_s19 + $0x428] sm:$0xff] }
 0xefb   : > { %9684 = vmatpush1.bf16.msra.mxu0 %v17244_v51  ;;  %9704 = vmatprep.subr.bf16.mxu1 %v16751_v2  ;;  %v16817_v51 = vcombine.high %v6209_v41, %v6217_v59  ;;  %v6224_v2 = vld [vmem:[%s21592_s19 + $0x2a0] sm:$0xff]  ;;  %v6281_v25 = vld [vmem:[%s21592_s19 + $0x468] sm:$0xff]  ;;  %v16864_v59 = vcombine.low %v6257_v16, %v6265_v18 }
 0xefc   : > { %9806 = vmatprep.subr.bf16.mxu0 %v16753_v0  ;;  %v6232_v0 = vld [vmem:[%s21592_s19 + $0x2e0] sm:$0xff] }
 0xefd   : > { %9584 = vmatmul.mubr.bf16.vlgmr.msra.gmra.mrb[60].mxu1 %v23002_v8  ;;  %v16830_v50 = vcombine.low %v6224_v2, %v6232_v0 }
 0xefe   : > { %9686 = vmatmul.mubr.bf16.vlgmr.msra.gmra.mrb[60].mxu0 %v23002_v8  ;;  %9593 = vmatprep.mubr.bf16.mxu1 %v23006_v57 }
 0xeff   : > { %9695 = vmatprep.mubr.bf16.mxu0 %v23006_v57  ;;  %9705 = vmatpush1.bf16.msra.mxu1 %v16750_v12  ;;  %v16831_v12 = vcombine.high %v6224_v2, %v6232_v0  ;;  %v6289_v2 = vld [vmem:[%s21592_s19 + $0x4a8] sm:$0xff] }
 0xf00   : > { %9807 = vmatpush1.bf16.msra.mxu0 %v16752_v14  ;;  %9706 = vmatprep.subr.bf16.mxu1 %v16767_v60  ;;  %v16833_v14 = vcombine.high %v6225_v52, %v6233_v27  ;;  %v6240_v60 = vld [vmem:[%s21592_s19 + $0x320] sm:$0xff]  ;;  %v6297_v0 = vld [vmem:[%s21592_s19 + $0x4e8] sm:$0xff]  ;;  %v16880_v27 = vcombine.low %v6273_v6, %v6281_v25 }
 0xf01   : > { %9808 = vmatprep.subr.bf16.mxu0 %v16769_v48  ;;  %v6248_v48 = vld [vmem:[%s21592_s19 + $0x360] sm:$0xff] }
 0xf02   : > { %v16846_v30 = vcombine.low %v6240_v60, %v6248_v48 }
 0xf03   : > { %9707 = vmatpush1.bf16.msra.mxu1 %v16766_v49  ;;  %v16847_v49 = vcombine.high %v6240_v60, %v6248_v48  ;;  %v6305_v60 = vld [vmem:[%s21592_s19 + $0x528] sm:$0xff] }
 0xf04   : > { %9809 = vmatpush1.bf16.msra.mxu0 %v16768_v21  ;;  %9708 = vmatprep.subr.bf16.mxu1 %v16783_v56  ;;  %v16849_v21 = vcombine.high %v6241_v13, %v6249_v7  ;;  %v6256_v56 = vld [vmem:[%s21592_s19 + $0x3a0] sm:$0xff]  ;;  %v6313_v48 = vld [vmem:[%s21592_s19 + $0x568] sm:$0xff]  ;;  %v16896_v7 = vcombine.low %v6289_v2, %v6297_v0 }
 0xf05   : > { %9594 = vmatmul.mubr.bf16.gmra.mrb[64].mxu1 %v23022_v47  ;;  %9810 = vmatprep.subr.bf16.mxu0 %v16785_v54  ;;  %v6264_v54 = vld [vmem:[%s21592_s19 + $0x3e0] sm:$0xff] }
 0xf06   : > { %9696 = vmatmul.mubr.bf16.gmra.mrb[64].mxu0 %v23022_v47  ;;  %9736 = vmatprep.mubr.bf16.mxu1 %v22872_v26  ;;  %v16862_v41 = vcombine.low %v6256_v56, %v6264_v54 }
 0xf07   : > { %9709 = vmatpush1.bf16.msra.mxu1 %v16782_v42  ;;  %9838 = vmatprep.mubr.bf16.mxu0 %v22872_v26  ;;  %v16863_v42 = vcombine.high %v6256_v56, %v6264_v54  ;;  %v6321_v56 = vld [vmem:[%s21592_s19 + $0x5a8] sm:$0xff] }
 0xf08   : > { %9811 = vmatpush1.bf16.msra.mxu0 %v16784_v23  ;;  %9710 = vmatprep.subr.bf16.mxu1 %v16799_v9  ;;  %v16865_v23 = vcombine.high %v6257_v16, %v6265_v18  ;;  %v6272_v9 = vld [vmem:[%s21592_s19 + $0x420] sm:$0xff]  ;;  %v6329_v54 = vld [vmem:[%s21592_s19 + $0x5e8] sm:$0xff]  ;;  %v16912_v18 = vcombine.low %v6305_v60, %v6313_v48 }
 0xf09   : > { %9812 = vmatprep.subr.bf16.mxu0 %v16801_v44  ;;  %v6280_v44 = vld [vmem:[%s21592_s19 + $0x460] sm:$0xff] }
 0xf0a   : > { %v16878_v52 = vcombine.low %v6272_v9, %v6280_v44 }
 0xf0b   : > { %9711 = vmatpush1.bf16.msra.mxu1 %v16798_v45  ;;  %v16879_v45 = vcombine.high %v6272_v9, %v6280_v44  ;;  %v6337_v9 = vld [vmem:[%s21592_s19 + $0x628] sm:$0xff] }
 0xf0c   : > { %9813 = vmatpush1.bf16.msra.mxu0 %v16800_v61  ;;  %9712 = vmatprep.subr.bf16.mxu1 %v16815_v15  ;;  %v16881_v61 = vcombine.high %v6273_v6, %v6281_v25  ;;  %v6288_v15 = vld [vmem:[%s21592_s19 + $0x4a0] sm:$0xff]  ;;  %v6345_v44 = vld [vmem:[%s21592_s19 + $0x668] sm:$0xff]  ;;  %v16928_v25 = vcombine.low %v6321_v56, %v6329_v54 }
 0xf0d   : > { %9814 = vmatprep.subr.bf16.mxu0 %v16817_v51  ;;  %v6296_v51 = vld [vmem:[%s21592_s19 + $0x4e0] sm:$0xff] }
 0xf0e   : > { %v16894_v13 = vcombine.low %v6288_v15, %v6296_v51 }
 0xf0f   : > { %9713 = vmatpush1.bf16.msra.mxu1 %v16814_v32  ;;  %v16895_v32 = vcombine.high %v6288_v15, %v6296_v51  ;;  %v6353_v15 = vld [vmem:[%s21592_s19 + $0x6a8] sm:$0xff] }
 0xf10   : > { %9815 = vmatpush1.bf16.msra.mxu0 %v16816_v46  ;;  %9714 = vmatprep.subr.bf16.mxu1 %v16831_v12  ;;  %v16897_v46 = vcombine.high %v6289_v2, %v6297_v0  ;;  %v6304_v12 = vld [vmem:[%s21592_s19 + $0x520] sm:$0xff]  ;;  %v6361_v51 = vld [vmem:[%s21592_s19 + $0x6e8] sm:$0xff]  ;;  %v16944_v0 = vcombine.low %v6337_v9, %v6345_v44 }
 0xf11   : > { %9816 = vmatprep.subr.bf16.mxu0 %v16833_v14  ;;  %v6312_v14 = vld [vmem:[%s21592_s19 + $0x560] sm:$0xff] }
 0xf12   : > { %v16910_v16 = vcombine.low %v6304_v12, %v6312_v14 }
 0xf13   : > { %9715 = vmatpush1.bf16.msra.mxu1 %v16830_v50  ;;  %v16911_v50 = vcombine.high %v6304_v12, %v6312_v14  ;;  %v6369_v12 = vld [vmem:[%s21592_s19 + $0x728] sm:$0xff] }
 0xf14   : > { %9817 = vmatpush1.bf16.msra.mxu0 %v16832_v31  ;;  %9716 = vmatprep.subr.bf16.mxu1 %v16847_v49  ;;  %v16913_v31 = vcombine.high %v6305_v60, %v6313_v48  ;;  %v6320_v49 = vld [vmem:[%s21592_s19 + $0x5a0] sm:$0xff]  ;;  %v6377_v14 = vld [vmem:[%s21592_s19 + $0x768] sm:$0xff]  ;;  %v16960_v48 = vcombine.low %v6353_v15, %v6361_v51 }
 0xf15   : > { %9818 = vmatprep.subr.bf16.mxu0 %v16849_v21  ;;  %v6328_v21 = vld [vmem:[%s21592_s19 + $0x5e0] sm:$0xff] }
 0xf16   : > { %v16926_v6 = vcombine.low %v6320_v49, %v6328_v21 }
 0xf17   : > { %9717 = vmatpush1.bf16.msra.mxu1 %v16846_v30  ;;  %v16927_v30 = vcombine.high %v6320_v49, %v6328_v21  ;;  %v6385_v49 = vld [vmem:[%s21592_s19 + $0x7a8] sm:$0xff] }
 0xf18   : > { %9819 = vmatpush1.bf16.msra.mxu0 %v16848_v1  ;;  %9718 = vmatprep.subr.bf16.mxu1 %v16863_v42  ;;  %v16929_v1 = vcombine.high %v6321_v56, %v6329_v54  ;;  %v6336_v42 = vld [vmem:[%s21592_s19 + $0x620] sm:$0xff]  ;;  %v6393_v21 = vld [vmem:[%s21592_s19 + $0x7e8] sm:$0xff]  ;;  %v16976_v54 = vcombine.low %v6369_v12, %v6377_v14 }
 0xf19   : > { %9820 = vmatprep.subr.bf16.mxu0 %v16865_v23  ;;  %v6344_v23 = vld [vmem:[%s21592_s19 + $0x660] sm:$0xff] }
 0xf1a   : > { %v16942_v2 = vcombine.low %v6336_v42, %v6344_v23 }
 0xf1b   : > { %9719 = vmatpush1.bf16.msra.mxu1 %v16862_v41  ;;  %v16943_v41 = vcombine.high %v6336_v42, %v6344_v23  ;;  %v6401_v42 = vld [vmem:[%s21592_s19 + $0x828] sm:$0xff] }
 0xf1c   : > { %9821 = vmatpush1.bf16.msra.mxu0 %v16864_v59  ;;  %9720 = vmatprep.subr.bf16.mxu1 %v16879_v45  ;;  %v16945_v59 = vcombine.high %v6337_v9, %v6345_v44  ;;  %v6352_v45 = vld [vmem:[%s21592_s19 + $0x6a0] sm:$0xff]  ;;  %v6409_v23 = vld [vmem:[%s21592_s19 + $0x868] sm:$0xff]  ;;  %v16992_v44 = vcombine.low %v6385_v49, %v6393_v21 }
 0xf1d   : > { %9822 = vmatprep.subr.bf16.mxu0 %v16881_v61  ;;  %v6360_v61 = vld [vmem:[%s21592_s19 + $0x6e0] sm:$0xff] }
 0xf1e   : > { %v16958_v60 = vcombine.low %v6352_v45, %v6360_v61 }
 0xf1f   : > { %9721 = vmatpush1.bf16.msra.mxu1 %v16878_v52  ;;  %v16959_v52 = vcombine.high %v6352_v45, %v6360_v61  ;;  %v6417_v45 = vld [vmem:[%s21592_s19 + $0x8a8] sm:$0xff] }
 0xf20   : > { %9823 = vmatpush1.bf16.msra.mxu0 %v16880_v27  ;;  %9722 = vmatprep.subr.bf16.mxu1 %v16895_v32  ;;  %v16961_v27 = vcombine.high %v6353_v15, %v6361_v51  ;;  %v6368_v32 = vld [vmem:[%s21592_s19 + $0x720] sm:$0xff]  ;;  %v6425_v61 = vld [vmem:[%s21592_s19 + $0x8e8] sm:$0xff]  ;;  %v17008_v51 = vcombine.low %v6401_v42, %v6409_v23 }
 0xf21   : > { %9824 = vmatprep.subr.bf16.mxu0 %v16897_v46  ;;  %v6376_v46 = vld [vmem:[%s21592_s19 + $0x760] sm:$0xff] }
 0xf22   : > { %v16974_v56 = vcombine.low %v6368_v32, %v6376_v46 }
 0xf23   : > { %9723 = vmatpush1.bf16.msra.mxu1 %v16894_v13  ;;  %v16975_v13 = vcombine.high %v6368_v32, %v6376_v46  ;;  %v6433_v32 = vld [vmem:[%s21592_s19 + $0x928] sm:$0xff] }
 0xf24   : > { %9825 = vmatpush1.bf16.msra.mxu0 %v16896_v7  ;;  %9724 = vmatprep.subr.bf16.mxu1 %v16911_v50  ;;  %v16977_v7 = vcombine.high %v6369_v12, %v6377_v14  ;;  %v6384_v50 = vld [vmem:[%s21592_s19 + $0x7a0] sm:$0xff]  ;;  %v6441_v46 = vld [vmem:[%s21592_s19 + $0x968] sm:$0xff]  ;;  %v17024_v14 = vcombine.low %v6417_v45, %v6425_v61 }
 0xf25   : > { %9826 = vmatprep.subr.bf16.mxu0 %v16913_v31  ;;  %v6392_v31 = vld [vmem:[%s21592_s19 + $0x7e0] sm:$0xff] }
 0xf26   : > { %v16990_v9 = vcombine.low %v6384_v50, %v6392_v31 }
 0xf27   : > { %9725 = vmatpush1.bf16.msra.mxu1 %v16910_v16  ;;  %v16991_v16 = vcombine.high %v6384_v50, %v6392_v31  ;;  %v6449_v50 = vld [vmem:[%s21592_s19 + $0x9a8] sm:$0xff] }
 0xf28   : > { %9827 = vmatpush1.bf16.msra.mxu0 %v16912_v18  ;;  %9726 = vmatprep.subr.bf16.mxu1 %v16927_v30  ;;  %v16993_v18 = vcombine.high %v6385_v49, %v6393_v21  ;;  %v6400_v30 = vld [vmem:[%s21592_s19 + $0x820] sm:$0xff]  ;;  %v6457_v31 = vld [vmem:[%s21592_s19 + $0x9e8] sm:$0xff]  ;;  %v17040_v21 = vcombine.low %v6433_v32, %v6441_v46 }
 0xf29   : > { %9828 = vmatprep.subr.bf16.mxu0 %v16929_v1  ;;  %v6408_v1 = vld [vmem:[%s21592_s19 + $0x860] sm:$0xff] }
 0xf2a   : > { %v17006_v15 = vcombine.low %v6400_v30, %v6408_v1 }
 0xf2b   : > { %9727 = vmatpush1.bf16.msra.mxu1 %v16926_v6  ;;  %v17007_v6 = vcombine.high %v6400_v30, %v6408_v1  ;;  %v6465_v30 = vld [vmem:[%s21592_s19 + $0xa28] sm:$0xff] }
 0xf2c   : > { %9829 = vmatpush1.bf16.msra.mxu0 %v16928_v25  ;;  %9728 = vmatprep.subr.bf16.mxu1 %v16943_v41  ;;  %v17009_v25 = vcombine.high %v6401_v42, %v6409_v23  ;;  %v6416_v41 = vld [vmem:[%s21592_s19 + $0x8a0] sm:$0xff]  ;;  %v6473_v1 = vld [vmem:[%s21592_s19 + $0xa68] sm:$0xff]  ;;  %v17056_v23 = vcombine.low %v6449_v50, %v6457_v31 }
 0xf2d   : > { %9830 = vmatprep.subr.bf16.mxu0 %v16945_v59  ;;  %v6424_v59 = vld [vmem:[%s21592_s19 + $0x8e0] sm:$0xff] }
 0xf2e   : > { %v17022_v12 = vcombine.low %v6416_v41, %v6424_v59 }
 0xf2f   : > { %9729 = vmatpush1.bf16.msra.mxu1 %v16942_v2  ;;  %v17023_v2 = vcombine.high %v6416_v41, %v6424_v59  ;;  %v6488_v41 = vld [vmem:[%s21592_s19 + $0xae0] sm:$0xff]  ;;  %v6481_v59 = vld [vmem:[%s21592_s19 + $0xaa8] sm:$0xff] }
 0xf30   : > { %9831 = vmatpush1.bf16.msra.mxu0 %v16944_v0  ;;  %9730 = vmatprep.subr.bf16.mxu1 %v16959_v52  ;;  %v17025_v0 = vcombine.high %v6417_v45, %v6425_v61  ;;  %v6432_v52 = vld [vmem:[%s21592_s19 + $0x920] sm:$0xff]  ;;  %v6489_v45 = vld [vmem:[%s21592_s19 + $0xae8] sm:$0xff] }
 0xf31   : > { %9832 = vmatprep.subr.bf16.mxu0 %v16961_v27  ;;  %v6440_v27 = vld [vmem:[%s21592_s19 + $0x960] sm:$0xff] }
 0xf32   : > { %v17038_v49 = vcombine.low %v6432_v52, %v6440_v27 }
 0xf33   : > { %9731 = vmatpush1.bf16.msra.mxu1 %v16958_v60  ;;  %v17039_v60 = vcombine.high %v6432_v52, %v6440_v27 }
 0xf34   : > { %9833 = vmatpush1.bf16.msra.mxu0 %v16960_v48  ;;  %9732 = vmatprep.subr.bf16.mxu1 %v16975_v13  ;;  %v17041_v48 = vcombine.high %v6433_v32, %v6441_v46  ;;  %v6448_v13 = vld [vmem:[%s21592_s19 + $0x9a0] sm:$0xff]  ;;  %v17089_v32 = vcombine.high %v6481_v59, %v6489_v45 }
 0xf35   : > { %9834 = vmatprep.subr.bf16.mxu0 %v16977_v7  ;;  %v6456_v7 = vld [vmem:[%s21592_s19 + $0x9e0] sm:$0xff] }
 0xf36   : > { %v17054_v42 = vcombine.low %v6448_v13, %v6456_v7  ;;  %v6496_v46 = vld [vmem:[%s21592_s19 + $0xb20] sm:$0xff] }
 0xf37   : > { %9733 = vmatpush1.bf16.msra.mxu1 %v16974_v56  ;;  %v17055_v56 = vcombine.high %v6448_v13, %v6456_v7  ;;  %v6505_v13 = vld [vmem:[%s21592_s19 + $0xb68] sm:$0xff] }
 0xf38   : > { %9835 = vmatpush1.bf16.msra.mxu0 %v16976_v54  ;;  %9734 = vmatprep.subr.bf16.mxu1 %v16991_v16  ;;  %v17057_v54 = vcombine.high %v6449_v50, %v6457_v31  ;;  %v6464_v16 = vld [vmem:[%s21592_s19 + $0xa20] sm:$0xff] }
 0xf39   : > { %9836 = vmatprep.subr.bf16.mxu0 %v16993_v18  ;;  %v6472_v18 = vld [vmem:[%s21592_s19 + $0xa60] sm:$0xff] }
 0xf3a   : > { %v17070_v61 = vcombine.low %v6464_v16, %v6472_v18 }
 0xf3b   : > { %9735 = vmatpush1.bf16.msra.mxu1 %v16990_v9  ;;  %v17071_v9 = vcombine.high %v6464_v16, %v6472_v18  ;;  %v6520_v16 = vld [vmem:[%s21592_s19 + $0xbe0] sm:$0xff] }
 0xf3c   : > { %9837 = vmatpush1.bf16.msra.mxu0 %v16992_v44  ;;  %9755 = vmatprep.subr.bf16.mxu1 %v17007_v6  ;;  %v23249_v44 = vld [vmem:[%s21595_s2] sm:$0xff]  ;;  %v17073_v6 = vcombine.high %v6465_v30, %v6473_v1 }
 0xf3d   : > { %9857 = vmatprep.subr.bf16.mxu0 %v17009_v25  ;;  %v6480_v25 = vld [vmem:[%s21592_s19 + $0xaa0] sm:$0xff]  ;;  %v23269_v52 = vrot.slane %v23249_v44, %v22285_v20 }
 0xf3e   : > { %9737 = vmatmul.mubr.bf16.vlgmr.msra.gmra.mrb[68].mxu1 %v22876_v62  ;;  %v17087_v27 = vcombine.high %v6480_v25, %v6488_v41 }
 0xf3f   : > { %9839 = vmatmul.mubr.bf16.vlgmr.msra.gmra.mrb[68].mxu0 %v22876_v62  ;;  %9746 = vmatprep.mubr.bf16.mxu1 %v22912_v58 }
 0xf40   : > { %9756 = vmatpush1.bf16.msra.mxu1 %v17006_v15  ;;  %9848 = vmatprep.mubr.bf16.mxu0 %v22912_v58  ;;  %v17072_v15 = vcombine.low %v6465_v30, %v6473_v1 }
 0xf41   : > { %9858 = vmatpush1.bf16.msra.mxu0 %v17008_v51  ;;  %9757 = vmatprep.subr.bf16.mxu1 %v17023_v2  ;;  %v23257_v51 = vrot.slane %v23249_v44, %v22115_v33  ;;  %v23261_v2 = vrot.slane %v23249_v44, %v22282_v40 }
 0xf42   : > { %9859 = vmatprep.subr.bf16.mxu0 %v17025_v0  ;;  %v23265_v0 = vrot.slane %v23249_v44, %v22118_v34 }
 0xf44   : > { %9758 = vmatpush1.bf16.msra.mxu1 %v17022_v12  ;;  %v6504_v12 = vld [vmem:[%s21592_s19 + $0xb60] sm:$0xff] }
 0xf45   : > { %9860 = vmatpush1.bf16.msra.mxu0 %v17024_v14  ;;  %9759 = vmatprep.subr.bf16.mxu1 %v17039_v60 }
 0xf46   : > { %9747 = vmatmul.mubr.bf16.gmra.mrb[72].mxu1 %v22925_v10  ;;  %9861 = vmatprep.subr.bf16.mxu0 %v17041_v48  ;;  %v6497_v48 = vld [vmem:[%s21592_s19 + $0xb28] sm:$0xff] }
 0xf47   : > { %9849 = vmatmul.mubr.bf16.gmra.mrb[72].mxu0 %v22925_v10  ;;  %9787 = vmatprep.mubr.bf16.mxu1 %v22938_v17 }
 0xf48   : > { %9760 = vmatpush1.bf16.msra.mxu1 %v17038_v49  ;;  %9889 = vmatprep.mubr.bf16.mxu0 %v22938_v17 }
 0xf49   : > { %9862 = vmatpush1.bf16.msra.mxu0 %v17040_v21  ;;  %9761 = vmatprep.subr.bf16.mxu1 %v17055_v56  ;;  %v17086_v21 = vcombine.low %v6480_v25, %v6488_v41  ;;  %v17088_v56 = vcombine.low %v6481_v59, %v6489_v45  ;;  %v17102_v59 = vcombine.low %v6496_v46, %v6504_v12 }
 0xf4a   : > { %9863 = vmatprep.subr.bf16.mxu0 %v17057_v54  ;;  %v23278_v54 = vld [vmem:[%s21592_s19 + $0xba0] sm:$0xff]  ;;  %v17105_v45 = vcombine.high %v6497_v48, %v6505_v13 }
 0xf4c   : > { %9762 = vmatpush1.bf16.msra.mxu1 %v17054_v42 }
 0xf4d   : > { %9864 = vmatpush1.bf16.msra.mxu0 %v17056_v23  ;;  %9763 = vmatprep.subr.bf16.mxu1 %v17071_v9  ;;  %v17103_v23 = vcombine.high %v6496_v46, %v6504_v12 }
 0xf4e   : > { %9865 = vmatprep.subr.bf16.mxu0 %v17073_v6 }
 0xf4f   : > { %v9381_v14 = vpop.f32.mrb[52].mxu1  ;;  %v9483_v60 = vpop.f32.mrb[52].mxu0 }
 0xf50   : > { %9764 = vmatpush1.bf16.msra.mxu1 %v17070_v61  ;;  %v18111_v7 = vadd.f32 %v9381_v14, %v23257_v51  ;;  %v18117_v50 = vadd.f32 %v9483_v60, %v23261_v2  ;;  %v9383_v31 = vpop.f32.mrb[53].mxu1  ;;  %v9485_v49 = vpop.f32.mrb[53].mxu0  ;;  %v17104_v14 = vcombine.low %v6497_v48, %v6505_v13  ;;  %v6513_v60 = vld [vmem:[%s21592_s19 + $0xba8] sm:$0xff] }
 0xf51   : > { %9866 = vmatpush1.bf16.msra.mxu0 %v17072_v15  ;;  %v18112_v18 = vadd.f32 %v9383_v31, %v23265_v0  ;;  %v18118_v30 = vadd.f32 %v9485_v49, %v23269_v52  ;;  %9765 = vmatprep.subr.bf16.mxu1 %v17087_v27  ;;  %v9385_v1 = vpop.f32.mrb[54].mxu1  ;;  %v9487_v42 = vpop.f32.mrb[54].mxu0  ;;  %v17119_v27 = vcombine.high %v23278_v54, %v6520_v16  ;;  %v6521_v31 = vld [vmem:[%s21592_s19 + $0xbe8] sm:$0xff] }
 0xf52   : > { %9867 = vmatprep.subr.bf16.mxu0 %v17089_v32  ;;  %v18113_v9 = vadd.f32 %v9385_v1, %v23257_v51  ;;  %v18119_v6 = vadd.f32 %v9487_v42, %v23261_v2  ;;  %v9387_v25 = vpop.f32.mrb[55].mxu1  ;;  %v9489_v41 = vpop.f32.mrb[55].mxu0  ;;  %v10112_v49 = vmax.f32 %v18111_v7, 0.0  ;;  %v10114_v32 = vmax.f32 %v18117_v50, 0.0  ;;  %v6528_v7 = vld [vmem:[%s21592_s19 + $0xc20] sm:$0xff] }
 0xf53   : > { %v18114_v61 = vadd.f32 %v9387_v25, %v23265_v0  ;;  %v18120_v15 = vadd.f32 %v9489_v41, %v23269_v52  ;;  %v10113_v42 = vmax.f32 %v18112_v18, 0.0  ;;  %v10115_v46 = vmax.f32 %v18118_v30, 0.0  ;;  %v6537_v30 = vld [vmem:[%s21592_s19 + $0xc68] sm:$0xff] }
 0xf54   : > { %v10128_v1 = vmax.f32 %v18113_v9, 0.0  ;;  %v10130_v22 = vmax.f32 %v18119_v6, 0.0  ;;  %9766 = vmatpush1.bf16.msra.mxu1 %v17086_v21  ;;  %v17121_v41 = vcombine.high %v6513_v60, %v6521_v31  ;;  %v17118_v6 = vcombine.low %v23278_v54, %v6520_v16 }
 0xf55   : > { %9868 = vmatpush1.bf16.msra.mxu0 %v17088_v56  ;;  %v10129_v12 = vmax.f32 %v18114_v61, 0.0  ;;  %v10131_v25 = vmax.f32 %v18120_v15, 0.0  ;;  %9767 = vmatprep.subr.bf16.mxu1 %v17103_v23  ;;  %v6529_v56 = vld [vmem:[%s21592_s19 + $0xc28] sm:$0xff]  ;;  %v17134_v54 = vcombine.low %v6528_v7, %v6536_v28 }
 0xf56   : > { %v23290_v48 = vpack.c.bf16 %v10128_v1, %v10112_v49  ;;  %v23292_v13 = vpack.c.bf16 %v10130_v22, %v10114_v32  ;;  %9869 = vmatprep.subr.bf16.mxu0 %v17105_v45  ;;  %v17120_v45 = vcombine.low %v6513_v60, %v6521_v31  ;;  %v17135_v49 = vcombine.high %v6528_v7, %v6536_v28  ;;  %v6560_v60 = vld [vmem:[%s21592_s19 + $0xd20] sm:$0xff] }
 0xf57   : > { %v23296_v50 = vpack.c.bf16 %v10129_v12, %v10113_v42  ;;  %v23298_v9 = vpack.c.bf16 %v10131_v25, %v10115_v46  ;;  %v23300_v21 = vpop.f32.mrb[56].mxu1  ;;  %v23302_v18 = vpop.f32.mrb[56].mxu0  ;;  %v6544_v42 = vld [vmem:[%s21592_s19 + $0xca0] sm:$0xff]  ;;  %v6545_v12 = vld [vmem:[%s21592_s19 + $0xca8] sm:$0xff]  ;;  %v17136_v16 = vcombine.low %v6529_v56, %v6537_v30 }
 0xf58   : > { %9768 = vmatpush1.bf16.msra.mxu1 %v17102_v59  ;;  %v23306_v22 = vpop.f32.mrb[57].mxu1  ;;  %v23308_v23 = vpop.f32.mrb[57].mxu0  ;;  %v17137_v59 = vcombine.high %v6529_v56, %v6537_v30  ;;  %v6552_v46 = vld [vmem:[%s21592_s19 + $0xce0] sm:$0xff]  ;;  %v6553_v25 = vld [vmem:[%s21592_s19 + $0xce8] sm:$0xff] }
 0xf59   : > { %9870 = vmatpush1.bf16.msra.mxu0 %v17104_v14  ;;  %9769 = vmatprep.subr.bf16.mxu1 %v17119_v27  ;;  %v9395_v61 = vpop.f32.mrb[58].mxu1  ;;  %v9497_v15 = vpop.f32.mrb[58].mxu0  ;;  %v17151_v14 = vcombine.high %v6544_v42, %v6552_v46  ;;  %v17153_v27 = vcombine.high %v6545_v12, %v6553_v25  ;;  %v6568_v31 = vld [vmem:[%s21592_s19 + $0xd60] sm:$0xff] }
 0xf5a   : > { %9871 = vmatprep.subr.bf16.mxu0 %v17121_v41  ;;  %v9396_v32 = vpop.f32.mrb[59].mxu1  ;;  %v9498_v1 = vpop.f32.mrb[59].mxu0  ;;  %v6561_v41 = vld [vmem:[%s21592_s19 + $0xd28] sm:$0xff]  ;;  %v17150_v15 = vcombine.low %v6544_v42, %v6552_v46  ;;  %v17167_v28 = vcombine.high %v6560_v60, %v6568_v31  ;;  %v6576_v56 = vld [vmem:[%s21592_s19 + $0xda0] sm:$0xff] }
 0xf5b   : > { %v6569_v61 = vld [vmem:[%s21592_s19 + $0xd68] sm:$0xff]  ;;  %v6584_v30 = vld [vmem:[%s21592_s19 + $0xde0] sm:$0xff]  ;;  %v17166_v32 = vcombine.low %v6560_v60, %v6568_v31 }
 0xf5c   : > { %9770 = vmatpush1.bf16.msra.mxu1 %v17118_v6  ;;  %v17152_v6 = vcombine.low %v6545_v12, %v6553_v25  ;;  %v17169_v7 = vcombine.high %v6561_v41, %v6569_v61  ;;  %v17168_v1 = vcombine.low %v6561_v41, %v6569_v61  ;;  %v6592_v46 = vld [vmem:[%s21592_s19 + $0xe20] sm:$0xff]  ;;  %v6593_v25 = vld [vmem:[%s21592_s19 + $0xe28] sm:$0xff] }
 0xf5d   : > { %9872 = vmatpush1.bf16.msra.mxu0 %v17120_v45  ;;  %9771 = vmatprep.subr.bf16.mxu1 %v17135_v49  ;;  %v6577_v45 = vld [vmem:[%s21592_s19 + $0xda8] sm:$0xff]  ;;  %v6600_v12 = vld [vmem:[%s21592_s19 + $0xe60] sm:$0xff] }
 0xf5e   : > { %9873 = vmatprep.subr.bf16.mxu0 %v17137_v59  ;;  %v6585_v49 = vld [vmem:[%s21592_s19 + $0xde8] sm:$0xff]  ;;  %v17183_v59 = vcombine.high %v6576_v56, %v6584_v30  ;;  %v6608_v31 = vld [vmem:[%s21592_s19 + $0xea0] sm:$0xff] }
 0xf5f   : > { %v17185_v42 = vcombine.high %v6577_v45, %v6585_v49  ;;  %v6616_v41 = vld [vmem:[%s21592_s19 + $0xee0] sm:$0xff]  ;;  %v6609_v61 = vld [vmem:[%s21592_s19 + $0xea8] sm:$0xff] }
 0xf60   : > { %9772 = vmatpush1.bf16.msra.mxu1 %v17134_v54  ;;  %v6601_v54 = vld [vmem:[%s21592_s19 + $0xe68] sm:$0xff] }
 0xf61   : > { %9874 = vmatpush1.bf16.msra.mxu0 %v17136_v16  ;;  %9773 = vmatprep.subr.bf16.mxu1 %v17151_v14  ;;  %v17182_v16 = vcombine.low %v6576_v56, %v6584_v30  ;;  %v17184_v14 = vcombine.low %v6577_v45, %v6585_v49  ;;  %v17201_v60 = vcombine.high %v6593_v25, %v6601_v54  ;;  %v6624_v30 = vld [vmem:[%s21592_s19 + $0xf20] sm:$0xff]  ;;  %v6625_v49 = vld [vmem:[%s21592_s19 + $0xf28] sm:$0xff] }
 0xf62   : > { %9875 = vmatprep.subr.bf16.mxu0 %v17153_v27  ;;  %v17199_v27 = vcombine.high %v6592_v46, %v6600_v12  ;;  %v6632_v45 = vld [vmem:[%s21592_s19 + $0xf60] sm:$0xff] }
 0xf64   : > { %9774 = vmatpush1.bf16.msra.mxu1 %v17150_v15  ;;  %v6617_v15 = vld [vmem:[%s21592_s19 + $0xee8] sm:$0xff] }
 0xf65   : > { %9876 = vmatpush1.bf16.msra.mxu0 %v17152_v6  ;;  %9775 = vmatprep.subr.bf16.mxu1 %v17167_v28  ;;  %v17198_v6 = vcombine.low %v6592_v46, %v6600_v12  ;;  %v17200_v28 = vcombine.low %v6593_v25, %v6601_v54  ;;  %v17217_v56 = vcombine.high %v6609_v61, %v6617_v15  ;;  %v6640_v12 = vld [vmem:[%s21592_s19 + $0xfa0] sm:$0xff]  ;;  %v6641_v54 = vld [vmem:[%s21592_s19 + $0xfa8] sm:$0xff] }
 0xf66   : > { %9877 = vmatprep.subr.bf16.mxu0 %v17169_v7  ;;  %v17215_v7 = vcombine.high %v6608_v31, %v6616_v41  ;;  %v6648_v25 = vld [vmem:[%s21592_s19 + $0xfe0] sm:$0xff] }
 0xf68   : > { %9776 = vmatpush1.bf16.msra.mxu1 %v17166_v32  ;;  %v6633_v32 = vld [vmem:[%s21592_s19 + $0xf68] sm:$0xff] }
 0xf69   : > { %9878 = vmatpush1.bf16.msra.mxu0 %v17168_v1  ;;  %9777 = vmatprep.subr.bf16.mxu1 %v17183_v59  ;;  %v17214_v1 = vcombine.low %v6608_v31, %v6616_v41  ;;  %v17216_v59 = vcombine.low %v6609_v61, %v6617_v15  ;;  %v17233_v46 = vcombine.high %v6625_v49, %v6633_v32  ;;  %v6146_v41 = vld [vmem:[%s21592_s19 + $0x30] sm:$0xff]  ;;  %v6147_v15 = vld [vmem:[%s21592_s19 + $0x38] sm:$0xff] }
 0xf6a   : > { %9879 = vmatprep.subr.bf16.mxu0 %v17185_v42  ;;  %v17231_v42 = vcombine.high %v6624_v30, %v6632_v45  ;;  %v6154_v61 = vld [vmem:[%s21592_s19 + $0x70] sm:$0xff] }
 0xf6c   : > { %9778 = vmatpush1.bf16.msra.mxu1 %v17182_v16  ;;  %v6649_v16 = vld [vmem:[%s21592_s19 + $0xfe8] sm:$0xff] }
 0xf6d   : > { %9880 = vmatpush1.bf16.msra.mxu0 %v17184_v14  ;;  %9779 = vmatprep.subr.bf16.mxu1 %v17199_v27  ;;  %v17230_v14 = vcombine.low %v6624_v30, %v6632_v45  ;;  %v17232_v27 = vcombine.low %v6625_v49, %v6633_v32  ;;  %v17249_v31 = vcombine.high %v6641_v54, %v6649_v16  ;;  %v6162_v45 = vld [vmem:[%s21592_s19 + $0xb0] sm:$0xff]  ;;  %v6163_v32 = vld [vmem:[%s21592_s19 + $0xb8] sm:$0xff] }
 0xf6e   : > { %9881 = vmatprep.subr.bf16.mxu0 %v17201_v60  ;;  %v17247_v60 = vcombine.high %v6640_v12, %v6648_v25  ;;  %v6170_v49 = vld [vmem:[%s21592_s19 + $0xf0] sm:$0xff] }
 0xf70   : > { %9780 = vmatpush1.bf16.msra.mxu1 %v17198_v6  ;;  %v6155_v6 = vld [vmem:[%s21592_s19 + $0x78] sm:$0xff] }
 0xf71   : > { %9882 = vmatpush1.bf16.msra.mxu0 %v17200_v28  ;;  %9781 = vmatprep.subr.bf16.mxu1 %v17215_v7  ;;  %v17246_v28 = vcombine.low %v6640_v12, %v6648_v25  ;;  %v17248_v7 = vcombine.low %v6641_v54, %v6649_v16  ;;  %v16757_v30 = vcombine.high %v6147_v15, %v6155_v6  ;;  %v6178_v25 = vld [vmem:[%s21592_s19 + $0x130] sm:$0xff]  ;;  %v6179_v16 = vld [vmem:[%s21592_s19 + $0x138] sm:$0xff] }
 0xf72   : > { %9883 = vmatprep.subr.bf16.mxu0 %v17217_v56  ;;  %v16755_v56 = vcombine.high %v6146_v41, %v6154_v61  ;;  %v6186_v54 = vld [vmem:[%s21592_s19 + $0x170] sm:$0xff] }
 0xf74   : > { %9782 = vmatpush1.bf16.msra.mxu1 %v17214_v1  ;;  %v6171_v1 = vld [vmem:[%s21592_s19 + $0xf8] sm:$0xff] }
 0xf75   : > { %9884 = vmatpush1.bf16.msra.mxu0 %v17216_v59  ;;  %9783 = vmatprep.subr.bf16.mxu1 %v17231_v42  ;;  %v16754_v59 = vcombine.low %v6146_v41, %v6154_v61  ;;  %v16756_v42 = vcombine.low %v6147_v15, %v6155_v6  ;;  %v16773_v12 = vcombine.high %v6163_v32, %v6171_v1  ;;  %v6194_v61 = vld [vmem:[%s21592_s19 + $0x1b0] sm:$0xff]  ;;  %v6195_v6 = vld [vmem:[%s21592_s19 + $0x1b8] sm:$0xff] }
 0xf76   : > { %9885 = vmatprep.subr.bf16.mxu0 %v17233_v46  ;;  %v16771_v46 = vcombine.high %v6162_v45, %v6170_v49  ;;  %v6202_v15 = vld [vmem:[%s21592_s19 + $0x1f0] sm:$0xff] }
 0xf78   : > { %9784 = vmatpush1.bf16.msra.mxu1 %v17230_v14  ;;  %v6187_v14 = vld [vmem:[%s21592_s19 + $0x178] sm:$0xff] }
 0xf79   : > { %9886 = vmatpush1.bf16.msra.mxu0 %v17232_v27  ;;  %9785 = vmatprep.subr.bf16.mxu1 %v17247_v60  ;;  %v16770_v27 = vcombine.low %v6162_v45, %v6170_v49  ;;  %v16772_v60 = vcombine.low %v6163_v32, %v6171_v1  ;;  %v16789_v41 = vcombine.high %v6179_v16, %v6187_v14  ;;  %v6210_v49 = vld [vmem:[%s21592_s19 + $0x230] sm:$0xff]  ;;  %v6211_v1 = vld [vmem:[%s21592_s19 + $0x238] sm:$0xff] }
 0xf7a   : > { %9887 = vmatprep.subr.bf16.mxu0 %v17249_v31  ;;  %v16787_v31 = vcombine.high %v6178_v25, %v6186_v54  ;;  %v6218_v32 = vld [vmem:[%s21592_s19 + $0x270] sm:$0xff] }
 0xf7c   : > { %9786 = vmatpush1.bf16.msra.mxu1 %v17246_v28  ;;  %v6203_v28 = vld [vmem:[%s21592_s19 + $0x1f8] sm:$0xff] }
 0xf7d   : > { %9888 = vmatpush1.bf16.msra.mxu0 %v17248_v7  ;;  %9908 = vmatprep.subr.bf16.mxu1 %v16755_v56  ;;  %v16786_v7 = vcombine.low %v6178_v25, %v6186_v54  ;;  %v16788_v56 = vcombine.low %v6179_v16, %v6187_v14  ;;  %v16805_v45 = vcombine.high %v6195_v6, %v6203_v28  ;;  %v6226_v54 = vld [vmem:[%s21592_s19 + $0x2b0] sm:$0xff]  ;;  %v6227_v14 = vld [vmem:[%s21592_s19 + $0x2b8] sm:$0xff] }
 0xf7e   : > { %10010 = vmatprep.subr.bf16.mxu0 %v16757_v30  ;;  %v16803_v30 = vcombine.high %v6194_v61, %v6202_v15  ;;  %v6234_v16 = vld [vmem:[%s21592_s19 + $0x2f0] sm:$0xff] }
 0xf7f   : > { %9788 = vmatmul.mubr.bf16.vlgmr.msra.gmra.mrb[68].mxu1 %v23002_v8 }
 0xf80   : > { %9890 = vmatmul.mubr.bf16.vlgmr.msra.gmra.mrb[68].mxu0 %v23002_v8  ;;  %9797 = vmatprep.mubr.bf16.mxu1 %v23006_v57 }
 0xf81   : > { %9899 = vmatprep.mubr.bf16.mxu0 %v23006_v57  ;;  %9909 = vmatpush1.bf16.msra.mxu1 %v16754_v59  ;;  %v6219_v59 = vld [vmem:[%s21592_s19 + $0x278] sm:$0xff] }
 0xf82   : > { %10011 = vmatpush1.bf16.msra.mxu0 %v16756_v42  ;;  %9910 = vmatprep.subr.bf16.mxu1 %v16771_v46  ;;  %v16802_v42 = vcombine.low %v6194_v61, %v6202_v15  ;;  %v16804_v46 = vcombine.low %v6195_v6, %v6203_v28  ;;  %v16821_v25 = vcombine.high %v6211_v1, %v6219_v59  ;;  %v6242_v61 = vld [vmem:[%s21592_s19 + $0x330] sm:$0xff]  ;;  %v6243_v6 = vld [vmem:[%s21592_s19 + $0x338] sm:$0xff] }
 0xf83   : > { %10012 = vmatprep.subr.bf16.mxu0 %v16773_v12  ;;  %v16819_v12 = vcombine.high %v6210_v49, %v6218_v32  ;;  %v6250_v15 = vld [vmem:[%s21592_s19 + $0x370] sm:$0xff]  ;;  %v6251_v28 = vld [vmem:[%s21592_s19 + $0x378] sm:$0xff] }
 0xf85   : > { %9911 = vmatpush1.bf16.msra.mxu1 %v16770_v27  ;;  %v6235_v27 = vld [vmem:[%s21592_s19 + $0x2f8] sm:$0xff] }
 0xf86   : > { %10013 = vmatpush1.bf16.msra.mxu0 %v16772_v60  ;;  %9912 = vmatprep.subr.bf16.mxu1 %v16787_v31  ;;  %v16818_v60 = vcombine.low %v6210_v49, %v6218_v32  ;;  %v16835_v31 = vcombine.high %v6226_v54, %v6234_v16  ;;  %v6258_v49 = vld [vmem:[%s21592_s19 + $0x3b0] sm:$0xff] }
 0xf87   : > { %9798 = vmatmul.mubr.bf16.gmra.mrb[72].mxu1 %v23022_v47  ;;  %10014 = vmatprep.subr.bf16.mxu0 %v16789_v41  ;;  %v16837_v41 = vcombine.high %v6227_v14, %v6235_v27  ;;  %v6266_v32 = vld [vmem:[%s21592_s19 + $0x3f0] sm:$0xff] }
 0xf88   : > { %9900 = vmatmul.mubr.bf16.gmra.mrb[72].mxu0 %v23022_v47  ;;  %9940 = vmatprep.mubr.bf16.mxu1 %v22872_v26 }
 0xf89   : > { %9913 = vmatpush1.bf16.msra.mxu1 %v16786_v7  ;;  %10042 = vmatprep.mubr.bf16.mxu0 %v22872_v26  ;;  %v16820_v26 = vcombine.low %v6211_v1, %v6219_v59  ;;  %v16834_v7 = vcombine.low %v6226_v54, %v6234_v16  ;;  %v6259_v1 = vld [vmem:[%s21592_s19 + $0x3b8] sm:$0xff]  ;;  %v6274_v54 = vld [vmem:[%s21592_s19 + $0x430] sm:$0xff] }
 0xf8a   : > { %10015 = vmatpush1.bf16.msra.mxu0 %v16788_v56  ;;  %9914 = vmatprep.subr.bf16.mxu1 %v16803_v30  ;;  %v16836_v56 = vcombine.low %v6227_v14, %v6235_v27  ;;  %v16851_v30 = vcombine.high %v6242_v61, %v6250_v15  ;;  %v6267_v59 = vld [vmem:[%s21592_s19 + $0x3f8] sm:$0xff]  ;;  %v6282_v16 = vld [vmem:[%s21592_s19 + $0x470] sm:$0xff] }
 0xf8b   : > { %10016 = vmatprep.subr.bf16.mxu0 %v16805_v45  ;;  %v16853_v45 = vcombine.high %v6243_v6, %v6251_v28  ;;  %v6275_v14 = vld [vmem:[%s21592_s19 + $0x438] sm:$0xff] }
 0xf8c   : > { %v6283_v27 = vld [vmem:[%s21592_s19 + $0x478] sm:$0xff] }
 0xf8d   : > { %9915 = vmatpush1.bf16.msra.mxu1 %v16802_v42  ;;  %v16850_v42 = vcombine.low %v6242_v61, %v6250_v15  ;;  %v6290_v61 = vld [vmem:[%s21592_s19 + $0x4b0] sm:$0xff] }
 0xf8e   : > { %10017 = vmatpush1.bf16.msra.mxu0 %v16804_v46  ;;  %9916 = vmatprep.subr.bf16.mxu1 %v16819_v12  ;;  %v16852_v46 = vcombine.low %v6243_v6, %v6251_v28  ;;  %v16867_v12 = vcombine.high %v6258_v49, %v6266_v32  ;;  %v6298_v15 = vld [vmem:[%s21592_s19 + $0x4f0] sm:$0xff]  ;;  %v6291_v6 = vld [vmem:[%s21592_s19 + $0x4b8] sm:$0xff] }
 0xf8f   : > { %10018 = vmatprep.subr.bf16.mxu0 %v16821_v25  ;;  %v16869_v25 = vcombine.high %v6259_v1, %v6267_v59  ;;  %v6299_v28 = vld [vmem:[%s21592_s19 + $0x4f8] sm:$0xff] }
 0xf91   : > { %9917 = vmatpush1.bf16.msra.mxu1 %v16818_v60  ;;  %v16866_v60 = vcombine.low %v6258_v49, %v6266_v32  ;;  %v6306_v49 = vld [vmem:[%s21592_s19 + $0x530] sm:$0xff] }
 0xf92   : > { %10019 = vmatpush1.bf16.msra.mxu0 %v16820_v26  ;;  %9918 = vmatprep.subr.bf16.mxu1 %v16835_v31  ;;  %v16868_v26 = vcombine.low %v6259_v1, %v6267_v59  ;;  %v16883_v31 = vcombine.high %v6274_v54, %v6282_v16  ;;  %v6314_v32 = vld [vmem:[%s21592_s19 + $0x570] sm:$0xff]  ;;  %v6307_v1 = vld [vmem:[%s21592_s19 + $0x538] sm:$0xff] }
 0xf93   : > { %10020 = vmatprep.subr.bf16.mxu0 %v16837_v41  ;;  %v16885_v41 = vcombine.high %v6275_v14, %v6283_v27  ;;  %v6315_v59 = vld [vmem:[%s21592_s19 + $0x578] sm:$0xff] }
 0xf95   : > { %9919 = vmatpush1.bf16.msra.mxu1 %v16834_v7  ;;  %v16882_v7 = vcombine.low %v6274_v54, %v6282_v16  ;;  %v6322_v54 = vld [vmem:[%s21592_s19 + $0x5b0] sm:$0xff] }
 0xf96   : > { %10021 = vmatpush1.bf16.msra.mxu0 %v16836_v56  ;;  %9920 = vmatprep.subr.bf16.mxu1 %v16851_v30  ;;  %v16884_v56 = vcombine.low %v6275_v14, %v6283_v27  ;;  %v16899_v30 = vcombine.high %v6290_v61, %v6298_v15  ;;  %v6330_v16 = vld [vmem:[%s21592_s19 + $0x5f0] sm:$0xff]  ;;  %v6323_v14 = vld [vmem:[%s21592_s19 + $0x5b8] sm:$0xff] }
 0xf97   : > { %10022 = vmatprep.subr.bf16.mxu0 %v16853_v45  ;;  %v16901_v45 = vcombine.high %v6291_v6, %v6299_v28  ;;  %v6331_v27 = vld [vmem:[%s21592_s19 + $0x5f8] sm:$0xff] }
 0xf99   : > { %9921 = vmatpush1.bf16.msra.mxu1 %v16850_v42  ;;  %v16898_v42 = vcombine.low %v6290_v61, %v6298_v15  ;;  %v6338_v61 = vld [vmem:[%s21592_s19 + $0x630] sm:$0xff] }
 0xf9a   : > { %10023 = vmatpush1.bf16.msra.mxu0 %v16852_v46  ;;  %9922 = vmatprep.subr.bf16.mxu1 %v16867_v12  ;;  %v16900_v46 = vcombine.low %v6291_v6, %v6299_v28  ;;  %v16915_v12 = vcombine.high %v6306_v49, %v6314_v32  ;;  %v6346_v15 = vld [vmem:[%s21592_s19 + $0x670] sm:$0xff]  ;;  %v6339_v6 = vld [vmem:[%s21592_s19 + $0x638] sm:$0xff] }
 0xf9b   : > { %10024 = vmatprep.subr.bf16.mxu0 %v16869_v25  ;;  %v16917_v25 = vcombine.high %v6307_v1, %v6315_v59  ;;  %v6347_v28 = vld [vmem:[%s21592_s19 + $0x678] sm:$0xff] }
 0xf9d   : > { %9923 = vmatpush1.bf16.msra.mxu1 %v16866_v60  ;;  %v16914_v60 = vcombine.low %v6306_v49, %v6314_v32  ;;  %v6354_v49 = vld [vmem:[%s21592_s19 + $0x6b0] sm:$0xff] }
 0xf9e   : > { %10025 = vmatpush1.bf16.msra.mxu0 %v16868_v26  ;;  %9924 = vmatprep.subr.bf16.mxu1 %v16883_v31  ;;  %v16916_v26 = vcombine.low %v6307_v1, %v6315_v59  ;;  %v16931_v31 = vcombine.high %v6322_v54, %v6330_v16  ;;  %v6362_v32 = vld [vmem:[%s21592_s19 + $0x6f0] sm:$0xff]  ;;  %v6355_v1 = vld [vmem:[%s21592_s19 + $0x6b8] sm:$0xff] }
 0xf9f   : > { %10026 = vmatprep.subr.bf16.mxu0 %v16885_v41  ;;  %v16933_v41 = vcombine.high %v6323_v14, %v6331_v27  ;;  %v6363_v59 = vld [vmem:[%s21592_s19 + $0x6f8] sm:$0xff] }
 0xfa1   : > { %9925 = vmatpush1.bf16.msra.mxu1 %v16882_v7  ;;  %v16930_v7 = vcombine.low %v6322_v54, %v6330_v16  ;;  %v6370_v54 = vld [vmem:[%s21592_s19 + $0x730] sm:$0xff] }
 0xfa2   : > { %10027 = vmatpush1.bf16.msra.mxu0 %v16884_v56  ;;  %9926 = vmatprep.subr.bf16.mxu1 %v16899_v30  ;;  %v16932_v56 = vcombine.low %v6323_v14, %v6331_v27  ;;  %v16947_v30 = vcombine.high %v6338_v61, %v6346_v15  ;;  %v6378_v16 = vld [vmem:[%s21592_s19 + $0x770] sm:$0xff]  ;;  %v6371_v14 = vld [vmem:[%s21592_s19 + $0x738] sm:$0xff] }
 0xfa3   : > { %10028 = vmatprep.subr.bf16.mxu0 %v16901_v45  ;;  %v16949_v45 = vcombine.high %v6339_v6, %v6347_v28  ;;  %v6379_v27 = vld [vmem:[%s21592_s19 + $0x778] sm:$0xff] }
 0xfa5   : > { %9927 = vmatpush1.bf16.msra.mxu1 %v16898_v42  ;;  %v16946_v42 = vcombine.low %v6338_v61, %v6346_v15  ;;  %v6386_v61 = vld [vmem:[%s21592_s19 + $0x7b0] sm:$0xff] }
 0xfa6   : > { %10029 = vmatpush1.bf16.msra.mxu0 %v16900_v46  ;;  %9928 = vmatprep.subr.bf16.mxu1 %v16915_v12  ;;  %v16948_v46 = vcombine.low %v6339_v6, %v6347_v28  ;;  %v16963_v12 = vcombine.high %v6354_v49, %v6362_v32  ;;  %v6394_v15 = vld [vmem:[%s21592_s19 + $0x7f0] sm:$0xff]  ;;  %v6387_v6 = vld [vmem:[%s21592_s19 + $0x7b8] sm:$0xff] }
 0xfa7   : > { %10030 = vmatprep.subr.bf16.mxu0 %v16917_v25  ;;  %v16965_v25 = vcombine.high %v6355_v1, %v6363_v59  ;;  %v6395_v28 = vld [vmem:[%s21592_s19 + $0x7f8] sm:$0xff] }
 0xfa9   : > { %9929 = vmatpush1.bf16.msra.mxu1 %v16914_v60  ;;  %v16962_v60 = vcombine.low %v6354_v49, %v6362_v32  ;;  %v6402_v49 = vld [vmem:[%s21592_s19 + $0x830] sm:$0xff] }
 0xfaa   : > { %10031 = vmatpush1.bf16.msra.mxu0 %v16916_v26  ;;  %9930 = vmatprep.subr.bf16.mxu1 %v16931_v31  ;;  %v16964_v26 = vcombine.low %v6355_v1, %v6363_v59  ;;  %v16979_v31 = vcombine.high %v6370_v54, %v6378_v16  ;;  %v6410_v32 = vld [vmem:[%s21592_s19 + $0x870] sm:$0xff]  ;;  %v6403_v1 = vld [vmem:[%s21592_s19 + $0x838] sm:$0xff] }
 0xfab   : > { %10032 = vmatprep.subr.bf16.mxu0 %v16933_v41  ;;  %v16981_v41 = vcombine.high %v6371_v14, %v6379_v27  ;;  %v6411_v59 = vld [vmem:[%s21592_s19 + $0x878] sm:$0xff] }
 0xfad   : > { %9931 = vmatpush1.bf16.msra.mxu1 %v16930_v7  ;;  %v16978_v7 = vcombine.low %v6370_v54, %v6378_v16  ;;  %v6418_v54 = vld [vmem:[%s21592_s19 + $0x8b0] sm:$0xff] }
 0xfae   : > { %10033 = vmatpush1.bf16.msra.mxu0 %v16932_v56  ;;  %9932 = vmatprep.subr.bf16.mxu1 %v16947_v30  ;;  %v16980_v56 = vcombine.low %v6371_v14, %v6379_v27  ;;  %v16995_v30 = vcombine.high %v6386_v61, %v6394_v15  ;;  %v6426_v16 = vld [vmem:[%s21592_s19 + $0x8f0] sm:$0xff]  ;;  %v6419_v14 = vld [vmem:[%s21592_s19 + $0x8b8] sm:$0xff] }
 0xfaf   : > { %10034 = vmatprep.subr.bf16.mxu0 %v16949_v45  ;;  %v16997_v45 = vcombine.high %v6387_v6, %v6395_v28  ;;  %v6427_v27 = vld [vmem:[%s21592_s19 + $0x8f8] sm:$0xff] }
 0xfb1   : > { %9933 = vmatpush1.bf16.msra.mxu1 %v16946_v42  ;;  %v16994_v42 = vcombine.low %v6386_v61, %v6394_v15  ;;  %v6434_v61 = vld [vmem:[%s21592_s19 + $0x930] sm:$0xff] }
 0xfb2   : > { %10035 = vmatpush1.bf16.msra.mxu0 %v16948_v46  ;;  %9934 = vmatprep.subr.bf16.mxu1 %v16963_v12  ;;  %v16996_v46 = vcombine.low %v6387_v6, %v6395_v28  ;;  %v17011_v12 = vcombine.high %v6402_v49, %v6410_v32  ;;  %v6442_v15 = vld [vmem:[%s21592_s19 + $0x970] sm:$0xff]  ;;  %v6435_v6 = vld [vmem:[%s21592_s19 + $0x938] sm:$0xff] }
 0xfb3   : > { %10036 = vmatprep.subr.bf16.mxu0 %v16965_v25  ;;  %v17013_v25 = vcombine.high %v6403_v1, %v6411_v59  ;;  %v6443_v28 = vld [vmem:[%s21592_s19 + $0x978] sm:$0xff] }
 0xfb5   : > { %9935 = vmatpush1.bf16.msra.mxu1 %v16962_v60  ;;  %v17010_v60 = vcombine.low %v6402_v49, %v6410_v32  ;;  %v6450_v49 = vld [vmem:[%s21592_s19 + $0x9b0] sm:$0xff] }
 0xfb6   : > { %10037 = vmatpush1.bf16.msra.mxu0 %v16964_v26  ;;  %9936 = vmatprep.subr.bf16.mxu1 %v16979_v31  ;;  %v17012_v26 = vcombine.low %v6403_v1, %v6411_v59  ;;  %v17027_v31 = vcombine.high %v6418_v54, %v6426_v16  ;;  %v6458_v32 = vld [vmem:[%s21592_s19 + $0x9f0] sm:$0xff]  ;;  %v6459_v1 = vld [vmem:[%s21592_s19 + $0x9f8] sm:$0xff]  ;;  %v17042_v59 = vcombine.low %v6434_v61, %v6442_v15 }
 0xfb7   : > { %10038 = vmatprep.subr.bf16.mxu0 %v16981_v41  ;;  %v17029_v41 = vcombine.high %v6419_v14, %v6427_v27 }
 0xfb9   : > { %9937 = vmatpush1.bf16.msra.mxu1 %v16978_v7  ;;  %v17026_v7 = vcombine.low %v6418_v54, %v6426_v16  ;;  %v6467_v54 = vld [vmem:[%s21592_s19 + $0xa38] sm:$0xff] }
 0xfba   : > { %10039 = vmatpush1.bf16.msra.mxu0 %v16980_v56  ;;  %9938 = vmatprep.subr.bf16.mxu1 %v16995_v30  ;;  %v17028_v56 = vcombine.low %v6419_v14, %v6427_v27  ;;  %v17043_v30 = vcombine.high %v6434_v61, %v6442_v15  ;;  %v6475_v16 = vld [vmem:[%s21592_s19 + $0xa78] sm:$0xff]  ;;  %v17058_v14 = vcombine.low %v6450_v49, %v6458_v32 }
 0xfbb   : > { %10040 = vmatprep.subr.bf16.mxu0 %v16997_v45  ;;  %v17045_v45 = vcombine.high %v6435_v6, %v6443_v28  ;;  %v6483_v61 = vld [vmem:[%s21592_s19 + $0xab8] sm:$0xff] }
 0xfbc   : > { %v6491_v15 = vld [vmem:[%s21592_s19 + $0xaf8] sm:$0xff] }
 0xfbd   : > { %9939 = vmatpush1.bf16.msra.mxu1 %v16994_v42  ;;  %v17059_v42 = vcombine.high %v6450_v49, %v6458_v32  ;;  %v17093_v49 = vcombine.high %v6483_v61, %v6491_v15  ;;  %v6498_v32 = vld [vmem:[%s21592_s19 + $0xb30] sm:$0xff] }
 0xfbe   : > { %10041 = vmatpush1.bf16.msra.mxu0 %v16996_v46  ;;  %9959 = vmatprep.subr.bf16.mxu1 %v17011_v12  ;;  %v6466_v12 = vld [vmem:[%s21592_s19 + $0xa30] sm:$0xff] }
 0xfbf   : > { %10061 = vmatprep.subr.bf16.mxu0 %v17013_v25  ;;  %v6474_v25 = vld [vmem:[%s21592_s19 + $0xa70] sm:$0xff] }
 0xfc0   : > { %9941 = vmatmul.mubr.bf16.vlgmr.msra.gmra.mrb[76].mxu1 %v22876_v62 }
 0xfc1   : > { %10043 = vmatmul.mubr.bf16.vlgmr.msra.gmra.mrb[76].mxu0 %v22876_v62  ;;  %9950 = vmatprep.mubr.bf16.mxu1 %v22912_v58  ;;  %v6451_v62 = vld [vmem:[%s21592_s19 + $0x9b8] sm:$0xff] }
 0xfc2   : > { %9960 = vmatpush1.bf16.msra.mxu1 %v17010_v60  ;;  %10052 = vmatprep.mubr.bf16.mxu0 %v22912_v58  ;;  %v17044_v58 = vcombine.low %v6435_v6, %v6443_v28  ;;  %v17061_v46 = vcombine.high %v6451_v62, %v6459_v1  ;;  %v17060_v27 = vcombine.low %v6451_v62, %v6459_v1  ;;  %v6506_v62 = vld [vmem:[%s21592_s19 + $0xb70] sm:$0xff] }
 0xfc3   : > { %10062 = vmatpush1.bf16.msra.mxu0 %v17012_v26  ;;  %9961 = vmatprep.subr.bf16.mxu1 %v17027_v31  ;;  %v17075_v60 = vcombine.high %v6466_v12, %v6474_v25  ;;  %v17077_v26 = vcombine.high %v6467_v54, %v6475_v16  ;;  %v6482_v31 = vld [vmem:[%s21592_s19 + $0xab0] sm:$0xff]  ;;  %v17074_v6 = vcombine.low %v6466_v12, %v6474_v25 }
 0xfc4   : > { %10063 = vmatprep.subr.bf16.mxu0 %v17029_v41  ;;  %v6490_v41 = vld [vmem:[%s21592_s19 + $0xaf0] sm:$0xff]  ;;  %v23453_v28 = vrot.slane %v23249_v44, %v22246_v36 }
 0xfc6   : > { %9962 = vmatpush1.bf16.msra.mxu1 %v17026_v7  ;;  %v17076_v7 = vcombine.low %v6467_v54, %v6475_v16  ;;  %v17092_v16 = vcombine.low %v6483_v61, %v6491_v15  ;;  %v17106_v61 = vcombine.low %v6498_v32, %v6506_v62 }
 0xfc7   : > { %10064 = vmatpush1.bf16.msra.mxu0 %v17028_v56  ;;  %9963 = vmatprep.subr.bf16.mxu1 %v17043_v30  ;;  %v23457_v56 = vrot.slane %v23249_v44, %v22364_v55  ;;  %v17091_v30 = vcombine.high %v6482_v31, %v6490_v41 }
 0xfc8   : > { %9951 = vmatmul.mubr.bf16.gmra.mrb[80].mxu1 %v22925_v10  ;;  %10065 = vmatprep.subr.bf16.mxu0 %v17045_v45 }
 0xfc9   : > { %10053 = vmatmul.mubr.bf16.gmra.mrb[80].mxu0 %v22925_v10  ;;  %9991 = vmatprep.mubr.bf16.mxu1 %v22938_v17  ;;  %v23443_v10 = vrot.slane %v23249_v44, %v22243_v35 }
 0xfca   : > { %9964 = vmatpush1.bf16.msra.mxu1 %v17042_v59  ;;  %10093 = vmatprep.mubr.bf16.mxu0 %v22938_v17  ;;  %v23449_v17 = vrot.slane %v23249_v44, %v22361_v19  ;;  %v17090_v44 = vcombine.low %v6482_v31, %v6490_v41 }
 0xfcb   : > { %10066 = vmatpush1.bf16.msra.mxu0 %v17044_v58  ;;  %9965 = vmatprep.subr.bf16.mxu1 %v17059_v42  ;;  %v6499_v42 = vld [vmem:[%s21592_s19 + $0xb38] sm:$0xff] }
 0xfcc   : > { %10067 = vmatprep.subr.bf16.mxu0 %v17061_v46  ;;  %v6507_v46 = vld [vmem:[%s21592_s19 + $0xb78] sm:$0xff] }
 0xfcd   : > { %v17109_v15 = vcombine.high %v6499_v42, %v6507_v46 }
 0xfce   : > { %9966 = vmatpush1.bf16.msra.mxu1 %v17058_v14 }
 0xfcf   : > { %10068 = vmatpush1.bf16.msra.mxu0 %v17060_v27  ;;  %9967 = vmatprep.subr.bf16.mxu1 %v17075_v60 }
 0xfd0   : > { %10069 = vmatprep.subr.bf16.mxu0 %v17077_v26  ;;  %v9585_v45 = vpop.f32.mrb[60].mxu1 }
 0xfd1   : > { %v18123_v1 = vadd.f32 %v9585_v45, %v23443_v10  ;;  %v9687_v59 = vpop.f32.mrb[60].mxu0  ;;  %v9587_v58 = vpop.f32.mrb[61].mxu1  ;;  %v17107_v45 = vcombine.high %v6498_v32, %v6506_v62 }
 0xfd2   : > { %9968 = vmatpush1.bf16.msra.mxu1 %v17074_v6  ;;  %v18129_v12 = vadd.f32 %v9687_v59, %v23449_v17  ;;  %v18124_v25 = vadd.f32 %v9587_v58, %v23453_v28  ;;  %v9689_v54 = vpop.f32.mrb[61].mxu0  ;;  %v9589_v14 = vpop.f32.mrb[62].mxu1  ;;  %v6514_v58 = vld [vmem:[%s21592_s19 + $0xbb0] sm:$0xff] }
 0xfd3   : > { %10070 = vmatpush1.bf16.msra.mxu0 %v17076_v7  ;;  %v18130_v27 = vadd.f32 %v9689_v54, %v23457_v56  ;;  %9969 = vmatprep.subr.bf16.mxu1 %v17091_v30  ;;  %v18125_v60 = vadd.f32 %v9589_v14, %v23443_v10  ;;  %v9691_v26 = vpop.f32.mrb[62].mxu0  ;;  %v9591_v6 = vpop.f32.mrb[63].mxu1  ;;  %v6522_v7 = vld [vmem:[%s21592_s19 + $0xbf0] sm:$0xff]  ;;  %v10116_v24 = vmax.f32 %v18123_v1, 0.0  ;;  %v17108_v14 = vcombine.low %v6499_v42, %v6507_v46 }
 0xfd4   : > { %10071 = vmatprep.subr.bf16.mxu0 %v17093_v49  ;;  %v18131_v59 = vadd.f32 %v9691_v26, %v23449_v17  ;;  %v18126_v31 = vadd.f32 %v9591_v6, %v23453_v28  ;;  %v9693_v41 = vpop.f32.mrb[63].mxu0  ;;  %v10118_v29 = vmax.f32 %v18129_v12, 0.0  ;;  %v10117_v3 = vmax.f32 %v18124_v25, 0.0  ;;  %v6530_v25 = vld [vmem:[%s21592_s19 + $0xc30] sm:$0xff] }
 0xfd5   : > { %v10132_v54 = vmax.f32 %v18125_v60, 0.0  ;;  %v18132_v30 = vadd.f32 %v9693_v41, %v23457_v56  ;;  %v10119_v6 = vmax.f32 %v18130_v27, 0.0  ;;  %v17123_v1 = vcombine.high %v6514_v58, %v6522_v7 }
 0xfd6   : > { %v10134_v49 = vmax.f32 %v18131_v59, 0.0  ;;  %9970 = vmatpush1.bf16.msra.mxu1 %v17090_v44  ;;  %v10133_v26 = vmax.f32 %v18126_v31, 0.0  ;;  %v17125_v12 = vcombine.high %v6515_v43, %v6523_v38  ;;  %v6538_v44 = vld [vmem:[%s21592_s19 + $0xc70] sm:$0xff]  ;;  %v17124_v41 = vcombine.low %v6515_v43, %v6523_v38 }
 0xfd7   : > { %v23475_v32 = vpack.c.bf16 %v10132_v54, %v10116_v24  ;;  %10072 = vmatpush1.bf16.msra.mxu0 %v17092_v16  ;;  %v10135_v62 = vmax.f32 %v18132_v30, 0.0  ;;  %9971 = vmatprep.subr.bf16.mxu1 %v17107_v45  ;;  %v6531_v16 = vld [vmem:[%s21592_s19 + $0xc38] sm:$0xff]  ;;  %v17139_v30 = vcombine.high %v6530_v25, %v6538_v44 }
 0xfd8   : > { %v23477_v60 = vpack.c.bf16 %v10134_v49, %v10118_v29  ;;  %v23479_v42 = vpack.c.bf16 %v10133_v26, %v10117_v3  ;;  %10073 = vmatprep.subr.bf16.mxu0 %v17109_v15  ;;  %v23481_v46 = vpop.f32.mrb[64].mxu1  ;;  %v6539_v45 = vld [vmem:[%s21592_s19 + $0xc78] sm:$0xff]  ;;  %v17122_v3 = vcombine.low %v6514_v58, %v6522_v7  ;;  %v17138_v58 = vcombine.low %v6530_v25, %v6538_v44 }
 0xfd9   : > { %v23485_v59 = vpack.c.bf16 %v10135_v62, %v10119_v6  ;;  %v23487_v27 = vpop.f32.mrb[64].mxu0  ;;  %v23489_v24 = vpop.f32.mrb[65].mxu1  ;;  %v17141_v26 = vcombine.high %v6531_v16, %v6539_v45  ;;  %v6546_v6 = vld [vmem:[%s21592_s19 + $0xcb0] sm:$0xff]  ;;  %v6547_v62 = vld [vmem:[%s21592_s19 + $0xcb8] sm:$0xff]  ;;  %v17140_v7 = vcombine.low %v6531_v16, %v6539_v45 }
 0xfda   : > { %9972 = vmatpush1.bf16.msra.mxu1 %v17106_v61  ;;  %v23493_v29 = vpop.f32.mrb[65].mxu0  ;;  %v9599_v31 = vpop.f32.mrb[66].mxu1  ;;  %v6554_v61 = vld [vmem:[%s21592_s19 + $0xcf0] sm:$0xff]  ;;  %v17157_v43 = vcombine.high %v6547_v62, %v6555_v37 }
 0xfdb   : > { %10074 = vmatpush1.bf16.msra.mxu0 %v17108_v14  ;;  %9973 = vmatprep.subr.bf16.mxu1 %v17123_v1  ;;  %v9701_v15 = vpop.f32.mrb[66].mxu0  ;;  %v9600_v54 = vpop.f32.mrb[67].mxu1  ;;  %v17155_v38 = vcombine.high %v6546_v6, %v6554_v61  ;;  %v6562_v14 = vld [vmem:[%s21592_s19 + $0xd30] sm:$0xff]  ;;  %v6571_v31 = vld [vmem:[%s21592_s19 + $0xd78] sm:$0xff] }
 0xfdc   : > { %10075 = vmatprep.subr.bf16.mxu0 %v17125_v12  ;;  %v9702_v49 = vpop.f32.mrb[67].mxu0  ;;  %v6570_v1 = vld [vmem:[%s21592_s19 + $0xd70] sm:$0xff]  ;;  %v6563_v12 = vld [vmem:[%s21592_s19 + $0xd38] sm:$0xff]  ;;  %v17154_v15 = vcombine.low %v6546_v6, %v6554_v61 }
 0xfdd   : > { %v17171_v25 = vcombine.high %v6562_v14, %v6570_v1  ;;  %v17173_v44 = vcombine.high %v6563_v12, %v6571_v31  ;;  %v6578_v16 = vld [vmem:[%s21592_s19 + $0xdb0] sm:$0xff]  ;;  %v6587_v54 = vld [vmem:[%s21592_s19 + $0xdf8] sm:$0xff]  ;;  %v17172_v49 = vcombine.low %v6563_v12, %v6571_v31 }
 0xfde   : > { %9974 = vmatpush1.bf16.msra.mxu1 %v17122_v3  ;;  %v17156_v3 = vcombine.low %v6547_v62, %v6555_v37  ;;  %v6586_v45 = vld [vmem:[%s21592_s19 + $0xdf0] sm:$0xff]  ;;  %v6595_v62 = vld [vmem:[%s21592_s19 + $0xe38] sm:$0xff] }
 0xfdf   : > { %10076 = vmatpush1.bf16.msra.mxu0 %v17124_v41  ;;  %9975 = vmatprep.subr.bf16.mxu1 %v17139_v30  ;;  %v6579_v41 = vld [vmem:[%s21592_s19 + $0xdb8] sm:$0xff]  ;;  %v17170_v30 = vcombine.low %v6562_v14, %v6570_v1  ;;  %v6594_v6 = vld [vmem:[%s21592_s19 + $0xe30] sm:$0xff] }
 0xfe0   : > { %10077 = vmatprep.subr.bf16.mxu0 %v17141_v26  ;;  %v17187_v26 = vcombine.high %v6578_v16, %v6586_v45  ;;  %v17189_v37 = vcombine.high %v6579_v41, %v6587_v54  ;;  %v6602_v61 = vld [vmem:[%s21592_s19 + $0xe70] sm:$0xff]  ;;  %v6611_v31 = vld [vmem:[%s21592_s19 + $0xeb8] sm:$0xff] }
 0xfe1   : > { %v6610_v1 = vld [vmem:[%s21592_s19 + $0xeb0] sm:$0xff] }
 0xfe2   : > { %9976 = vmatpush1.bf16.msra.mxu1 %v17138_v58  ;;  %v6603_v58 = vld [vmem:[%s21592_s19 + $0xe78] sm:$0xff]  ;;  %v6618_v12 = vld [vmem:[%s21592_s19 + $0xef0] sm:$0xff] }
 0xfe3   : > { %10078 = vmatpush1.bf16.msra.mxu0 %v17140_v7  ;;  %9977 = vmatprep.subr.bf16.mxu1 %v17155_v38  ;;  %v17186_v7 = vcombine.low %v6578_v16, %v6586_v45  ;;  %v17188_v38 = vcombine.low %v6579_v41, %v6587_v54  ;;  %v17205_v14 = vcombine.high %v6595_v62, %v6603_v58  ;;  %v6626_v45 = vld [vmem:[%s21592_s19 + $0xf30] sm:$0xff]  ;;  %v6627_v54 = vld [vmem:[%s21592_s19 + $0xf38] sm:$0xff] }
 0xfe4   : > { %10079 = vmatprep.subr.bf16.mxu0 %v17157_v43  ;;  %v17203_v43 = vcombine.high %v6594_v6, %v6602_v61  ;;  %v6634_v41 = vld [vmem:[%s21592_s19 + $0xf70] sm:$0xff] }
 0xfe6   : > { %9978 = vmatpush1.bf16.msra.mxu1 %v17154_v15  ;;  %v6619_v15 = vld [vmem:[%s21592_s19 + $0xef8] sm:$0xff] }
 0xfe7   : > { %10080 = vmatpush1.bf16.msra.mxu0 %v17156_v3  ;;  %9979 = vmatprep.subr.bf16.mxu1 %v17171_v25  ;;  %v17202_v3 = vcombine.low %v6594_v6, %v6602_v61  ;;  %v17204_v25 = vcombine.low %v6595_v62, %v6603_v58  ;;  %v17221_v16 = vcombine.high %v6611_v31, %v6619_v15  ;;  %v6642_v61 = vld [vmem:[%s21592_s19 + $0xfb0] sm:$0xff]  ;;  %v6643_v58 = vld [vmem:[%s21592_s19 + $0xfb8] sm:$0xff] }
 0xfe8   : > { %10081 = vmatprep.subr.bf16.mxu0 %v17173_v44  ;;  %v17219_v44 = vcombine.high %v6610_v1, %v6618_v12  ;;  %v6650_v62 = vld [vmem:[%s21592_s19 + $0xff0] sm:$0xff] }
 0xfea   : > { %9980 = vmatpush1.bf16.msra.mxu1 %v17170_v30  ;;  %v6635_v30 = vld [vmem:[%s21592_s19 + $0xf78] sm:$0xff] }
 0xfeb   : > { %10082 = vmatpush1.bf16.msra.mxu0 %v17172_v49  ;;  %9981 = vmatprep.subr.bf16.mxu1 %v17187_v26  ;;  %v17218_v49 = vcombine.low %v6610_v1, %v6618_v12  ;;  %v17220_v26 = vcombine.low %v6611_v31, %v6619_v15  ;;  %v17237_v6 = vcombine.high %v6627_v54, %v6635_v30  ;;  %v19338_v15 = vld [vmem:[%s21601_s18 + $0x4] ss:$16 sps:$4 sm:$0xff]  }
 0xfec   : > { %10083 = vmatprep.subr.bf16.mxu0 %v17189_v37  ;;  %v17235_v37 = vcombine.high %v6626_v45, %v6634_v41  ;;  %v17250_v12 = vcombine.low %v6642_v61, %v6650_v62 }
 0xfee   : > { %9982 = vmatpush1.bf16.msra.mxu1 %v17186_v7  ;;  %v6651_v7 = vld [vmem:[%s21592_s19 + $0xff8] sm:$0xff]  ;;  %s24571_s19 = scalar_lea.vmem [#allocation17], %s21573_s15 }
 0xfef   : > { %10084 = vmatpush1.bf16.msra.mxu0 %v17188_v38  ;;  %9983 = vmatprep.subr.bf16.mxu1 %v17203_v43  ;;  %v17234_v38 = vcombine.low %v6626_v45, %v6634_v41  ;;  %v17236_v43 = vcombine.low %v6627_v54, %v6635_v30  ;;  %v17253_v1 = vcombine.high %v6643_v58, %v6651_v7  ;;  %v19347_v45 = vld [vmem:[%s21601_s18 + $0x2c] ss:$16 sps:$4 sm:$0xff]   ;;  %v19342_v41 = vld [vmem:[%s21601_s18 + $0x20] ss:$16 sps:$4 sm:$0xff]   ;;  %v19345_v54 = vld [vmem:[%s21601_s18 + $0x28] ss:$16 sps:$4 sm:$0xff]  }
 0xff0   : > { %10085 = vmatprep.subr.bf16.mxu0 %v17205_v14  ;;  %v17251_v14 = vcombine.high %v6642_v61, %v6650_v62  ;;  %v17252_v31 = vcombine.low %v6643_v58, %v6651_v7  ;;  %v19350_v30 = vld [vmem:[%s21601_s18 + $0x44] ss:$16 sps:$4 sm:$0xff]   ;;  %v19357_v61 = vld [vmem:[%s21601_s18 + $0x68] ss:$16 sps:$4 sm:$0xff]   ;;  %v19365_v58 = vld [vmem:[%s21601_s18 + $0x8c] ss:$16 sps:$4 sm:$0xff]  }
 0xff1   : > { %v19362_v62 = vld [vmem:[%s21601_s18 + $0x84] ss:$16 sps:$4 sm:$0xff]   ;;  %v19363_v7 = vld [vmem:[%s21601_s18 + $0x88] ss:$16 sps:$4 sm:$0xff]  }
 0xff2   : > { %9984 = vmatpush1.bf16.msra.mxu1 %v17202_v3  ;;  %v19341_v3 = vld [vmem:[%s21601_s18 + $0xc] ss:$16 sps:$4 sm:$0xff]  }
 0xff3   : > { %10086 = vmatpush1.bf16.msra.mxu0 %v17204_v25  ;;  %9985 = vmatprep.subr.bf16.mxu1 %v17219_v44  ;;  %v19336_v25 = vld [vmem:[%s21601_s18] ss:$16 sps:$4 sm:$0xff]   ;;  %v19339_v44 = vld [vmem:[%s21601_s18 + $0x8] ss:$16 sps:$4 sm:$0xff]  }
 0xff4   : > { %10087 = vmatprep.subr.bf16.mxu0 %v17221_v16  ;;  %v19344_v16 = vld [vmem:[%s21601_s18 + $0x24] ss:$16 sps:$4 sm:$0xff]  }
 0xff6   : > { %9986 = vmatpush1.bf16.msra.mxu1 %v17218_v49  ;;  %v19353_v49 = vld [vmem:[%s21601_s18 + $0x4c] ss:$16 sps:$4 sm:$0xff]  }
 0xff7   : > { %10088 = vmatpush1.bf16.msra.mxu0 %v17220_v26  ;;  %9987 = vmatprep.subr.bf16.mxu1 %v17235_v37  ;;  %v19348_v26 = vld [vmem:[%s21601_s18 + $0x40] ss:$16 sps:$4 sm:$0xff]   ;;  %v19356_v37 = vld [vmem:[%s21601_s18 + $0x64] ss:$16 sps:$4 sm:$0xff]  }
 0xff8   : > { %10089 = vmatprep.subr.bf16.mxu0 %v17237_v6  ;;  %v19354_v6 = vld [vmem:[%s21601_s18 + $0x60] ss:$16 sps:$4 sm:$0xff]  }
 0xffa   : > { %9988 = vmatpush1.bf16.msra.mxu1 %v17234_v38  ;;  %v19368_v38 = vld [vmem:[%s21601_s18 + $0xa4] ss:$16 sps:$4 sm:$0xff]  }
 0xffb   : > { %10090 = vmatpush1.bf16.msra.mxu0 %v17236_v43  ;;  %9989 = vmatprep.subr.bf16.mxu1 %v17251_v14  ;;  %v19366_v43 = vld [vmem:[%s21601_s18 + $0xa0] ss:$16 sps:$4 sm:$0xff]   ;;  %v19369_v14 = vld [vmem:[%s21601_s18 + $0xa8] ss:$16 sps:$4 sm:$0xff]  }
 0xffc   : > { %10091 = vmatprep.subr.bf16.mxu0 %v17253_v1  ;;  %v19374_v1 = vld [vmem:[%s21601_s18 + $0xc4] ss:$16 sps:$4 sm:$0xff]  }
 0xffe   : > { %9990 = vmatpush1.bf16.msra.mxu1 %v17250_v12  ;;  %v19377_v12 = vld [vmem:[%s21601_s18 + $0xcc] ss:$16 sps:$4 sm:$0xff]  }
 0xfff   : > { %10092 = vmatpush1.bf16.msra.mxu0 %v17252_v31  ;;  %13286 = vmatprep.subr.bf16.mxu1 %v19338_v15  ;;  %v19372_v31 = vld [vmem:[%s21601_s18 + $0xc0] ss:$16 sps:$4 sm:$0xff]   ;;  %v19375_v15 = vld [vmem:[%s21601_s18 + $0xc8] ss:$16 sps:$4 sm:$0xff]  }
0x1000   : > { %13694 = vmatprep.subr.bf16.mxu0 %v19341_v3  ;;  %v19380_v3 = vld [vmem:[%s21601_s18 + $0xe4] ss:$16 sps:$4 sm:$0xff]  }
0x1001   : > { %9992 = vmatmul.mubr.bf16.vlgmr.msra.gmra.mrb[76].mxu1 %v23002_v8 }
0x1002   : > { %10094 = vmatmul.mubr.bf16.vlgmr.msra.gmra.mrb[76].mxu0 %v23002_v8  ;;  %10001 = vmatprep.mubr.bf16.mxu1 %v23006_v57  ;;  %v19351_v8 = vld [vmem:[%s21601_s18 + $0x48] ss:$16 sps:$4 sm:$0xff]  }
0x1003   : > { %10103 = vmatprep.mubr.bf16.mxu0 %v23006_v57  ;;  %13287 = vmatpush1.bf16.msra.mxu1 %v19336_v25  ;;  %v19359_v57 = vld [vmem:[%s21601_s18 + $0x6c] ss:$16 sps:$4 sm:$0xff]  }
0x1004   : > { %13695 = vmatpush1.bf16.msra.mxu0 %v19339_v44  ;;  %13288 = vmatprep.subr.bf16.mxu1 %v19344_v16  ;;  %v19383_v25 = vld [vmem:[%s21601_s18 + $0xec] ss:$16 sps:$4 sm:$0xff]   ;;  %v19378_v44 = vld [vmem:[%s21601_s18 + $0xe0] ss:$16 sps:$4 sm:$0xff]   ;;  %v19381_v16 = vld [vmem:[%s21601_s18 + $0xe8] ss:$16 sps:$4 sm:$0xff]  }
0x1005   : > { %13696 = vmatprep.subr.bf16.mxu0 %v19347_v45  ;;  %v19386_v45 = vld [vmem:[%s21601_s18 + $0x104] ss:$16 sps:$4 sm:$0xff]  }
0x1007   : > { %13289 = vmatpush1.bf16.msra.mxu1 %v19342_v41  ;;  %v19389_v41 = vld [vmem:[%s21601_s18 + $0x10c] ss:$16 sps:$4 sm:$0xff]  }
0x1008   : > { %13697 = vmatpush1.bf16.msra.mxu0 %v19345_v54  ;;  %13290 = vmatprep.subr.bf16.mxu1 %v19350_v30  ;;  %v19384_v54 = vld [vmem:[%s21601_s18 + $0x100] ss:$16 sps:$4 sm:$0xff]   ;;  %v19387_v30 = vld [vmem:[%s21601_s18 + $0x108] ss:$16 sps:$4 sm:$0xff]  }
0x1009   : > { %10002 = vmatmul.mubr.bf16.gmra.mrb[80].mxu1 %v23022_v47  ;;  %13698 = vmatprep.subr.bf16.mxu0 %v19353_v49  ;;  %v19392_v49 = vld [vmem:[%s21601_s18 + $0x124] ss:$16 sps:$4 sm:$0xff]  }
0x100a   : > { %10104 = vmatmul.mubr.bf16.gmra.mrb[80].mxu0 %v23022_v47  ;;  %13318 = vmatprep.mubr.bf16.mxu1 %v23296_v50  ;;  %v19360_v47 = vld [vmem:[%s21601_s18 + $0x80] ss:$16 sps:$4 sm:$0xff]  }
0x100b   : > { %13291 = vmatpush1.bf16.msra.mxu1 %v19348_v26  ;;  %13726 = vmatprep.mubr.bf16.mxu0 %v23296_v50  ;;  %v19371_v50 = vld [vmem:[%s21601_s18 + $0xac] ss:$16 sps:$4 sm:$0xff]  }
0x100c   : > { %13699 = vmatpush1.bf16.msra.mxu0 %v19351_v8  ;;  %13292 = vmatprep.subr.bf16.mxu1 %v19356_v37  ;;  %v19395_v26 = vld [vmem:[%s21601_s18 + $0x12c] ss:$16 sps:$4 sm:$0xff]   ;;  %v19390_v8 = vld [vmem:[%s21601_s18 + $0x120] ss:$16 sps:$4 sm:$0xff]   ;;  %v19393_v37 = vld [vmem:[%s21601_s18 + $0x128] ss:$16 sps:$4 sm:$0xff]  }
0x100d   : > { %13700 = vmatprep.subr.bf16.mxu0 %v19359_v57  ;;  %v19398_v57 = vld [vmem:[%s21601_s18 + $0x144] ss:$16 sps:$4 sm:$0xff]  }
0x100f   : > { %13293 = vmatpush1.bf16.msra.mxu1 %v19354_v6  ;;  %v19401_v6 = vld [vmem:[%s21601_s18 + $0x14c] ss:$16 sps:$4 sm:$0xff]  }
0x1010   : > { %13701 = vmatpush1.bf16.msra.mxu0 %v19357_v61  ;;  %13294 = vmatprep.subr.bf16.mxu1 %v19362_v62  ;;  %v19396_v61 = vld [vmem:[%s21601_s18 + $0x140] ss:$16 sps:$4 sm:$0xff]   ;;  %v19399_v62 = vld [vmem:[%s21601_s18 + $0x148] ss:$16 sps:$4 sm:$0xff]  }
0x1011   : > { %13702 = vmatprep.subr.bf16.mxu0 %v19365_v58  ;;  %v19404_v58 = vld [vmem:[%s21601_s18 + $0x164] ss:$16 sps:$4 sm:$0xff]  }
0x1013   : > { %13295 = vmatpush1.bf16.msra.mxu1 %v19360_v47  ;;  %v19407_v47 = vld [vmem:[%s21601_s18 + $0x16c] ss:$16 sps:$4 sm:$0xff]  }
0x1014   : > { %13703 = vmatpush1.bf16.msra.mxu0 %v19363_v7  ;;  %13296 = vmatprep.subr.bf16.mxu1 %v19368_v38  ;;  %v19402_v7 = vld [vmem:[%s21601_s18 + $0x160] ss:$16 sps:$4 sm:$0xff]   ;;  %v19405_v38 = vld [vmem:[%s21601_s18 + $0x168] ss:$16 sps:$4 sm:$0xff]  }
0x1015   : > { %13704 = vmatprep.subr.bf16.mxu0 %v19371_v50  ;;  %v19410_v50 = vld [vmem:[%s21601_s18 + $0x184] ss:$16 sps:$4 sm:$0xff]  }
0x1017   : > { %13297 = vmatpush1.bf16.msra.mxu1 %v19366_v43  ;;  %v19413_v43 = vld [vmem:[%s21601_s18 + $0x18c] ss:$16 sps:$4 sm:$0xff]  }
0x1018   : > { %13705 = vmatpush1.bf16.msra.mxu0 %v19369_v14  ;;  %13298 = vmatprep.subr.bf16.mxu1 %v19374_v1  ;;  %v19408_v14 = vld [vmem:[%s21601_s18 + $0x180] ss:$16 sps:$4 sm:$0xff]   ;;  %v19411_v1 = vld [vmem:[%s21601_s18 + $0x188] ss:$16 sps:$4 sm:$0xff]  }
0x1019   : > { %13706 = vmatprep.subr.bf16.mxu0 %v19377_v12  ;;  %v19416_v12 = vld [vmem:[%s21601_s18 + $0x1a4] ss:$16 sps:$4 sm:$0xff]  }
0x101b   : > { %13299 = vmatpush1.bf16.msra.mxu1 %v19372_v31  ;;  %v19419_v31 = vld [vmem:[%s21601_s18 + $0x1ac] ss:$16 sps:$4 sm:$0xff]  }
0x101c   : > { %13707 = vmatpush1.bf16.msra.mxu0 %v19375_v15  ;;  %13300 = vmatprep.subr.bf16.mxu1 %v19380_v3  ;;  %v19414_v15 = vld [vmem:[%s21601_s18 + $0x1a0] ss:$16 sps:$4 sm:$0xff]   ;;  %v19417_v3 = vld [vmem:[%s21601_s18 + $0x1a8] ss:$16 sps:$4 sm:$0xff]  }
0x101d   : > { %13708 = vmatprep.subr.bf16.mxu0 %v19383_v25  ;;  %v19422_v25 = vld [vmem:[%s21601_s18 + $0x1c4] ss:$16 sps:$4 sm:$0xff]  }
0x101f   : > { %13301 = vmatpush1.bf16.msra.mxu1 %v19378_v44  ;;  %v19425_v44 = vld [vmem:[%s21601_s18 + $0x1cc] ss:$16 sps:$4 sm:$0xff]  }
0x1020   : > { %13709 = vmatpush1.bf16.msra.mxu0 %v19381_v16  ;;  %13302 = vmatprep.subr.bf16.mxu1 %v19386_v45  ;;  %v19420_v16 = vld [vmem:[%s21601_s18 + $0x1c0] ss:$16 sps:$4 sm:$0xff]   ;;  %v19423_v45 = vld [vmem:[%s21601_s18 + $0x1c8] ss:$16 sps:$4 sm:$0xff]  }
0x1021   : > { %13710 = vmatprep.subr.bf16.mxu0 %v19389_v41  ;;  %v19428_v41 = vld [vmem:[%s21601_s18 + $0x1e4] ss:$16 sps:$4 sm:$0xff]  }
0x1023   : > { %13303 = vmatpush1.bf16.msra.mxu1 %v19384_v54  ;;  %v18116_v54 = vadd.f32 %v23306_v22, %v23265_v0  ;;  %v19432_v0 = vld [vmem:[%s21601_s18 + $0x200] ss:$16 sps:$4 sm:$0xff]  }
0x1024   : > { %13711 = vmatpush1.bf16.msra.mxu0 %v19387_v30  ;;  %13304 = vmatprep.subr.bf16.mxu1 %v19392_v49  ;;  %v19431_v30 = vld [vmem:[%s21601_s18 + $0x1ec] ss:$16 sps:$4 sm:$0xff]   ;;  %v19426_v49 = vld [vmem:[%s21601_s18 + $0x1e0] ss:$16 sps:$4 sm:$0xff]  }
0x1025   : > { %13712 = vmatprep.subr.bf16.mxu0 %v19395_v26  ;;  %v19429_v26 = vld [vmem:[%s21601_s18 + $0x1e8] ss:$16 sps:$4 sm:$0xff]  }
0x1027   : > { %13305 = vmatpush1.bf16.msra.mxu1 %v19390_v8  ;;  %v19434_v8 = vld [vmem:[%s21601_s18 + $0x204] ss:$16 sps:$4 sm:$0xff]  }
0x1028   : > { %13713 = vmatpush1.bf16.msra.mxu0 %v19393_v37  ;;  %13306 = vmatprep.subr.bf16.mxu1 %v19398_v57  ;;  %v10145_v37 = vmax.f32 %v18116_v54, 0.0  ;;  %v19437_v57 = vld [vmem:[%s21601_s18 + $0x20c] ss:$16 sps:$4 sm:$0xff]  }
0x1029   : > { %13714 = vmatprep.subr.bf16.mxu0 %v19401_v6  ;;  %v18115_v6 = vadd.f32 %v23300_v21, %v23257_v51  ;;  %v19438_v51 = vld [vmem:[%s21601_s18 + $0x220] ss:$16 sps:$4 sm:$0xff]   ;;  %v19441_v21 = vld [vmem:[%s21601_s18 + $0x228] ss:$16 sps:$4 sm:$0xff]  }
0x102a   : > { %v10177_v22 = vpack.c.bf16 %v10145_v37, %v10145_v37 }
0x102b   : > { %13307 = vmatpush1.bf16.msra.mxu1 %v19396_v61  ;;  %v19435_v61 = vld [vmem:[%s21601_s18 + $0x208] ss:$16 sps:$4 sm:$0xff]  }
0x102c   : > { %13715 = vmatpush1.bf16.msra.mxu0 %v19399_v62  ;;  %13308 = vmatprep.subr.bf16.mxu1 %v19404_v58  ;;  %v19440_v62 = vld [vmem:[%s21601_s18 + $0x224] ss:$16 sps:$4 sm:$0xff]   ;;  %v19443_v58 = vld [vmem:[%s21601_s18 + $0x22c] ss:$16 sps:$4 sm:$0xff]  }
0x102d   : > { %13716 = vmatprep.subr.bf16.mxu0 %v19407_v47  ;;  %v10144_v47 = vmax.f32 %v18115_v6, 0.0 }
0x102f   : > { %13309 = vmatpush1.bf16.msra.mxu1 %v19402_v7  ;;  %v19446_v7 = vld [vmem:[%s21601_s18 + $0x244] ss:$16 sps:$4 sm:$0xff]  }
0x1030   : > { %13717 = vmatpush1.bf16.msra.mxu0 %v19405_v38  ;;  %13310 = vmatprep.subr.bf16.mxu1 %v19410_v50  ;;  %v19449_v38 = vld [vmem:[%s21601_s18 + $0x24c] ss:$16 sps:$4 sm:$0xff]   ;;  %v10176_v50 = vpack.c.bf16 %v10144_v47, %v10144_v47  ;;  %v19465_v47 = vld [vmem:[%s21601_s18 + $0x2a8] ss:$16 sps:$4 sm:$0xff]  }
0x1031   : > { %13718 = vmatprep.subr.bf16.mxu0 %v19413_v43  ;;  %v19444_v43 = vld [vmem:[%s21601_s18 + $0x240] ss:$16 sps:$4 sm:$0xff]  }
0x1033   : > { %13311 = vmatpush1.bf16.msra.mxu1 %v19408_v14  ;;  %v19452_v14 = vld [vmem:[%s21601_s18 + $0x264] ss:$16 sps:$4 sm:$0xff]  }
0x1034   : > { %13719 = vmatpush1.bf16.msra.mxu0 %v19411_v1  ;;  %13312 = vmatprep.subr.bf16.mxu1 %v19416_v12  ;;  %v19455_v1 = vld [vmem:[%s21601_s18 + $0x26c] ss:$16 sps:$4 sm:$0xff]   ;;  %v19450_v12 = vld [vmem:[%s21601_s18 + $0x260] ss:$16 sps:$4 sm:$0xff]  }
0x1035   : > { %13720 = vmatprep.subr.bf16.mxu0 %v19419_v31  ;;  %v23619_v31 = vld [vmem:[%s21595_s2 + $0x8] sm:$0xff]  ;;  %s24578_s2 = scalar_lea.vmem [#allocation19], %s21573_s15 }
0x1036   : > { %v23640_v54 = vrot.slane %v23619_v31, %v22285_v20 }
0x1037   : > { %13313 = vmatpush1.bf16.msra.mxu1 %v19414_v15  ;;  %v19453_v15 = vld [vmem:[%s21601_s18 + $0x268] ss:$16 sps:$4 sm:$0xff]  }
0x1038   : > { %13721 = vmatpush1.bf16.msra.mxu0 %v19417_v3  ;;  %13314 = vmatprep.subr.bf16.mxu1 %v19422_v25  ;;  %v19458_v3 = vld [vmem:[%s21601_s18 + $0x284] ss:$16 sps:$4 sm:$0xff]   ;;  %v19461_v25 = vld [vmem:[%s21601_s18 + $0x28c] ss:$16 sps:$4 sm:$0xff]  }
0x1039   : > { %13722 = vmatprep.subr.bf16.mxu0 %v19425_v44  ;;  %v23626_v44 = vrot.slane %v23619_v31, %v22115_v33 }
0x103b   : > { %13315 = vmatpush1.bf16.msra.mxu1 %v19420_v16  ;;  %v19456_v16 = vld [vmem:[%s21601_s18 + $0x280] ss:$16 sps:$4 sm:$0xff]  }
0x103c   : > { %13723 = vmatpush1.bf16.msra.mxu0 %v19423_v45  ;;  %13316 = vmatprep.subr.bf16.mxu1 %v19428_v41  ;;  %v23635_v45 = vrot.slane %v23619_v31, %v22118_v34  ;;  %v19459_v41 = vld [vmem:[%s21601_s18 + $0x288] ss:$16 sps:$4 sm:$0xff]  }
0x103d   : > { %13724 = vmatprep.subr.bf16.mxu0 %v19431_v30  ;;  %v19464_v30 = vld [vmem:[%s21601_s18 + $0x2a4] ss:$16 sps:$4 sm:$0xff]  }
0x103f   : > { %13317 = vmatpush1.bf16.msra.mxu1 %v19426_v49 }
0x1040   : > { %13725 = vmatpush1.bf16.msra.mxu0 %v19429_v26  ;;  %13337 = vmatprep.subr.bf16.mxu1 %v19434_v8  ;;  %v19467_v26 = vld [vmem:[%s21601_s18 + $0x2ac] ss:$16 sps:$4 sm:$0xff]  }
0x1041   : > { %13745 = vmatprep.subr.bf16.mxu0 %v19437_v57 }
0x1042   : > { %13319 = vmatmul.mubr.bf16.vlgmr.msra.gmra.mrb[84].mxu1 %v23290_v48 }
0x1043   : > { %13727 = vmatmul.mubr.bf16.vlgmr.msra.gmra.mrb[84].mxu0 %v23290_v48  ;;  %13328 = vmatprep.mubr.bf16.mxu1 %v10177_v22  ;;  %v19447_v48 = vld [vmem:[%s21601_s18 + $0x248] ss:$16 sps:$4 sm:$0xff]  }
0x1044   : > { %13338 = vmatpush1.bf16.msra.mxu1 %v19432_v0  ;;  %13736 = vmatprep.mubr.bf16.mxu0 %v10177_v22 }
0x1045   : > { %13746 = vmatpush1.bf16.msra.mxu0 %v19435_v61  ;;  %13339 = vmatprep.subr.bf16.mxu1 %v19440_v62  ;;  %v19462_v61 = vld [vmem:[%s21601_s18 + $0x2a0] ss:$16 sps:$4 sm:$0xff]  }
0x1046   : > { %13747 = vmatprep.subr.bf16.mxu0 %v19443_v58 }
0x1048   : > { %13340 = vmatpush1.bf16.msra.mxu1 %v19438_v51 }
0x1049   : > { %13748 = vmatpush1.bf16.msra.mxu0 %v19441_v21  ;;  %13341 = vmatprep.subr.bf16.mxu1 %v19446_v7 }
0x104a   : > { %13329 = vmatmul.mubr.bf16.gmra.mrb[88].mxu1 %v10176_v50  ;;  %13749 = vmatprep.subr.bf16.mxu0 %v19449_v38  ;;  %v19470_v38 = vld [vmem:[%s21601_s18 + $0x2c4] ss:$16 sps:$4 sm:$0xff]  }
0x104b   : > { %13737 = vmatmul.mubr.bf16.gmra.mrb[88].mxu0 %v10176_v50  ;;  %13369 = vmatprep.mubr.bf16.mxu1 %v23298_v9 }
0x104c   : > { %13342 = vmatpush1.bf16.msra.mxu1 %v19444_v43  ;;  %13777 = vmatprep.mubr.bf16.mxu0 %v23298_v9  ;;  %v23631_v9 = vrot.slane %v23619_v31, %v22282_v40 }
0x104d   : > { %13750 = vmatpush1.bf16.msra.mxu0 %v19447_v48  ;;  %13343 = vmatprep.subr.bf16.mxu1 %v19452_v14  ;;  %v19473_v14 = vld [vmem:[%s21601_s18 + $0x2cc] ss:$16 sps:$4 sm:$0xff]  }
0x104e   : > { %13751 = vmatprep.subr.bf16.mxu0 %v19455_v1 }
0x1050   : > { %13344 = vmatpush1.bf16.msra.mxu1 %v19450_v12 }
0x1051   : > { %13752 = vmatpush1.bf16.msra.mxu0 %v19453_v15  ;;  %13345 = vmatprep.subr.bf16.mxu1 %v19458_v3 }
0x1052   : > { %13753 = vmatprep.subr.bf16.mxu0 %v19461_v25  ;;  %v9789_v49 = vpop.f32.mrb[68].mxu1 }
0x1053   : > { %v18135_v8 = vadd.f32 %v9789_v49, %v23626_v44  ;;  %v9891_v37 = vpop.f32.mrb[68].mxu0  ;;  %v9791_v57 = vpop.f32.mrb[69].mxu1 }
0x1054   : > { %13346 = vmatpush1.bf16.msra.mxu1 %v19456_v16  ;;  %v18141_v6 = vadd.f32 %v9891_v37, %v23631_v9  ;;  %v18136_v0 = vadd.f32 %v9791_v57, %v23635_v45  ;;  %v9893_v22 = vpop.f32.mrb[69].mxu0  ;;  %v9793_v62 = vpop.f32.mrb[70].mxu1  ;;  %v19471_v57 = vld [vmem:[%s21601_s18 + $0x2c8] ss:$16 sps:$4 sm:$0xff]  }
0x1055   : > { %13754 = vmatpush1.bf16.msra.mxu0 %v19459_v41  ;;  %v18142_v58 = vadd.f32 %v9893_v22, %v23640_v54  ;;  %13347 = vmatprep.subr.bf16.mxu1 %v19464_v30  ;;  %v18137_v51 = vadd.f32 %v9793_v62, %v23626_v44  ;;  %v9895_v21 = vpop.f32.mrb[70].mxu0  ;;  %v9795_v7 = vpop.f32.mrb[71].mxu1  ;;  %v10120_v1 = vmax.f32 %v18135_v8, 0.0  ;;  %v19468_v30 = vld [vmem:[%s21601_s18 + $0x2c0] ss:$16 sps:$4 sm:$0xff]  }
0x1056   : > { %13755 = vmatprep.subr.bf16.mxu0 %v19467_v26  ;;  %v18143_v50 = vadd.f32 %v9895_v21, %v23631_v9  ;;  %v18138_v43 = vadd.f32 %v9795_v7, %v23635_v45  ;;  %v9897_v48 = vpop.f32.mrb[71].mxu0  ;;  %v10122_v3 = vmax.f32 %v18141_v6, 0.0  ;;  %v10121_v25 = vmax.f32 %v18136_v0, 0.0  ;;  %v19476_v8 = vld [vmem:[%s21601_s18 + $0x2e4] ss:$16 sps:$4 sm:$0xff]  }
0x1057   : > { %v10136_v12 = vmax.f32 %v18137_v51, 0.0  ;;  %v18144_v15 = vadd.f32 %v9897_v48, %v23640_v54  ;;  %v10123_v49 = vmax.f32 %v18142_v58, 0.0  ;;  %v19479_v0 = vld [vmem:[%s21601_s18 + $0x2ec] ss:$16 sps:$4 sm:$0xff]   ;;  %v19474_v21 = vld [vmem:[%s21601_s18 + $0x2e0] ss:$16 sps:$4 sm:$0xff]  }
0x1058   : > { %v10138_v16 = vmax.f32 %v18143_v50, 0.0  ;;  %13348 = vmatpush1.bf16.msra.mxu1 %v19462_v61  ;;  %v10137_v41 = vmax.f32 %v18138_v43, 0.0  ;;  %v19482_v48 = vld [vmem:[%s21601_s18 + $0x304] ss:$16 sps:$4 sm:$0xff]  }
0x1059   : > { %v23657_v26 = vpack.c.bf16 %v10136_v12, %v10120_v1  ;;  %13756 = vmatpush1.bf16.msra.mxu0 %v19465_v47  ;;  %v10139_v37 = vmax.f32 %v18144_v15, 0.0  ;;  %13349 = vmatprep.subr.bf16.mxu1 %v19470_v38  ;;  %v19477_v38 = vld [vmem:[%s21601_s18 + $0x2e8] ss:$16 sps:$4 sm:$0xff]   ;;  %v19485_v1 = vld [vmem:[%s21601_s18 + $0x30c] ss:$16 sps:$4 sm:$0xff]  }
0x105a   : > { %v23661_v22 = vpack.c.bf16 %v10138_v16, %v10122_v3  ;;  %v23663_v62 = vpack.c.bf16 %v10137_v41, %v10121_v25  ;;  %13757 = vmatprep.subr.bf16.mxu0 %v19473_v14  ;;  %v23665_v6 = vpop.f32.mrb[72].mxu1  ;;  %v19480_v12 = vld [vmem:[%s21601_s18 + $0x300] ss:$16 sps:$4 sm:$0xff]   ;;  %v19483_v15 = vld [vmem:[%s21601_s18 + $0x308] ss:$16 sps:$4 sm:$0xff]  }
0x105b   : > { %v23668_v61 = vpack.c.bf16 %v10139_v37, %v10123_v49  ;;  %v23670_v58 = vpop.f32.mrb[72].mxu0  ;;  %v23672_v47 = vpop.f32.mrb[73].mxu1  ;;  %v19488_v3 = vld [vmem:[%s21601_s18 + $0x324] ss:$16 sps:$4 sm:$0xff]   ;;  %v19491_v25 = vld [vmem:[%s21601_s18 + $0x32c] ss:$16 sps:$4 sm:$0xff]  }
0x105c   : > { %13350 = vmatpush1.bf16.msra.mxu1 %v19468_v30  ;;  %v23674_v51 = vpop.f32.mrb[73].mxu0  ;;  %v9803_v7 = vpop.f32.mrb[74].mxu1  ;;  %v19486_v16 = vld [vmem:[%s21601_s18 + $0x320] ss:$16 sps:$4 sm:$0xff]   ;;  %v19489_v41 = vld [vmem:[%s21601_s18 + $0x328] ss:$16 sps:$4 sm:$0xff]  }
0x105d   : > { %13758 = vmatpush1.bf16.msra.mxu0 %v19471_v57  ;;  %13351 = vmatprep.subr.bf16.mxu1 %v19476_v8  ;;  %v9905_v50 = vpop.f32.mrb[74].mxu0  ;;  %v9804_v43 = vpop.f32.mrb[75].mxu1  ;;  %v19494_v30 = vld [vmem:[%s21601_s18 + $0x344] ss:$16 sps:$4 sm:$0xff]   ;;  %v19497_v49 = vld [vmem:[%s21601_s18 + $0x34c] ss:$16 sps:$4 sm:$0xff]  }
0x105e   : > { %13759 = vmatprep.subr.bf16.mxu0 %v19479_v0  ;;  %v9906_v14 = vpop.f32.mrb[75].mxu0  ;;  %v19492_v37 = vld [vmem:[%s21601_s18 + $0x340] ss:$16 sps:$4 sm:$0xff]   ;;  %v19495_v57 = vld [vmem:[%s21601_s18 + $0x348] ss:$16 sps:$4 sm:$0xff]  }
0x105f   : > { %v19500_v8 = vld [vmem:[%s21601_s18 + $0x364] ss:$16 sps:$4 sm:$0xff]   ;;  %v19503_v0 = vld [vmem:[%s21601_s18 + $0x36c] ss:$16 sps:$4 sm:$0xff]   ;;  %v19501_v7 = vld [vmem:[%s21601_s18 + $0x368] ss:$16 sps:$4 sm:$0xff]  }
0x1060   : > { %13352 = vmatpush1.bf16.msra.mxu1 %v19474_v21  ;;  %v19498_v21 = vld [vmem:[%s21601_s18 + $0x360] ss:$16 sps:$4 sm:$0xff]   ;;  %v19509_v50 = vld [vmem:[%s21601_s18 + $0x38c] ss:$16 sps:$4 sm:$0xff]   ;;  %v19512_v14 = vld [vmem:[%s21601_s18 + $0x3a4] ss:$16 sps:$4 sm:$0xff]  }
0x1061   : > { %13760 = vmatpush1.bf16.msra.mxu0 %v19477_v38  ;;  %13353 = vmatprep.subr.bf16.mxu1 %v19482_v48  ;;  %v19506_v38 = vld [vmem:[%s21601_s18 + $0x384] ss:$16 sps:$4 sm:$0xff]   ;;  %v19504_v43 = vld [vmem:[%s21601_s18 + $0x380] ss:$16 sps:$4 sm:$0xff]   ;;  %v19507_v48 = vld [vmem:[%s21601_s18 + $0x388] ss:$16 sps:$4 sm:$0xff]  }
0x1062   : > { %13761 = vmatprep.subr.bf16.mxu0 %v19485_v1  ;;  %v19515_v1 = vld [vmem:[%s21601_s18 + $0x3ac] ss:$16 sps:$4 sm:$0xff]  }
0x1064   : > { %13354 = vmatpush1.bf16.msra.mxu1 %v19480_v12  ;;  %v19510_v12 = vld [vmem:[%s21601_s18 + $0x3a0] ss:$16 sps:$4 sm:$0xff]  }
0x1065   : > { %13762 = vmatpush1.bf16.msra.mxu0 %v19483_v15  ;;  %13355 = vmatprep.subr.bf16.mxu1 %v19488_v3  ;;  %v19513_v15 = vld [vmem:[%s21601_s18 + $0x3a8] ss:$16 sps:$4 sm:$0xff]   ;;  %v19518_v3 = vld [vmem:[%s21601_s18 + $0x3c4] ss:$16 sps:$4 sm:$0xff]  }
0x1066   : > { %13763 = vmatprep.subr.bf16.mxu0 %v19491_v25  ;;  %v19521_v25 = vld [vmem:[%s21601_s18 + $0x3cc] ss:$16 sps:$4 sm:$0xff]  }
0x1068   : > { %13356 = vmatpush1.bf16.msra.mxu1 %v19486_v16  ;;  %v19516_v16 = vld [vmem:[%s21601_s18 + $0x3c0] ss:$16 sps:$4 sm:$0xff]  }
0x1069   : > { %13764 = vmatpush1.bf16.msra.mxu0 %v19489_v41  ;;  %13357 = vmatprep.subr.bf16.mxu1 %v19494_v30  ;;  %v19519_v41 = vld [vmem:[%s21601_s18 + $0x3c8] ss:$16 sps:$4 sm:$0xff]   ;;  %v19524_v30 = vld [vmem:[%s21601_s18 + $0x3e4] ss:$16 sps:$4 sm:$0xff]  }
0x106a   : > { %13765 = vmatprep.subr.bf16.mxu0 %v19497_v49  ;;  %v18122_v49 = vadd.f32 %v23308_v23, %v23269_v52  ;;  %v19528_v52 = vld [vmem:[%s21601_s18 + $0x400] ss:$16 sps:$4 sm:$0xff]  }
0x106c   : > { %13358 = vmatpush1.bf16.msra.mxu1 %v19492_v37  ;;  %v19527_v37 = vld [vmem:[%s21601_s18 + $0x3ec] ss:$16 sps:$4 sm:$0xff]  }
0x106d   : > { %13766 = vmatpush1.bf16.msra.mxu0 %v19495_v57  ;;  %13359 = vmatprep.subr.bf16.mxu1 %v19500_v8  ;;  %v19522_v57 = vld [vmem:[%s21601_s18 + $0x3e0] ss:$16 sps:$4 sm:$0xff]   ;;  %v19525_v8 = vld [vmem:[%s21601_s18 + $0x3e8] ss:$16 sps:$4 sm:$0xff]  }
0x106e   : > { %13767 = vmatprep.subr.bf16.mxu0 %v19503_v0  ;;  %v19530_v0 = vld [vmem:[%s21601_s18 + $0x404] ss:$16 sps:$4 sm:$0xff]  }
0x1070   : > { %13360 = vmatpush1.bf16.msra.mxu1 %v19498_v21  ;;  %v10147_v21 = vmax.f32 %v18122_v49, 0.0  ;;  %v19554_v49 = vld [vmem:[%s21601_s18 + $0x484] ss:$16 sps:$4 sm:$0xff]  }
0x1071   : > { %13768 = vmatpush1.bf16.msra.mxu0 %v19501_v7  ;;  %13361 = vmatprep.subr.bf16.mxu1 %v19506_v38  ;;  %v19533_v7 = vld [vmem:[%s21601_s18 + $0x40c] ss:$16 sps:$4 sm:$0xff]   ;;  %v18121_v38 = vadd.f32 %v23302_v18, %v23261_v2  ;;  %v19534_v2 = vld [vmem:[%s21601_s18 + $0x420] ss:$16 sps:$4 sm:$0xff]   ;;  %v19537_v18 = vld [vmem:[%s21601_s18 + $0x428] ss:$16 sps:$4 sm:$0xff]  }
0x1072   : > { %13769 = vmatprep.subr.bf16.mxu0 %v19509_v50  ;;  %v10179_v23 = vpack.c.bf16 %v10147_v21, %v10147_v21  ;;  %v19531_v50 = vld [vmem:[%s21601_s18 + $0x408] ss:$16 sps:$4 sm:$0xff]   ;;  %v19558_v21 = vld [vmem:[%s21601_s18 + $0x4a0] ss:$16 sps:$4 sm:$0xff]  }
0x1074   : > { %13362 = vmatpush1.bf16.msra.mxu1 %v19504_v43  ;;  %v19536_v43 = vld [vmem:[%s21601_s18 + $0x424] ss:$16 sps:$4 sm:$0xff]  }
0x1075   : > { %13770 = vmatpush1.bf16.msra.mxu0 %v19507_v48  ;;  %13363 = vmatprep.subr.bf16.mxu1 %v19512_v14  ;;  %v19539_v48 = vld [vmem:[%s21601_s18 + $0x42c] ss:$16 sps:$4 sm:$0xff]   ;;  %v10146_v14 = vmax.f32 %v18121_v38, 0.0  ;;  %v19566_v38 = vld [vmem:[%s21601_s18 + $0x4c4] ss:$16 sps:$4 sm:$0xff]  }
0x1076   : > { %13771 = vmatprep.subr.bf16.mxu0 %v19515_v1  ;;  %v19542_v1 = vld [vmem:[%s21601_s18 + $0x444] ss:$16 sps:$4 sm:$0xff]  }
0x1078   : > { %13364 = vmatpush1.bf16.msra.mxu1 %v19510_v12  ;;  %v19545_v12 = vld [vmem:[%s21601_s18 + $0x44c] ss:$16 sps:$4 sm:$0xff]  }
0x1079   : > { %13772 = vmatpush1.bf16.msra.mxu0 %v19513_v15  ;;  %13365 = vmatprep.subr.bf16.mxu1 %v19518_v3  ;;  %v10178_v15 = vpack.c.bf16 %v10146_v14, %v10146_v14  ;;  %v19540_v3 = vld [vmem:[%s21601_s18 + $0x440] ss:$16 sps:$4 sm:$0xff]  }
0x107a   : > { %13773 = vmatprep.subr.bf16.mxu0 %v19521_v25  ;;  %v19548_v25 = vld [vmem:[%s21601_s18 + $0x464] ss:$16 sps:$4 sm:$0xff]   ;;  %v19570_v14 = vld [vmem:[%s21601_s18 + $0x4e0] ss:$16 sps:$4 sm:$0xff]  }
0x107c   : > { %13366 = vmatpush1.bf16.msra.mxu1 %v19516_v16  ;;  %v19551_v16 = vld [vmem:[%s21601_s18 + $0x46c] ss:$16 sps:$4 sm:$0xff]  }
0x107d   : > { %13774 = vmatpush1.bf16.msra.mxu0 %v19519_v41  ;;  %13367 = vmatprep.subr.bf16.mxu1 %v19524_v30  ;;  %v19546_v41 = vld [vmem:[%s21601_s18 + $0x460] ss:$16 sps:$4 sm:$0xff]   ;;  %v19549_v30 = vld [vmem:[%s21601_s18 + $0x468] ss:$16 sps:$4 sm:$0xff]  }
0x107e   : > { %13775 = vmatprep.subr.bf16.mxu0 %v19527_v37  ;;  %v19557_v37 = vld [vmem:[%s21601_s18 + $0x48c] ss:$16 sps:$4 sm:$0xff]  }
0x1080   : > { %13368 = vmatpush1.bf16.msra.mxu1 %v19522_v57  ;;  %v19552_v57 = vld [vmem:[%s21601_s18 + $0x480] ss:$16 sps:$4 sm:$0xff]  }
0x1081   : > { %13776 = vmatpush1.bf16.msra.mxu0 %v19525_v8  ;;  %13388 = vmatprep.subr.bf16.mxu1 %v19530_v0  ;;  %v19555_v8 = vld [vmem:[%s21601_s18 + $0x488] ss:$16 sps:$4 sm:$0xff]   ;;  %v19560_v0 = vld [vmem:[%s21601_s18 + $0x4a4] ss:$16 sps:$4 sm:$0xff]  }
0x1082   : > { %13796 = vmatprep.subr.bf16.mxu0 %v19533_v7  ;;  %v19561_v7 = vld [vmem:[%s21601_s18 + $0x4a8] ss:$16 sps:$4 sm:$0xff]  }
0x1083   : > { %13370 = vmatmul.mubr.bf16.vlgmr.msra.gmra.mrb[84].mxu1 %v23292_v13 }
0x1084   : > { %13778 = vmatmul.mubr.bf16.vlgmr.msra.gmra.mrb[84].mxu0 %v23292_v13  ;;  %13379 = vmatprep.mubr.bf16.mxu1 %v10179_v23  ;;  %v19543_v13 = vld [vmem:[%s21601_s18 + $0x448] ss:$16 sps:$4 sm:$0xff]  }
0x1085   : > { %13389 = vmatpush1.bf16.msra.mxu1 %v19528_v52  ;;  %13787 = vmatprep.mubr.bf16.mxu0 %v10179_v23  ;;  %v19569_v52 = vld [vmem:[%s21601_s18 + $0x4cc] ss:$16 sps:$4 sm:$0xff]   ;;  %v19564_v23 = vld [vmem:[%s21601_s18 + $0x4c0] ss:$16 sps:$4 sm:$0xff]  }
0x1086   : > { %13797 = vmatpush1.bf16.msra.mxu0 %v19531_v50  ;;  %13390 = vmatprep.subr.bf16.mxu1 %v19536_v43  ;;  %v19567_v50 = vld [vmem:[%s21601_s18 + $0x4c8] ss:$16 sps:$4 sm:$0xff]   ;;  %v19572_v43 = vld [vmem:[%s21601_s18 + $0x4e4] ss:$16 sps:$4 sm:$0xff]  }
0x1087   : > { %13798 = vmatprep.subr.bf16.mxu0 %v19539_v48  ;;  %v19575_v48 = vld [vmem:[%s21601_s18 + $0x4ec] ss:$16 sps:$4 sm:$0xff]  }
0x1089   : > { %13391 = vmatpush1.bf16.msra.mxu1 %v19534_v2  ;;  %v19573_v2 = vld [vmem:[%s21601_s18 + $0x4e8] ss:$16 sps:$4 sm:$0xff]  }
0x108a   : > { %13799 = vmatpush1.bf16.msra.mxu0 %v19537_v18  ;;  %13392 = vmatprep.subr.bf16.mxu1 %v19542_v1  ;;  %v19578_v18 = vld [vmem:[%s21601_s18 + $0x504] ss:$16 sps:$4 sm:$0xff]   ;;  %v19581_v1 = vld [vmem:[%s21601_s18 + $0x50c] ss:$16 sps:$4 sm:$0xff]  }
0x108b   : > { %13380 = vmatmul.mubr.bf16.gmra.mrb[92].mxu1 %v10178_v15  ;;  %13800 = vmatprep.subr.bf16.mxu0 %v19545_v12  ;;  %v19576_v12 = vld [vmem:[%s21601_s18 + $0x500] ss:$16 sps:$4 sm:$0xff]  }
0x108c   : > { %13788 = vmatmul.mubr.bf16.gmra.mrb[92].mxu0 %v10178_v15  ;;  %13420 = vmatprep.mubr.bf16.mxu1 %v23479_v42  ;;  %v19579_v15 = vld [vmem:[%s21601_s18 + $0x508] ss:$16 sps:$4 sm:$0xff]  }
0x108d   : > { %13393 = vmatpush1.bf16.msra.mxu1 %v19540_v3  ;;  %13828 = vmatprep.mubr.bf16.mxu0 %v23479_v42  ;;  %v19563_v42 = vld [vmem:[%s21601_s18 + $0x4ac] ss:$16 sps:$4 sm:$0xff]   ;;  %v19584_v3 = vld [vmem:[%s21601_s18 + $0x524] ss:$16 sps:$4 sm:$0xff]  }
0x108e   : > { %13801 = vmatpush1.bf16.msra.mxu0 %v19543_v13  ;;  %13394 = vmatprep.subr.bf16.mxu1 %v19548_v25  ;;  %v19587_v13 = vld [vmem:[%s21601_s18 + $0x52c] ss:$16 sps:$4 sm:$0xff]   ;;  %v19582_v25 = vld [vmem:[%s21601_s18 + $0x520] ss:$16 sps:$4 sm:$0xff]  }
0x108f   : > { %13802 = vmatprep.subr.bf16.mxu0 %v19551_v16  ;;  %v19585_v16 = vld [vmem:[%s21601_s18 + $0x528] ss:$16 sps:$4 sm:$0xff]  }
0x1091   : > { %13395 = vmatpush1.bf16.msra.mxu1 %v19546_v41  ;;  %v19590_v41 = vld [vmem:[%s21601_s18 + $0x544] ss:$16 sps:$4 sm:$0xff]  }
0x1092   : > { %13803 = vmatpush1.bf16.msra.mxu0 %v19549_v30  ;;  %13396 = vmatprep.subr.bf16.mxu1 %v19554_v49  ;;  %v19593_v30 = vld [vmem:[%s21601_s18 + $0x54c] ss:$16 sps:$4 sm:$0xff]   ;;  %v19588_v49 = vld [vmem:[%s21601_s18 + $0x540] ss:$16 sps:$4 sm:$0xff]  }
0x1093   : > { %13804 = vmatprep.subr.bf16.mxu0 %v19557_v37  ;;  %v19591_v37 = vld [vmem:[%s21601_s18 + $0x548] ss:$16 sps:$4 sm:$0xff]  }
0x1095   : > { %13397 = vmatpush1.bf16.msra.mxu1 %v19552_v57  ;;  %v19596_v57 = vld [vmem:[%s21601_s18 + $0x564] ss:$16 sps:$4 sm:$0xff]  }
0x1096   : > { %13805 = vmatpush1.bf16.msra.mxu0 %v19555_v8  ;;  %13398 = vmatprep.subr.bf16.mxu1 %v19560_v0  ;;  %v19599_v8 = vld [vmem:[%s21601_s18 + $0x56c] ss:$16 sps:$4 sm:$0xff]   ;;  %v19594_v0 = vld [vmem:[%s21601_s18 + $0x560] ss:$16 sps:$4 sm:$0xff]  }
0x1097   : > { %13806 = vmatprep.subr.bf16.mxu0 %v19563_v42  ;;  %v19597_v42 = vld [vmem:[%s21601_s18 + $0x568] ss:$16 sps:$4 sm:$0xff]  }
0x1099   : > { %13399 = vmatpush1.bf16.msra.mxu1 %v19558_v21  ;;  %v19602_v21 = vld [vmem:[%s21601_s18 + $0x584] ss:$16 sps:$4 sm:$0xff]  }
0x109a   : > { %13807 = vmatpush1.bf16.msra.mxu0 %v19561_v7  ;;  %13400 = vmatprep.subr.bf16.mxu1 %v19566_v38  ;;  %v19605_v7 = vld [vmem:[%s21601_s18 + $0x58c] ss:$16 sps:$4 sm:$0xff]   ;;  %v19600_v38 = vld [vmem:[%s21601_s18 + $0x580] ss:$16 sps:$4 sm:$0xff]  }
0x109b   : > { %13808 = vmatprep.subr.bf16.mxu0 %v19569_v52  ;;  %v19603_v52 = vld [vmem:[%s21601_s18 + $0x588] ss:$16 sps:$4 sm:$0xff]  }
0x109d   : > { %13401 = vmatpush1.bf16.msra.mxu1 %v19564_v23  ;;  %v19608_v23 = vld [vmem:[%s21601_s18 + $0x5a4] ss:$16 sps:$4 sm:$0xff]  }
0x109e   : > { %13809 = vmatpush1.bf16.msra.mxu0 %v19567_v50  ;;  %13402 = vmatprep.subr.bf16.mxu1 %v19572_v43  ;;  %v19611_v50 = vld [vmem:[%s21601_s18 + $0x5ac] ss:$16 sps:$4 sm:$0xff]   ;;  %v19606_v43 = vld [vmem:[%s21601_s18 + $0x5a0] ss:$16 sps:$4 sm:$0xff]  }
0x109f   : > { %13810 = vmatprep.subr.bf16.mxu0 %v19575_v48  ;;  %v19609_v48 = vld [vmem:[%s21601_s18 + $0x5a8] ss:$16 sps:$4 sm:$0xff]  }
0x10a1   : > { %13403 = vmatpush1.bf16.msra.mxu1 %v19570_v14  ;;  %v19614_v14 = vld [vmem:[%s21601_s18 + $0x5c4] ss:$16 sps:$4 sm:$0xff]  }
0x10a2   : > { %13811 = vmatpush1.bf16.msra.mxu0 %v19573_v2  ;;  %13404 = vmatprep.subr.bf16.mxu1 %v19578_v18  ;;  %v19617_v2 = vld [vmem:[%s21601_s18 + $0x5cc] ss:$16 sps:$4 sm:$0xff]   ;;  %v19612_v18 = vld [vmem:[%s21601_s18 + $0x5c0] ss:$16 sps:$4 sm:$0xff]  }
0x10a3   : > { %13812 = vmatprep.subr.bf16.mxu0 %v19581_v1  ;;  %v19615_v1 = vld [vmem:[%s21601_s18 + $0x5c8] ss:$16 sps:$4 sm:$0xff]  }
0x10a5   : > { %13405 = vmatpush1.bf16.msra.mxu1 %v19576_v12  ;;  %v19620_v12 = vld [vmem:[%s21601_s18 + $0x5e4] ss:$16 sps:$4 sm:$0xff]  }
0x10a6   : > { %13813 = vmatpush1.bf16.msra.mxu0 %v19579_v15  ;;  %13406 = vmatprep.subr.bf16.mxu1 %v19584_v3  ;;  %v18128_v15 = vadd.f32 %v23489_v24, %v23453_v28  ;;  %v19623_v3 = vld [vmem:[%s21601_s18 + $0x5ec] ss:$16 sps:$4 sm:$0xff]   ;;  %v19624_v28 = vld [vmem:[%s21601_s18 + $0x600] ss:$16 sps:$4 sm:$0xff]  }
0x10a7   : > { %13814 = vmatprep.subr.bf16.mxu0 %v19587_v13  ;;  %v19618_v13 = vld [vmem:[%s21601_s18 + $0x5e0] ss:$16 sps:$4 sm:$0xff]  }
0x10a9   : > { %13407 = vmatpush1.bf16.msra.mxu1 %v19582_v25  ;;  %v19621_v25 = vld [vmem:[%s21601_s18 + $0x5e8] ss:$16 sps:$4 sm:$0xff]  }
0x10aa   : > { %13815 = vmatpush1.bf16.msra.mxu0 %v19585_v16  ;;  %13408 = vmatprep.subr.bf16.mxu1 %v19590_v41  ;;  %v19626_v16 = vld [vmem:[%s21601_s18 + $0x604] ss:$16 sps:$4 sm:$0xff]   ;;  %v10149_v41 = vmax.f32 %v18128_v15, 0.0  ;;  %v23824_v15 = vrot.slane %v23619_v31, %v22364_v55 }
0x10ab   : > { %13816 = vmatprep.subr.bf16.mxu0 %v19593_v30  ;;  %v19629_v30 = vld [vmem:[%s21601_s18 + $0x60c] ss:$16 sps:$4 sm:$0xff]  }
0x10ac   : > { %v10181_v24 = vpack.c.bf16 %v10149_v41, %v10149_v41 }
0x10ad   : > { %13409 = vmatpush1.bf16.msra.mxu1 %v19588_v49  ;;  %v18127_v49 = vadd.f32 %v23481_v46, %v23443_v10  ;;  %v19630_v10 = vld [vmem:[%s21601_s18 + $0x620] ss:$16 sps:$4 sm:$0xff]   ;;  %v19633_v46 = vld [vmem:[%s21601_s18 + $0x628] ss:$16 sps:$4 sm:$0xff]  }
0x10ae   : > { %13817 = vmatpush1.bf16.msra.mxu0 %v19591_v37  ;;  %13410 = vmatprep.subr.bf16.mxu1 %v19596_v57  ;;  %v19627_v37 = vld [vmem:[%s21601_s18 + $0x608] ss:$16 sps:$4 sm:$0xff]   ;;  %v19632_v57 = vld [vmem:[%s21601_s18 + $0x624] ss:$16 sps:$4 sm:$0xff]  }
0x10af   : > { %13818 = vmatprep.subr.bf16.mxu0 %v19599_v8  ;;  %v19635_v8 = vld [vmem:[%s21601_s18 + $0x62c] ss:$16 sps:$4 sm:$0xff]  }
0x10b1   : > { %13411 = vmatpush1.bf16.msra.mxu1 %v19594_v0  ;;  %v10148_v0 = vmax.f32 %v18127_v49, 0.0 }
0x10b2   : > { %13819 = vmatpush1.bf16.msra.mxu0 %v19597_v42  ;;  %13412 = vmatprep.subr.bf16.mxu1 %v19602_v21  ;;  %v19638_v42 = vld [vmem:[%s21601_s18 + $0x644] ss:$16 sps:$4 sm:$0xff]   ;;  %v19641_v21 = vld [vmem:[%s21601_s18 + $0x64c] ss:$16 sps:$4 sm:$0xff]  }
0x10b3   : > { %13820 = vmatprep.subr.bf16.mxu0 %v19605_v7  ;;  %v10180_v7 = vpack.c.bf16 %v10148_v0, %v10148_v0 }
0x10b5   : > { %13413 = vmatpush1.bf16.msra.mxu1 %v19600_v38  ;;  %v19636_v38 = vld [vmem:[%s21601_s18 + $0x640] ss:$16 sps:$4 sm:$0xff]  }
0x10b6   : > { %13821 = vmatpush1.bf16.msra.mxu0 %v19603_v52  ;;  %13414 = vmatprep.subr.bf16.mxu1 %v19608_v23  ;;  %v19644_v52 = vld [vmem:[%s21601_s18 + $0x664] ss:$16 sps:$4 sm:$0xff]   ;;  %v19647_v23 = vld [vmem:[%s21601_s18 + $0x66c] ss:$16 sps:$4 sm:$0xff]  }
0x10b7   : > { %13822 = vmatprep.subr.bf16.mxu0 %v19611_v50  ;;  %v19642_v50 = vld [vmem:[%s21601_s18 + $0x660] ss:$16 sps:$4 sm:$0xff]  }
0x10b9   : > { %13415 = vmatpush1.bf16.msra.mxu1 %v19606_v43  ;;  %v19645_v43 = vld [vmem:[%s21601_s18 + $0x668] ss:$16 sps:$4 sm:$0xff]  }
0x10ba   : > { %13823 = vmatpush1.bf16.msra.mxu0 %v19609_v48  ;;  %13416 = vmatprep.subr.bf16.mxu1 %v19614_v14  ;;  %v19650_v48 = vld [vmem:[%s21601_s18 + $0x684] ss:$16 sps:$4 sm:$0xff]   ;;  %v19653_v14 = vld [vmem:[%s21601_s18 + $0x68c] ss:$16 sps:$4 sm:$0xff]  }
0x10bb   : > { %13824 = vmatprep.subr.bf16.mxu0 %v19617_v2  ;;  %v23810_v2 = vrot.slane %v23619_v31, %v22243_v35 }
0x10bd   : > { %13417 = vmatpush1.bf16.msra.mxu1 %v19612_v18  ;;  %v19648_v18 = vld [vmem:[%s21601_s18 + $0x680] ss:$16 sps:$4 sm:$0xff]  }
0x10be   : > { %13825 = vmatpush1.bf16.msra.mxu0 %v19615_v1  ;;  %13418 = vmatprep.subr.bf16.mxu1 %v19620_v12  ;;  %v23815_v1 = vrot.slane %v23619_v31, %v22361_v19  ;;  %v19651_v12 = vld [vmem:[%s21601_s18 + $0x688] ss:$16 sps:$4 sm:$0xff]  }
0x10bf   : > { %13826 = vmatprep.subr.bf16.mxu0 %v19623_v3  ;;  %v19656_v3 = vld [vmem:[%s21601_s18 + $0x6a4] ss:$16 sps:$4 sm:$0xff]  }
0x10c1   : > { %13419 = vmatpush1.bf16.msra.mxu1 %v19618_v13 }
0x10c2   : > { %13827 = vmatpush1.bf16.msra.mxu0 %v19621_v25  ;;  %13439 = vmatprep.subr.bf16.mxu1 %v19626_v16  ;;  %v19659_v25 = vld [vmem:[%s21601_s18 + $0x6ac] ss:$16 sps:$4 sm:$0xff]  }
0x10c3   : > { %13847 = vmatprep.subr.bf16.mxu0 %v19629_v30 }
0x10c4   : > { %13421 = vmatmul.mubr.bf16.vlgmr.msra.gmra.mrb[84].mxu1 %v23475_v32 }
0x10c5   : > { %13829 = vmatmul.mubr.bf16.vlgmr.msra.gmra.mrb[84].mxu0 %v23475_v32  ;;  %13430 = vmatprep.mubr.bf16.mxu1 %v10181_v24  ;;  %v19639_v32 = vld [vmem:[%s21601_s18 + $0x648] ss:$16 sps:$4 sm:$0xff]  }
0x10c6   : > { %13440 = vmatpush1.bf16.msra.mxu1 %v19624_v28  ;;  %13838 = vmatprep.mubr.bf16.mxu0 %v10181_v24  ;;  %v19654_v24 = vld [vmem:[%s21601_s18 + $0x6a0] ss:$16 sps:$4 sm:$0xff]  }
0x10c7   : > { %13848 = vmatpush1.bf16.msra.mxu0 %v19627_v37  ;;  %13441 = vmatprep.subr.bf16.mxu1 %v19632_v57  ;;  %v19657_v37 = vld [vmem:[%s21601_s18 + $0x6a8] ss:$16 sps:$4 sm:$0xff]  }
0x10c8   : > { %13849 = vmatprep.subr.bf16.mxu0 %v19635_v8 }
0x10ca   : > { %13442 = vmatpush1.bf16.msra.mxu1 %v19630_v10  ;;  %v19662_v10 = vld [vmem:[%s21601_s18 + $0x6c4] ss:$16 sps:$4 sm:$0xff]  }
0x10cb   : > { %13850 = vmatpush1.bf16.msra.mxu0 %v19633_v46  ;;  %13443 = vmatprep.subr.bf16.mxu1 %v19638_v42 }
0x10cc   : > { %13431 = vmatmul.mubr.bf16.gmra.mrb[96].mxu1 %v10180_v7  ;;  %13851 = vmatprep.subr.bf16.mxu0 %v19641_v21 }
0x10cd   : > { %13839 = vmatmul.mubr.bf16.gmra.mrb[96].mxu0 %v10180_v7  ;;  %13471 = vmatprep.mubr.bf16.mxu1 %v23485_v59  ;;  %v19665_v7 = vld [vmem:[%s21601_s18 + $0x6cc] ss:$16 sps:$4 sm:$0xff]  }
0x10ce   : > { %13444 = vmatpush1.bf16.msra.mxu1 %v19636_v38  ;;  %13879 = vmatprep.mubr.bf16.mxu0 %v23485_v59  ;;  %v23819_v59 = vrot.slane %v23619_v31, %v22246_v36 }
0x10cf   : > { %13852 = vmatpush1.bf16.msra.mxu0 %v19639_v32  ;;  %13445 = vmatprep.subr.bf16.mxu1 %v19644_v52 }
0x10d0   : > { %13853 = vmatprep.subr.bf16.mxu0 %v19647_v23 }
0x10d2   : > { %13446 = vmatpush1.bf16.msra.mxu1 %v19642_v50 }
0x10d3   : > { %13854 = vmatpush1.bf16.msra.mxu0 %v19645_v43  ;;  %13447 = vmatprep.subr.bf16.mxu1 %v19650_v48 }
0x10d4   : > { %13855 = vmatprep.subr.bf16.mxu0 %v19653_v14  ;;  %v9993_v13 = vpop.f32.mrb[76].mxu1  ;;  %v19660_v14 = vld [vmem:[%s21601_s18 + $0x6c0] ss:$16 sps:$4 sm:$0xff]  }
0x10d5   : > { %v18147_v19 = vadd.f32 %v9993_v13, %v23810_v2  ;;  %v10095_v16 = vpop.f32.mrb[76].mxu0  ;;  %v9995_v41 = vpop.f32.mrb[77].mxu1  ;;  %v19663_v13 = vld [vmem:[%s21601_s18 + $0x6c8] ss:$16 sps:$4 sm:$0xff]  }
0x10d6   : > { %13448 = vmatpush1.bf16.msra.mxu1 %v19648_v18  ;;  %v18153_v30 = vadd.f32 %v10095_v16, %v23815_v1  ;;  %v18148_v49 = vadd.f32 %v9995_v41, %v23819_v59  ;;  %v10097_v28 = vpop.f32.mrb[77].mxu0  ;;  %v9997_v55 = vpop.f32.mrb[78].mxu1 }
0x10d7   : > { %13856 = vmatpush1.bf16.msra.mxu0 %v19651_v12  ;;  %v18154_v31 = vadd.f32 %v10097_v28, %v23824_v15  ;;  %13449 = vmatprep.subr.bf16.mxu1 %v19656_v3  ;;  %v18149_v57 = vadd.f32 %v9997_v55, %v23810_v2  ;;  %v10099_v8 = vpop.f32.mrb[78].mxu0  ;;  %v9999_v0 = vpop.f32.mrb[79].mxu1  ;;  %v10124_v38 = vmax.f32 %v18147_v19, 0.0 }
0x10d8   : > { %13857 = vmatprep.subr.bf16.mxu0 %v19659_v25  ;;  %v18155_v46 = vadd.f32 %v10099_v8, %v23815_v1  ;;  %v18150_v42 = vadd.f32 %v9999_v0, %v23819_v59  ;;  %v10101_v21 = vpop.f32.mrb[79].mxu0  ;;  %v10126_v23 = vmax.f32 %v18153_v30, 0.0  ;;  %v10125_v50 = vmax.f32 %v18148_v49, 0.0  ;;  %v19668_v25 = vld [vmem:[%s21601_s18 + $0x6e4] ss:$16 sps:$4 sm:$0xff]  }
0x10d9   : > { %v10140_v32 = vmax.f32 %v18149_v57, 0.0  ;;  %v18156_v52 = vadd.f32 %v10101_v21, %v23824_v15  ;;  %v10127_v18 = vmax.f32 %v18154_v31, 0.0  ;;  %v19671_v30 = vld [vmem:[%s21601_s18 + $0x6ec] ss:$16 sps:$4 sm:$0xff]   ;;  %v19666_v31 = vld [vmem:[%s21601_s18 + $0x6e0] ss:$16 sps:$4 sm:$0xff]  }
0x10da   : > { %v10142_v43 = vmax.f32 %v18155_v46, 0.0  ;;  %13450 = vmatpush1.bf16.msra.mxu1 %v19654_v24  ;;  %v10141_v48 = vmax.f32 %v18150_v42, 0.0  ;;  %v19669_v57 = vld [vmem:[%s21601_s18 + $0x6e8] ss:$16 sps:$4 sm:$0xff]   ;;  %v19677_v42 = vld [vmem:[%s21601_s18 + $0x70c] ss:$16 sps:$4 sm:$0xff]  }
0x10db   : > { %v23841_v12 = vpack.c.bf16 %v10140_v32, %v10124_v38  ;;  %13858 = vmatpush1.bf16.msra.mxu0 %v19657_v37  ;;  %v10143_v3 = vmax.f32 %v18156_v52, 0.0  ;;  %13451 = vmatprep.subr.bf16.mxu1 %v19662_v10  ;;  %v19674_v10 = vld [vmem:[%s21601_s18 + $0x704] ss:$16 sps:$4 sm:$0xff]   ;;  %v19672_v21 = vld [vmem:[%s21601_s18 + $0x700] ss:$16 sps:$4 sm:$0xff]  }
0x10dc   : > { %v23845_v19 = vpack.c.bf16 %v10142_v43, %v10126_v23  ;;  %v23847_v16 = vpack.c.bf16 %v10141_v48, %v10125_v50  ;;  %13859 = vmatprep.subr.bf16.mxu0 %v19665_v7  ;;  %v23849_v41 = vpop.f32.mrb[80].mxu1  ;;  %v19675_v7 = vld [vmem:[%s21601_s18 + $0x708] ss:$16 sps:$4 sm:$0xff]   ;;  %v19680_v38 = vld [vmem:[%s21601_s18 + $0x724] ss:$16 sps:$4 sm:$0xff]  }
0x10dd   : > { %v23852_v49 = vpack.c.bf16 %v10143_v3, %v10127_v18  ;;  %v23854_v28 = vpop.f32.mrb[80].mxu0  ;;  %v23856_v24 = vpop.f32.mrb[81].mxu1  ;;  %v19683_v32 = vld [vmem:[%s21601_s18 + $0x72c] ss:$16 sps:$4 sm:$0xff]   ;;  %v19678_v52 = vld [vmem:[%s21601_s18 + $0x720] ss:$16 sps:$4 sm:$0xff]  }
0x10de   : > { %13452 = vmatpush1.bf16.msra.mxu1 %v19660_v14  ;;  %v23858_v55 = vpop.f32.mrb[81].mxu0  ;;  %v10007_v37 = vpop.f32.mrb[82].mxu1  ;;  %v19681_v23 = vld [vmem:[%s21601_s18 + $0x728] ss:$16 sps:$4 sm:$0xff]   ;;  %v19686_v50 = vld [vmem:[%s21601_s18 + $0x744] ss:$16 sps:$4 sm:$0xff]  }
0x10df   : > { %13860 = vmatpush1.bf16.msra.mxu0 %v19663_v13  ;;  %13453 = vmatprep.subr.bf16.mxu1 %v19668_v25  ;;  %v10109_v8 = vpop.f32.mrb[82].mxu0  ;;  %v10008_v0 = vpop.f32.mrb[83].mxu1  ;;  %v19689_v43 = vld [vmem:[%s21601_s18 + $0x74c] ss:$16 sps:$4 sm:$0xff]   ;;  %v19684_v48 = vld [vmem:[%s21601_s18 + $0x740] ss:$16 sps:$4 sm:$0xff]  }
0x10e0   : > { %13861 = vmatprep.subr.bf16.mxu0 %v19671_v30  ;;  %v10110_v46 = vpop.f32.mrb[83].mxu0  ;;  %v19687_v14 = vld [vmem:[%s21601_s18 + $0x748] ss:$16 sps:$4 sm:$0xff]   ;;  %v19692_v18 = vld [vmem:[%s21601_s18 + $0x764] ss:$16 sps:$4 sm:$0xff]  }
0x10e1   : > { %v19695_v3 = vld [vmem:[%s21601_s18 + $0x76c] ss:$16 sps:$4 sm:$0xff]   ;;  %v19690_v13 = vld [vmem:[%s21601_s18 + $0x760] ss:$16 sps:$4 sm:$0xff]   ;;  %v19693_v25 = vld [vmem:[%s21601_s18 + $0x768] ss:$16 sps:$4 sm:$0xff]  }
0x10e2   : > { %13454 = vmatpush1.bf16.msra.mxu1 %v19666_v31  ;;  %v19698_v30 = vld [vmem:[%s21601_s18 + $0x784] ss:$16 sps:$4 sm:$0xff]   ;;  %v19701_v31 = vld [vmem:[%s21601_s18 + $0x78c] ss:$16 sps:$4 sm:$0xff]   ;;  %v19696_v37 = vld [vmem:[%s21601_s18 + $0x780] ss:$16 sps:$4 sm:$0xff]  }
0x10e3   : > { %13862 = vmatpush1.bf16.msra.mxu0 %v19669_v57  ;;  %13455 = vmatprep.subr.bf16.mxu1 %v19674_v10  ;;  %v19699_v57 = vld [vmem:[%s21601_s18 + $0x788] ss:$16 sps:$4 sm:$0xff]   ;;  %v19704_v8 = vld [vmem:[%s21601_s18 + $0x7a4] ss:$16 sps:$4 sm:$0xff]   ;;  %v19707_v0 = vld [vmem:[%s21601_s18 + $0x7ac] ss:$16 sps:$4 sm:$0xff]  }
0x10e4   : > { %13863 = vmatprep.subr.bf16.mxu0 %v19677_v42  ;;  %v19702_v10 = vld [vmem:[%s21601_s18 + $0x7a0] ss:$16 sps:$4 sm:$0xff]   ;;  %v19705_v46 = vld [vmem:[%s21601_s18 + $0x7a8] ss:$16 sps:$4 sm:$0xff]   ;;  %v19710_v42 = vld [vmem:[%s21601_s18 + $0x7c4] ss:$16 sps:$4 sm:$0xff]  }
0x10e6   : > { %13456 = vmatpush1.bf16.msra.mxu1 %v19672_v21  ;;  %v19713_v21 = vld [vmem:[%s21601_s18 + $0x7cc] ss:$16 sps:$4 sm:$0xff]  }
0x10e7   : > { %13864 = vmatpush1.bf16.msra.mxu0 %v19675_v7  ;;  %13457 = vmatprep.subr.bf16.mxu1 %v19680_v38  ;;  %v19708_v7 = vld [vmem:[%s21601_s18 + $0x7c0] ss:$16 sps:$4 sm:$0xff]   ;;  %v19711_v38 = vld [vmem:[%s21601_s18 + $0x7c8] ss:$16 sps:$4 sm:$0xff]  }
0x10e8   : > { %13865 = vmatprep.subr.bf16.mxu0 %v19683_v32  ;;  %v19716_v32 = vld [vmem:[%s21601_s18 + $0x7e4] ss:$16 sps:$4 sm:$0xff]  }
0x10ea   : > { %13458 = vmatpush1.bf16.msra.mxu1 %v19678_v52  ;;  %v18134_v52 = vadd.f32 %v23493_v29, %v23457_v56  ;;  %v19720_v56 = vld [vmem:[%s21601_s18 + $0x800] ss:$16 sps:$4 sm:$0xff]  }
0x10eb   : > { %13866 = vmatpush1.bf16.msra.mxu0 %v19681_v23  ;;  %13459 = vmatprep.subr.bf16.mxu1 %v19686_v50  ;;  %v19719_v23 = vld [vmem:[%s21601_s18 + $0x7ec] ss:$16 sps:$4 sm:$0xff]   ;;  %v19714_v50 = vld [vmem:[%s21601_s18 + $0x7e0] ss:$16 sps:$4 sm:$0xff]  }
0x10ec   : > { %13867 = vmatprep.subr.bf16.mxu0 %v19689_v43  ;;  %v19717_v43 = vld [vmem:[%s21601_s18 + $0x7e8] ss:$16 sps:$4 sm:$0xff]  }
0x10ee   : > { %13460 = vmatpush1.bf16.msra.mxu1 %v19684_v48  ;;  %v19722_v48 = vld [vmem:[%s21601_s18 + $0x804] ss:$16 sps:$4 sm:$0xff]  }
0x10ef   : > { %13868 = vmatpush1.bf16.msra.mxu0 %v19687_v14  ;;  %13461 = vmatprep.subr.bf16.mxu1 %v19692_v18  ;;  %v10151_v14 = vmax.f32 %v18134_v52, 0.0  ;;  %v19725_v18 = vld [vmem:[%s21601_s18 + $0x80c] ss:$16 sps:$4 sm:$0xff]   ;;  %v19747_v52 = vld [vmem:[%s21601_s18 + $0x888] ss:$16 sps:$4 sm:$0xff]  }
0x10f0   : > { %13869 = vmatprep.subr.bf16.mxu0 %v19695_v3  ;;  %v18133_v3 = vadd.f32 %v23487_v27, %v23449_v17  ;;  %v19726_v17 = vld [vmem:[%s21601_s18 + $0x820] ss:$16 sps:$4 sm:$0xff]   ;;  %v19729_v27 = vld [vmem:[%s21601_s18 + $0x828] ss:$16 sps:$4 sm:$0xff]  }
0x10f1   : > { %v10183_v29 = vpack.c.bf16 %v10151_v14, %v10151_v14  ;;  %v19761_v14 = vld [vmem:[%s21601_s18 + $0x8cc] ss:$16 sps:$4 sm:$0xff]  }
0x10f2   : > { %13462 = vmatpush1.bf16.msra.mxu1 %v19690_v13  ;;  %v19723_v13 = vld [vmem:[%s21601_s18 + $0x808] ss:$16 sps:$4 sm:$0xff]  }
0x10f3   : > { %13870 = vmatpush1.bf16.msra.mxu0 %v19693_v25  ;;  %13463 = vmatprep.subr.bf16.mxu1 %v19698_v30  ;;  %v19728_v25 = vld [vmem:[%s21601_s18 + $0x824] ss:$16 sps:$4 sm:$0xff]   ;;  %v19731_v30 = vld [vmem:[%s21601_s18 + $0x82c] ss:$16 sps:$4 sm:$0xff]  }
0x10f4   : > { %13871 = vmatprep.subr.bf16.mxu0 %v19701_v31  ;;  %v10150_v31 = vmax.f32 %v18133_v3, 0.0  ;;  %v19759_v3 = vld [vmem:[%s21601_s18 + $0x8c8] ss:$16 sps:$4 sm:$0xff]  }
0x10f6   : > { %13464 = vmatpush1.bf16.msra.mxu1 %v19696_v37  ;;  %v19734_v37 = vld [vmem:[%s21601_s18 + $0x844] ss:$16 sps:$4 sm:$0xff]  }
0x10f7   : > { %13872 = vmatpush1.bf16.msra.mxu0 %v19699_v57  ;;  %13465 = vmatprep.subr.bf16.mxu1 %v19704_v8  ;;  %v19737_v57 = vld [vmem:[%s21601_s18 + $0x84c] ss:$16 sps:$4 sm:$0xff]   ;;  %v10182_v8 = vpack.c.bf16 %v10150_v31, %v10150_v31  ;;  %v19762_v31 = vld [vmem:[%s21601_s18 + $0x8e0] ss:$16 sps:$4 sm:$0xff]  }
0x10f8   : > { %13873 = vmatprep.subr.bf16.mxu0 %v19707_v0  ;;  %v19732_v0 = vld [vmem:[%s21601_s18 + $0x840] ss:$16 sps:$4 sm:$0xff]  }
0x10fa   : > { %13466 = vmatpush1.bf16.msra.mxu1 %v19702_v10  ;;  %v19740_v10 = vld [vmem:[%s21601_s18 + $0x864] ss:$16 sps:$4 sm:$0xff]  }
0x10fb   : > { %13874 = vmatpush1.bf16.msra.mxu0 %v19705_v46  ;;  %13467 = vmatprep.subr.bf16.mxu1 %v19710_v42  ;;  %v19743_v46 = vld [vmem:[%s21601_s18 + $0x86c] ss:$16 sps:$4 sm:$0xff]   ;;  %v19738_v42 = vld [vmem:[%s21601_s18 + $0x860] ss:$16 sps:$4 sm:$0xff]  }
0x10fc   : > { %13875 = vmatprep.subr.bf16.mxu0 %v19713_v21  ;;  %v19741_v21 = vld [vmem:[%s21601_s18 + $0x868] ss:$16 sps:$4 sm:$0xff]  }
0x10fe   : > { %13468 = vmatpush1.bf16.msra.mxu1 %v19708_v7  ;;  %v19746_v7 = vld [vmem:[%s21601_s18 + $0x884] ss:$16 sps:$4 sm:$0xff]  }
0x10ff   : > { %13876 = vmatpush1.bf16.msra.mxu0 %v19711_v38  ;;  %13469 = vmatprep.subr.bf16.mxu1 %v19716_v32  ;;  %v19749_v38 = vld [vmem:[%s21601_s18 + $0x88c] ss:$16 sps:$4 sm:$0xff]   ;;  %v19744_v32 = vld [vmem:[%s21601_s18 + $0x880] ss:$16 sps:$4 sm:$0xff]  }
0x1100   : > { %13877 = vmatprep.subr.bf16.mxu0 %v19719_v23  ;;  %v19752_v23 = vld [vmem:[%s21601_s18 + $0x8a4] ss:$16 sps:$4 sm:$0xff]  }
0x1102   : > { %13470 = vmatpush1.bf16.msra.mxu1 %v19714_v50  ;;  %v19750_v50 = vld [vmem:[%s21601_s18 + $0x8a0] ss:$16 sps:$4 sm:$0xff]  }
0x1103   : > { %13878 = vmatpush1.bf16.msra.mxu0 %v19717_v43  ;;  %13490 = vmatprep.subr.bf16.mxu1 %v19722_v48  ;;  %v19753_v43 = vld [vmem:[%s21601_s18 + $0x8a8] ss:$16 sps:$4 sm:$0xff]   ;;  %v19758_v48 = vld [vmem:[%s21601_s18 + $0x8c4] ss:$16 sps:$4 sm:$0xff]  }
0x1104   : > { %13898 = vmatprep.subr.bf16.mxu0 %v19725_v18  ;;  %v19756_v18 = vld [vmem:[%s21601_s18 + $0x8c0] ss:$16 sps:$4 sm:$0xff]  }
0x1105   : > { %13472 = vmatmul.mubr.bf16.vlgmr.msra.gmra.mrb[84].mxu1 %v23477_v60 }
0x1106   : > { %13880 = vmatmul.mubr.bf16.vlgmr.msra.gmra.mrb[84].mxu0 %v23477_v60  ;;  %13481 = vmatprep.mubr.bf16.mxu1 %v10183_v29  ;;  %v19735_v60 = vld [vmem:[%s21601_s18 + $0x848] ss:$16 sps:$4 sm:$0xff]  }
0x1107   : > { %13491 = vmatpush1.bf16.msra.mxu1 %v19720_v56  ;;  %13889 = vmatprep.mubr.bf16.mxu0 %v10183_v29  ;;  %v19764_v56 = vld [vmem:[%s21601_s18 + $0x8e4] ss:$16 sps:$4 sm:$0xff]  }
0x1108   : > { %13899 = vmatpush1.bf16.msra.mxu0 %v19723_v13  ;;  %13492 = vmatprep.subr.bf16.mxu1 %v19728_v25  ;;  %v19767_v13 = vld [vmem:[%s21601_s18 + $0x8ec] ss:$16 sps:$4 sm:$0xff]  }
0x1109   : > { %13900 = vmatprep.subr.bf16.mxu0 %v19731_v30 }
0x110b   : > { %13493 = vmatpush1.bf16.msra.mxu1 %v19726_v17 }
0x110c   : > { %13901 = vmatpush1.bf16.msra.mxu0 %v19729_v27  ;;  %13494 = vmatprep.subr.bf16.mxu1 %v19734_v37  ;;  %v19765_v37 = vld [vmem:[%s21601_s18 + $0x8e8] ss:$16 sps:$4 sm:$0xff]  }
0x110d   : > { %13482 = vmatmul.mubr.bf16.gmra.mrb[100].mxu1 %v10182_v8  ;;  %13902 = vmatprep.subr.bf16.mxu0 %v19737_v57 }
0x110e   : > { %13890 = vmatmul.mubr.bf16.gmra.mrb[100].mxu0 %v10182_v8  ;;  %13522 = vmatprep.mubr.bf16.mxu1 %v23663_v62 }
0x110f   : > { %13495 = vmatpush1.bf16.msra.mxu1 %v19732_v0  ;;  %13930 = vmatprep.mubr.bf16.mxu0 %v23663_v62  ;;  %v19755_v62 = vld [vmem:[%s21601_s18 + $0x8ac] ss:$16 sps:$4 sm:$0xff]   ;;  %v19770_v0 = vld [vmem:[%s21601_s18 + $0x904] ss:$16 sps:$4 sm:$0xff]  }
0x1110   : > { %13903 = vmatpush1.bf16.msra.mxu0 %v19735_v60  ;;  %13496 = vmatprep.subr.bf16.mxu1 %v19740_v10  ;;  %v19773_v10 = vld [vmem:[%s21601_s18 + $0x90c] ss:$16 sps:$4 sm:$0xff]  }
0x1111   : > { %13904 = vmatprep.subr.bf16.mxu0 %v19743_v46  ;;  %v19768_v46 = vld [vmem:[%s21601_s18 + $0x900] ss:$16 sps:$4 sm:$0xff]  }
0x1113   : > { %13497 = vmatpush1.bf16.msra.mxu1 %v19738_v42  ;;  %v19771_v42 = vld [vmem:[%s21601_s18 + $0x908] ss:$16 sps:$4 sm:$0xff]  }
0x1114   : > { %13905 = vmatpush1.bf16.msra.mxu0 %v19741_v21  ;;  %13498 = vmatprep.subr.bf16.mxu1 %v19746_v7  ;;  %v19776_v21 = vld [vmem:[%s21601_s18 + $0x924] ss:$16 sps:$4 sm:$0xff]   ;;  %v19779_v7 = vld [vmem:[%s21601_s18 + $0x92c] ss:$16 sps:$4 sm:$0xff]  }
0x1115   : > { %13906 = vmatprep.subr.bf16.mxu0 %v19749_v38  ;;  %v19774_v38 = vld [vmem:[%s21601_s18 + $0x920] ss:$16 sps:$4 sm:$0xff]  }
0x1117   : > { %13499 = vmatpush1.bf16.msra.mxu1 %v19744_v32  ;;  %v19777_v32 = vld [vmem:[%s21601_s18 + $0x928] ss:$16 sps:$4 sm:$0xff]  }
0x1118   : > { %13907 = vmatpush1.bf16.msra.mxu0 %v19747_v52  ;;  %13500 = vmatprep.subr.bf16.mxu1 %v19752_v23  ;;  %v19782_v52 = vld [vmem:[%s21601_s18 + $0x944] ss:$16 sps:$4 sm:$0xff]   ;;  %v19785_v23 = vld [vmem:[%s21601_s18 + $0x94c] ss:$16 sps:$4 sm:$0xff]  }
0x1119   : > { %13908 = vmatprep.subr.bf16.mxu0 %v19755_v62  ;;  %v19780_v62 = vld [vmem:[%s21601_s18 + $0x940] ss:$16 sps:$4 sm:$0xff]  }
0x111b   : > { %13501 = vmatpush1.bf16.msra.mxu1 %v19750_v50  ;;  %v19783_v50 = vld [vmem:[%s21601_s18 + $0x948] ss:$16 sps:$4 sm:$0xff]  }
0x111c   : > { %13909 = vmatpush1.bf16.msra.mxu0 %v19753_v43  ;;  %13502 = vmatprep.subr.bf16.mxu1 %v19758_v48  ;;  %v19788_v43 = vld [vmem:[%s21601_s18 + $0x964] ss:$16 sps:$4 sm:$0xff]   ;;  %v19791_v48 = vld [vmem:[%s21601_s18 + $0x96c] ss:$16 sps:$4 sm:$0xff]  }
0x111d   : > { %13910 = vmatprep.subr.bf16.mxu0 %v19761_v14  ;;  %v23931_v29 = vpop.f32.mrb[88].mxu1  ;;  %v19786_v14 = vld [vmem:[%s21601_s18 + $0x960] ss:$16 sps:$4 sm:$0xff]  }
0x111e   : > { %v23934_v25 = vpop.f32.mrb[88].mxu0  ;;  %v23936_v30 = vpop.f32.mrb[89].mxu1 }
0x111f   : > { %13503 = vmatpush1.bf16.msra.mxu1 %v19756_v18  ;;  %v23939_v17 = vpop.f32.mrb[89].mxu0  ;;  %v13334_v27 = vpop.f32.mrb[90].mxu1  ;;  %v19789_v18 = vld [vmem:[%s21601_s18 + $0x968] ss:$16 sps:$4 sm:$0xff]  }
0x1120   : > { %13911 = vmatpush1.bf16.msra.mxu0 %v19759_v3  ;;  %13504 = vmatprep.subr.bf16.mxu1 %v19764_v56  ;;  %v13742_v57 = vpop.f32.mrb[90].mxu0  ;;  %v13335_v8 = vpop.f32.mrb[91].mxu1  ;;  %v19794_v3 = vld [vmem:[%s21601_s18 + $0x984] ss:$16 sps:$4 sm:$0xff]   ;;  %v19797_v56 = vld [vmem:[%s21601_s18 + $0x98c] ss:$16 sps:$4 sm:$0xff]  }
0x1121   : > { %13912 = vmatprep.subr.bf16.mxu0 %v19767_v13  ;;  %v13743_v60 = vpop.f32.mrb[91].mxu0  ;;  %v19792_v13 = vld [vmem:[%s21601_s18 + $0x980] ss:$16 sps:$4 sm:$0xff]   ;;  %v19800_v27 = vld [vmem:[%s21601_s18 + $0x9a4] ss:$16 sps:$4 sm:$0xff]  }
0x1122   : > { %v19798_v57 = vld [vmem:[%s21601_s18 + $0x9a0] ss:$16 sps:$4 sm:$0xff]   ;;  %v19801_v8 = vld [vmem:[%s21601_s18 + $0x9a8] ss:$16 sps:$4 sm:$0xff]   ;;  %v19809_v60 = vld [vmem:[%s21601_s18 + $0x9cc] ss:$16 sps:$4 sm:$0xff]  }
0x1123   : > { %13505 = vmatpush1.bf16.msra.mxu1 %v19762_v31  ;;  %v19795_v31 = vld [vmem:[%s21601_s18 + $0x988] ss:$16 sps:$4 sm:$0xff]  }
0x1124   : > { %13913 = vmatpush1.bf16.msra.mxu0 %v19765_v37  ;;  %13506 = vmatprep.subr.bf16.mxu1 %v19770_v0  ;;  %v19803_v37 = vld [vmem:[%s21601_s18 + $0x9ac] ss:$16 sps:$4 sm:$0xff]   ;;  %v19806_v0 = vld [vmem:[%s21601_s18 + $0x9c4] ss:$16 sps:$4 sm:$0xff]  }
0x1125   : > { %13914 = vmatprep.subr.bf16.mxu0 %v19773_v10  ;;  %v19804_v10 = vld [vmem:[%s21601_s18 + $0x9c0] ss:$16 sps:$4 sm:$0xff]  }
0x1127   : > { %13507 = vmatpush1.bf16.msra.mxu1 %v19768_v46  ;;  %v19807_v46 = vld [vmem:[%s21601_s18 + $0x9c8] ss:$16 sps:$4 sm:$0xff]  }
0x1128   : > { %13915 = vmatpush1.bf16.msra.mxu0 %v19771_v42  ;;  %13508 = vmatprep.subr.bf16.mxu1 %v19776_v21  ;;  %v19812_v42 = vld [vmem:[%s21601_s18 + $0x9e4] ss:$16 sps:$4 sm:$0xff]   ;;  %v18140_v21 = vadd.f32 %v23672_v47, %v23635_v45  ;;  %v19816_v45 = vld [vmem:[%s21601_s18 + $0xa00] ss:$16 sps:$4 sm:$0xff]  }
0x1129   : > { %13916 = vmatprep.subr.bf16.mxu0 %v19779_v7  ;;  %v19815_v7 = vld [vmem:[%s21601_s18 + $0x9ec] ss:$16 sps:$4 sm:$0xff]  }
0x112b   : > { %13509 = vmatpush1.bf16.msra.mxu1 %v19774_v38  ;;  %v19810_v38 = vld [vmem:[%s21601_s18 + $0x9e0] ss:$16 sps:$4 sm:$0xff]  }
0x112c   : > { %13917 = vmatpush1.bf16.msra.mxu0 %v19777_v32  ;;  %13510 = vmatprep.subr.bf16.mxu1 %v19782_v52  ;;  %v19813_v32 = vld [vmem:[%s21601_s18 + $0x9e8] ss:$16 sps:$4 sm:$0xff]   ;;  %v19818_v52 = vld [vmem:[%s21601_s18 + $0xa04] ss:$16 sps:$4 sm:$0xff]  }
0x112d   : > { %13918 = vmatprep.subr.bf16.mxu0 %v19785_v23  ;;  %v10153_v23 = vmax.f32 %v18140_v21, 0.0  ;;  %v19851_v21 = vld [vmem:[%s21601_s18 + $0xaac] ss:$16 sps:$4 sm:$0xff]  }
0x112f   : > { %13511 = vmatpush1.bf16.msra.mxu1 %v19780_v62  ;;  %v19821_v62 = vld [vmem:[%s21601_s18 + $0xa0c] ss:$16 sps:$4 sm:$0xff]   ;;  %v10185_v47 = vpack.c.bf16 %v10153_v23, %v10153_v23 }
0x1130   : > { %13919 = vmatpush1.bf16.msra.mxu0 %v19783_v50  ;;  %13512 = vmatprep.subr.bf16.mxu1 %v19788_v43  ;;  %v18139_v50 = vadd.f32 %v23665_v6, %v23626_v44  ;;  %v19819_v43 = vld [vmem:[%s21601_s18 + $0xa08] ss:$16 sps:$4 sm:$0xff]   ;;  %v19822_v44 = vld [vmem:[%s21601_s18 + $0xa20] ss:$16 sps:$4 sm:$0xff]  }
0x1131   : > { %13920 = vmatprep.subr.bf16.mxu0 %v19791_v48  ;;  %v19824_v48 = vld [vmem:[%s21601_s18 + $0xa24] ss:$16 sps:$4 sm:$0xff]   ;;  %v19825_v6 = vld [vmem:[%s21601_s18 + $0xa28] ss:$16 sps:$4 sm:$0xff]  }
0x1133   : > { %13513 = vmatpush1.bf16.msra.mxu1 %v19786_v14  ;;  %v19827_v14 = vld [vmem:[%s21601_s18 + $0xa2c] ss:$16 sps:$4 sm:$0xff]  }
0x1134   : > { %13921 = vmatpush1.bf16.msra.mxu0 %v19789_v18  ;;  %13514 = vmatprep.subr.bf16.mxu1 %v19794_v3  ;;  %v10152_v18 = vmax.f32 %v18139_v50, 0.0  ;;  %v19830_v3 = vld [vmem:[%s21601_s18 + $0xa44] ss:$16 sps:$4 sm:$0xff]   ;;  %v19857_v50 = vld [vmem:[%s21601_s18 + $0xacc] ss:$16 sps:$4 sm:$0xff]  }
0x1135   : > { %13922 = vmatprep.subr.bf16.mxu0 %v19797_v56  ;;  %v19833_v56 = vld [vmem:[%s21601_s18 + $0xa4c] ss:$16 sps:$4 sm:$0xff]  }
0x1137   : > { %13515 = vmatpush1.bf16.msra.mxu1 %v19792_v13  ;;  %v10184_v13 = vpack.c.bf16 %v10152_v18, %v10152_v18 }
0x1138   : > { %13923 = vmatpush1.bf16.msra.mxu0 %v19795_v31  ;;  %13516 = vmatprep.subr.bf16.mxu1 %v19800_v27  ;;  %v19828_v31 = vld [vmem:[%s21601_s18 + $0xa40] ss:$16 sps:$4 sm:$0xff]   ;;  %v19836_v27 = vld [vmem:[%s21601_s18 + $0xa64] ss:$16 sps:$4 sm:$0xff]  }
0x1139   : > { %13924 = vmatprep.subr.bf16.mxu0 %v19803_v37  ;;  %v19839_v37 = vld [vmem:[%s21601_s18 + $0xa6c] ss:$16 sps:$4 sm:$0xff]  }
0x113b   : > { %13517 = vmatpush1.bf16.msra.mxu1 %v19798_v57  ;;  %v19834_v57 = vld [vmem:[%s21601_s18 + $0xa60] ss:$16 sps:$4 sm:$0xff]  }
0x113c   : > { %13925 = vmatpush1.bf16.msra.mxu0 %v19801_v8  ;;  %13518 = vmatprep.subr.bf16.mxu1 %v19806_v0  ;;  %v19837_v8 = vld [vmem:[%s21601_s18 + $0xa68] ss:$16 sps:$4 sm:$0xff]   ;;  %v19842_v0 = vld [vmem:[%s21601_s18 + $0xa84] ss:$16 sps:$4 sm:$0xff]  }
0x113d   : > { %13926 = vmatprep.subr.bf16.mxu0 %v19809_v60  ;;  %v19845_v60 = vld [vmem:[%s21601_s18 + $0xa8c] ss:$16 sps:$4 sm:$0xff]  }
0x113f   : > { %13519 = vmatpush1.bf16.msra.mxu1 %v19804_v10  ;;  %v19840_v10 = vld [vmem:[%s21601_s18 + $0xa80] ss:$16 sps:$4 sm:$0xff]  }
0x1140   : > { %13927 = vmatpush1.bf16.msra.mxu0 %v19807_v46  ;;  %13520 = vmatprep.subr.bf16.mxu1 %v19812_v42  ;;  %v19843_v46 = vld [vmem:[%s21601_s18 + $0xa88] ss:$16 sps:$4 sm:$0xff]   ;;  %v19848_v42 = vld [vmem:[%s21601_s18 + $0xaa4] ss:$16 sps:$4 sm:$0xff]  }
0x1141   : > { %13928 = vmatprep.subr.bf16.mxu0 %v19815_v7  ;;  %v19846_v7 = vld [vmem:[%s21601_s18 + $0xaa0] ss:$16 sps:$4 sm:$0xff]  }
0x1143   : > { %13521 = vmatpush1.bf16.msra.mxu1 %v19810_v38 }
0x1144   : > { %13929 = vmatpush1.bf16.msra.mxu0 %v19813_v32  ;;  %13541 = vmatprep.subr.bf16.mxu1 %v19818_v52  ;;  %v19849_v32 = vld [vmem:[%s21601_s18 + $0xaa8] ss:$16 sps:$4 sm:$0xff]   ;;  %v19854_v52 = vld [vmem:[%s21601_s18 + $0xac4] ss:$16 sps:$4 sm:$0xff]  }
0x1145   : > { %13949 = vmatprep.subr.bf16.mxu0 %v19821_v62 }
0x1146   : > { %13523 = vmatmul.mubr.bf16.vlgmr.msra.gmra.mrb[84].mxu1 %v23657_v26 }
0x1147   : > { %13931 = vmatmul.mubr.bf16.vlgmr.msra.gmra.mrb[84].mxu0 %v23657_v26  ;;  %13532 = vmatprep.mubr.bf16.mxu1 %v10185_v47  ;;  %v19831_v26 = vld [vmem:[%s21601_s18 + $0xa48] ss:$16 sps:$4 sm:$0xff]  }
0x1148   : > { %13542 = vmatpush1.bf16.msra.mxu1 %v19816_v45  ;;  %13940 = vmatprep.mubr.bf16.mxu0 %v10185_v47  ;;  %v19852_v47 = vld [vmem:[%s21601_s18 + $0xac0] ss:$16 sps:$4 sm:$0xff]  }
0x1149   : > { %13950 = vmatpush1.bf16.msra.mxu0 %v19819_v43  ;;  %13543 = vmatprep.subr.bf16.mxu1 %v19824_v48  ;;  %v19855_v48 = vld [vmem:[%s21601_s18 + $0xac8] ss:$16 sps:$4 sm:$0xff]  }
0x114a   : > { %13951 = vmatprep.subr.bf16.mxu0 %v19827_v14  ;;  %v19860_v14 = vld [vmem:[%s21601_s18 + $0xae4] ss:$16 sps:$4 sm:$0xff]  }
0x114c   : > { %13544 = vmatpush1.bf16.msra.mxu1 %v19822_v44 }
0x114d   : > { %13952 = vmatpush1.bf16.msra.mxu0 %v19825_v6  ;;  %13545 = vmatprep.subr.bf16.mxu1 %v19830_v3  ;;  %v19863_v3 = vld [vmem:[%s21601_s18 + $0xaec] ss:$16 sps:$4 sm:$0xff]  }
0x114e   : > { %13533 = vmatmul.mubr.bf16.gmra.mrb[104].mxu1 %v10184_v13  ;;  %13953 = vmatprep.subr.bf16.mxu0 %v19833_v56 }
0x114f   : > { %13941 = vmatmul.mubr.bf16.gmra.mrb[104].mxu0 %v10184_v13  ;;  %13573 = vmatprep.mubr.bf16.mxu1 %v23668_v61 }
0x1150   : > { %13546 = vmatpush1.bf16.msra.mxu1 %v19828_v31  ;;  %13981 = vmatprep.mubr.bf16.mxu0 %v23668_v61  ;;  %v10704_v61 = vld [vmem:[%s24571_s19] sm:$0xf] }
0x1151   : > { %13954 = vmatpush1.bf16.msra.mxu0 %v19831_v26  ;;  %13547 = vmatprep.subr.bf16.mxu1 %v19836_v27  ;;  %v24008_v38 = vrot.slane %v10704_v61, %v22115_v33  ;;  %v24013_v23 = vrot.slane %v10704_v61, %v22282_v40  ;;  %v24016_v62 = vrot.slane %v10704_v61, %v22118_v34 }
0x1152   : > { %13955 = vmatprep.subr.bf16.mxu0 %v19839_v37  ;;  %v24020_v45 = vrot.slane %v10704_v61, %v22285_v20  ;;  %v19867_v61 = vld [vmem:[%s21601_s18 + $0xb08] ss:$16 sps:$4 sm:$0xff]  }
0x1153   : > { %v13331_v43 = vadd.f32 %v23931_v29, %v24008_v38  ;;  %v13739_v18 = vadd.f32 %v23934_v25, %v24013_v23  ;;  %v13333_v44 = vadd.f32 %v23936_v30, %v24016_v62  ;;  %v19858_v30 = vld [vmem:[%s21601_s18 + $0xae0] ss:$16 sps:$4 sm:$0xff]  }
0x1154   : > { %13548 = vmatpush1.bf16.msra.mxu1 %v19834_v57  ;;  %v13741_v56 = vadd.f32 %v23939_v17, %v24020_v45  ;;  %v19861_v57 = vld [vmem:[%s21601_s18 + $0xae8] ss:$16 sps:$4 sm:$0xff]  }
0x1155   : > { %13956 = vmatpush1.bf16.msra.mxu0 %v19837_v8  ;;  %13549 = vmatprep.subr.bf16.mxu1 %v19842_v0 }
0x1156   : > { %13957 = vmatprep.subr.bf16.mxu0 %v19845_v60  ;;  %v19866_v60 = vld [vmem:[%s21601_s18 + $0xb04] ss:$16 sps:$4 sm:$0xff]  }
0x1158   : > { %13550 = vmatpush1.bf16.msra.mxu1 %v19840_v10 }
0x1159   : > { %13958 = vmatpush1.bf16.msra.mxu0 %v19843_v46  ;;  %13551 = vmatprep.subr.bf16.mxu1 %v19848_v42  ;;  %v19869_v46 = vld [vmem:[%s21601_s18 + $0xb0c] ss:$16 sps:$4 sm:$0xff]   ;;  %v19864_v42 = vld [vmem:[%s21601_s18 + $0xb00] ss:$16 sps:$4 sm:$0xff]  }
0x115a   : > { %13959 = vmatprep.subr.bf16.mxu0 %v19851_v21  ;;  %v19872_v21 = vld [vmem:[%s21601_s18 + $0xb24] ss:$16 sps:$4 sm:$0xff]  }
0x115c   : > { %13552 = vmatpush1.bf16.msra.mxu1 %v19846_v7  ;;  %v19875_v7 = vld [vmem:[%s21601_s18 + $0xb2c] ss:$16 sps:$4 sm:$0xff]  }
0x115d   : > { %13960 = vmatpush1.bf16.msra.mxu0 %v19849_v32  ;;  %13553 = vmatprep.subr.bf16.mxu1 %v19854_v52  ;;  %v19870_v32 = vld [vmem:[%s21601_s18 + $0xb20] ss:$16 sps:$4 sm:$0xff]   ;;  %v19873_v52 = vld [vmem:[%s21601_s18 + $0xb28] ss:$16 sps:$4 sm:$0xff]  }
0x115e   : > { %13961 = vmatprep.subr.bf16.mxu0 %v19857_v50  ;;  %v13381_v6 = vpop.f32.mrb[92].mxu1  ;;  %v19878_v50 = vld [vmem:[%s21601_s18 + $0xb44] ss:$16 sps:$4 sm:$0xff]  }
0x115f   : > { %v24034_v29 = vadd.f32 %v13381_v6, %v13331_v43  ;;  %v13789_v13 = vpop.f32.mrb[92].mxu0  ;;  %v13383_v31 = vpop.f32.mrb[93].mxu1  ;;  %v19876_v43 = vld [vmem:[%s21601_s18 + $0xb40] ss:$16 sps:$4 sm:$0xff]   ;;  %v19885_v6 = vld [vmem:[%s21601_s18 + $0xb68] ss:$16 sps:$4 sm:$0xff]  }
0x1160   : > { %13554 = vmatpush1.bf16.msra.mxu1 %v19852_v47  ;;  %v24036_v26 = vadd.f32 %v13789_v13, %v13739_v18  ;;  %v24038_v25 = vadd.f32 %v13383_v31, %v13333_v44  ;;  %v13791_v27 = vpop.f32.mrb[93].mxu0  ;;  %v13385_v37 = vpop.f32.mrb[94].mxu1  ;;  %v19881_v47 = vld [vmem:[%s21601_s18 + $0xb4c] ss:$16 sps:$4 sm:$0xff]   ;;  %v19882_v44 = vld [vmem:[%s21601_s18 + $0xb60] ss:$16 sps:$4 sm:$0xff]  }
0x1161   : > { %13962 = vmatpush1.bf16.msra.mxu0 %v19855_v48  ;;  %13555 = vmatprep.subr.bf16.mxu1 %v19860_v14  ;;  %v24041_v17 = vadd.f32 %v13791_v27, %v13741_v56  ;;  %v13793_v8 = vpop.f32.mrb[94].mxu0  ;;  %v13386_v0 = vpop.f32.mrb[95].mxu1  ;;  %v19879_v48 = vld [vmem:[%s21601_s18 + $0xb48] ss:$16 sps:$4 sm:$0xff]   ;;  %v19884_v14 = vld [vmem:[%s21601_s18 + $0xb64] ss:$16 sps:$4 sm:$0xff]  }
0x1162   : > { %13963 = vmatprep.subr.bf16.mxu0 %v19863_v3  ;;  %v13794_v10 = vpop.f32.mrb[95].mxu0  ;;  %v19887_v18 = vld [vmem:[%s21601_s18 + $0xb6c] ss:$16 sps:$4 sm:$0xff]   ;;  %v19890_v3 = vld [vmem:[%s21601_s18 + $0xb84] ss:$16 sps:$4 sm:$0xff]  }
0x1163   : > { %v19893_v56 = vld [vmem:[%s21601_s18 + $0xb8c] ss:$16 sps:$4 sm:$0xff]   ;;  %v19888_v13 = vld [vmem:[%s21601_s18 + $0xb80] ss:$16 sps:$4 sm:$0xff]   ;;  %v19891_v31 = vld [vmem:[%s21601_s18 + $0xb88] ss:$16 sps:$4 sm:$0xff]  }
0x1164   : > { %13556 = vmatpush1.bf16.msra.mxu1 %v19858_v30  ;;  %v19896_v30 = vld [vmem:[%s21601_s18 + $0xba4] ss:$16 sps:$4 sm:$0xff]   ;;  %v19899_v27 = vld [vmem:[%s21601_s18 + $0xbac] ss:$16 sps:$4 sm:$0xff]   ;;  %v19894_v37 = vld [vmem:[%s21601_s18 + $0xba0] ss:$16 sps:$4 sm:$0xff]  }
0x1165   : > { %13964 = vmatpush1.bf16.msra.mxu0 %v19861_v57  ;;  %13557 = vmatprep.subr.bf16.mxu1 %v19866_v60  ;;  %v19897_v57 = vld [vmem:[%s21601_s18 + $0xba8] ss:$16 sps:$4 sm:$0xff]   ;;  %v19902_v8 = vld [vmem:[%s21601_s18 + $0xbc4] ss:$16 sps:$4 sm:$0xff]   ;;  %v19905_v0 = vld [vmem:[%s21601_s18 + $0xbcc] ss:$16 sps:$4 sm:$0xff]  }
0x1166   : > { %13965 = vmatprep.subr.bf16.mxu0 %v19869_v46  ;;  %v19900_v60 = vld [vmem:[%s21601_s18 + $0xbc0] ss:$16 sps:$4 sm:$0xff]   ;;  %v19903_v10 = vld [vmem:[%s21601_s18 + $0xbc8] ss:$16 sps:$4 sm:$0xff]   ;;  %v19908_v46 = vld [vmem:[%s21601_s18 + $0xbe4] ss:$16 sps:$4 sm:$0xff]  }
0x1168   : > { %13558 = vmatpush1.bf16.msra.mxu1 %v19864_v42  ;;  %v18146_v42 = vadd.f32 %v23674_v51, %v23640_v54  ;;  %v19912_v54 = vld [vmem:[%s21601_s18 + $0xc00] ss:$16 sps:$4 sm:$0xff]  }
0x1169   : > { %13966 = vmatpush1.bf16.msra.mxu0 %v19867_v61  ;;  %13559 = vmatprep.subr.bf16.mxu1 %v19872_v21  ;;  %v19911_v61 = vld [vmem:[%s21601_s18 + $0xbec] ss:$16 sps:$4 sm:$0xff]   ;;  %v19906_v21 = vld [vmem:[%s21601_s18 + $0xbe0] ss:$16 sps:$4 sm:$0xff]  }
0x116a   : > { %13967 = vmatprep.subr.bf16.mxu0 %v19875_v7  ;;  %v19909_v7 = vld [vmem:[%s21601_s18 + $0xbe8] ss:$16 sps:$4 sm:$0xff]  }
0x116c   : > { %13560 = vmatpush1.bf16.msra.mxu1 %v19870_v32  ;;  %v19914_v32 = vld [vmem:[%s21601_s18 + $0xc04] ss:$16 sps:$4 sm:$0xff]  }
0x116d   : > { %13968 = vmatpush1.bf16.msra.mxu0 %v19873_v52  ;;  %13561 = vmatprep.subr.bf16.mxu1 %v19878_v50  ;;  %v10155_v52 = vmax.f32 %v18146_v42, 0.0  ;;  %v19917_v50 = vld [vmem:[%s21601_s18 + $0xc0c] ss:$16 sps:$4 sm:$0xff]   ;;  %v19950_v42 = vld [vmem:[%s21601_s18 + $0xcc4] ss:$16 sps:$4 sm:$0xff]  }
0x116e   : > { %13969 = vmatprep.subr.bf16.mxu0 %v19881_v47  ;;  %v18145_v47 = vadd.f32 %v23670_v58, %v23631_v9  ;;  %v19918_v9 = vld [vmem:[%s21601_s18 + $0xc20] ss:$16 sps:$4 sm:$0xff]   ;;  %v19921_v58 = vld [vmem:[%s21601_s18 + $0xc28] ss:$16 sps:$4 sm:$0xff]  }
0x116f   : > { %v10187_v51 = vpack.c.bf16 %v10155_v52, %v10155_v52 }
0x1170   : > { %13562 = vmatpush1.bf16.msra.mxu1 %v19876_v43  ;;  %v19915_v43 = vld [vmem:[%s21601_s18 + $0xc08] ss:$16 sps:$4 sm:$0xff]  }
0x1171   : > { %13970 = vmatpush1.bf16.msra.mxu0 %v19879_v48  ;;  %13563 = vmatprep.subr.bf16.mxu1 %v19884_v14  ;;  %v19920_v48 = vld [vmem:[%s21601_s18 + $0xc24] ss:$16 sps:$4 sm:$0xff]   ;;  %v19923_v14 = vld [vmem:[%s21601_s18 + $0xc2c] ss:$16 sps:$4 sm:$0xff]  }
0x1172   : > { %13971 = vmatprep.subr.bf16.mxu0 %v19887_v18  ;;  %v10154_v18 = vmax.f32 %v18145_v47, 0.0 }
0x1174   : > { %13564 = vmatpush1.bf16.msra.mxu1 %v19882_v44  ;;  %v19926_v44 = vld [vmem:[%s21601_s18 + $0xc44] ss:$16 sps:$4 sm:$0xff]  }
0x1175   : > { %13972 = vmatpush1.bf16.msra.mxu0 %v19885_v6  ;;  %13565 = vmatprep.subr.bf16.mxu1 %v19890_v3  ;;  %v19929_v6 = vld [vmem:[%s21601_s18 + $0xc4c] ss:$16 sps:$4 sm:$0xff]   ;;  %v10186_v3 = vpack.c.bf16 %v10154_v18, %v10154_v18 }
0x1176   : > { %13973 = vmatprep.subr.bf16.mxu0 %v19893_v56  ;;  %v19924_v56 = vld [vmem:[%s21601_s18 + $0xc40] ss:$16 sps:$4 sm:$0xff]  }
0x1178   : > { %13566 = vmatpush1.bf16.msra.mxu1 %v19888_v13  ;;  %v19932_v13 = vld [vmem:[%s21601_s18 + $0xc64] ss:$16 sps:$4 sm:$0xff]  }
0x1179   : > { %13974 = vmatpush1.bf16.msra.mxu0 %v19891_v31  ;;  %13567 = vmatprep.subr.bf16.mxu1 %v19896_v30  ;;  %v19935_v31 = vld [vmem:[%s21601_s18 + $0xc6c] ss:$16 sps:$4 sm:$0xff]   ;;  %v19930_v30 = vld [vmem:[%s21601_s18 + $0xc60] ss:$16 sps:$4 sm:$0xff]  }
0x117a   : > { %13975 = vmatprep.subr.bf16.mxu0 %v19899_v27  ;;  %v19933_v27 = vld [vmem:[%s21601_s18 + $0xc68] ss:$16 sps:$4 sm:$0xff]  }
0x117c   : > { %13568 = vmatpush1.bf16.msra.mxu1 %v19894_v37  ;;  %v19938_v37 = vld [vmem:[%s21601_s18 + $0xc84] ss:$16 sps:$4 sm:$0xff]  }
0x117d   : > { %13976 = vmatpush1.bf16.msra.mxu0 %v19897_v57  ;;  %13569 = vmatprep.subr.bf16.mxu1 %v19902_v8  ;;  %v19941_v57 = vld [vmem:[%s21601_s18 + $0xc8c] ss:$16 sps:$4 sm:$0xff]   ;;  %v19936_v8 = vld [vmem:[%s21601_s18 + $0xc80] ss:$16 sps:$4 sm:$0xff]  }
0x117e   : > { %13977 = vmatprep.subr.bf16.mxu0 %v19905_v0  ;;  %v19939_v0 = vld [vmem:[%s21601_s18 + $0xc88] ss:$16 sps:$4 sm:$0xff]  }
0x1180   : > { %13570 = vmatpush1.bf16.msra.mxu1 %v19900_v60  ;;  %v19944_v60 = vld [vmem:[%s21601_s18 + $0xca4] ss:$16 sps:$4 sm:$0xff]  }
0x1181   : > { %13978 = vmatpush1.bf16.msra.mxu0 %v19903_v10  ;;  %13571 = vmatprep.subr.bf16.mxu1 %v19908_v46  ;;  %v19942_v10 = vld [vmem:[%s21601_s18 + $0xca0] ss:$16 sps:$4 sm:$0xff]   ;;  %v19945_v46 = vld [vmem:[%s21601_s18 + $0xca8] ss:$16 sps:$4 sm:$0xff]  }
0x1182   : > { %13979 = vmatprep.subr.bf16.mxu0 %v19911_v61  ;;  %v19953_v61 = vld [vmem:[%s21601_s18 + $0xccc] ss:$16 sps:$4 sm:$0xff]  }
0x1184   : > { %13572 = vmatpush1.bf16.msra.mxu1 %v19906_v21  ;;  %v19948_v21 = vld [vmem:[%s21601_s18 + $0xcc0] ss:$16 sps:$4 sm:$0xff]  }
0x1185   : > { %13980 = vmatpush1.bf16.msra.mxu0 %v19909_v7  ;;  %13592 = vmatprep.subr.bf16.mxu1 %v19914_v32  ;;  %v19951_v7 = vld [vmem:[%s21601_s18 + $0xcc8] ss:$16 sps:$4 sm:$0xff]   ;;  %v19956_v32 = vld [vmem:[%s21601_s18 + $0xce4] ss:$16 sps:$4 sm:$0xff]  }
0x1186   : > { %14000 = vmatprep.subr.bf16.mxu0 %v19917_v50  ;;  %v19959_v50 = vld [vmem:[%s21601_s18 + $0xcec] ss:$16 sps:$4 sm:$0xff]  }
0x1187   : > { %13574 = vmatmul.mubr.bf16.vlgmr.msra.gmra.mrb[84].mxu1 %v23661_v22 }
0x1188   : > { %13982 = vmatmul.mubr.bf16.vlgmr.msra.gmra.mrb[84].mxu0 %v23661_v22  ;;  %13583 = vmatprep.mubr.bf16.mxu1 %v10187_v51  ;;  %v19927_v22 = vld [vmem:[%s21601_s18 + $0xc48] ss:$16 sps:$4 sm:$0xff]  }
0x1189   : > { %13593 = vmatpush1.bf16.msra.mxu1 %v19912_v54  ;;  %13991 = vmatprep.mubr.bf16.mxu0 %v10187_v51 }
0x118a   : > { %14001 = vmatpush1.bf16.msra.mxu0 %v19915_v43  ;;  %13594 = vmatprep.subr.bf16.mxu1 %v19920_v48 }
0x118b   : > { %14002 = vmatprep.subr.bf16.mxu0 %v19923_v14  ;;  %v19954_v14 = vld [vmem:[%s21601_s18 + $0xce0] ss:$16 sps:$4 sm:$0xff]  }
0x118d   : > { %13595 = vmatpush1.bf16.msra.mxu1 %v19918_v9 }
0x118e   : > { %14003 = vmatpush1.bf16.msra.mxu0 %v19921_v58  ;;  %13596 = vmatprep.subr.bf16.mxu1 %v19926_v44  ;;  %v19957_v58 = vld [vmem:[%s21601_s18 + $0xce8] ss:$16 sps:$4 sm:$0xff]  }
0x118f   : > { %13584 = vmatmul.mubr.bf16.gmra.mrb[108].mxu1 %v10186_v3  ;;  %14004 = vmatprep.subr.bf16.mxu0 %v19929_v6  ;;  %v19962_v6 = vld [vmem:[%s21601_s18 + $0xd04] ss:$16 sps:$4 sm:$0xff]  }
0x1190   : > { %13992 = vmatmul.mubr.bf16.gmra.mrb[108].mxu0 %v10186_v3  ;;  %13624 = vmatprep.mubr.bf16.mxu1 %v23847_v16  ;;  %v19965_v3 = vld [vmem:[%s21601_s18 + $0xd0c] ss:$16 sps:$4 sm:$0xff]  }
0x1191   : > { %13597 = vmatpush1.bf16.msra.mxu1 %v19924_v56  ;;  %14032 = vmatprep.mubr.bf16.mxu0 %v23847_v16  ;;  %v19947_v16 = vld [vmem:[%s21601_s18 + $0xcac] ss:$16 sps:$4 sm:$0xff]   ;;  %v19960_v56 = vld [vmem:[%s21601_s18 + $0xd00] ss:$16 sps:$4 sm:$0xff]  }
0x1192   : > { %14005 = vmatpush1.bf16.msra.mxu0 %v19927_v22  ;;  %13598 = vmatprep.subr.bf16.mxu1 %v19932_v13  ;;  %v19963_v22 = vld [vmem:[%s21601_s18 + $0xd08] ss:$16 sps:$4 sm:$0xff]   ;;  %v19971_v13 = vld [vmem:[%s21601_s18 + $0xd2c] ss:$16 sps:$4 sm:$0xff]  }
0x1193   : > { %14006 = vmatprep.subr.bf16.mxu0 %v19935_v31  ;;  %v19966_v31 = vld [vmem:[%s21601_s18 + $0xd20] ss:$16 sps:$4 sm:$0xff]  }
0x1195   : > { %13599 = vmatpush1.bf16.msra.mxu1 %v19930_v30  ;;  %v19969_v30 = vld [vmem:[%s21601_s18 + $0xd28] ss:$16 sps:$4 sm:$0xff]  }
0x1196   : > { %14007 = vmatpush1.bf16.msra.mxu0 %v19933_v27  ;;  %13600 = vmatprep.subr.bf16.mxu1 %v19938_v37  ;;  %v19974_v27 = vld [vmem:[%s21601_s18 + $0xd44] ss:$16 sps:$4 sm:$0xff]   ;;  %v19977_v37 = vld [vmem:[%s21601_s18 + $0xd4c] ss:$16 sps:$4 sm:$0xff]  }
0x1197   : > { %14008 = vmatprep.subr.bf16.mxu0 %v19941_v57  ;;  %v19972_v57 = vld [vmem:[%s21601_s18 + $0xd40] ss:$16 sps:$4 sm:$0xff]  }
0x1199   : > { %13601 = vmatpush1.bf16.msra.mxu1 %v19936_v8  ;;  %v19975_v8 = vld [vmem:[%s21601_s18 + $0xd48] ss:$16 sps:$4 sm:$0xff]  }
0x119a   : > { %14009 = vmatpush1.bf16.msra.mxu0 %v19939_v0  ;;  %13602 = vmatprep.subr.bf16.mxu1 %v19944_v60  ;;  %v19980_v0 = vld [vmem:[%s21601_s18 + $0xd64] ss:$16 sps:$4 sm:$0xff]   ;;  %v19983_v60 = vld [vmem:[%s21601_s18 + $0xd6c] ss:$16 sps:$4 sm:$0xff]  }
0x119b   : > { %14010 = vmatprep.subr.bf16.mxu0 %v19947_v16  ;;  %v19978_v16 = vld [vmem:[%s21601_s18 + $0xd60] ss:$16 sps:$4 sm:$0xff]  }
0x119d   : > { %13603 = vmatpush1.bf16.msra.mxu1 %v19942_v10  ;;  %v19981_v10 = vld [vmem:[%s21601_s18 + $0xd68] ss:$16 sps:$4 sm:$0xff]  }
0x119e   : > { %14011 = vmatpush1.bf16.msra.mxu0 %v19945_v46  ;;  %13604 = vmatprep.subr.bf16.mxu1 %v19950_v42  ;;  %v19986_v46 = vld [vmem:[%s21601_s18 + $0xd84] ss:$16 sps:$4 sm:$0xff]   ;;  %v19989_v42 = vld [vmem:[%s21601_s18 + $0xd8c] ss:$16 sps:$4 sm:$0xff]  }
0x119f   : > { %14012 = vmatprep.subr.bf16.mxu0 %v19953_v61  ;;  %v13432_v52 = vpop.f32.mrb[96].mxu1  ;;  %v19984_v61 = vld [vmem:[%s21601_s18 + $0xd80] ss:$16 sps:$4 sm:$0xff]  }
0x11a0   : > { %v24115_v47 = vadd.f32 %v13432_v52, %v24034_v29  ;;  %v13840_v54 = vpop.f32.mrb[96].mxu0  ;;  %v13434_v51 = vpop.f32.mrb[97].mxu1  ;;  %v19990_v52 = vld [vmem:[%s21601_s18 + $0xda0] ss:$16 sps:$4 sm:$0xff]  }
0x11a1   : > { %13605 = vmatpush1.bf16.msra.mxu1 %v19948_v21  ;;  %v24118_v43 = vadd.f32 %v13840_v54, %v24036_v26  ;;  %v24121_v48 = vadd.f32 %v13434_v51, %v24038_v25  ;;  %v13842_v18 = vpop.f32.mrb[97].mxu0  ;;  %v13436_v9 = vpop.f32.mrb[98].mxu1  ;;  %v19987_v21 = vld [vmem:[%s21601_s18 + $0xd88] ss:$16 sps:$4 sm:$0xff]   ;;  %v19998_v54 = vld [vmem:[%s21601_s18 + $0xdc4] ss:$16 sps:$4 sm:$0xff]  }
0x11a2   : > { %14013 = vmatpush1.bf16.msra.mxu0 %v19951_v7  ;;  %13606 = vmatprep.subr.bf16.mxu1 %v19956_v32  ;;  %v24125_v29 = vadd.f32 %v13842_v18, %v24041_v17  ;;  %v13844_v44 = vpop.f32.mrb[98].mxu0  ;;  %v13437_v26 = vpop.f32.mrb[99].mxu1  ;;  %v19968_v17 = vld [vmem:[%s21601_s18 + $0xd24] ss:$16 sps:$4 sm:$0xff]   ;;  %v19995_v32 = vld [vmem:[%s21601_s18 + $0xdac] ss:$16 sps:$4 sm:$0xff]  }
0x11a3   : > { %14014 = vmatprep.subr.bf16.mxu0 %v19959_v50  ;;  %v13845_v25 = vpop.f32.mrb[99].mxu0  ;;  %v19992_v7 = vld [vmem:[%s21601_s18 + $0xda4] ss:$16 sps:$4 sm:$0xff]   ;;  %v19993_v50 = vld [vmem:[%s21601_s18 + $0xda8] ss:$16 sps:$4 sm:$0xff]  }
0x11a4   : > { %v20001_v51 = vld [vmem:[%s21601_s18 + $0xdcc] ss:$16 sps:$4 sm:$0xff]   ;;  %v19999_v18 = vld [vmem:[%s21601_s18 + $0xdc8] ss:$16 sps:$4 sm:$0xff]   ;;  %v20004_v9 = vld [vmem:[%s21601_s18 + $0xde4] ss:$16 sps:$4 sm:$0xff]  }
0x11a5   : > { %13607 = vmatpush1.bf16.msra.mxu1 %v19954_v14  ;;  %v19996_v14 = vld [vmem:[%s21601_s18 + $0xdc0] ss:$16 sps:$4 sm:$0xff]   ;;  %v20007_v44 = vld [vmem:[%s21601_s18 + $0xdec] ss:$16 sps:$4 sm:$0xff]   ;;  %v20010_v25 = vld [vmem:[%s21601_s18 + $0xe04] ss:$16 sps:$4 sm:$0xff]  }
0x11a6   : > { %14015 = vmatpush1.bf16.msra.mxu0 %v19957_v58  ;;  %13608 = vmatprep.subr.bf16.mxu1 %v19962_v6  ;;  %v18152_v58 = vadd.f32 %v23856_v24, %v23819_v59  ;;  %v20002_v26 = vld [vmem:[%s21601_s18 + $0xde0] ss:$16 sps:$4 sm:$0xff]   ;;  %v20005_v6 = vld [vmem:[%s21601_s18 + $0xde8] ss:$16 sps:$4 sm:$0xff]  }
0x11a7   : > { %14016 = vmatprep.subr.bf16.mxu0 %v19965_v3  ;;  %v20008_v59 = vld [vmem:[%s21601_s18 + $0xe00] ss:$16 sps:$4 sm:$0xff]  }
0x11a8   : > { %v10157_v3 = vmax.f32 %v18152_v58, 0.0  ;;  %v20055_v58 = vld [vmem:[%s21601_s18 + $0xeec] ss:$16 sps:$4 sm:$0xff]  }
0x11a9   : > { %13609 = vmatpush1.bf16.msra.mxu1 %v19960_v56  ;;  %v20013_v56 = vld [vmem:[%s21601_s18 + $0xe0c] ss:$16 sps:$4 sm:$0xff]  }
0x11aa   : > { %14017 = vmatpush1.bf16.msra.mxu0 %v19963_v22  ;;  %13610 = vmatprep.subr.bf16.mxu1 %v19968_v17  ;;  %v18151_v22 = vadd.f32 %v23849_v41, %v23810_v2  ;;  %v10189_v24 = vpack.c.bf16 %v10157_v3, %v10157_v3  ;;  %v20011_v17 = vld [vmem:[%s21601_s18 + $0xe08] ss:$16 sps:$4 sm:$0xff]   ;;  %v20014_v2 = vld [vmem:[%s21601_s18 + $0xe20] ss:$16 sps:$4 sm:$0xff]  }
0x11ab   : > { %14018 = vmatprep.subr.bf16.mxu0 %v19971_v13  ;;  %v20016_v13 = vld [vmem:[%s21601_s18 + $0xe24] ss:$16 sps:$4 sm:$0xff]   ;;  %v20017_v41 = vld [vmem:[%s21601_s18 + $0xe28] ss:$16 sps:$4 sm:$0xff]  }
0x11ad   : > { %13611 = vmatpush1.bf16.msra.mxu1 %v19966_v31  ;;  %v20019_v31 = vld [vmem:[%s21601_s18 + $0xe2c] ss:$16 sps:$4 sm:$0xff]  }
0x11ae   : > { %14019 = vmatpush1.bf16.msra.mxu0 %v19969_v30  ;;  %13612 = vmatprep.subr.bf16.mxu1 %v19974_v27  ;;  %v10156_v30 = vmax.f32 %v18151_v22, 0.0  ;;  %v20022_v27 = vld [vmem:[%s21601_s18 + $0xe44] ss:$16 sps:$4 sm:$0xff]  }
0x11af   : > { %14020 = vmatprep.subr.bf16.mxu0 %v19977_v37  ;;  %v20025_v37 = vld [vmem:[%s21601_s18 + $0xe4c] ss:$16 sps:$4 sm:$0xff]  }
0x11b1   : > { %13613 = vmatpush1.bf16.msra.mxu1 %v19972_v57  ;;  %v10188_v57 = vpack.c.bf16 %v10156_v30, %v10156_v30  ;;  %v20056_v30 = vld [vmem:[%s21601_s18 + $0xf00] ss:$16 sps:$4 sm:$0xff]  }
0x11b2   : > { %14021 = vmatpush1.bf16.msra.mxu0 %v19975_v8  ;;  %13614 = vmatprep.subr.bf16.mxu1 %v19980_v0  ;;  %v20020_v8 = vld [vmem:[%s21601_s18 + $0xe40] ss:$16 sps:$4 sm:$0xff]   ;;  %v20028_v0 = vld [vmem:[%s21601_s18 + $0xe64] ss:$16 sps:$4 sm:$0xff]  }
0x11b3   : > { %14022 = vmatprep.subr.bf16.mxu0 %v19983_v60  ;;  %v20031_v60 = vld [vmem:[%s21601_s18 + $0xe6c] ss:$16 sps:$4 sm:$0xff]  }
0x11b5   : > { %13615 = vmatpush1.bf16.msra.mxu1 %v19978_v16  ;;  %v20026_v16 = vld [vmem:[%s21601_s18 + $0xe60] ss:$16 sps:$4 sm:$0xff]  }
0x11b6   : > { %14023 = vmatpush1.bf16.msra.mxu0 %v19981_v10  ;;  %13616 = vmatprep.subr.bf16.mxu1 %v19986_v46  ;;  %v20029_v10 = vld [vmem:[%s21601_s18 + $0xe68] ss:$16 sps:$4 sm:$0xff]   ;;  %v20034_v46 = vld [vmem:[%s21601_s18 + $0xe84] ss:$16 sps:$4 sm:$0xff]  }
0x11b7   : > { %14024 = vmatprep.subr.bf16.mxu0 %v19989_v42  ;;  %v20037_v42 = vld [vmem:[%s21601_s18 + $0xe8c] ss:$16 sps:$4 sm:$0xff]  }
0x11b9   : > { %13617 = vmatpush1.bf16.msra.mxu1 %v19984_v61  ;;  %v20032_v61 = vld [vmem:[%s21601_s18 + $0xe80] ss:$16 sps:$4 sm:$0xff]  }
0x11ba   : > { %14025 = vmatpush1.bf16.msra.mxu0 %v19987_v21  ;;  %13618 = vmatprep.subr.bf16.mxu1 %v19992_v7  ;;  %v20035_v21 = vld [vmem:[%s21601_s18 + $0xe88] ss:$16 sps:$4 sm:$0xff]   ;;  %v20040_v7 = vld [vmem:[%s21601_s18 + $0xea4] ss:$16 sps:$4 sm:$0xff]  }
0x11bb   : > { %14026 = vmatprep.subr.bf16.mxu0 %v19995_v32  ;;  %v20038_v32 = vld [vmem:[%s21601_s18 + $0xea0] ss:$16 sps:$4 sm:$0xff]  }
0x11bd   : > { %13619 = vmatpush1.bf16.msra.mxu1 %v19990_v52  ;;  %v20041_v52 = vld [vmem:[%s21601_s18 + $0xea8] ss:$16 sps:$4 sm:$0xff]  }
0x11be   : > { %14027 = vmatpush1.bf16.msra.mxu0 %v19993_v50  ;;  %13620 = vmatprep.subr.bf16.mxu1 %v19998_v54  ;;  %v20046_v50 = vld [vmem:[%s21601_s18 + $0xec4] ss:$16 sps:$4 sm:$0xff]   ;;  %v20049_v54 = vld [vmem:[%s21601_s18 + $0xecc] ss:$16 sps:$4 sm:$0xff]  }
0x11bf   : > { %14028 = vmatprep.subr.bf16.mxu0 %v20001_v51  ;;  %v20044_v51 = vld [vmem:[%s21601_s18 + $0xec0] ss:$16 sps:$4 sm:$0xff]  }
0x11c1   : > { %13621 = vmatpush1.bf16.msra.mxu1 %v19996_v14  ;;  %v20047_v14 = vld [vmem:[%s21601_s18 + $0xec8] ss:$16 sps:$4 sm:$0xff]  }
0x11c2   : > { %14029 = vmatpush1.bf16.msra.mxu0 %v19999_v18  ;;  %13622 = vmatprep.subr.bf16.mxu1 %v20004_v9  ;;  %v20052_v18 = vld [vmem:[%s21601_s18 + $0xee4] ss:$16 sps:$4 sm:$0xff]  }
0x11c3   : > { %14030 = vmatprep.subr.bf16.mxu0 %v20007_v44 }
0x11c5   : > { %13623 = vmatpush1.bf16.msra.mxu1 %v20002_v26 }
0x11c6   : > { %14031 = vmatpush1.bf16.msra.mxu0 %v20005_v6  ;;  %13643 = vmatprep.subr.bf16.mxu1 %v20010_v25 }
0x11c7   : > { %14051 = vmatprep.subr.bf16.mxu0 %v20013_v56  ;;  %v20050_v56 = vld [vmem:[%s21601_s18 + $0xee0] ss:$16 sps:$4 sm:$0xff]  }
0x11c8   : > { %13625 = vmatmul.mubr.bf16.vlgmr.msra.gmra.mrb[84].mxu1 %v23841_v12 }
0x11c9   : > { %14033 = vmatmul.mubr.bf16.vlgmr.msra.gmra.mrb[84].mxu0 %v23841_v12  ;;  %13634 = vmatprep.mubr.bf16.mxu1 %v10189_v24  ;;  %v20023_v12 = vld [vmem:[%s21601_s18 + $0xe48] ss:$16 sps:$4 sm:$0xff]  }
0x11ca   : > { %13644 = vmatpush1.bf16.msra.mxu1 %v20008_v59  ;;  %14042 = vmatprep.mubr.bf16.mxu0 %v10189_v24  ;;  %v20053_v24 = vld [vmem:[%s21601_s18 + $0xee8] ss:$16 sps:$4 sm:$0xff]  }
0x11cb   : > { %14052 = vmatpush1.bf16.msra.mxu0 %v20011_v17  ;;  %13645 = vmatprep.subr.bf16.mxu1 %v20016_v13  ;;  %v20058_v13 = vld [vmem:[%s21601_s18 + $0xf04] ss:$16 sps:$4 sm:$0xff]  }
0x11cc   : > { %14053 = vmatprep.subr.bf16.mxu0 %v20019_v31  ;;  %v20061_v31 = vld [vmem:[%s21601_s18 + $0xf0c] ss:$16 sps:$4 sm:$0xff]  }
0x11ce   : > { %13646 = vmatpush1.bf16.msra.mxu1 %v20014_v2  ;;  %v20059_v2 = vld [vmem:[%s21601_s18 + $0xf08] ss:$16 sps:$4 sm:$0xff]  }
0x11cf   : > { %14054 = vmatpush1.bf16.msra.mxu0 %v20017_v41  ;;  %13647 = vmatprep.subr.bf16.mxu1 %v20022_v27  ;;  %v20067_v41 = vld [vmem:[%s21601_s18 + $0xf2c] ss:$16 sps:$4 sm:$0xff]   ;;  %v20062_v27 = vld [vmem:[%s21601_s18 + $0xf20] ss:$16 sps:$4 sm:$0xff]  }
0x11d0   : > { %13635 = vmatmul.mubr.bf16.gmra.mrb[112].mxu1 %v10188_v57  ;;  %14055 = vmatprep.subr.bf16.mxu0 %v20025_v37  ;;  %v20065_v37 = vld [vmem:[%s21601_s18 + $0xf28] ss:$16 sps:$4 sm:$0xff]  }
0x11d1   : > { %14043 = vmatmul.mubr.bf16.gmra.mrb[112].mxu0 %v10188_v57  ;;  %13675 = vmatprep.mubr.bf16.mxu1 %v23852_v49  ;;  %v20070_v57 = vld [vmem:[%s21601_s18 + $0xf44] ss:$16 sps:$4 sm:$0xff]  }
0x11d2   : > { %13648 = vmatpush1.bf16.msra.mxu1 %v20020_v8  ;;  %14083 = vmatprep.mubr.bf16.mxu0 %v23852_v49  ;;  %v20043_v49 = vld [vmem:[%s21601_s18 + $0xeac] ss:$16 sps:$4 sm:$0xff]  }
0x11d3   : > { %14056 = vmatpush1.bf16.msra.mxu0 %v20023_v12  ;;  %13649 = vmatprep.subr.bf16.mxu1 %v20028_v0  ;;  %v20073_v8 = vld [vmem:[%s21601_s18 + $0xf4c] ss:$16 sps:$4 sm:$0xff]   ;;  %v20068_v12 = vld [vmem:[%s21601_s18 + $0xf40] ss:$16 sps:$4 sm:$0xff]   ;;  %v20071_v0 = vld [vmem:[%s21601_s18 + $0xf48] ss:$16 sps:$4 sm:$0xff]  }
0x11d4   : > { %14057 = vmatprep.subr.bf16.mxu0 %v20031_v60  ;;  %v20076_v60 = vld [vmem:[%s21601_s18 + $0xf64] ss:$16 sps:$4 sm:$0xff]  }
0x11d6   : > { %13650 = vmatpush1.bf16.msra.mxu1 %v20026_v16  ;;  %v20079_v16 = vld [vmem:[%s21601_s18 + $0xf6c] ss:$16 sps:$4 sm:$0xff]  }
0x11d7   : > { %14058 = vmatpush1.bf16.msra.mxu0 %v20029_v10  ;;  %13651 = vmatprep.subr.bf16.mxu1 %v20034_v46  ;;  %v20074_v10 = vld [vmem:[%s21601_s18 + $0xf60] ss:$16 sps:$4 sm:$0xff]   ;;  %v20077_v46 = vld [vmem:[%s21601_s18 + $0xf68] ss:$16 sps:$4 sm:$0xff]  }
0x11d8   : > { %14059 = vmatprep.subr.bf16.mxu0 %v20037_v42  ;;  %v20082_v42 = vld [vmem:[%s21601_s18 + $0xf84] ss:$16 sps:$4 sm:$0xff]  }
0x11da   : > { %13652 = vmatpush1.bf16.msra.mxu1 %v20032_v61  ;;  %v20085_v61 = vld [vmem:[%s21601_s18 + $0xf8c] ss:$16 sps:$4 sm:$0xff]  }
0x11db   : > { %14060 = vmatpush1.bf16.msra.mxu0 %v20035_v21  ;;  %13653 = vmatprep.subr.bf16.mxu1 %v20040_v7  ;;  %v20080_v21 = vld [vmem:[%s21601_s18 + $0xf80] ss:$16 sps:$4 sm:$0xff]   ;;  %v20083_v7 = vld [vmem:[%s21601_s18 + $0xf88] ss:$16 sps:$4 sm:$0xff]  }
0x11dc   : > { %14061 = vmatprep.subr.bf16.mxu0 %v20043_v49  ;;  %v20088_v49 = vld [vmem:[%s21601_s18 + $0xfa4] ss:$16 sps:$4 sm:$0xff]  }
0x11de   : > { %13654 = vmatpush1.bf16.msra.mxu1 %v20038_v32  ;;  %v20091_v32 = vld [vmem:[%s21601_s18 + $0xfac] ss:$16 sps:$4 sm:$0xff]  }
0x11df   : > { %14062 = vmatpush1.bf16.msra.mxu0 %v20041_v52  ;;  %13655 = vmatprep.subr.bf16.mxu1 %v20046_v50  ;;  %v20086_v52 = vld [vmem:[%s21601_s18 + $0xfa0] ss:$16 sps:$4 sm:$0xff]   ;;  %v20089_v50 = vld [vmem:[%s21601_s18 + $0xfa8] ss:$16 sps:$4 sm:$0xff]  }
0x11e0   : > { %14063 = vmatprep.subr.bf16.mxu0 %v20049_v54  ;;  %v13483_v9 = vpop.f32.mrb[100].mxu1  ;;  %v20094_v54 = vld [vmem:[%s21601_s18 + $0xfc4] ss:$16 sps:$4 sm:$0xff]  }
0x11e1   : > { %v24199_v44 = vadd.f32 %v13483_v9, %v24115_v47  ;;  %v13891_v26 = vpop.f32.mrb[100].mxu0  ;;  %v13485_v6 = vpop.f32.mrb[101].mxu1  ;;  %v20100_v9 = vld [vmem:[%s21601_s18 + $0xfe4] ss:$16 sps:$4 sm:$0xff]  }
0x11e2   : > { %13656 = vmatpush1.bf16.msra.mxu1 %v20044_v51  ;;  %v24202_v25 = vadd.f32 %v13891_v26, %v24118_v43  ;;  %v24205_v3 = vadd.f32 %v13485_v6, %v24121_v48  ;;  %v13893_v22 = vpop.f32.mrb[101].mxu0  ;;  %v13487_v59 = vpop.f32.mrb[102].mxu1  ;;  %v20097_v51 = vld [vmem:[%s21601_s18 + $0xfcc] ss:$16 sps:$4 sm:$0xff]   ;;  %v20098_v6 = vld [vmem:[%s21601_s18 + $0xfe0] ss:$16 sps:$4 sm:$0xff]  }
0x11e3   : > { %14064 = vmatpush1.bf16.msra.mxu0 %v20047_v14  ;;  %13657 = vmatprep.subr.bf16.mxu1 %v20052_v18  ;;  %v24209_v47 = vadd.f32 %v13893_v22, %v24125_v29  ;;  %v13895_v17 = vpop.f32.mrb[102].mxu0  ;;  %v13488_v43 = vpop.f32.mrb[103].mxu1  ;;  %v20064_v29 = vld [vmem:[%s21601_s18 + $0xf24] ss:$16 sps:$4 sm:$0xff]   ;;  %v20092_v14 = vld [vmem:[%s21601_s18 + $0xfc0] ss:$16 sps:$4 sm:$0xff]   ;;  %v18157_v59 = vadd.f32 %v23854_v28, %v23815_v1 }
0x11e4   : > { %14065 = vmatprep.subr.bf16.mxu0 %v20055_v58  ;;  %v13896_v48 = vpop.f32.mrb[103].mxu0  ;;  %v20095_v18 = vld [vmem:[%s21601_s18 + $0xfc8] ss:$16 sps:$4 sm:$0xff]   ;;  %v18158_v58 = vadd.f32 %v23858_v55, %v23824_v15  ;;  %v20103_v26 = vld [vmem:[%s21601_s18 + $0xfec] ss:$16 sps:$4 sm:$0xff]  }
0x11e5   : > { %v10158_v15 = vmax.f32 %v18157_v59, 0.0 }
0x11e6   : > { %13658 = vmatpush1.bf16.msra.mxu1 %v20050_v56  ;;  %v20101_v56 = vld [vmem:[%s21601_s18 + $0xfe8] ss:$16 sps:$4 sm:$0xff]   ;;  %v10159_v22 = vmax.f32 %v18158_v58, 0.0  ;;  %s24579_s18 = scalar_lea.vmem [#allocation20], %s21573_s15  ;;  %s24580_s15 = sld [smem:[#allocation32_spill]] }
0x11e7   : > { %14066 = vmatpush1.bf16.msra.mxu0 %v20053_v24  ;;  %13659 = vmatprep.subr.bf16.mxu1 %v20058_v13  ;;  %v10190_v55 = vpack.c.bf16 %v10158_v15, %v10158_v15 }
0x11e8   : > { %14067 = vmatprep.subr.bf16.mxu0 %v20061_v31  ;;  %v10191_v24 = vpack.c.bf16 %v10159_v22, %v10159_v22 }
0x11ea   : > { %13660 = vmatpush1.bf16.msra.mxu1 %v20056_v30 }
0x11eb   : > { %14068 = vmatpush1.bf16.msra.mxu0 %v20059_v2  ;;  %13661 = vmatprep.subr.bf16.mxu1 %v20064_v29 }
0x11ec   : > { %14069 = vmatprep.subr.bf16.mxu0 %v20067_v41  ;;  %p17766_p3 = scmp.ne.s32.totalorder %s24580_s15, 1 }
0x11ed   : > { %s24581_s28 = sld [smem:[#allocation60_spill]] (!%p17766_p3) }
0x11ee   : > { %13662 = vmatpush1.bf16.msra.mxu1 %v20062_v27 }
0x11ef   : > { %14070 = vmatpush1.bf16.msra.mxu0 %v20065_v37  ;;  %13663 = vmatprep.subr.bf16.mxu1 %v20070_v57 }
0x11f0   : > { %14071 = vmatprep.subr.bf16.mxu0 %v20073_v8 }
0x11f2   : > { %13664 = vmatpush1.bf16.msra.mxu1 %v20068_v12 }
0x11f3   : > { %14072 = vmatpush1.bf16.msra.mxu0 %v20071_v0  ;;  %13665 = vmatprep.subr.bf16.mxu1 %v20076_v60 }
0x11f4   : > { %14073 = vmatprep.subr.bf16.mxu0 %v20079_v16 }
0x11f6   : > { %13666 = vmatpush1.bf16.msra.mxu1 %v20074_v10 }
0x11f7   : > { %14074 = vmatpush1.bf16.msra.mxu0 %v20077_v46  ;;  %13667 = vmatprep.subr.bf16.mxu1 %v20082_v42 }
0x11f8   : > { %14075 = vmatprep.subr.bf16.mxu0 %v20085_v61 }
0x11fa   : > { %13668 = vmatpush1.bf16.msra.mxu1 %v20080_v21 }
0x11fb   : > { %14076 = vmatpush1.bf16.msra.mxu0 %v20083_v7  ;;  %13669 = vmatprep.subr.bf16.mxu1 %v20088_v49 }
0x11fc   : > { %14077 = vmatprep.subr.bf16.mxu0 %v20091_v32 }
0x11fe   : > { %13670 = vmatpush1.bf16.msra.mxu1 %v20086_v52 }
0x11ff   : > { %14078 = vmatpush1.bf16.msra.mxu0 %v20089_v50  ;;  %13671 = vmatprep.subr.bf16.mxu1 %v20094_v54 }
0x1200   : > { %14079 = vmatprep.subr.bf16.mxu0 %v20097_v51 }
0x1202   : > { %13672 = vmatpush1.bf16.msra.mxu1 %v20092_v14 }
0x1203   : > { %14080 = vmatpush1.bf16.msra.mxu0 %v20095_v18  ;;  %13673 = vmatprep.subr.bf16.mxu1 %v20100_v9 }
0x1204   : > { %14081 = vmatprep.subr.bf16.mxu0 %v20103_v26 }
0x1206   : > { %13674 = vmatpush1.bf16.msra.mxu1 %v20098_v6 }
0x1207   : > { %14082 = vmatpush1.bf16.msra.mxu0 %v20101_v56 }
0x1209   : > { %13676 = vmatmul.mubr.bf16.vlgmr.msra.gmra.mrb[84].mxu1 %v23845_v19 }
0x120a   : > { %14084 = vmatmul.mubr.bf16.vlgmr.msra.gmra.mrb[84].mxu0 %v23845_v19  ;;  %13685 = vmatprep.mubr.bf16.mxu1 %v10191_v24 }
0x120b   : > { %14093 = vmatprep.mubr.bf16.mxu0 %v10191_v24 }
0x1211   : > { %13686 = vmatmul.mubr.bf16.gmra.mrb[116].mxu1 %v10190_v55 }
0x1212   : > { %14094 = vmatmul.mubr.bf16.gmra.mrb[116].mxu0 %v10190_v55 }
0x1221   : > { %v13534_v17 = vpop.f32.mrb[104].mxu1 }
0x1222   : > { %v13535_v43 = vadd.f32 %v13534_v17, %v24199_v44  ;;  %v13942_v13 = vpop.f32.mrb[104].mxu0  ;;  %v13536_v48 = vpop.f32.mrb[105].mxu1 }
0x1223   : > { %v13943_v31 = vadd.f32 %v13942_v13, %v24202_v25  ;;  %v13537_v1 = vadd.f32 %v13536_v48, %v24205_v3  ;;  %v13944_v28 = vpop.f32.mrb[105].mxu0  ;;  %v13538_v30 = vpop.f32.mrb[106].mxu1 }
0x1224   : > { %v13945_v2 = vadd.f32 %v13944_v28, %v24209_v47  ;;  %v13946_v19 = vpop.f32.mrb[106].mxu0  ;;  %v13539_v29 = vpop.f32.mrb[107].mxu1 }
0x1225   : > { %v13947_v41 = vpop.f32.mrb[107].mxu0  ;;  %v24572_v19 = vld [vmem:[#allocation42_spill] sm:$0xff] }
0x1262   : > { %v13585_v27 = vpop.f32.mrb[108].mxu1 }
0x1263   : > { %v13586_v37 = vadd.f32 %v13585_v27, %v13535_v43  ;;  %v13993_v57 = vpop.f32.mrb[108].mxu0  ;;  %v13587_v8 = vpop.f32.mrb[109].mxu1 }
0x1264   : > { %v13994_v12 = vadd.f32 %v13993_v57, %v13943_v31  ;;  %v13588_v0 = vadd.f32 %v13587_v8, %v13537_v1  ;;  %v13995_v44 = vpop.f32.mrb[109].mxu0  ;;  %v13589_v60 = vpop.f32.mrb[110].mxu1 }
0x1265   : > { %v13996_v16 = vadd.f32 %v13995_v44, %v13945_v2  ;;  %v13997_v10 = vpop.f32.mrb[110].mxu0  ;;  %v13590_v25 = vpop.f32.mrb[111].mxu1  ;;  %v24574_v60 = vld [vmem:[#allocation44_spill] sm:$0xff] }
0x1266   : > { %v13998_v46 = vpop.f32.mrb[111].mxu0  ;;  %v24575_v25 = vld [vmem:[#allocation43_spill] sm:$0xff] }
0x12a3   : > { %v13636_v3 = vpop.f32.mrb[112].mxu1 }
0x12a4   : > { %v13637_v42 = vadd.f32 %v13636_v3, %v13586_v37  ;;  %v14044_v61 = vpop.f32.mrb[112].mxu0  ;;  %v13638_v21 = vpop.f32.mrb[113].mxu1 }
0x12a5   : > { %v14045_v47 = vadd.f32 %v14044_v61, %v13994_v12  ;;  %v13639_v7 = vadd.f32 %v13638_v21, %v13588_v0  ;;  %v14046_v49 = vpop.f32.mrb[113].mxu0  ;;  %v13640_v32 = vpop.f32.mrb[114].mxu1  ;;  %v24576_v21 = vld [vmem:[#allocation45_spill] sm:$0xff] }
0x12a6   : > { %v14047_v52 = vadd.f32 %v14046_v49, %v13996_v16  ;;  %v14048_v50 = vpop.f32.mrb[114].mxu0  ;;  %v13641_v54 = vpop.f32.mrb[115].mxu1 }
0x12a7   : > { %v14049_v51 = vpop.f32.mrb[115].mxu0 }
0x12dc   : > { %v13677_v14 = vpop.f32.mrb[84].mxu1 }
0x12dd   : > { %v18159_v18 = vadd.f32 %v13677_v14, %v24008_v38  ;;  %v14085_v9 = vpop.f32.mrb[84].mxu0  ;;  %v13679_v58 = vpop.f32.mrb[85].mxu1 }
0x12de   : > { %v18163_v26 = vadd.f32 %v14085_v9, %v24013_v23  ;;  %v18160_v6 = vadd.f32 %v13679_v58, %v24016_v62  ;;  %v14087_v56 = vpop.f32.mrb[85].mxu0  ;;  %v13681_v22 = vpop.f32.mrb[86].mxu1 }
0x12df   : > { %v14102_v59 = vadd.f32 %v18159_v18, %v22855_v4  ;;  %v18161_v24 = vadd.f32 %v13681_v22, %v24008_v38  ;;  %v14089_v15 = vpop.f32.mrb[86].mxu0  ;;  %v13683_v55 = vpop.f32.mrb[87].mxu1  ;;  %v18164_v43 = vadd.f32 %v14087_v56, %v24020_v45 }
0x12e0   : > { %v14103_v17 = vadd.f32 %v18160_v6, %v22851_v5  ;;  %v18165_v13 = vadd.f32 %v14089_v15, %v24013_v23  ;;  %v18162_v48 = vadd.f32 %v13683_v55, %v24016_v62  ;;  %v14091_v31 = vpop.f32.mrb[87].mxu0  ;;  %v14104_v30 = vadd.f32 %v18163_v26, %v22849_v11  ;;  %v24573_v23 = vld [vmem:[#allocation46_spill] sm:$0xff] }
0x12e1   : > { %v14106_v1 = vadd.f32 %v18161_v24, %v22857_v53  ;;  %v18166_v28 = vadd.f32 %v14091_v31, %v24020_v45  ;;  %v14105_v2 = vadd.f32 %v18164_v43, %v22928_v39 }
0x12e2   : > { %v14116_v4 = vadd.f32 %v14103_v17, %v14102_v59  ;;  %v14107_v38 = vadd.f32 %v18162_v48, %v22853_v63  ;;  %v14108_v5 = vadd.f32 %v18165_v13, %v24572_v19 }
0x12e3   : > { %v14109_v37 = vadd.f32 %v18166_v28, %v24573_v23 }
0x12e4   : > { %v14121_v29 = vadd.f32 %v14107_v38, %v14106_v1  ;;  %v13687_v41 = vpop.f32.mrb[116].mxu1  ;;  %v14117_v27 = vadd.f32 %v14116_v4, %v14104_v30 }
0x12e5   : > { %v13688_v62 = vadd.f32 %v13687_v41, %v13637_v42  ;;  %v14095_v57 = vpop.f32.mrb[116].mxu0  ;;  %v13689_v8 = vpop.f32.mrb[117].mxu1 }
0x12e6   : > { %v14096_v53 = vadd.f32 %v14095_v57, %v14045_v47  ;;  %v13690_v12 = vadd.f32 %v13689_v8, %v13639_v7  ;;  %v14097_v45 = vpop.f32.mrb[117].mxu0  ;;  %v13691_v0 = vpop.f32.mrb[118].mxu1  ;;  %v14118_v11 = vadd.f32 %v14117_v27, %v14105_v2  ;;  %v14122_v44 = vadd.f32 %v14121_v29, %v14108_v5  ;;  %v24577_v47 = vld [vmem:[#allocation47_spill] sm:$0xff] }
0x12e7   : > { %v14110_v63 = vadd.f32 %v13688_v62, %v24574_v60  ;;  %v14098_v16 = vadd.f32 %v14097_v45, %v14047_v52  ;;  %v14099_v39 = vpop.f32.mrb[118].mxu0  ;;  %v13692_v10 = vpop.f32.mrb[119].mxu1 }
0x12e8   : > { %v14111_v46 = vadd.f32 %v13690_v12, %v24575_v25  ;;  %v14100_v3 = vpop.f32.mrb[119].mxu0  ;;  %14119 = vadd.xlane.f32.xlu0 %v14118_v11  ;;  %v14123_v61 = vadd.f32 %v14122_v44, %v14109_v37  ;;  %v14112_v42 = vadd.f32 %v14096_v53, %v24576_v21  ;;  %v14114_v25 = vld [vmem:[%s24578_s2] sm:$0xf] }
0x12e9   : > { %v14113_v7 = vadd.f32 %v14098_v16, %v24577_v47  ;;  %v14115_v3 = vld [vmem:[%s24579_s18] sm:$0xf]  ;;  %v14202_v21 = vrot.slane %v14114_v25, %v22118_v34 }
0x12ea   : > { %v14126_v49 = vadd.f32 %v14111_v46, %v14110_v63  ;;  %14124 = vadd.xlane.f32.xlu1 %v14123_v61  ;;  %v14198_v61 = vrot.slane %v14114_v25, %v22115_v33 }
0x12ec   : > { %v14127_v32 = vadd.f32 %v14126_v49, %v14112_v42  ;;  %v14210_v49 = vrot.slane %v14114_v25, %v22285_v20 }
0x12ee   : > { %v14128_v50 = vadd.f32 %v14127_v32, %v14113_v7  ;;  %v14235_v32 = vrot.slane %v14115_v3, %v22118_v34 }
0x12f0   : > { %14129 = vadd.xlane.f32.xlu0 %v14128_v50  ;;  %v14239_v50 = vrot.slane %v14115_v3, %v22282_v40 }
0x1375   : > { %v14120_v54 = vpop.xlane.xlu0 %14119 }
0x1376   : > { %v14131_v51 = vmul.f32 0.001953125, %v14120_v54  ;;  %v14243_v54 = vrot.slane %v14115_v3, %v22285_v20 }
0x1377   : > { %v14125_v14 = vpop.xlane.xlu1 %14124 }
0x1378   : > { %v14134_v52 = vsub.f32 %v14102_v59, %v14131_v51  ;;  %v14135_v18 = vsub.f32 %v14103_v17, %v14131_v51  ;;  %v14132_v9 = vmul.f32 0.001953125, %v14125_v14  ;;  %v14136_v58 = vsub.f32 %v14104_v30, %v14131_v51 }
0x1379   : > { %v14137_v26 = vsub.f32 %v14105_v2, %v14131_v51 }
0x137a   : > { %v24274_v6 = vsub.f32 %v14106_v1, %v14132_v9  ;;  %v24276_v56 = vsub.f32 %v14107_v38, %v14132_v9  ;;  %v14146_v22 = vmul.f32 %v14134_v52, %v14134_v52  ;;  %v14147_v24 = vmul.f32 %v14135_v18, %v14135_v18 }
0x137b   : > { %v24278_v15 = vsub.f32 %v14108_v5, %v14132_v9  ;;  %v24280_v55 = vsub.f32 %v14109_v37, %v14132_v9  ;;  %v14148_v43 = vmul.f32 %v14136_v58, %v14136_v58  ;;  %v14149_v31 = vmul.f32 %v14137_v26, %v14137_v26 }
0x137c   : > { %v14158_v13 = vadd.f32 %v14147_v24, %v14146_v22  ;;  %v14150_v48 = vmul.f32 %v24274_v6, %v24274_v6  ;;  %v14151_v59 = vmul.f32 %v24276_v56, %v24276_v56 }
0x137d   : > { %v14130_v17 = vpop.xlane.xlu0 %14129  ;;  %v14152_v30 = vmul.f32 %v24278_v15, %v24278_v15  ;;  %v14153_v38 = vmul.f32 %v24280_v55, %v24280_v55 }
0x137e   : > { %v14133_v1 = vmul.f32 0.001953125, %v14130_v17  ;;  %v14159_v28 = vadd.f32 %v14158_v13, %v14148_v43  ;;  %v14163_v4 = vadd.f32 %v14151_v59, %v14150_v48 }
0x1380   : > { %v24290_v2 = vsub.f32 %v14110_v63, %v14133_v1  ;;  %v24292_v19 = vsub.f32 %v14111_v46, %v14133_v1  ;;  %v14160_v5 = vadd.f32 %v14159_v28, %v14149_v31  ;;  %v14164_v29 = vadd.f32 %v14163_v4, %v14152_v30 }
0x1381   : > { %v24294_v41 = vsub.f32 %v14112_v42, %v14133_v1  ;;  %v24296_v23 = vsub.f32 %v14113_v7, %v14133_v1  ;;  %v14206_v42 = vrot.slane %v14114_v25, %v22282_v40  ;;  %v14231_v7 = vrot.slane %v14115_v3, %v22115_v33  ;;  %v20187_v25 = vld [vmem:[#allocation22 + $0x30] ss:$24 sps:$4 sm:$0xff] (!%p17766_p3)   ;;  %v20189_v3 = vld [vmem:[#allocation22 + $0x64] ss:$24 sps:$4 sm:$0xff] (!%p17766_p3)  }
0x1382   : > { %14161 = vadd.xlane.f32.xlu1 %v14160_v5  ;;  %v14165_v27 = vadd.f32 %v14164_v29, %v14153_v38  ;;  %v14154_v37 = vmul.f32 %v24290_v2, %v24290_v2  ;;  %v14155_v62 = vmul.f32 %v24292_v19, %v24292_v19 }
0x1383   : > { %v14156_v57 = vmul.f32 %v24294_v41, %v24294_v41  ;;  %v14157_v53 = vmul.f32 %v24296_v23, %v24296_v23 }
0x1384   : > { %14166 = vadd.xlane.f32.xlu0 %v14165_v27  ;;  %v14168_v8 = vadd.f32 %v14155_v62, %v14154_v37 }
0x1386   : > { %v14169_v12 = vadd.f32 %v14168_v8, %v14156_v57 }
0x1388   : > { %v14170_v45 = vadd.f32 %v14169_v12, %v14157_v53 }
0x138a   : > { %14171 = vadd.xlane.f32.xlu1 %v14170_v45 }
0x140f   : > { %v14162_v0 = vpop.xlane.xlu1 %14161 }
0x1410   : > { %v14173_v11 = vmul.f32 0.001953125, %v14162_v0 }
0x1411   : > { %v14167_v44 = vpop.xlane.xlu0 %14166 }
0x1412   : > { %v14176_v60 = vadd.f32 1e-05, %v14173_v11  ;;  %v14174_v63 = vmul.f32 0.001953125, %v14167_v44 }
0x1414   : > { %20158 = vrsqrt.f32 %v14176_v60  ;;  %v14177_v16 = vadd.f32 1e-05, %v14174_v63  ;;  %v20179_v60 = vld [vmem:[#allocation22 + $0x304] ss:$24 sps:$4 sm:$0xff] (!%p17766_p3)   ;;  %v20181_v63 = vld [vmem:[#allocation22] ss:$24 sps:$4 sm:$0xff] (!%p17766_p3)  }
0x1415   : > { %15515 = vmatprep.subr.bf16.mxu0 (!%p17766_p3), %v20179_v60  ;;  %v20251_v60 = vld [vmem:[#allocation22 + $0x544] ss:$24 sps:$4 sm:$0xff] (!%p17766_p3)  }
0x1416   : > { %20160 = vrsqrt.f32 %v14177_v16  ;;  %v20182_v16 = vld [vmem:[#allocation22 + $0x300] ss:$24 sps:$4 sm:$0xff] (!%p17766_p3)  }
0x1417   : > { %v14172_v39 = vpop.xlane.xlu1 %14171  ;;  %15516 = vmatpush1.bf16.msra.mxu0 (!%p17766_p3), %v20182_v16  ;;  %v20254_v16 = vld [vmem:[#allocation22 + $0x540] ss:$24 sps:$4 sm:$0xff] (!%p17766_p3)  }
0x1418   : > { %v14175_v10 = vmul.f32 0.001953125, %v14172_v39  ;;  %v20183_v39 = vld [vmem:[#allocation22 + $0x34] ss:$24 sps:$4 sm:$0xff] (!%p17766_p3)  }
0x141a   : > { %v14178_v46 = vadd.f32 1e-05, %v14175_v10  ;;  %v20185_v10 = vld [vmem:[#allocation22 + $0x334] ss:$24 sps:$4 sm:$0xff] (!%p17766_p3)  }
0x141b   : > { %15517 = vmatprep.subr.bf16.mxu0 (!%p17766_p3), %v20185_v10  ;;  %v20257_v10 = vld [vmem:[#allocation22 + $0x574] ss:$24 sps:$4 sm:$0xff] (!%p17766_p3)  }
0x141c   : > { %20162 = vrsqrt.f32 %v14178_v46  ;;  %v20188_v46 = vld [vmem:[#allocation22 + $0x330] ss:$24 sps:$4 sm:$0xff] (!%p17766_p3)  }
0x141d   : > { %15518 = vmatpush1.bf16.msra.mxu0 (!%p17766_p3), %v20188_v46  ;;  %v20260_v46 = vld [vmem:[#allocation22 + $0x570] ss:$24 sps:$4 sm:$0xff] (!%p17766_p3)  }
0x141e   : > { %v20159_v47 = vpop.eup %20158 }
0x141f   : > { %v14182_v51 = vmul.f32 %v20159_v47, %v14134_v52  ;;  %v14183_v14 = vmul.f32 %v20159_v47, %v14135_v18  ;;  %v14184_v9 = vmul.f32 %v20159_v47, %v14136_v58  ;;  %v14185_v22 = vmul.f32 %v20159_v47, %v14137_v26  ;;  %v20197_v47 = vld [vmem:[#allocation22 + $0x394] ss:$24 sps:$4 sm:$0xff] (!%p17766_p3)  }
0x1420   : > { %v20161_v24 = vpop.eup %20160 }
0x1421   : > { %v14215_v43 = vmul.f32 %v14198_v61, %v14182_v51  ;;  %v14216_v13 = vmul.f32 %v14202_v21, %v14183_v14  ;;  %v14217_v48 = vmul.f32 %v14206_v42, %v14184_v9  ;;  %v14218_v59 = vmul.f32 %v14210_v49, %v14185_v22  ;;  %v20205_v51 = vld [vmem:[#allocation22 + $0xc0] ss:$24 sps:$4 sm:$0xff] (!%p17766_p3)   ;;  %v20207_v9 = vld [vmem:[#allocation22 + $0xf4] ss:$24 sps:$4 sm:$0xff] (!%p17766_p3)  }
0x1422   : > { %v14186_v17 = vmul.f32 %v20161_v24, %v24274_v6  ;;  %v14187_v31 = vmul.f32 %v20161_v24, %v24276_v56  ;;  %v14188_v1 = vmul.f32 %v20161_v24, %v24278_v15  ;;  %v14189_v28 = vmul.f32 %v20161_v24, %v24280_v55  ;;  %v20206_v14 = vld [vmem:[#allocation22 + $0x3c0] ss:$24 sps:$4 sm:$0xff] (!%p17766_p3)   ;;  %v20209_v22 = vld [vmem:[#allocation22 + $0x3f4] ss:$24 sps:$4 sm:$0xff] (!%p17766_p3)   ;;  %v20211_v24 = vld [vmem:[#allocation22 + $0xf0] ss:$24 sps:$4 sm:$0xff] (!%p17766_p3)  }
0x1423   : > { %v24322_v30 = vadd.f32 %v14231_v7, %v14215_v43  ;;  %v14249_v4 = vadd.f32 %v14235_v32, %v14216_v13  ;;  %v24324_v52 = vadd.f32 %v14239_v50, %v14217_v48  ;;  %v14251_v18 = vadd.f32 %v14243_v54, %v14218_v59  ;;  %v20212_v43 = vld [vmem:[#allocation22 + $0x3f0] ss:$24 sps:$4 sm:$0xff] (!%p17766_p3)   ;;  %v20213_v13 = vld [vmem:[#allocation22 + $0x124] ss:$24 sps:$4 sm:$0xff] (!%p17766_p3)   ;;  %v20217_v59 = vld [vmem:[#allocation22 + $0x120] ss:$24 sps:$4 sm:$0xff] (!%p17766_p3)  }
0x1424   : > { %v14219_v58 = vmul.f32 %v14198_v61, %v14186_v17  ;;  %v14220_v26 = vmul.f32 %v14202_v21, %v14187_v31  ;;  %v14221_v38 = vmul.f32 %v14206_v42, %v14188_v1  ;;  %v14222_v5 = vmul.f32 %v14210_v49, %v14189_v28  ;;  %v20215_v48 = vld [vmem:[#allocation22 + $0x424] ss:$24 sps:$4 sm:$0xff] (!%p17766_p3)   ;;  %v20218_v17 = vld [vmem:[#allocation22 + $0x420] ss:$24 sps:$4 sm:$0xff] (!%p17766_p3)   ;;  %v20219_v31 = vld [vmem:[#allocation22 + $0x154] ss:$24 sps:$4 sm:$0xff] (!%p17766_p3)  }
0x1425   : > { %14260 = vst [vmem:[#allocation2] sm:$0xff] %v24322_v30  ;;  %14261 = vst [vmem:[#allocation2 + $0x8] sm:$0xff] %v14249_v4  ;;  %v20221_v1 = vld [vmem:[#allocation22 + $0x454] ss:$24 sps:$4 sm:$0xff] (!%p17766_p3)   ;;  %v20223_v28 = vld [vmem:[#allocation22 + $0x150] ss:$24 sps:$4 sm:$0xff] (!%p17766_p3)  }
0x1426   : > { %14262 = vst [vmem:[#allocation2 + $0x10] sm:$0xff] %v24324_v52  ;;  %14263 = vst [vmem:[#allocation2 + $0x18] sm:$0xff] %v14251_v18  ;;  %v20163_v6 = vpop.eup %20162  ;;  %v24328_v56 = vadd.f32 %v14231_v7, %v14219_v58  ;;  %v14253_v15 = vadd.f32 %v14235_v32, %v14220_v26  ;;  %v24330_v55 = vadd.f32 %v14239_v50, %v14221_v38  ;;  %v20227_v58 = vld [vmem:[#allocation22 + $0x484] ss:$24 sps:$4 sm:$0xff] (!%p17766_p3)   ;;  %v20229_v26 = vld [vmem:[#allocation22 + $0x180] ss:$24 sps:$4 sm:$0xff] (!%p17766_p3)  }
0x1427   : > { %v14255_v29 = vadd.f32 %v14243_v54, %v14222_v5  ;;  %v14190_v27 = vmul.f32 %v20163_v6, %v24290_v2  ;;  %v14191_v37 = vmul.f32 %v20163_v6, %v24292_v19  ;;  %v14192_v62 = vmul.f32 %v20163_v6, %v24294_v41  ;;  %v20177_v41 = vld [vmem:[#allocation22 + $0x4] ss:$24 sps:$4 sm:$0xff] (!%p17766_p3)   ;;  %v20230_v38 = vld [vmem:[#allocation22 + $0x480] ss:$24 sps:$4 sm:$0xff] (!%p17766_p3)   ;;  %v20231_v5 = vld [vmem:[#allocation22 + $0x1b4] ss:$24 sps:$4 sm:$0xff] (!%p17766_p3)  }
0x1428   : > { %v14193_v57 = vmul.f32 %v20163_v6, %v24296_v23  ;;  %14264 = vst [vmem:[#allocation2 + $0x20] sm:$0xff] %v24328_v56  ;;  %14265 = vst [vmem:[#allocation2 + $0x28] sm:$0xff] %v14253_v15  ;;  %14275 = sbr.rel (%p17766_p3) target bundleno = 5578 (0x15ca), region = 148  ;;  %v24351_v23 = vpack.c.bf16 (!%p17766_p3), %v14253_v15, %v14249_v4  ;;  %15468 = vmatprep.subr.bf16.mxu1 (!%p17766_p3), %v20177_v41  ;;  %v20224_v4 = vld [vmem:[#allocation22 + $0x450] ss:$24 sps:$4 sm:$0xff] (!%p17766_p3)  }
0x1429   : > { %14266 = vst [vmem:[#allocation2 + $0x30] sm:$0xff] %v24330_v55  ;;  %14267 = vst [vmem:[#allocation2 + $0x38] sm:$0xff] %v14255_v29  ;;  %v14223_v8 = vmul.f32 %v14198_v61, %v14190_v27  ;;  %v14224_v53 = vmul.f32 %v14202_v21, %v14191_v37  ;;  %v14225_v12 = vmul.f32 %v14206_v42, %v14192_v62  ;;  %15469 = vmatpush1.bf16.msra.mxu1 (!%p17766_p3), %v20181_v63  ;;  %v20191_v61 = vld [vmem:[#allocation22 + $0x364] ss:$24 sps:$4 sm:$0xff] (!%p17766_p3)   ;;  %v20193_v21 = vld [vmem:[#allocation22 + $0x60] ss:$24 sps:$4 sm:$0xff] (!%p17766_p3)  }
0x142a   : > { %v14226_v45 = vmul.f32 %v14210_v49, %v14193_v57  ;;  %v24353_v44 = vpack.c.bf16 (!%p17766_p3), %v14255_v29, %v14251_v18  ;;  %15500 = vmatprep.mubr.bf16.mxu1 (!%p17766_p3), %v24351_v23  ;;  %15470 = vmatprep.subr.bf16.mxu1 (!%p17766_p3), %v20183_v39  ;;  %v20194_v42 = vld [vmem:[#allocation22 + $0x360] ss:$24 sps:$4 sm:$0xff] (!%p17766_p3)   ;;  %v20195_v49 = vld [vmem:[#allocation22 + $0x94] ss:$24 sps:$4 sm:$0xff] (!%p17766_p3)   ;;  %v20225_v18 = vld [vmem:[#allocation22 + $0x184] ss:$24 sps:$4 sm:$0xff] (!%p17766_p3)  }
0x142b   : > { %v24338_v0 = vadd.f32 %v14231_v7, %v14223_v8  ;;  %v24340_v11 = vadd.f32 %v14235_v32, %v14224_v53  ;;  %v24342_v2 = vadd.f32 %v14239_v50, %v14225_v12  ;;  %15519 = vmatprep.subr.bf16.mxu0 (!%p17766_p3), %v20191_v61  ;;  %v20199_v7 = vld [vmem:[#allocation22 + $0x90] ss:$24 sps:$4 sm:$0xff] (!%p17766_p3)   ;;  %v20201_v50 = vld [vmem:[#allocation22 + $0xc4] ss:$24 sps:$4 sm:$0xff] (!%p17766_p3)   ;;  %v20233_v6 = vld [vmem:[#allocation22 + $0x4b4] ss:$24 sps:$4 sm:$0xff] (!%p17766_p3)  }
0x142c   : > { %v24344_v19 = vadd.f32 %v14243_v54, %v14226_v45  ;;  %15547 = vmatprep.mubr.bf16.mxu0 (!%p17766_p3), %v24353_v44  ;;  %15520 = vmatpush1.bf16.msra.mxu0 (!%p17766_p3), %v20194_v42  ;;  %v20200_v32 = vld [vmem:[#allocation22 + $0x390] ss:$24 sps:$4 sm:$0xff] (!%p17766_p3)   ;;  %v20203_v54 = vld [vmem:[#allocation22 + $0x3c4] ss:$24 sps:$4 sm:$0xff] (!%p17766_p3)   ;;  %v20241_v62 = vld [vmem:[#allocation22 + $0x1e0] ss:$24 sps:$4 sm:$0xff] (!%p17766_p3)  }
0x142d   : > { %14268 = vst [vmem:[#allocation2 + $0x40] sm:$0xff] %v24338_v0  ;;  %14269 = vst [vmem:[#allocation2 + $0x48] sm:$0xff] %v24340_v11  ;;  %15471 = vmatpush1.bf16.msra.mxu1 (!%p17766_p3), %v20187_v25  ;;  %15521 = vmatprep.subr.bf16.mxu0 (!%p17766_p3), %v20197_v47  ;;  %v20235_v15 = vld [vmem:[#allocation22 + $0x1b0] ss:$24 sps:$4 sm:$0xff] (!%p17766_p3)   ;;  %v20237_v27 = vld [vmem:[#allocation22 + $0x1e4] ss:$24 sps:$4 sm:$0xff] (!%p17766_p3)  }
0x142e   : > { %14270 = vst [vmem:[#allocation2 + $0x50] sm:$0xff] %v24342_v2  ;;  %14271 = vst [vmem:[#allocation2 + $0x58] sm:$0xff] %v24344_v19  ;;  %15472 = vmatprep.subr.bf16.mxu1 (!%p17766_p3), %v20189_v3  ;;  %v20236_v29 = vld [vmem:[#allocation22 + $0x4b0] ss:$24 sps:$4 sm:$0xff] (!%p17766_p3)   ;;  %v20239_v37 = vld [vmem:[#allocation22 + $0x4e4] ss:$24 sps:$4 sm:$0xff] (!%p17766_p3)  }
0x142f   : > { %v20242_v57 = vld [vmem:[#allocation22 + $0x4e0] ss:$24 sps:$4 sm:$0xff]   ;;  %v20243_v8 = vld [vmem:[#allocation22 + $0x214] ss:$24 sps:$4 sm:$0xff]   ;;  %v20247_v12 = vld [vmem:[#allocation22 + $0x210] ss:$24 sps:$4 sm:$0xff]  }
0x1430   : > { %15522 = vmatpush1.bf16.msra.mxu0 %v20200_v32  ;;  %v20245_v53 = vld [vmem:[#allocation22 + $0x514] ss:$24 sps:$4 sm:$0xff]   ;;  %v20248_v45 = vld [vmem:[#allocation22 + $0x510] ss:$24 sps:$4 sm:$0xff]   ;;  %v20249_v41 = vld [vmem:[#allocation22 + $0x244] ss:$24 sps:$4 sm:$0xff]  }
0x1431   : > { %15473 = vmatpush1.bf16.msra.mxu1 %v20193_v21  ;;  %15523 = vmatprep.subr.bf16.mxu0 %v20203_v54  ;;  %v20253_v63 = vld [vmem:[#allocation22 + $0x240] ss:$24 sps:$4 sm:$0xff]   ;;  %v20255_v39 = vld [vmem:[#allocation22 + $0x274] ss:$24 sps:$4 sm:$0xff]   ;;  %v20259_v25 = vld [vmem:[#allocation22 + $0x270] ss:$24 sps:$4 sm:$0xff]  }
0x1432   : > { %15474 = vmatprep.subr.bf16.mxu1 %v20195_v49  ;;  %v20261_v3 = vld [vmem:[#allocation22 + $0x2a4] ss:$24 sps:$4 sm:$0xff]   ;;  %v20265_v21 = vld [vmem:[#allocation22 + $0x2a0] ss:$24 sps:$4 sm:$0xff]   ;;  %v20267_v49 = vld [vmem:[#allocation22 + $0x2d4] ss:$24 sps:$4 sm:$0xff]  }
0x1433   : > { %v20263_v61 = vld [vmem:[#allocation22 + $0x5a4] ss:$24 sps:$4 sm:$0xff]   ;;  %v20266_v42 = vld [vmem:[#allocation22 + $0x5a0] ss:$24 sps:$4 sm:$0xff]   ;;  %v20269_v47 = vld [vmem:[#allocation22 + $0x5d4] ss:$24 sps:$4 sm:$0xff]  }
0x1434   : > { %15524 = vmatpush1.bf16.msra.mxu0 %v20206_v14  ;;  %v20272_v32 = vld [vmem:[#allocation22 + $0x5d0] ss:$24 sps:$4 sm:$0xff]   ;;  %v20278_v54 = vld [vmem:[#allocation22 + $0x14] ss:$24 sps:$4 sm:$0xff]   ;;  %v24363_v14 = vpack.c.bf16 %v24330_v55, %v24324_v52 }
0x1435   : > { %15475 = vmatpush1.bf16.msra.mxu1 %v20199_v7  ;;  %15525 = vmatprep.subr.bf16.mxu0 %v20209_v22  ;;  %v20271_v7 = vld [vmem:[#allocation22 + $0x2d0] ss:$24 sps:$4 sm:$0xff]   ;;  %v20287_v55 = vld [vmem:[#allocation22 + $0x6c] ss:$24 sps:$4 sm:$0xff]  }
0x1436   : > { %15476 = vmatprep.subr.bf16.mxu1 %v20201_v50  ;;  %v20275_v50 = vld [vmem:[#allocation22 + $0xc] ss:$24 sps:$4 sm:$0xff]   ;;  %v20276_v22 = vld [vmem:[#allocation22 + $0x10] ss:$24 sps:$4 sm:$0xff]  }
0x1437   : > { %v20279_v52 = vld [vmem:[#allocation22 + $0x38] ss:$24 sps:$4 sm:$0xff]  }
0x1438   : > { %15526 = vmatpush1.bf16.msra.mxu0 %v20212_v43  ;;  %v20284_v43 = vld [vmem:[#allocation22 + $0x44] ss:$24 sps:$4 sm:$0xff]  }
0x1439   : > { %15477 = vmatpush1.bf16.msra.mxu1 %v20205_v51  ;;  %15527 = vmatprep.subr.bf16.mxu0 %v20215_v48  ;;  %v24359_v51 = vpack.c.bf16 %v24328_v56, %v24322_v30  ;;  %v24371_v30 = vpack.c.bf16 %v24344_v19, %v24344_v19  ;;  %v20282_v56 = vld [vmem:[#allocation22 + $0x40] ss:$24 sps:$4 sm:$0xff]   ;;  %v20290_v48 = vld [vmem:[#allocation22 + $0x74] ss:$24 sps:$4 sm:$0xff]   ;;  %v24379_v19 = vpack.c.bf16 %v24338_v0, %v24338_v0 }
0x143a   : > { %15478 = vmatprep.subr.bf16.mxu1 %v20207_v9  ;;  %v20273_v9 = vld [vmem:[#allocation22 + $0x8] ss:$24 sps:$4 sm:$0xff]   ;;  %v20299_v0 = vld [vmem:[#allocation22 + $0xcc] ss:$24 sps:$4 sm:$0xff]  }
0x143c   : > { %15528 = vmatpush1.bf16.msra.mxu0 %v20218_v17  ;;  %v24383_v17 = vpack.c.bf16 %v24342_v2, %v24342_v2  ;;  %v20297_v2 = vld [vmem:[#allocation22 + $0xc8] ss:$24 sps:$4 sm:$0xff]  }
0x143d   : > { %15479 = vmatpush1.bf16.msra.mxu1 %v20211_v24  ;;  %15529 = vmatprep.subr.bf16.mxu0 %v20221_v1  ;;  %v20281_v24 = vld [vmem:[#allocation22 + $0x3c] ss:$24 sps:$4 sm:$0xff]  }
0x143e   : > { %15480 = vmatprep.subr.bf16.mxu1 %v20213_v13  ;;  %v24367_v13 = vpack.c.bf16 %v24340_v11, %v24340_v11  ;;  %v20285_v11 = vld [vmem:[#allocation22 + $0x68] ss:$24 sps:$4 sm:$0xff]   ;;  %v20296_v1 = vld [vmem:[#allocation22 + $0xa4] ss:$24 sps:$4 sm:$0xff]  }
0x1440   : > { %15530 = vmatpush1.bf16.msra.mxu0 %v20224_v4  ;;  %v20294_v4 = vld [vmem:[#allocation22 + $0xa0] ss:$24 sps:$4 sm:$0xff]  }
0x1441   : > { %15481 = vmatpush1.bf16.msra.mxu1 %v20217_v59  ;;  %15531 = vmatprep.subr.bf16.mxu0 %v20227_v58  ;;  %v20288_v59 = vld [vmem:[#allocation22 + $0x70] ss:$24 sps:$4 sm:$0xff]  }
0x1442   : > { %15482 = vmatprep.subr.bf16.mxu1 %v20219_v31  ;;  %v20293_v31 = vld [vmem:[#allocation22 + $0x9c] ss:$24 sps:$4 sm:$0xff]   ;;  %v20300_v58 = vld [vmem:[#allocation22 + $0xd0] ss:$24 sps:$4 sm:$0xff]  }
0x1444   : > { %15532 = vmatpush1.bf16.msra.mxu0 %v20230_v38  ;;  %v20308_v38 = vld [vmem:[#allocation22 + $0x104] ss:$24 sps:$4 sm:$0xff]  }
0x1445   : > { %15483 = vmatpush1.bf16.msra.mxu1 %v20223_v28  ;;  %15533 = vmatprep.subr.bf16.mxu0 %v20233_v6  ;;  %v20291_v28 = vld [vmem:[#allocation22 + $0x98] ss:$24 sps:$4 sm:$0xff]  }
0x1446   : > { %15484 = vmatprep.subr.bf16.mxu1 %v20225_v18  ;;  %v20302_v18 = vld [vmem:[#allocation22 + $0xd4] ss:$24 sps:$4 sm:$0xff]   ;;  %v20306_v6 = vld [vmem:[#allocation22 + $0x100] ss:$24 sps:$4 sm:$0xff]  }
0x1448   : > { %15534 = vmatpush1.bf16.msra.mxu0 %v20236_v29  ;;  %v20314_v29 = vld [vmem:[#allocation22 + $0x134] ss:$24 sps:$4 sm:$0xff]  }
0x1449   : > { %15485 = vmatpush1.bf16.msra.mxu1 %v20229_v26  ;;  %15535 = vmatprep.subr.bf16.mxu0 %v20239_v37  ;;  %v20305_v26 = vld [vmem:[#allocation22 + $0xfc] ss:$24 sps:$4 sm:$0xff]   ;;  %v20312_v37 = vld [vmem:[#allocation22 + $0x130] ss:$24 sps:$4 sm:$0xff]  }
0x144a   : > { %15486 = vmatprep.subr.bf16.mxu1 %v20231_v5  ;;  %v20303_v5 = vld [vmem:[#allocation22 + $0xf8] ss:$24 sps:$4 sm:$0xff]  }
0x144c   : > { %15536 = vmatpush1.bf16.msra.mxu0 %v20242_v57  ;;  %v20315_v57 = vld [vmem:[#allocation22 + $0x158] ss:$24 sps:$4 sm:$0xff]  }
0x144d   : > { %15487 = vmatpush1.bf16.msra.mxu1 %v20235_v15  ;;  %15537 = vmatprep.subr.bf16.mxu0 %v20245_v53  ;;  %v20311_v15 = vld [vmem:[#allocation22 + $0x12c] ss:$24 sps:$4 sm:$0xff]  }
0x144e   : > { %15488 = vmatprep.subr.bf16.mxu1 %v20237_v27  ;;  %v20309_v27 = vld [vmem:[#allocation22 + $0x128] ss:$24 sps:$4 sm:$0xff]   ;;  %v20323_v53 = vld [vmem:[#allocation22 + $0x18c] ss:$24 sps:$4 sm:$0xff]  }
0x1450   : > { %15538 = vmatpush1.bf16.msra.mxu0 %v20248_v45  ;;  %v20321_v45 = vld [vmem:[#allocation22 + $0x188] ss:$24 sps:$4 sm:$0xff]  }
0x1451   : > { %15489 = vmatpush1.bf16.msra.mxu1 %v20241_v62  ;;  %15539 = vmatprep.subr.bf16.mxu0 %v20251_v60  ;;  %v20320_v62 = vld [vmem:[#allocation22 + $0x164] ss:$24 sps:$4 sm:$0xff]  }
0x1452   : > { %15490 = vmatprep.subr.bf16.mxu1 %v20243_v8  ;;  %v20318_v8 = vld [vmem:[#allocation22 + $0x160] ss:$24 sps:$4 sm:$0xff]   ;;  %v20329_v60 = vld [vmem:[#allocation22 + $0x1bc] ss:$24 sps:$4 sm:$0xff]  }
0x1454   : > { %15540 = vmatpush1.bf16.msra.mxu0 %v20254_v16  ;;  %v20327_v16 = vld [vmem:[#allocation22 + $0x1b8] ss:$24 sps:$4 sm:$0xff]  }
0x1455   : > { %15491 = vmatpush1.bf16.msra.mxu1 %v20247_v12  ;;  %15541 = vmatprep.subr.bf16.mxu0 %v20257_v10  ;;  %v20326_v12 = vld [vmem:[#allocation22 + $0x194] ss:$24 sps:$4 sm:$0xff]  }
0x1456   : > { %15492 = vmatprep.subr.bf16.mxu1 %v20249_v41  ;;  %v20324_v41 = vld [vmem:[#allocation22 + $0x190] ss:$24 sps:$4 sm:$0xff]   ;;  %v20335_v10 = vld [vmem:[#allocation22 + $0x1ec] ss:$24 sps:$4 sm:$0xff]  }
0x1458   : > { %15542 = vmatpush1.bf16.msra.mxu0 %v20260_v46  ;;  %v20333_v46 = vld [vmem:[#allocation22 + $0x1e8] ss:$24 sps:$4 sm:$0xff]  }
0x1459   : > { %15493 = vmatpush1.bf16.msra.mxu1 %v20253_v63  ;;  %15543 = vmatprep.subr.bf16.mxu0 %v20263_v61  ;;  %v20332_v63 = vld [vmem:[#allocation22 + $0x1c4] ss:$24 sps:$4 sm:$0xff]  }
0x145a   : > { %15494 = vmatprep.subr.bf16.mxu1 %v20255_v39  ;;  %v20330_v39 = vld [vmem:[#allocation22 + $0x1c0] ss:$24 sps:$4 sm:$0xff]   ;;  %v20341_v61 = vld [vmem:[#allocation22 + $0x21c] ss:$24 sps:$4 sm:$0xff]  }
0x145c   : > { %15544 = vmatpush1.bf16.msra.mxu0 %v20266_v42  ;;  %v20339_v42 = vld [vmem:[#allocation22 + $0x218] ss:$24 sps:$4 sm:$0xff]  }
0x145d   : > { %15495 = vmatpush1.bf16.msra.mxu1 %v20259_v25  ;;  %15545 = vmatprep.subr.bf16.mxu0 %v20269_v47  ;;  %v20338_v25 = vld [vmem:[#allocation22 + $0x1f4] ss:$24 sps:$4 sm:$0xff]  }
0x145e   : > { %15496 = vmatprep.subr.bf16.mxu1 %v20261_v3  ;;  %v20336_v3 = vld [vmem:[#allocation22 + $0x1f0] ss:$24 sps:$4 sm:$0xff]   ;;  %v20347_v47 = vld [vmem:[#allocation22 + $0x24c] ss:$24 sps:$4 sm:$0xff]  }
0x1460   : > { %15546 = vmatpush1.bf16.msra.mxu0 %v20272_v32  ;;  %v20345_v32 = vld [vmem:[#allocation22 + $0x248] ss:$24 sps:$4 sm:$0xff]  }
0x1461   : > { %15497 = vmatpush1.bf16.msra.mxu1 %v20265_v21  ;;  %15656 = vmatprep.subr.bf16.mxu0 %v20278_v54  ;;  %v20344_v21 = vld [vmem:[#allocation22 + $0x224] ss:$24 sps:$4 sm:$0xff]  }
0x1462   : > { %15498 = vmatprep.subr.bf16.mxu1 %v20267_v49  ;;  %v20342_v49 = vld [vmem:[#allocation22 + $0x220] ss:$24 sps:$4 sm:$0xff]   ;;  %v20353_v54 = vld [vmem:[#allocation22 + $0x27c] ss:$24 sps:$4 sm:$0xff]  }
0x1463   : > { %15548 = vmatmul.mubr.bf16.vlgmr.msra.gmra.mrb[0].mxu0 %v24363_v14 }
0x1464   : > { %15657 = vmatpush1.bf16.msra.mxu0 %v20276_v22  ;;  %15555 = vmatprep.mubr.bf16.mxu0 %v24371_v30  ;;  %v20351_v22 = vld [vmem:[#allocation22 + $0x278] ss:$24 sps:$4 sm:$0xff]  }
0x1465   : > { %15499 = vmatpush1.bf16.msra.mxu1 %v20271_v7  ;;  %15658 = vmatprep.subr.bf16.mxu0 %v20284_v43  ;;  %v20350_v7 = vld [vmem:[#allocation22 + $0x254] ss:$24 sps:$4 sm:$0xff]  }
0x1466   : > { %15562 = vmatprep.subr.bf16.mxu1 %v20275_v50  ;;  %v20348_v50 = vld [vmem:[#allocation22 + $0x250] ss:$24 sps:$4 sm:$0xff]   ;;  %v20359_v43 = vld [vmem:[#allocation22 + $0x2ac] ss:$24 sps:$4 sm:$0xff]  }
0x1468   : > { %15501 = vmatmul.mubr.bf16.vlgmr.msra.gmra.mrb[0].mxu1 %v24359_v51  ;;  %15659 = vmatpush1.bf16.msra.mxu0 %v20282_v56  ;;  %v20357_v56 = vld [vmem:[#allocation22 + $0x2a8] ss:$24 sps:$4 sm:$0xff]  }
0x1469   : > { %15563 = vmatpush1.bf16.msra.mxu1 %v20273_v9  ;;  %15508 = vmatprep.mubr.bf16.mxu1 %v24367_v13  ;;  %v20356_v9 = vld [vmem:[#allocation22 + $0x284] ss:$24 sps:$4 sm:$0xff]  }
0x146a   : > { %15564 = vmatprep.subr.bf16.mxu1 %v20281_v24  ;;  %15660 = vmatprep.subr.bf16.mxu0 %v20290_v48  ;;  %v20354_v24 = vld [vmem:[#allocation22 + $0x280] ss:$24 sps:$4 sm:$0xff]   ;;  %v20365_v48 = vld [vmem:[#allocation22 + $0x2dc] ss:$24 sps:$4 sm:$0xff]  }
0x146b   : > { %15556 = vmatmul.mubr.bf16.gmra.mrb[4].mxu0 %v24383_v17 }
0x146c   : > { %15661 = vmatpush1.bf16.msra.mxu0 %v20288_v59  ;;  %15688 = vmatprep.mubr.bf16.mxu0 %v24351_v23  ;;  %v20363_v59 = vld [vmem:[#allocation22 + $0x2d8] ss:$24 sps:$4 sm:$0xff]  }
0x146d   : > { %15565 = vmatpush1.bf16.msra.mxu1 %v20279_v52  ;;  %15662 = vmatprep.subr.bf16.mxu0 %v20296_v1  ;;  %v20362_v52 = vld [vmem:[#allocation22 + $0x2b4] ss:$24 sps:$4 sm:$0xff]  }
0x146e   : > { %15566 = vmatprep.subr.bf16.mxu1 %v20287_v55  ;;  %v20360_v55 = vld [vmem:[#allocation22 + $0x2b0] ss:$24 sps:$4 sm:$0xff]   ;;  %v20371_v1 = vld [vmem:[#allocation22 + $0x30c] ss:$24 sps:$4 sm:$0xff]  }
0x1470   : > { %15509 = vmatmul.mubr.bf16.gmra.mrb[4].mxu1 %v24379_v19  ;;  %15663 = vmatpush1.bf16.msra.mxu0 %v20294_v4  ;;  %v20369_v4 = vld [vmem:[#allocation22 + $0x308] ss:$24 sps:$4 sm:$0xff]  }
0x1471   : > { %15567 = vmatpush1.bf16.msra.mxu1 %v20285_v11  ;;  %15594 = vmatprep.mubr.bf16.mxu1 %v24351_v23  ;;  %v20317_v23 = vld [vmem:[#allocation22 + $0x15c] ss:$24 sps:$4 sm:$0xff]  }
0x1472   : > { %15568 = vmatprep.subr.bf16.mxu1 %v20293_v31  ;;  %15664 = vmatprep.subr.bf16.mxu0 %v20302_v18  ;;  %v20368_v11 = vld [vmem:[#allocation22 + $0x2e4] ss:$24 sps:$4 sm:$0xff]   ;;  %v20366_v31 = vld [vmem:[#allocation22 + $0x2e0] ss:$24 sps:$4 sm:$0xff]  }
0x1473   : > { %v20377_v18 = vld [vmem:[#allocation22 + $0x33c] ss:$24 sps:$4 sm:$0xff]  }
0x1474   : > { %15665 = vmatpush1.bf16.msra.mxu0 %v20300_v58  ;;  %v20375_v58 = vld [vmem:[#allocation22 + $0x338] ss:$24 sps:$4 sm:$0xff]  }
0x1475   : > { %15569 = vmatpush1.bf16.msra.mxu1 %v20291_v28  ;;  %15666 = vmatprep.subr.bf16.mxu0 %v20308_v38  ;;  %v20374_v28 = vld [vmem:[#allocation22 + $0x314] ss:$24 sps:$4 sm:$0xff]  }
0x1476   : > { %15570 = vmatprep.subr.bf16.mxu1 %v20299_v0  ;;  %v20372_v0 = vld [vmem:[#allocation22 + $0x310] ss:$24 sps:$4 sm:$0xff]   ;;  %v20383_v38 = vld [vmem:[#allocation22 + $0x36c] ss:$24 sps:$4 sm:$0xff]  }
0x1478   : > { %15667 = vmatpush1.bf16.msra.mxu0 %v20306_v6  ;;  %v20381_v6 = vld [vmem:[#allocation22 + $0x368] ss:$24 sps:$4 sm:$0xff]  }
0x1479   : > { %15571 = vmatpush1.bf16.msra.mxu1 %v20297_v2  ;;  %15668 = vmatprep.subr.bf16.mxu0 %v20314_v29  ;;  %v20380_v2 = vld [vmem:[#allocation22 + $0x344] ss:$24 sps:$4 sm:$0xff]  }
0x147a   : > { %15572 = vmatprep.subr.bf16.mxu1 %v20305_v26  ;;  %v20378_v26 = vld [vmem:[#allocation22 + $0x340] ss:$24 sps:$4 sm:$0xff]   ;;  %v20389_v29 = vld [vmem:[#allocation22 + $0x39c] ss:$24 sps:$4 sm:$0xff]  }
0x147c   : > { %15669 = vmatpush1.bf16.msra.mxu0 %v20312_v37  ;;  %v20390_v37 = vld [vmem:[#allocation22 + $0x3a0] ss:$24 sps:$4 sm:$0xff]  }
0x147d   : > { %15573 = vmatpush1.bf16.msra.mxu1 %v20303_v5  ;;  %15670 = vmatprep.subr.bf16.mxu0 %v20320_v62  ;;  %v20386_v5 = vld [vmem:[#allocation22 + $0x374] ss:$24 sps:$4 sm:$0xff]   ;;  %v20393_v62 = vld [vmem:[#allocation22 + $0x3c8] ss:$24 sps:$4 sm:$0xff]  }
0x147e   : > { %15574 = vmatprep.subr.bf16.mxu1 %v20311_v15  ;;  %v20384_v15 = vld [vmem:[#allocation22 + $0x370] ss:$24 sps:$4 sm:$0xff]  }
0x1480   : > { %15671 = vmatpush1.bf16.msra.mxu0 %v20318_v8  ;;  %v20401_v8 = vld [vmem:[#allocation22 + $0x3fc] ss:$24 sps:$4 sm:$0xff]  }
0x1481   : > { %15575 = vmatpush1.bf16.msra.mxu1 %v20309_v27  ;;  %15672 = vmatprep.subr.bf16.mxu0 %v20326_v12  ;;  %v20387_v27 = vld [vmem:[#allocation22 + $0x398] ss:$24 sps:$4 sm:$0xff]  }
0x1482   : > { %15576 = vmatprep.subr.bf16.mxu1 %v20317_v23  ;;  %v20395_v23 = vld [vmem:[#allocation22 + $0x3cc] ss:$24 sps:$4 sm:$0xff]   ;;  %v20402_v12 = vld [vmem:[#allocation22 + $0x400] ss:$24 sps:$4 sm:$0xff]  }
0x1484   : > { %15673 = vmatpush1.bf16.msra.mxu0 %v20324_v41  ;;  %v20410_v41 = vld [vmem:[#allocation22 + $0x434] ss:$24 sps:$4 sm:$0xff]  }
0x1485   : > { %15577 = vmatpush1.bf16.msra.mxu1 %v20315_v57  ;;  %15674 = vmatprep.subr.bf16.mxu0 %v20332_v63  ;;  %v20396_v57 = vld [vmem:[#allocation22 + $0x3d0] ss:$24 sps:$4 sm:$0xff]   ;;  %v20413_v63 = vld [vmem:[#allocation22 + $0x45c] ss:$24 sps:$4 sm:$0xff]  }
0x1486   : > { %15578 = vmatprep.subr.bf16.mxu1 %v20323_v53  ;;  %v20399_v53 = vld [vmem:[#allocation22 + $0x3f8] ss:$24 sps:$4 sm:$0xff]  }
0x1488   : > { %15675 = vmatpush1.bf16.msra.mxu0 %v20330_v39  ;;  %v20411_v39 = vld [vmem:[#allocation22 + $0x458] ss:$24 sps:$4 sm:$0xff]  }
0x1489   : > { %15579 = vmatpush1.bf16.msra.mxu1 %v20321_v45  ;;  %15676 = vmatprep.subr.bf16.mxu0 %v20338_v25  ;;  %v20407_v45 = vld [vmem:[#allocation22 + $0x42c] ss:$24 sps:$4 sm:$0xff]  }
0x148a   : > { %15580 = vmatprep.subr.bf16.mxu1 %v20329_v60  ;;  %v20405_v60 = vld [vmem:[#allocation22 + $0x428] ss:$24 sps:$4 sm:$0xff]   ;;  %v20419_v25 = vld [vmem:[#allocation22 + $0x48c] ss:$24 sps:$4 sm:$0xff]  }
0x148c   : > { %15677 = vmatpush1.bf16.msra.mxu0 %v20336_v3  ;;  %v20417_v3 = vld [vmem:[#allocation22 + $0x488] ss:$24 sps:$4 sm:$0xff]  }
0x148d   : > { %15581 = vmatpush1.bf16.msra.mxu1 %v20327_v16  ;;  %15678 = vmatprep.subr.bf16.mxu0 %v20344_v21  ;;  %v20416_v16 = vld [vmem:[#allocation22 + $0x464] ss:$24 sps:$4 sm:$0xff]  }
0x148e   : > { %15582 = vmatprep.subr.bf16.mxu1 %v20335_v10  ;;  %v20414_v10 = vld [vmem:[#allocation22 + $0x460] ss:$24 sps:$4 sm:$0xff]   ;;  %v20425_v21 = vld [vmem:[#allocation22 + $0x4bc] ss:$24 sps:$4 sm:$0xff]  }
0x1490   : > { %15679 = vmatpush1.bf16.msra.mxu0 %v20342_v49  ;;  %v20423_v49 = vld [vmem:[#allocation22 + $0x4b8] ss:$24 sps:$4 sm:$0xff]  }
0x1491   : > { %15583 = vmatpush1.bf16.msra.mxu1 %v20333_v46  ;;  %15680 = vmatprep.subr.bf16.mxu0 %v20350_v7  ;;  %v20422_v46 = vld [vmem:[#allocation22 + $0x494] ss:$24 sps:$4 sm:$0xff]  }
0x1492   : > { %15584 = vmatprep.subr.bf16.mxu1 %v20341_v61  ;;  %v20420_v61 = vld [vmem:[#allocation22 + $0x490] ss:$24 sps:$4 sm:$0xff]   ;;  %v20431_v7 = vld [vmem:[#allocation22 + $0x4ec] ss:$24 sps:$4 sm:$0xff]  }
0x1494   : > { %15681 = vmatpush1.bf16.msra.mxu0 %v20348_v50  ;;  %v20429_v50 = vld [vmem:[#allocation22 + $0x4e8] ss:$24 sps:$4 sm:$0xff]  }
0x1495   : > { %15585 = vmatpush1.bf16.msra.mxu1 %v20339_v42  ;;  %15682 = vmatprep.subr.bf16.mxu0 %v20356_v9  ;;  %v20428_v42 = vld [vmem:[#allocation22 + $0x4c4] ss:$24 sps:$4 sm:$0xff]  }
0x1496   : > { %15586 = vmatprep.subr.bf16.mxu1 %v20347_v47  ;;  %v20426_v47 = vld [vmem:[#allocation22 + $0x4c0] ss:$24 sps:$4 sm:$0xff]   ;;  %v20437_v9 = vld [vmem:[#allocation22 + $0x51c] ss:$24 sps:$4 sm:$0xff]  }
0x1498   : > { %15683 = vmatpush1.bf16.msra.mxu0 %v20354_v24  ;;  %v20435_v24 = vld [vmem:[#allocation22 + $0x518] ss:$24 sps:$4 sm:$0xff]  }
0x1499   : > { %15587 = vmatpush1.bf16.msra.mxu1 %v20345_v32  ;;  %15684 = vmatprep.subr.bf16.mxu0 %v20362_v52  ;;  %v20434_v32 = vld [vmem:[#allocation22 + $0x4f4] ss:$24 sps:$4 sm:$0xff]  }
0x149a   : > { %15588 = vmatprep.subr.bf16.mxu1 %v20353_v54  ;;  %v20432_v54 = vld [vmem:[#allocation22 + $0x4f0] ss:$24 sps:$4 sm:$0xff]   ;;  %v20443_v52 = vld [vmem:[#allocation22 + $0x54c] ss:$24 sps:$4 sm:$0xff]  }
0x149c   : > { %15685 = vmatpush1.bf16.msra.mxu0 %v20360_v55  ;;  %v20441_v55 = vld [vmem:[#allocation22 + $0x548] ss:$24 sps:$4 sm:$0xff]  }
0x149d   : > { %15589 = vmatpush1.bf16.msra.mxu1 %v20351_v22  ;;  %15686 = vmatprep.subr.bf16.mxu0 %v20368_v11  ;;  %v20440_v22 = vld [vmem:[#allocation22 + $0x524] ss:$24 sps:$4 sm:$0xff]  }
0x149e   : > { %15590 = vmatprep.subr.bf16.mxu1 %v20359_v43  ;;  %v20438_v43 = vld [vmem:[#allocation22 + $0x520] ss:$24 sps:$4 sm:$0xff]   ;;  %v20449_v11 = vld [vmem:[#allocation22 + $0x57c] ss:$24 sps:$4 sm:$0xff]  }
0x14a0   : > { %15687 = vmatpush1.bf16.msra.mxu0 %v20366_v31  ;;  %v20447_v31 = vld [vmem:[#allocation22 + $0x578] ss:$24 sps:$4 sm:$0xff]  }
0x14a1   : > { %15591 = vmatpush1.bf16.msra.mxu1 %v20357_v56  ;;  %15703 = vmatprep.subr.bf16.mxu0 %v20374_v28  ;;  %v20446_v56 = vld [vmem:[#allocation22 + $0x554] ss:$24 sps:$4 sm:$0xff]  }
0x14a2   : > { %15592 = vmatprep.subr.bf16.mxu1 %v20365_v48  ;;  %v20444_v48 = vld [vmem:[#allocation22 + $0x550] ss:$24 sps:$4 sm:$0xff]   ;;  %v20455_v28 = vld [vmem:[#allocation22 + $0x5ac] ss:$24 sps:$4 sm:$0xff]  }
0x14a3   : > { %15689 = vmatmul.mubr.bf16.vlgmr.msra.gmra.mrb[8].mxu0 %v24359_v51 }
0x14a4   : > { %15704 = vmatpush1.bf16.msra.mxu0 %v20372_v0  ;;  %15696 = vmatprep.mubr.bf16.mxu0 %v24367_v13  ;;  %v20453_v0 = vld [vmem:[#allocation22 + $0x5a8] ss:$24 sps:$4 sm:$0xff]  }
0x14a5   : > { %15593 = vmatpush1.bf16.msra.mxu1 %v20363_v59  ;;  %15705 = vmatprep.subr.bf16.mxu0 %v20380_v2  ;;  %v20452_v59 = vld [vmem:[#allocation22 + $0x584] ss:$24 sps:$4 sm:$0xff]  }
0x14a6   : > { %15609 = vmatprep.subr.bf16.mxu1 %v20371_v1  ;;  %v20450_v1 = vld [vmem:[#allocation22 + $0x580] ss:$24 sps:$4 sm:$0xff]   ;;  %v20461_v2 = vld [vmem:[#allocation22 + $0x5dc] ss:$24 sps:$4 sm:$0xff]  }
0x14a8   : > { %15595 = vmatmul.mubr.bf16.vlgmr.msra.gmra.mrb[8].mxu1 %v24359_v51  ;;  %15706 = vmatpush1.bf16.msra.mxu0 %v20378_v26  ;;  %v20392_v51 = vld [vmem:[#allocation22 + $0x3a4] ss:$24 sps:$4 sm:$0xff]   ;;  %v20459_v26 = vld [vmem:[#allocation22 + $0x5d8] ss:$24 sps:$4 sm:$0xff]  }
0x14a9   : > { %15610 = vmatpush1.bf16.msra.mxu1 %v20369_v4  ;;  %15602 = vmatprep.mubr.bf16.mxu1 %v24367_v13  ;;  %v20398_v13 = vld [vmem:[#allocation22 + $0x3d4] ss:$24 sps:$4 sm:$0xff]  }
0x14aa   : > { %15611 = vmatprep.subr.bf16.mxu1 %v20377_v18  ;;  %15707 = vmatprep.subr.bf16.mxu0 %v20386_v5  ;;  %v20458_v4 = vld [vmem:[#allocation22 + $0x5b4] ss:$24 sps:$4 sm:$0xff]   ;;  %v20456_v18 = vld [vmem:[#allocation22 + $0x5b0] ss:$24 sps:$4 sm:$0xff]   ;;  %v14476_v5 = vld [vmem:[%s24581_s28] sm:$0x3f] }
0x14ab   : > { %15697 = vmatmul.mubr.bf16.gmra.mrb[12].mxu0 %v24379_v19 }
0x14ac   : > { %15708 = vmatpush1.bf16.msra.mxu0 %v20384_v15  ;;  %15735 = vmatprep.mubr.bf16.mxu0 %v24353_v44  ;;  %v14485_v15 = vrot.slane %v14476_v5, %v22118_v34 }
0x14ad   : > { %15612 = vmatpush1.bf16.msra.mxu1 %v20375_v58  ;;  %15709 = vmatprep.subr.bf16.mxu0 %v20392_v51  ;;  %v20464_v58 = vld [vmem:[#allocation22 + $0x5e4] ss:$24 sps:$4 sm:$0xff]  }
0x14ae   : > { %15613 = vmatprep.subr.bf16.mxu1 %v20383_v38  ;;  %v20462_v38 = vld [vmem:[#allocation22 + $0x5e0] ss:$24 sps:$4 sm:$0xff]  }
0x14b0   : > { %15603 = vmatmul.mubr.bf16.gmra.mrb[12].mxu1 %v24379_v19  ;;  %15710 = vmatpush1.bf16.msra.mxu0 %v20390_v37  ;;  %v20404_v19 = vld [vmem:[#allocation22 + $0x404] ss:$24 sps:$4 sm:$0xff]  }
0x14b1   : > { %15614 = vmatpush1.bf16.msra.mxu1 %v20381_v6  ;;  %15641 = vmatprep.mubr.bf16.mxu1 %v24353_v44  ;;  %v20408_v44 = vld [vmem:[#allocation22 + $0x430] ss:$24 sps:$4 sm:$0xff]   ;;  %v14481_v6 = vrot.slane %v14476_v5, %v22115_v33 }
0x14b2   : > { %15615 = vmatprep.subr.bf16.mxu1 %v20389_v29  ;;  %15711 = vmatprep.subr.bf16.mxu0 %v20398_v13 }
0x14b4   : > { %15712 = vmatpush1.bf16.msra.mxu0 %v20396_v57 }
0x14b5   : > { %15616 = vmatpush1.bf16.msra.mxu1 %v20387_v27  ;;  %15713 = vmatprep.subr.bf16.mxu0 %v20404_v19 }
0x14b6   : > { %15617 = vmatprep.subr.bf16.mxu1 %v20395_v23 }
0x14b8   : > { %15714 = vmatpush1.bf16.msra.mxu0 %v20402_v12 }
0x14b9   : > { %15618 = vmatpush1.bf16.msra.mxu1 %v20393_v62  ;;  %15715 = vmatprep.subr.bf16.mxu0 %v20410_v41 }
0x14ba   : > { %15619 = vmatprep.subr.bf16.mxu1 %v20401_v8 }
0x14bc   : > { %15716 = vmatpush1.bf16.msra.mxu0 %v20408_v44 }
0x14bd   : > { %15620 = vmatpush1.bf16.msra.mxu1 %v20399_v53  ;;  %15717 = vmatprep.subr.bf16.mxu0 %v20416_v16 }
0x14be   : > { %15621 = vmatprep.subr.bf16.mxu1 %v20407_v45 }
0x14c0   : > { %15718 = vmatpush1.bf16.msra.mxu0 %v20414_v10 }
0x14c1   : > { %15622 = vmatpush1.bf16.msra.mxu1 %v20405_v60  ;;  %15719 = vmatprep.subr.bf16.mxu0 %v20422_v46 }
0x14c2   : > { %15623 = vmatprep.subr.bf16.mxu1 %v20413_v63 }
0x14c4   : > { %15720 = vmatpush1.bf16.msra.mxu0 %v20420_v61 }
0x14c5   : > { %15624 = vmatpush1.bf16.msra.mxu1 %v20411_v39  ;;  %15721 = vmatprep.subr.bf16.mxu0 %v20428_v42 }
0x14c6   : > { %15625 = vmatprep.subr.bf16.mxu1 %v20419_v25 }
0x14c8   : > { %15722 = vmatpush1.bf16.msra.mxu0 %v20426_v47  ;;  %v14497_v47 = vrot.slane %v14476_v5, %v22243_v35 }
0x14c9   : > { %15626 = vmatpush1.bf16.msra.mxu1 %v20417_v3  ;;  %15723 = vmatprep.subr.bf16.mxu0 %v20434_v32  ;;  %v14493_v32 = vrot.slane %v14476_v5, %v22285_v20 }
0x14ca   : > { %15627 = vmatprep.subr.bf16.mxu1 %v20425_v21  ;;  %v20971_v21 = vmov 1966171168  }
0x14cb   : > { %v15760_v42 = vunpack.c.l.s4 %v20971_v21 }
0x14cc   : > { %15724 = vmatpush1.bf16.msra.mxu0 %v20432_v54 }
0x14cd   : > { %15628 = vmatpush1.bf16.msra.mxu1 %v20423_v49  ;;  %15725 = vmatprep.subr.bf16.mxu0 %v20440_v22  ;;  %v14489_v49 = vrot.slane %v14476_v5, %v22282_v40 }
0x14ce   : > { %15629 = vmatprep.subr.bf16.mxu1 %v20431_v7  ;;  %v15761_v7 = vunpack.c.0.s8 %v15760_v42 }
0x14d0   : > { %15726 = vmatpush1.bf16.msra.mxu0 %v20438_v43 }
0x14d1   : > { %15630 = vmatpush1.bf16.msra.mxu1 %v20429_v50  ;;  %15727 = vmatprep.subr.bf16.mxu0 %v20446_v56  ;;  %v14501_v50 = vrot.slane %v14476_v5, %v22246_v36  ;;  %v24582_v56 = vld [vmem:[#allocation41_spill] sm:$0xff] }
0x14d2   : > { %15631 = vmatprep.subr.bf16.mxu1 %v20437_v9 }
0x14d4   : > { %15728 = vmatpush1.bf16.msra.mxu0 %v20444_v48 }
0x14d5   : > { %15632 = vmatpush1.bf16.msra.mxu1 %v20435_v24  ;;  %15729 = vmatprep.subr.bf16.mxu0 %v20452_v59 }
0x14d6   : > { %15633 = vmatprep.subr.bf16.mxu1 %v20443_v52 }
0x14d8   : > { %15730 = vmatpush1.bf16.msra.mxu0 %v20450_v1 }
0x14d9   : > { %15634 = vmatpush1.bf16.msra.mxu1 %v20441_v55  ;;  %15731 = vmatprep.subr.bf16.mxu0 %v20458_v4  ;;  %v15764_v55 = vsub.s32 %v15761_v7, %v24582_v56 }
0x14da   : > { %15635 = vmatprep.subr.bf16.mxu1 %v20449_v11 }
0x14dc   : > { %15732 = vmatpush1.bf16.msra.mxu0 %v20456_v18 }
0x14dd   : > { %15636 = vmatpush1.bf16.msra.mxu1 %v20447_v31  ;;  %15733 = vmatprep.subr.bf16.mxu0 %v20464_v58 }
0x14de   : > { %15637 = vmatprep.subr.bf16.mxu1 %v20455_v28 }
0x14e0   : > { %15734 = vmatpush1.bf16.msra.mxu0 %v20462_v38 }
0x14e1   : > { %15638 = vmatpush1.bf16.msra.mxu1 %v20453_v0 }
0x14e2   : > { %15639 = vmatprep.subr.bf16.mxu1 %v20461_v2 }
0x14e3   : > { %15736 = vmatmul.mubr.bf16.vlgmr.msra.gmra.mrb[8].mxu0 %v24363_v14 }
0x14e4   : > { %15743 = vmatprep.mubr.bf16.mxu0 %v24371_v30 }
0x14e5   : > { %15640 = vmatpush1.bf16.msra.mxu1 %v20459_v26 }
0x14e8   : > { %15642 = vmatmul.mubr.bf16.vlgmr.msra.gmra.mrb[8].mxu1 %v24363_v14 }
0x14e9   : > { %15649 = vmatprep.mubr.bf16.mxu1 %v24371_v30 }
0x14eb   : > { %15744 = vmatmul.mubr.bf16.gmra.mrb[16].mxu0 %v24383_v17 }
0x14f0   : > { %15650 = vmatmul.mubr.bf16.gmra.mrb[16].mxu1 %v24383_v17 }
0x1536   : > { %v15549_v51 = vpop.f32.mrb[0].mxu0 }
0x1537   : > { %v15551_v37 = vpop.f32.mrb[1].mxu0 }
0x1538   : > { %v15553_v30 = vpop.f32.mrb[2].mxu0 }
0x1539   : > { %v15554_v8 = vpop.f32.mrb[3].mxu0 }
0x153b   : > { %v15502_v29 = vpop.f32.mrb[0].mxu1 }
0x153c   : > { %v15503_v27 = vadd.f32 %v15502_v29, %v14481_v6  ;;  %v15504_v14 = vpop.f32.mrb[1].mxu1  ;;  %v24583_v29 = vlaneseq }
0x153d   : > { %v15505_v23 = vadd.f32 %v15504_v14, %v14485_v15  ;;  %v15506_v13 = vpop.f32.mrb[2].mxu1 }
0x153e   : > { %v15550_v62 = vadd.f32 %v15549_v51, %v15503_v27  ;;  %v15507_v57 = vpop.f32.mrb[3].mxu1  ;;  %v15557_v12 = vpop.f32.mrb[4].mxu0  ;;  %vm15799_vm3 = vcmp.lt.s32.totalorder %v24583_v29, 768 }
0x153f   : > { %v15552_v17 = vadd.f32 %v15551_v37, %v15505_v23  ;;  %v15558_v41 = vpop.f32.mrb[5].mxu0 }
0x1540   : > { %v15559_v60 = vpop.f32.mrb[6].mxu0 }
0x1541   : > { %v15756_v19 = vcombine.low %v15550_v62, %v15552_v17  ;;  %v15560_v44 = vpop.f32.mrb[7].mxu0 }
0x1543   : > { %v15510_v53 = vpop.f32.mrb[4].mxu1  ;;  %v15765_v4 = vrot.slane %v15756_v19, %v15764_v55 }
0x1544   : > { %v15511_v45 = vpop.f32.mrb[5].mxu1 }
0x1545   : > { %v15512_v33 = vpop.f32.mrb[6].mxu1 }
0x1546   : > { %v15513_v34 = vpop.f32.mrb[7].mxu1 }
0x157e   : > { %v15698_v16 = vpop.f32.mrb[12].mxu0 }
0x157f   : > { %v15699_v10 = vpop.f32.mrb[13].mxu0 }
0x1580   : > { %v15700_v46 = vpop.f32.mrb[14].mxu0 }
0x1581   : > { %v15701_v61 = vpop.f32.mrb[15].mxu0 }
0x1583   : > { %v15604_v63 = vpop.f32.mrb[12].mxu1 }
0x1584   : > { %v15605_v39 = vpop.f32.mrb[13].mxu1 }
0x1585   : > { %v15606_v25 = vpop.f32.mrb[14].mxu1 }
0x1586   : > { %v15607_v3 = vpop.f32.mrb[15].mxu1 }
0x15b6   : > { %v15737_v9 = vpop.f32.mrb[8].mxu0 }
0x15b7   : > { %v18349_v24 = vadd.f32 %v15737_v9, %v14497_v47  ;;  %v15739_v52 = vpop.f32.mrb[9].mxu0 }
0x15b8   : > { %v18350_v11 = vadd.f32 %v15739_v52, %v14501_v50  ;;  %v15741_v31 = vpop.f32.mrb[10].mxu0 }
0x15b9   : > { %v15742_v1 = vpop.f32.mrb[11].mxu0 }
0x15ba   : > { %v15758_v28 = vcombine.low %v18349_v24, %v18350_v11 }
0x15bb   : > { %v15643_v54 = vpop.f32.mrb[8].mxu1 }
0x15bc   : > { %v18347_v22 = vadd.f32 %v15643_v54, %v14489_v49  ;;  %v15645_v43 = vpop.f32.mrb[9].mxu1  ;;  %v15779_v36 = vrot.slane %v15758_v28, %v15764_v55 }
0x15bd   : > { %v18348_v48 = vadd.f32 %v15645_v43, %v14493_v32  ;;  %v15647_v59 = vpop.f32.mrb[10].mxu1 }
0x15be   : > { %v15648_v40 = vpop.f32.mrb[11].mxu1  ;;  %v15745_v2 = vpop.f32.mrb[16].mxu0  ;;  %v15794_v5 = vrot.slane %v15779_v36, %v15764_v55 }
0x15bf   : > { %v15757_v35 = vcombine.low %v18347_v22, %v18348_v48  ;;  %v15746_v26 = vpop.f32.mrb[17].mxu0 }
0x15c0   : > { %v15747_v15 = vpop.f32.mrb[18].mxu0 }
0x15c1   : > { %v15772_v20 = vrot.slane %v15757_v35, %v15764_v55  ;;  %v15748_v27 = vpop.f32.mrb[19].mxu0 }
0x15c3   : > { %v15780_v0 = vcombine.low %v15765_v4, %v15772_v20  ;;  %v15651_v18 = vpop.f32.mrb[16].mxu1 }
0x15c4   : > { %v15652_v58 = vpop.f32.mrb[17].mxu1 }
0x15c5   : > { %v15787_v38 = vrot.slane %v15780_v0, %v15764_v55  ;;  %v15653_v6 = vpop.f32.mrb[18].mxu1 }
0x15c6   : > { %v15654_v51 = vpop.f32.mrb[19].mxu1 }
0x15c7   : > { %v15795_v14 = vcombine.low %v15787_v38, %v15794_v5 }
0x15c9   : > { %15801 = vst.msk [vmem:[%s21630_s6] sm:$0x3f] %vm15799_vm3, %v15795_v14 }
0x15ca PF: > { %s24584_s23 = sld [smem:[#allocation35_spill]]  ;;  %s24585_s1 = sld [smem:[#allocation31_spill]] }
0x15cb   : > { %s24586_s26 = sld [smem:[#allocation40_spill]]  ;;  %s24587_s28 = sld [smem:[#allocation34_spill]] }
0x15cc   : > { %s24588_s5 = sld [smem:[#allocation38_spill]]  ;;  %s24589_s0 = sld [smem:[#allocation39_spill]] }
0x15cd   : > { %s24590_s24 = smov %s20923_s25  ;;  %s24592_s27 = smov %s20939_s29 }
0x15d0   : > { %s48_s30 = sadd.s32 1, %s24584_s23   ;;  %s24591_s25 = smov %s24585_s1 }
0x15d1   : > { %p45_p0 = scmp.ge.s32.totalorder %s48_s30, 6  }
0x15d2   : > { %s24593_s29 = smov %s24588_s5 }
0x15d3   :  { %47 = sbr.rel (!%p45_p0) target bundleno = 32 (0x20), region = 276 }
0x15da   :  { %15821 = vsyncpa [#allocation4], 1 }
0x15db   :  { %15823 = vsyncpa [#allocation4 + $0x1], 1 }
0x15dc   :  { %15824 = vsyncpa [#allocation6], 1 }
0x15dd   :  { %15826 = vsyncpa [#allocation6 + $0x1], 1 }
0x15de   :  { %15827 = vsyncpa [#allocation9], 1 }
0x15df   :  { %15829 = vsyncpa [#allocation9 + $0x1], 1 }
0x15e0   :  { %15830 = vsyncpa [#allocation12], 1 }
0x15e1   :  { %15832 = vsyncpa [#allocation12 + $0x1], 1 }
0x15e2   :  { %15833 = vsyncpa [#allocation15], 1 }
0x15e3   :  { %15835 = vsyncpa [#allocation15 + $0x1], 1 }
0x15e4   :  { %15836 = vsyncpa [#allocation18], 1 }
0x15e5   :  { %15838 = vsyncpa [#allocation18 + $0x1], 1 }
0x15e6   :  { %15839 = vsyncpa [#allocation21], 1 }
0x15e7   :  { %15841 = vsyncpa [#allocation21 + $0x1], 1 }

</bundles_post_ra>
